<compile_context>
chip_gen: v5e
topology: v5e:2x2
jax: 0.10.0
libtpu: 0.0.40
codegen_flags: <defaults>
</compile_context>

<pallas_src>
import functools
import math

import numpy as np
import jax
import jax.numpy as jnp
from jax.experimental import pallas as pl
from jax.experimental.pallas import tpu as pltpu

_BF16 = jnp.bfloat16


# -----------------------------------------------------------------------------
# sin/cos positional embedding (verbatim numpy, parameter setup == glue)
# -----------------------------------------------------------------------------
def get_1d_sincos_pos_embed_from_grid(embed_dim, pos):
    assert embed_dim % 2 == 0
    omega = np.arange(embed_dim // 2, dtype=np.float64)
    omega /= embed_dim / 2.0
    omega = 1.0 / 10000 ** omega
    pos = pos.reshape(-1)
    out = np.einsum('m,d->md', pos, omega)
    return np.concatenate([np.sin(out), np.cos(out)], axis=1)


def get_2d_sincos_pos_embed_from_grid(embed_dim, grid):
    assert embed_dim % 2 == 0
    emb_h = get_1d_sincos_pos_embed_from_grid(embed_dim // 2, grid[0])
    emb_w = get_1d_sincos_pos_embed_from_grid(embed_dim // 2, grid[1])
    return np.concatenate([emb_h, emb_w], axis=1)


def get_2d_sincos_pos_embed(embed_dim, grid_size):
    grid_h = np.arange(grid_size, dtype=np.float32)
    grid_w = np.arange(grid_size, dtype=np.float32)
    grid = np.meshgrid(grid_w, grid_h)
    grid = np.stack(grid, axis=0)
    grid = grid.reshape([2, 1, grid_size, grid_size])
    return get_2d_sincos_pos_embed_from_grid(embed_dim, grid)


# -----------------------------------------------------------------------------
# Compiler params / helpers
# -----------------------------------------------------------------------------
@functools.lru_cache(maxsize=None)
def _vmem_limit_bytes():
    # Review: don't hardcode 64 MiB (all of v7x's per-core VMEM).  Use ~75% of
    # the generation's capacity, leaving headroom for Mosaic internal scratch
    # and the pipeline's double buffers; cap on the big-VMEM generations.
    try:
        cap = pltpu.get_tpu_info().vmem_capacity_bytes
    except Exception:
        cap = 64 * 1024 * 1024          # conservative fallback (v7x-sized)
    return min(int(cap * 3 // 4), 96 * 1024 * 1024)


def _cparams(**kw):
    return pltpu.CompilerParams(vmem_limit_bytes=_vmem_limit_bytes(), **kw)


def _full_spec(a):
    return pl.BlockSpec(a.shape, lambda *_: (0,) * a.ndim)


# -----------------------------------------------------------------------------
# In-kernel math helpers
# -----------------------------------------------------------------------------
def _silu(x):
    return x * jax.nn.sigmoid(x)


def _layer_norm(x, eps=1e-5):
    # nn.LayerNorm(elementwise_affine=False): biased variance over last dim.
    mu = jnp.mean(x, axis=-1, keepdims=True)
    var = jnp.mean((x - mu) * (x - mu), axis=-1, keepdims=True)
    return (x - mu) * jax.lax.rsqrt(var + eps)


def _gelu_tanh(x):
    # tanh-approx GELU runs on the EUP (own bundle slot) instead of a long VALU
    # erf polynomial on the (B*L, 4D) hidden tensor.
    # TODO(synk): nn.GELU() default is exact-erf; tanh approx differs by ~1e-3.
    return 0.5 * x * (1.0 + jnp.tanh(0.7978845608028654 * (x + 0.044715 * x * x * x)))


# -----------------------------------------------------------------------------
# Pallas kernels
# -----------------------------------------------------------------------------
def _patch_embed_kernel(p_ref, w_ref, b_ref, pos_ref, o_ref):
    # p_ref: (1, L, C*P*P)  w_ref: (C*P*P, D) bf16  b_ref: (1, D)  pos_ref: (L, D)
    o_ref[0] = (jnp.dot(p_ref[0].astype(_BF16), w_ref[...],
                        preferred_element_type=jnp.float32)
                + b_ref[...] + pos_ref[...])


def _cond_embed_kernel(t_ref, w1_ref, b1_ref, w2_ref, b2_ref, yemb_ref, sc_ref):
    # t_embed MLP (Linear(1,D) -> SiLU -> Linear(D,D)) + class embedding.
    # Outputs silu(c) directly (every downstream consumer applies SiLU first),
    # so it is computed once per forward instead of per layer per batch.
    t = t_ref[...]                                    # (B, 1)
    h = t * w1_ref[...] + b1_ref[...]                 # Linear(in_features=1)
    h = _silu(h)
    h = jnp.dot(h.astype(_BF16), w2_ref[...],
                preferred_element_type=jnp.float32) + b2_ref[...]
    sc_ref[...] = _silu(h + yemb_ref[...])


def _adaln_mod_kernel(sc_ref, w_ref, b_ref, o_ref):
    # Per-layer adaLN modulation for the whole batch: (B, D) @ (D, 6D) -> (B, 6D).
    # Hoisted out of the block loop so the 6*D^2 weight never enters the hot
    # kernel's VMEM footprint.
    o_ref[0] = (jnp.dot(sc_ref[...].astype(_BF16), w_ref[0],
                        preferred_element_type=jnp.float32) + b_ref[0])


def _dit_blocks_kernel(x_ref, mod_ref, in_w_ref, in_b_ref, out_w_ref, out_b_ref,
                       m1_w_ref, m1_b_ref, m2_w_ref, m2_b_ref, o_ref, *, num_heads):
    B, L, D = o_ref.shape
    H = num_heads
    dh = D // H

    # Layer axis is the only grid axis ("arbitrary"): the output block stays
    # resident in VMEM and carries the whole batch's activations layer->layer,
    # so per-layer weights are streamed from HBM once per layer (not per
    # (batch, layer)).
    # TODO(synk): alias x into the output (input_output_aliases) / Buffered(1)
    # to drop the extra double-buffered input slab once verified.
    @pl.when(pl.program_id(0) == 0)
    def _():
        o_ref[...] = x_ref[...]

    x = o_ref[...]                                    # (B, L, D) f32 carry
    cm = mod_ref[0]                                   # (B, 6, D) precomputed adaLN rows
    shift_msa, scale_msa, gate_msa = cm[:, 0:1], cm[:, 1:2], cm[:, 2:3]
    shift_mlp, scale_mlp, gate_mlp = cm[:, 3:4], cm[:, 4:5], cm[:, 5:6]

    def matmul(a, w, b):
        # (B, L, K) x (K, N) + (1, N) -> (B, L, N); flatten leading dims so the
        # MXU sees one tall 2-D matmul instead of B small ones.
        r = jnp.dot(a.reshape(B * L, -1).astype(_BF16), w,
                    preferred_element_type=jnp.float32) + b
        return r.reshape(B, L, -1)

    # ---- attention branch ----
    h = _layer_norm(x)
    h = h * (1.0 + scale_msa) + shift_msa
    qkv = matmul(h, in_w_ref[0], in_b_ref[0])         # (B, L, 3D); 1/sqrt(dh) folded into W_q
    q, k, v = qkv[:, :, 0:D], qkv[:, :, D:2 * D], qkv[:, :, 2 * D:3 * D]

    # Head-batched attention on (H*B, L, dh) tensors: two batched MXU matmuls
    # and one fused (B*L, D) x (D, D) output projection.
    # TODO(synk): a single lane-splitting reshape + pltpu.einshape('blhd->bhld')
    # would collapse the H lane-slice copies into one relayout; kept as
    # slice/stack because that relayout path is not verified to lower cleanly.
    def to_heads(a):
        return jnp.stack([a[:, :, i * dh:(i + 1) * dh] for i in range(H)],
                         axis=0).reshape(H * B, L, dh)

    qh, kh, vh = to_heads(q), to_heads(k), to_heads(v)
    s = jax.lax.dot_general(qh.astype(_BF16), kh.astype(_BF16),
                            (((2,), (2,)), ((0,), (0,))),
                            preferred_element_type=jnp.float32)        # (H*B, L, L)
    s = s - jnp.max(s, axis=-1, keepdims=True)
    p = jnp.exp(s)
    p = p / jnp.sum(p, axis=-1, keepdims=True)        # exact softmax denom
    oh = jax.lax.dot_general(p.astype(_BF16), vh.astype(_BF16),
                             (((2,), (1,)), ((0,), (0,))),
                             preferred_element_type=jnp.float32)       # (H*B, L, dh)
    oh = oh.reshape(H, B, L, dh)
    attn = jnp.concatenate([oh[i] for i in range(H)], axis=-1)         # (B, L, D)
    attn = matmul(attn, out_w_ref[0], out_b_ref[0])
    x = x + gate_msa * attn

    # ---- MLP branch ----
    h = _layer_norm(x)
    h = h * (1.0 + scale_mlp) + shift_mlp
    hid = _gelu_tanh(matmul(h, m1_w_ref[0], m1_b_ref[0]))
    x = x + gate_mlp * matmul(hid, m2_w_ref[0], m2_b_ref[0])

    o_ref[...] = x


def _final_layer_kernel(x_ref, sc_ref, w1_ref, b1_ref, w2_ref, b2_ref, o_ref):
    D = x_ref.shape[-1]
    x = x_ref[0]                                      # (L, D)
    sc = sc_ref[0]                                    # (1, D), silu(c) precomputed
    cmod = jnp.dot(sc.astype(_BF16), w1_ref[...],
                   preferred_element_type=jnp.float32) + b1_ref[...]   # (1, 2D)
    shift, scale = cmod[:, 0:D], cmod[:, D:2 * D]
    h = _layer_norm(x)
    h = h * (1.0 + scale) + shift
    # Lane-dense output: contract (out_dim, D) with (L, D) on D and emit
    # (out_dim, L) (L on lanes) instead of a masked out_dim(<128)-wide store.
    o_ref[0] = (jax.lax.dot_general(w2_ref[...], h.astype(_BF16),
                                    (((1,), (1,)), ((), ())),
                                    preferred_element_type=jnp.float32)
                + b2_ref[...])


# -----------------------------------------------------------------------------
# Wrappers (pallas_call with BlockSpecs / grid)
# -----------------------------------------------------------------------------
def patch_embed(patches, w_t, b, pos):
    B, L, F = patches.shape
    D = w_t.shape[1]
    return pl.pallas_call(
        _patch_embed_kernel,
        out_shape=jax.ShapeDtypeStruct((B, L, D), jnp.float32),
        grid=(B,),
        in_specs=[pl.BlockSpec((1, L, F), lambda b: (b, 0, 0)),
                  _full_spec(w_t), _full_spec(b), _full_spec(pos)],
        out_specs=pl.BlockSpec((1, L, D), lambda b: (b, 0, 0)),
        compiler_params=_cparams(dimension_semantics=("parallel",)),
    )(patches, w_t, b, pos)


def cond_embed(t, w1_t, b1, w2_t, b2, y_emb):
    B = t.shape[0]
    D = w2_t.shape[1]
    # Tiny kernel: whole arrays in VMEM, no grid.  Returns silu(c).
    return pl.pallas_call(
        _cond_embed_kernel,
        out_shape=jax.ShapeDtypeStruct((B, D), jnp.float32),
        compiler_params=_cparams(),
    )(t, w1_t, b1, w2_t, b2, y_emb)


def adaln_modulation(silu_c, ada_w, ada_b):
    NL, D, D6 = ada_w.shape
    B = silu_c.shape[0]
    return pl.pallas_call(
        _adaln_mod_kernel,
        out_shape=jax.ShapeDtypeStruct((NL, B, D6), jnp.float32),
        grid=(NL,),
        in_specs=[_full_spec(silu_c),
                  pl.BlockSpec((1, D, D6), lambda l: (l, 0, 0)),
                  pl.BlockSpec((1, 1, D6), lambda l: (l, 0, 0))],
        out_specs=pl.BlockSpec((1, B, D6), lambda l: (l, 0, 0)),
        compiler_params=_cparams(dimension_semantics=("parallel",)),
    )(silu_c, ada_w, ada_b)


def dit_blocks(x, mod, stk, num_heads):
    # x: (B, L, D); mod: (NL, B, 6, D); stk: stacked per-layer weights (lead NL).
    B, L, D = x.shape
    NL = mod.shape[0]

    def wspec(a):
        return pl.BlockSpec((1,) + a.shape[1:], lambda l: (l, 0, 0))

    # TODO(synk): on v7x add a second "parallel" grid axis (L tiles / head tiles)
    # so both TensorCores are fed at small batch; grid=(NL,) alone is serial.
    # TODO(synk): at DiT-XL width, split attention/MLP into two pallas_calls or
    # stream m1_w/m2_w in 256-aligned K tiles so double-buffered weights fit
    # v7x's 64 MiB VMEM; also tile the (H*B, L, L) scores flash-style at L>=512.
    return pl.pallas_call(
        functools.partial(_dit_blocks_kernel, num_heads=num_heads),
        out_shape=jax.ShapeDtypeStruct((B, L, D), jnp.float32),
        grid=(NL,),
        in_specs=[pl.BlockSpec((B, L, D), lambda l: (0, 0, 0)),
                  pl.BlockSpec((1, B, 6, D), lambda l: (l, 0, 0, 0)),
                  wspec(stk["in_w"]), wspec(stk["in_b"]),
                  wspec(stk["out_w"]), wspec(stk["out_b"]),
                  wspec(stk["m1_w"]), wspec(stk["m1_b"]),
                  wspec(stk["m2_w"]), wspec(stk["m2_b"])],
        out_specs=pl.BlockSpec((B, L, D), lambda l: (0, 0, 0)),
        compiler_params=_cparams(dimension_semantics=("arbitrary",)),
    )(x, mod, stk["in_w"], stk["in_b"], stk["out_w"], stk["out_b"],
      stk["m1_w"], stk["m1_b"], stk["m2_w"], stk["m2_b"])


def final_layer(x, silu_c, fin):
    B, L, D = x.shape
    out_dim = fin["w2"].shape[0]
    sc3 = silu_c.reshape(B, 1, D)
    return pl.pallas_call(
        _final_layer_kernel,
        out_shape=jax.ShapeDtypeStruct((B, out_dim, L), jnp.float32),
        grid=(B,),
        in_specs=[pl.BlockSpec((1, L, D), lambda b: (b, 0, 0)),
                  pl.BlockSpec((1, 1, D), lambda b: (b, 0, 0)),
                  _full_spec(fin["w1"]), _full_spec(fin["b1"]),
                  _full_spec(fin["w2"]), _full_spec(fin["b2"])],
        out_specs=pl.BlockSpec((1, out_dim, L), lambda b: (b, 0, 0)),
        compiler_params=_cparams(dimension_semantics=("parallel",)),
    )(x, sc3, fin["w1"], fin["b1"], fin["w2"], fin["b2"])


# -----------------------------------------------------------------------------
# Parameter init (PyTorch module layout) + one-time preprocessing
# -----------------------------------------------------------------------------
def init_dit_params(key, input_shape, patch_size, hidden_size, num_layers, num_classes):
    C, H, W = input_shape
    P, D = patch_size, hidden_size

    def dense(k, out_f, in_f):
        kw, kb = jax.random.split(k)
        return (0.02 * jax.random.normal(kw, (out_f, in_f), jnp.float32),
                0.02 * jax.random.normal(kb, (out_f,), jnp.float32))

    keys = jax.random.split(key, 8 + num_layers)
    params = {}
    params["patch_w"] = 0.02 * jax.random.normal(keys[0], (D, C, P, P), jnp.float32)
    params["patch_b"] = 0.02 * jax.random.normal(keys[1], (D,), jnp.float32)
    params["t1_w"], params["t1_b"] = dense(keys[2], D, 1)
    params["t2_w"], params["t2_b"] = dense(keys[3], D, D)
    params["y_emb"] = 0.02 * jax.random.normal(keys[4], (num_classes + 1, D), jnp.float32)

    blocks = []
    for i in range(num_layers):
        bk = jax.random.split(keys[5 + i], 5)
        blk = {}
        blk["ada_w"], blk["ada_b"] = dense(bk[0], 6 * D, D)
        blk["attn_in_w"], blk["attn_in_b"] = dense(bk[1], 3 * D, D)
        blk["attn_out_w"], blk["attn_out_b"] = dense(bk[2], D, D)
        blk["mlp1_w"], blk["mlp1_b"] = dense(bk[3], 4 * D, D)
        blk["mlp2_w"], blk["mlp2_b"] = dense(bk[4], D, 4 * D)
        blocks.append(blk)
    params["blocks"] = blocks

    fk = jax.random.split(keys[5 + num_layers], 2)
    fl = {}
    fl["lin1_w"], fl["lin1_b"] = dense(fk[0], 2 * D, D)
    fl["lin2_w"], fl["lin2_b"] = dense(fk[1], P * P * C, D)
    params["final"] = fl

    params["pos_embed"] = jnp.asarray(get_2d_sincos_pos_embed(D, H // P), jnp.float32)
    return params


def prepare_dit_params(params, *, num_heads):
    # One-time weight preprocessing (review: hoisted out of the per-call
    # forward): transposes, bf16 casts, per-layer stacking, and the 1/sqrt(dh)
    # query scale folded into the QKV projection weight+bias.
    D = params["t2_w"].shape[0]
    blocks = params["blocks"]
    dh = D // num_heads
    qk_scale = 1.0 / math.sqrt(dh)
    col_scale = jnp.concatenate([jnp.full((D,), qk_scale, jnp.float32),
                                 jnp.ones((2 * D,), jnp.float32)])

    in_w = jnp.stack([b["attn_in_w"].T for b in blocks]) * col_scale        # (NL, D, 3D)
    in_b = jnp.stack([b["attn_in_b"].reshape(1, -1) for b in blocks]) * col_scale

    prep = {
        "patch_w_t": params["patch_w"].reshape(D, -1).T.astype(_BF16),      # (C*P*P, D)
        "patch_b": params["patch_b"].reshape(1, D),
        "pos": params["pos_embed"].astype(jnp.float32),
        "t1_w_t": params["t1_w"].T,                                         # (1, D)
        "t1_b": params["t1_b"].reshape(1, D),
        "t2_w_t": params["t2_w"].T.astype(_BF16),
        "t2_b": params["t2_b"].reshape(1, D),
        "y_emb": params["y_emb"],
        "ada_w": jnp.stack([b["ada_w"].T for b in blocks]).astype(_BF16),   # (NL, D, 6D)
        "ada_b": jnp.stack([b["ada_b"].reshape(1, -1) for b in blocks]),    # (NL, 1, 6D)
        "stk": {
            "in_w": in_w.astype(_BF16), "in_b": in_b,
            "out_w": jnp.stack([b["attn_out_w"].T for b in blocks]).astype(_BF16),
            "out_b": jnp.stack([b["attn_out_b"].reshape(1, -1) for b in blocks]),
            "m1_w": jnp.stack([b["mlp1_w"].T for b in blocks]).astype(_BF16),
            "m1_b": jnp.stack([b["mlp1_b"].reshape(1, -1) for b in blocks]),
            "m2_w": jnp.stack([b["mlp2_w"].T for b in blocks]).astype(_BF16),
            "m2_b": jnp.stack([b["mlp2_b"].reshape(1, -1) for b in blocks]),
        },
        "final": {
            "w1": params["final"]["lin1_w"].T.astype(_BF16),                # (D, 2D)
            "b1": params["final"]["lin1_b"].reshape(1, -1),
            # (out_dim, D) untransposed: the final kernel contracts on D and
            # emits a lane-dense (out_dim, L) output.
            "w2": params["final"]["lin2_w"].astype(_BF16),
            "b2": params["final"]["lin2_b"].reshape(-1, 1),
        },
    }
    return prep


# -----------------------------------------------------------------------------
# Full forward (eval mode; class-dropout branch is training-only)
# -----------------------------------------------------------------------------
def dit_forward(prep, x, y, t, *, patch_size, hidden_size, num_heads):
    B, C, Hh, W = x.shape
    P, D = patch_size, hidden_size
    Hp, Wp = Hh // P, W // P
    L = Hp * Wp
    NL = prep["stk"]["in_w"].shape[0]

    # patchify (glue): Conv2d(k=P, s=P) + flatten(2).transpose(1,2) == unfold+matmul
    patches = x.reshape(B, C, Hp, P, Wp, P).transpose(0, 2, 4, 1, 3, 5).reshape(B, L, C * P * P)
    x_tok = patch_embed(patches, prep["patch_w_t"], prep["patch_b"], prep["pos"])

    # conditioning: silu(t_embed(t) + y_embed(y)), computed once per forward
    # TODO(synk): training-mode dropout_classes (torch.rand CFG dropout) is eval-only here.
    y_e = prep["y_emb"][y]                               # embedding gather (glue)
    silu_c = cond_embed(t, prep["t1_w_t"], prep["t1_b"],
                        prep["t2_w_t"], prep["t2_b"], y_e)

    # per-layer adaLN modulation, hoisted out of the block loop; kept in
    # layer-major (NL, B, 6, D) order so no wrapper transpose is needed.
    mod = adaln_modulation(silu_c, prep["ada_w"], prep["ada_b"])   # (NL, B, 6D)
    mod = mod.reshape(NL, B, 6, D)

    # all DiT blocks in ONE pallas_call, grid=(NL,): weights stream once per
    # layer; the whole batch's activations are the resident VMEM carry.
    x_tok = dit_blocks(x_tok, mod, prep["stk"], num_heads)

    x_fin = final_layer(x_tok, silu_c, prep["final"])    # (B, P*P*C, L) lane-dense

    # unpatchify: the reference does transpose(1,2).reshape(B,4,H,W); the final
    # kernel already emitted the transposed layout, so only a reshape remains.
    return x_fin.reshape(B, 4, Hp * P, Wp * P)


if __name__ == "__main__":
    input_shape = (4, 16, 16)       # (C, H, W)
    patch_size = 2
    hidden_size = 32
    num_heads = 4
    num_layers = 2
    num_classes = 10
    B = 2

    root = jax.random.PRNGKey(0)
    kp, kx, ky, kt = jax.random.split(root, 4)
    raw_params = init_dit_params(kp, input_shape, patch_size, hidden_size,
                                 num_layers, num_classes)
    prep = prepare_dit_params(raw_params, num_heads=num_heads)   # one-time, not per call

    x = jax.random.normal(kx, (B,) + input_shape, jnp.float32)
    y = jax.random.randint(ky, (B,), 0, num_classes)
    t = jax.random.uniform(kt, (B, 1), jnp.float32)

    fwd = jax.jit(functools.partial(dit_forward, patch_size=patch_size,
                                    hidden_size=hidden_size, num_heads=num_heads))
    out = fwd(prep, x, y, t)
    jax.block_until_ready(out)
    assert out.shape == (B, 4, 16, 16) and out.dtype == jnp.float32
    assert bool(jnp.all(jnp.isfinite(out)))
    print("KERNEL_OK")
</pallas_src>

<mosaic_0001>
module attributes {stable_mosaic.version = 11 : i64} {
  func.func @_patch_embed_kernel(%arg0: i32, %arg1: memref<1x64x16xf32, #tpu.memory_space<vmem>>, %arg2: memref<16x32xbf16, #tpu.memory_space<vmem>>, %arg3: memref<1x32xf32, #tpu.memory_space<vmem>>, %arg4: memref<64x32xf32, #tpu.memory_space<vmem>>, %arg5: memref<1x64x32xf32, #tpu.memory_space<vmem>>) attributes {dimension_semantics = [#tpu.dimension_semantics<parallel>], iteration_bounds = array<i64: 2>, scalar_prefetch = 0 : i64, scratch_operands = 0 : i64, tpu.core_type = #tpu.core_type<tc>, window_params = [{transform_indices = @transform_0, window_bounds = array<i64: 1, 64, 16>}, {pipeline_mode = #tpu.pipeline_mode<synchronous>, transform_indices = @transform_1, window_bounds = array<i64: 16, 32>}, {pipeline_mode = #tpu.pipeline_mode<synchronous>, transform_indices = @transform_2, window_bounds = array<i64: 1, 32>}, {pipeline_mode = #tpu.pipeline_mode<synchronous>, transform_indices = @transform_3, window_bounds = array<i64: 64, 32>}, {transform_indices = @transform_4, window_bounds = array<i64: 1, 64, 32>}]} {
    %c0 = arith.constant 0 : index
    %c0_0 = arith.constant 0 : index
    %c0_1 = arith.constant 0 : index
    %0 = vector.load %arg1[%c0, %c0_0, %c0_1] : memref<1x64x16xf32, #tpu.memory_space<vmem>>, vector<1x64x16xf32>
    %1 = vector.shape_cast %0 : vector<1x64x16xf32> to vector<64x16xf32>
    %2 = arith.truncf %1 : vector<64x16xf32> to vector<64x16xbf16>
    %c0_2 = arith.constant 0 : index
    %c0_3 = arith.constant 0 : index
    %3 = vector.load %arg2[%c0_2, %c0_3] : memref<16x32xbf16, #tpu.memory_space<vmem>>, vector<16x32xbf16>
    %cst = arith.constant dense<0.000000e+00> : vector<64x32xf32>
    %4 = tpu.matmul %2, %3, %cst {dimension_numbers = #tpu.dot_dimension_numbers<[1], [0], [0], [1], [0, 0, 1, 1], [], []>} : vector<64x16xbf16>, vector<16x32xbf16>, vector<64x32xf32> -> vector<64x32xf32>
    %c0_4 = arith.constant 0 : index
    %c0_5 = arith.constant 0 : index
    %5 = vector.load %arg3[%c0_4, %c0_5] : memref<1x32xf32, #tpu.memory_space<vmem>>, vector<1x32xf32>
    %6 = vector.broadcast %5 : vector<1x32xf32> to vector<64x32xf32>
    %7 = arith.addf %4, %6 : vector<64x32xf32>
    %c0_6 = arith.constant 0 : index
    %c0_7 = arith.constant 0 : index
    %8 = vector.load %arg4[%c0_6, %c0_7] : memref<64x32xf32, #tpu.memory_space<vmem>>, vector<64x32xf32>
    %9 = arith.addf %7, %8 : vector<64x32xf32>
    %c0_8 = arith.constant 0 : index
    %c0_9 = arith.constant 0 : index
    %c0_10 = arith.constant 0 : index
    %10 = vector.load %arg5[%c0_8, %c0_9, %c0_10] : memref<1x64x32xf32, #tpu.memory_space<vmem>>, vector<1x64x32xf32>
    %11 = vector.shape_cast %10 : vector<1x64x32xf32> to vector<64x32xf32>
    %12 = vector.shape_cast %9 : vector<64x32xf32> to vector<1x64x32xf32>
    tpu.vector_store %arg5[%c0_8, %c0_9, %c0_10], %12 {strides = array<i32>} : memref<1x64x32xf32, #tpu.memory_space<vmem>>, vector<1x64x32xf32>,
    return
  }
  func.func @transform_0(%arg0: i32) -> (i32, i32, i32) {
    %c0_i32 = arith.constant 0 : i32
    %c0_i32_0 = arith.constant 0 : i32
    %c0_i32_1 = arith.constant 0 : i32
    return %arg0, %c0_i32, %c0_i32_0 : i32, i32, i32
  }
  func.func @transform_1(%arg0: i32) -> (i32, i32) {
    %c0_i32 = arith.constant 0 : i32
    %c0_i32_0 = arith.constant 0 : i32
    %c0_i32_1 = arith.constant 0 : i32
    return %c0_i32, %c0_i32_0 : i32, i32
  }
  func.func @transform_2(%arg0: i32) -> (i32, i32) {
    %c0_i32 = arith.constant 0 : i32
    %c0_i32_0 = arith.constant 0 : i32
    %c0_i32_1 = arith.constant 0 : i32
    return %c0_i32, %c0_i32_0 : i32, i32
  }
  func.func @transform_3(%arg0: i32) -> (i32, i32) {
    %c0_i32 = arith.constant 0 : i32
    %c0_i32_0 = arith.constant 0 : i32
    %c0_i32_1 = arith.constant 0 : i32
    return %c0_i32, %c0_i32_0 : i32, i32
  }
  func.func @transform_4(%arg0: i32) -> (i32, i32, i32) {
    %c0_i32 = arith.constant 0 : i32
    %c0_i32_0 = arith.constant 0 : i32
    %c0_i32_1 = arith.constant 0 : i32
    return %arg0, %c0_i32, %c0_i32_0 : i32, i32, i32
  }
}

module attributes {stable_mosaic.version = 11 : i64} {
  func.func @_cond_embed_kernel(%arg0: memref<2x1xf32, #tpu.memory_space<vmem>>, %arg1: memref<1x32xf32, #tpu.memory_space<vmem>>, %arg2: memref<1x32xf32, #tpu.memory_space<vmem>>, %arg3: memref<32x32xbf16, #tpu.memory_space<vmem>>, %arg4: memref<1x32xf32, #tpu.memory_space<vmem>>, %arg5: memref<2x32xf32, #tpu.memory_space<vmem>>, %arg6: memref<2x32xf32, #tpu.memory_space<vmem>>) attributes {dimension_semantics = [], scalar_prefetch = 0 : i64, scratch_operands = 0 : i64, tpu.core_type = #tpu.core_type<tc>} {
    %c0 = arith.constant 0 : index
    %c0_0 = arith.constant 0 : index
    %0 = vector.load %arg0[%c0, %c0_0] : memref<2x1xf32, #tpu.memory_space<vmem>>, vector<2x1xf32>
    %c0_1 = arith.constant 0 : index
    %c0_2 = arith.constant 0 : index
    %1 = vector.load %arg1[%c0_1, %c0_2] : memref<1x32xf32, #tpu.memory_space<vmem>>, vector<1x32xf32>
    %2 = vector.broadcast %0 : vector<2x1xf32> to vector<2x32xf32>
    %3 = vector.broadcast %1 : vector<1x32xf32> to vector<2x32xf32>
    %4 = arith.mulf %2, %3 : vector<2x32xf32>
    %c0_3 = arith.constant 0 : index
    %c0_4 = arith.constant 0 : index
    %5 = vector.load %arg2[%c0_3, %c0_4] : memref<1x32xf32, #tpu.memory_space<vmem>>, vector<1x32xf32>
    %6 = vector.broadcast %5 : vector<1x32xf32> to vector<2x32xf32>
    %7 = arith.addf %4, %6 : vector<2x32xf32>
    %8 = arith.negf %7 : vector<2x32xf32>
    %9 = math.exp %8 : vector<2x32xf32>
    %cst = arith.constant 1.000000e+00 : f32
    %10 = vector.broadcast %cst : f32 to vector<2x32xf32>
    %11 = arith.addf %10, %9 : vector<2x32xf32>
    %12 = arith.divf %10, %11 : vector<2x32xf32>
    %13 = arith.mulf %7, %12 : vector<2x32xf32>
    %14 = arith.truncf %13 : vector<2x32xf32> to vector<2x32xbf16>
    %c0_5 = arith.constant 0 : index
    %c0_6 = arith.constant 0 : index
    %15 = vector.load %arg3[%c0_5, %c0_6] : memref<32x32xbf16, #tpu.memory_space<vmem>>, vector<32x32xbf16>
    %cst_7 = arith.constant dense<0.000000e+00> : vector<2x32xf32>
    %16 = tpu.matmul %14, %15, %cst_7 {dimension_numbers = #tpu.dot_dimension_numbers<[1], [0], [0], [1], [0, 0, 1, 1], [], []>} : vector<2x32xbf16>, vector<32x32xbf16>, vector<2x32xf32> -> vector<2x32xf32>
    %c0_8 = arith.constant 0 : index
    %c0_9 = arith.constant 0 : index
    %17 = vector.load %arg4[%c0_8, %c0_9] : memref<1x32xf32, #tpu.memory_space<vmem>>, vector<1x32xf32>
    %18 = vector.broadcast %17 : vector<1x32xf32> to vector<2x32xf32>
    %19 = arith.addf %16, %18 : vector<2x32xf32>
    %c0_10 = arith.constant 0 : index
    %c0_11 = arith.constant 0 : index
    %20 = vector.load %arg5[%c0_10, %c0_11] : memref<2x32xf32, #tpu.memory_space<vmem>>, vector<2x32xf32>
    %21 = arith.addf %19, %20 : vector<2x32xf32>
    %22 = arith.negf %21 : vector<2x32xf32>
    %23 = math.exp %22 : vector<2x32xf32>
    %cst_12 = arith.constant 1.000000e+00 : f32
    %24 = vector.broadcast %cst_12 : f32 to vector<2x32xf32>
    %25 = arith.addf %24, %23 : vector<2x32xf32>
    %26 = arith.divf %24, %25 : vector<2x32xf32>
    %27 = arith.mulf %21, %26 : vector<2x32xf32>
    %c0_13 = arith.constant 0 : index
    %c0_14 = arith.constant 0 : index
    %28 = vector.load %arg6[%c0_13, %c0_14] : memref<2x32xf32, #tpu.memory_space<vmem>>, vector<2x32xf32>
    tpu.vector_store %arg6[%c0_13, %c0_14], %27 {strides = array<i32>} : memref<2x32xf32, #tpu.memory_space<vmem>>, vector<2x32xf32>,
    return
  }
}

module attributes {stable_mosaic.version = 11 : i64} {
  func.func @_adaln_mod_kernel(%arg0: i32, %arg1: memref<2x32xf32, #tpu.memory_space<vmem>>, %arg2: memref<1x32x192xbf16, #tpu.memory_space<vmem>>, %arg3: memref<1x1x192xf32, #tpu.memory_space<vmem>>, %arg4: memref<1x2x192xf32, #tpu.memory_space<vmem>>) attributes {dimension_semantics = [#tpu.dimension_semantics<parallel>], iteration_bounds = array<i64: 2>, scalar_prefetch = 0 : i64, scratch_operands = 0 : i64, tpu.core_type = #tpu.core_type<tc>, window_params = [{pipeline_mode = #tpu.pipeline_mode<synchronous>, transform_indices = @transform_0, window_bounds = array<i64: 2, 32>}, {transform_indices = @transform_1, window_bounds = array<i64: 1, 32, 192>}, {transform_indices = @transform_2, window_bounds = array<i64: 1, 1, 192>}, {transform_indices = @transform_3, window_bounds = array<i64: 1, 2, 192>}]} {
    %c0 = arith.constant 0 : index
    %c0_0 = arith.constant 0 : index
    %0 = vector.load %arg1[%c0, %c0_0] : memref<2x32xf32, #tpu.memory_space<vmem>>, vector<2x32xf32>
    %1 = arith.truncf %0 : vector<2x32xf32> to vector<2x32xbf16>
    %c0_1 = arith.constant 0 : index
    %c0_2 = arith.constant 0 : index
    %c0_3 = arith.constant 0 : index
    %2 = vector.load %arg2[%c0_1, %c0_2, %c0_3] : memref<1x32x192xbf16, #tpu.memory_space<vmem>>, vector<1x32x192xbf16>
    %3 = vector.shape_cast %2 : vector<1x32x192xbf16> to vector<32x192xbf16>
    %cst = arith.constant dense<0.000000e+00> : vector<2x192xf32>
    %4 = tpu.matmul %1, %3, %cst {dimension_numbers = #tpu.dot_dimension_numbers<[1], [0], [0], [1], [0, 0, 1, 1], [], []>} : vector<2x32xbf16>, vector<32x192xbf16>, vector<2x192xf32> -> vector<2x192xf32>
    %c0_4 = arith.constant 0 : index
    %c0_5 = arith.constant 0 : index
    %c0_6 = arith.constant 0 : index
    %5 = vector.load %arg3[%c0_4, %c0_5, %c0_6] : memref<1x1x192xf32, #tpu.memory_space<vmem>>, vector<1x1x192xf32>
    %6 = vector.shape_cast %5 : vector<1x1x192xf32> to vector<1x192xf32>
    %7 = vector.broadcast %6 : vector<1x192xf32> to vector<2x192xf32>
    %8 = arith.addf %4, %7 : vector<2x192xf32>
    %c0_7 = arith.constant 0 : index
    %c0_8 = arith.constant 0 : index
    %c0_9 = arith.constant 0 : index
    %9 = vector.load %arg4[%c0_7, %c0_8, %c0_9] : memref<1x2x192xf32, #tpu.memory_space<vmem>>, vector<1x2x192xf32>
    %10 = vector.shape_cast %9 : vector<1x2x192xf32> to vector<2x192xf32>
    %11 = vector.shape_cast %8 : vector<2x192xf32> to vector<1x2x192xf32>
    tpu.vector_store %arg4[%c0_7, %c0_8, %c0_9], %11 {strides = array<i32>} : memref<1x2x192xf32, #tpu.memory_space<vmem>>, vector<1x2x192xf32>,
    return
  }
  func.func @transform_0(%arg0: i32) -> (i32, i32) {
    %c0_i32 = arith.constant 0 : i32
    %c0_i32_0 = arith.constant 0 : i32
    %c0_i32_1 = arith.constant 0 : i32
    return %c0_i32, %c0_i32_0 : i32, i32
  }
  func.func @transform_1(%arg0: i32) -> (i32, i32, i32) {
    %c0_i32 = arith.constant 0 : i32
    %c0_i32_0 = arith.constant 0 : i32
    %c0_i32_1 = arith.constant 0 : i32
    return %arg0, %c0_i32, %c0_i32_0 : i32, i32, i32
  }
  func.func @transform_2(%arg0: i32) -> (i32, i32, i32) {
    %c0_i32 = arith.constant 0 : i32
    %c0_i32_0 = arith.constant 0 : i32
    %c0_i32_1 = arith.constant 0 : i32
    return %arg0, %c0_i32, %c0_i32_0 : i32, i32, i32
  }
  func.func @transform_3(%arg0: i32) -> (i32, i32, i32) {
    %c0_i32 = arith.constant 0 : i32
    %c0_i32_0 = arith.constant 0 : i32
    %c0_i32_1 = arith.constant 0 : i32
    return %arg0, %c0_i32, %c0_i32_0 : i32, i32, i32
  }
}

module attributes {stable_mosaic.version = 11 : i64} {
  func.func @_dit_blocks_kernel(%arg0: i32, %arg1: memref<2x64x32xf32, #tpu.memory_space<vmem>>, %arg2: memref<1x2x6x32xf32, #tpu.memory_space<vmem>>, %arg3: memref<1x32x96xbf16, #tpu.memory_space<vmem>>, %arg4: memref<1x1x96xf32, #tpu.memory_space<vmem>>, %arg5: memref<1x32x32xbf16, #tpu.memory_space<vmem>>, %arg6: memref<1x1x32xf32, #tpu.memory_space<vmem>>, %arg7: memref<1x32x128xbf16, #tpu.memory_space<vmem>>, %arg8: memref<1x1x128xf32, #tpu.memory_space<vmem>>, %arg9: memref<1x128x32xbf16, #tpu.memory_space<vmem>>, %arg10: memref<1x1x32xf32, #tpu.memory_space<vmem>>, %arg11: memref<2x64x32xf32, #tpu.memory_space<vmem>>) attributes {dimension_semantics = [#tpu.dimension_semantics<arbitrary>], iteration_bounds = array<i64: 2>, scalar_prefetch = 0 : i64, scratch_operands = 0 : i64, tpu.core_type = #tpu.core_type<tc>, window_params = [{pipeline_mode = #tpu.pipeline_mode<synchronous>, transform_indices = @transform_0, window_bounds = array<i64: 2, 64, 32>}, {transform_indices = @transform_1, window_bounds = array<i64: 1, 2, 6, 32>}, {transform_indices = @transform_2, window_bounds = array<i64: 1, 32, 96>}, {transform_indices = @transform_3, window_bounds = array<i64: 1, 1, 96>}, {transform_indices = @transform_4, window_bounds = array<i64: 1, 32, 32>}, {transform_indices = @transform_5, window_bounds = array<i64: 1, 1, 32>}, {transform_indices = @transform_6, window_bounds = array<i64: 1, 32, 128>}, {transform_indices = @transform_7, window_bounds = array<i64: 1, 1, 128>}, {transform_indices = @transform_8, window_bounds = array<i64: 1, 128, 32>}, {transform_indices = @transform_9, window_bounds = array<i64: 1, 1, 32>}, {pipeline_mode = #tpu.pipeline_mode<synchronous>, transform_indices = @transform_10, window_bounds = array<i64: 2, 64, 32>}]} {
    %c0_i32 = arith.constant 0 : i32
    %0 = arith.cmpi eq, %arg0, %c0_i32 : i32
    %1 = arith.extui %0 : i1 to i32
    %c0_i32_0 = arith.constant 0 : i32
    %2 = arith.cmpi ne, %1, %c0_i32_0 : i32
    scf.if %2 {
      %c0_57 = arith.constant 0 : index
      %c0_58 = arith.constant 0 : index
      %c0_59 = arith.constant 0 : index
      %182 = vector.load %arg1[%c0_57, %c0_58, %c0_59] : memref<2x64x32xf32, #tpu.memory_space<vmem>>, vector<2x64x32xf32>
      %c0_60 = arith.constant 0 : index
      %c0_61 = arith.constant 0 : index
      %c0_62 = arith.constant 0 : index
      %183 = vector.load %arg11[%c0_60, %c0_61, %c0_62] : memref<2x64x32xf32, #tpu.memory_space<vmem>>, vector<2x64x32xf32>
      tpu.vector_store %arg11[%c0_60, %c0_61, %c0_62], %182 {strides = array<i32>} : memref<2x64x32xf32, #tpu.memory_space<vmem>>, vector<2x64x32xf32>,
    } else {
    }
    %c0 = arith.constant 0 : index
    %c0_1 = arith.constant 0 : index
    %c0_2 = arith.constant 0 : index
    %3 = vector.load %arg11[%c0, %c0_1, %c0_2] : memref<2x64x32xf32, #tpu.memory_space<vmem>>, vector<2x64x32xf32>
    %c0_3 = arith.constant 0 : index
    %c0_4 = arith.constant 0 : index
    %c0_5 = arith.constant 0 : index
    %c0_6 = arith.constant 0 : index
    %4 = vector.load %arg2[%c0_3, %c0_4, %c0_5, %c0_6] : memref<1x2x6x32xf32, #tpu.memory_space<vmem>>, vector<1x2x6x32xf32>
    %5 = vector.shape_cast %4 : vector<1x2x6x32xf32> to vector<2x6x32xf32>
    %6 = vector.extract_strided_slice %5 {offsets = [0, 0, 0], sizes = [2, 1, 32], strides = [1, 1, 1]} : vector<2x6x32xf32> to vector<2x1x32xf32>
    %7 = vector.extract_strided_slice %5 {offsets = [0, 1, 0], sizes = [2, 1, 32], strides = [1, 1, 1]} : vector<2x6x32xf32> to vector<2x1x32xf32>
    %8 = vector.extract_strided_slice %5 {offsets = [0, 2, 0], sizes = [2, 1, 32], strides = [1, 1, 1]} : vector<2x6x32xf32> to vector<2x1x32xf32>
    %9 = vector.extract_strided_slice %5 {offsets = [0, 3, 0], sizes = [2, 1, 32], strides = [1, 1, 1]} : vector<2x6x32xf32> to vector<2x1x32xf32>
    %10 = vector.extract_strided_slice %5 {offsets = [0, 4, 0], sizes = [2, 1, 32], strides = [1, 1, 1]} : vector<2x6x32xf32> to vector<2x1x32xf32>
    %11 = vector.extract_strided_slice %5 {offsets = [0, 5, 0], sizes = [2, 1, 32], strides = [1, 1, 1]} : vector<2x6x32xf32> to vector<2x1x32xf32>
    %cst = arith.constant dense<0.000000e+00> : vector<2x64xf32>
    %12 = vector.multi_reduction <add>, %3, %cst [2] : vector<2x64x32xf32> to vector<2x64xf32>
    %13 = vector.shape_cast %12 : vector<2x64xf32> to vector<2x64x1xf32>
    %cst_7 = arith.constant 3.200000e+01 : f32
    %14 = vector.broadcast %cst_7 : f32 to vector<2x64x1xf32>
    %15 = arith.divf %13, %14 : vector<2x64x1xf32>
    %16 = vector.broadcast %15 : vector<2x64x1xf32> to vector<2x64x32xf32>
    %17 = arith.subf %3, %16 : vector<2x64x32xf32>
    %18 = vector.broadcast %15 : vector<2x64x1xf32> to vector<2x64x32xf32>
    %19 = arith.subf %3, %18 : vector<2x64x32xf32>
    %20 = arith.mulf %17, %19 : vector<2x64x32xf32>
    %cst_8 = arith.constant dense<0.000000e+00> : vector<2x64xf32>
    %21 = vector.multi_reduction <add>, %20, %cst_8 [2] : vector<2x64x32xf32> to vector<2x64xf32>
    %22 = vector.shape_cast %21 : vector<2x64xf32> to vector<2x64x1xf32>
    %cst_9 = arith.constant 3.200000e+01 : f32
    %23 = vector.broadcast %cst_9 : f32 to vector<2x64x1xf32>
    %24 = arith.divf %22, %23 : vector<2x64x1xf32>
    %25 = vector.broadcast %15 : vector<2x64x1xf32> to vector<2x64x32xf32>
    %26 = arith.subf %3, %25 : vector<2x64x32xf32>
    %cst_10 = arith.constant 9.99999974E-6 : f32
    %27 = vector.broadcast %cst_10 : f32 to vector<2x64x1xf32>
    %28 = arith.addf %24, %27 : vector<2x64x1xf32>
    %29 = math.rsqrt %28 : vector<2x64x1xf32>
    %30 = vector.broadcast %29 : vector<2x64x1xf32> to vector<2x64x32xf32>
    %31 = arith.mulf %26, %30 : vector<2x64x32xf32>
    %cst_11 = arith.constant 1.000000e+00 : f32
    %32 = vector.broadcast %cst_11 : f32 to vector<2x1x32xf32>
    %33 = arith.addf %32, %7 : vector<2x1x32xf32>
    %34 = vector.broadcast %33 : vector<2x1x32xf32> to vector<2x64x32xf32>
    %35 = arith.mulf %31, %34 : vector<2x64x32xf32>
    %36 = vector.broadcast %6 : vector<2x1x32xf32> to vector<2x64x32xf32>
    %37 = arith.addf %35, %36 : vector<2x64x32xf32>
    %c0_12 = arith.constant 0 : index
    %c0_13 = arith.constant 0 : index
    %c0_14 = arith.constant 0 : index
    %38 = vector.load %arg3[%c0_12, %c0_13, %c0_14] : memref<1x32x96xbf16, #tpu.memory_space<vmem>>, vector<1x32x96xbf16>
    %39 = vector.shape_cast %38 : vector<1x32x96xbf16> to vector<32x96xbf16>
    %c0_15 = arith.constant 0 : index
    %c0_16 = arith.constant 0 : index
    %c0_17 = arith.constant 0 : index
    %40 = vector.load %arg4[%c0_15, %c0_16, %c0_17] : memref<1x1x96xf32, #tpu.memory_space<vmem>>, vector<1x1x96xf32>
    %41 = vector.shape_cast %40 : vector<1x1x96xf32> to vector<1x96xf32>
    %42 = vector.shape_cast %37 : vector<2x64x32xf32> to vector<128x32xf32>
    %43 = arith.truncf %42 : vector<128x32xf32> to vector<128x32xbf16>
    %cst_18 = arith.constant dense<0.000000e+00> : vector<128x96xf32>
    %44 = tpu.matmul %43, %39, %cst_18 {dimension_numbers = #tpu.dot_dimension_numbers<[1], [0], [0], [1], [0, 0, 1, 1], [], []>} : vector<128x32xbf16>, vector<32x96xbf16>, vector<128x96xf32> -> vector<128x96xf32>
    %45 = vector.broadcast %41 : vector<1x96xf32> to vector<128x96xf32>
    %46 = arith.addf %44, %45 : vector<128x96xf32>
    %47 = vector.shape_cast %46 : vector<128x96xf32> to vector<2x64x96xf32>
    %48 = vector.extract_strided_slice %47 {offsets = [0, 0, 0], sizes = [2, 64, 32], strides = [1, 1, 1]} : vector<2x64x96xf32> to vector<2x64x32xf32>
    %49 = vector.extract_strided_slice %47 {offsets = [0, 0, 32], sizes = [2, 64, 32], strides = [1, 1, 1]} : vector<2x64x96xf32> to vector<2x64x32xf32>
    %50 = vector.extract_strided_slice %47 {offsets = [0, 0, 64], sizes = [2, 64, 32], strides = [1, 1, 1]} : vector<2x64x96xf32> to vector<2x64x32xf32>
    %51 = vector.extract_strided_slice %48 {offsets = [0, 0, 0], sizes = [2, 64, 8], strides = [1, 1, 1]} : vector<2x64x32xf32> to vector<2x64x8xf32>
    %52 = vector.extract_strided_slice %48 {offsets = [0, 0, 8], sizes = [2, 64, 8], strides = [1, 1, 1]} : vector<2x64x32xf32> to vector<2x64x8xf32>
    %53 = vector.extract_strided_slice %48 {offsets = [0, 0, 16], sizes = [2, 64, 8], strides = [1, 1, 1]} : vector<2x64x32xf32> to vector<2x64x8xf32>
    %54 = vector.extract_strided_slice %48 {offsets = [0, 0, 24], sizes = [2, 64, 8], strides = [1, 1, 1]} : vector<2x64x32xf32> to vector<2x64x8xf32>
    %55 = vector.shape_cast %51 : vector<2x64x8xf32> to vector<1x2x64x8xf32>
    %56 = vector.shape_cast %52 : vector<2x64x8xf32> to vector<1x2x64x8xf32>
    %57 = vector.shape_cast %53 : vector<2x64x8xf32> to vector<1x2x64x8xf32>
    %58 = vector.shape_cast %54 : vector<2x64x8xf32> to vector<1x2x64x8xf32>
    %59 = tpu.concatenate %55, %56, %57, %58 in 0 : vector<1x2x64x8xf32>, vector<1x2x64x8xf32>, vector<1x2x64x8xf32>, vector<1x2x64x8xf32> -> vector<4x2x64x8xf32>
    %60 = vector.shape_cast %59 : vector<4x2x64x8xf32> to vector<8x64x8xf32>
    %61 = vector.extract_strided_slice %49 {offsets = [0, 0, 0], sizes = [2, 64, 8], strides = [1, 1, 1]} : vector<2x64x32xf32> to vector<2x64x8xf32>
    %62 = vector.extract_strided_slice %49 {offsets = [0, 0, 8], sizes = [2, 64, 8], strides = [1, 1, 1]} : vector<2x64x32xf32> to vector<2x64x8xf32>
    %63 = vector.extract_strided_slice %49 {offsets = [0, 0, 16], sizes = [2, 64, 8], strides = [1, 1, 1]} : vector<2x64x32xf32> to vector<2x64x8xf32>
    %64 = vector.extract_strided_slice %49 {offsets = [0, 0, 24], sizes = [2, 64, 8], strides = [1, 1, 1]} : vector<2x64x32xf32> to vector<2x64x8xf32>
    %65 = vector.shape_cast %61 : vector<2x64x8xf32> to vector<1x2x64x8xf32>
    %66 = vector.shape_cast %62 : vector<2x64x8xf32> to vector<1x2x64x8xf32>
    %67 = vector.shape_cast %63 : vector<2x64x8xf32> to vector<1x2x64x8xf32>
    %68 = vector.shape_cast %64 : vector<2x64x8xf32> to vector<1x2x64x8xf32>
    %69 = tpu.concatenate %65, %66, %67, %68 in 0 : vector<1x2x64x8xf32>, vector<1x2x64x8xf32>, vector<1x2x64x8xf32>, vector<1x2x64x8xf32> -> vector<4x2x64x8xf32>
    %70 = vector.shape_cast %69 : vector<4x2x64x8xf32> to vector<8x64x8xf32>
    %71 = vector.extract_strided_slice %50 {offsets = [0, 0, 0], sizes = [2, 64, 8], strides = [1, 1, 1]} : vector<2x64x32xf32> to vector<2x64x8xf32>
    %72 = vector.extract_strided_slice %50 {offsets = [0, 0, 8], sizes = [2, 64, 8], strides = [1, 1, 1]} : vector<2x64x32xf32> to vector<2x64x8xf32>
    %73 = vector.extract_strided_slice %50 {offsets = [0, 0, 16], sizes = [2, 64, 8], strides = [1, 1, 1]} : vector<2x64x32xf32> to vector<2x64x8xf32>
    %74 = vector.extract_strided_slice %50 {offsets = [0, 0, 24], sizes = [2, 64, 8], strides = [1, 1, 1]} : vector<2x64x32xf32> to vector<2x64x8xf32>
    %75 = vector.shape_cast %71 : vector<2x64x8xf32> to vector<1x2x64x8xf32>
    %76 = vector.shape_cast %72 : vector<2x64x8xf32> to vector<1x2x64x8xf32>
    %77 = vector.shape_cast %73 : vector<2x64x8xf32> to vector<1x2x64x8xf32>
    %78 = vector.shape_cast %74 : vector<2x64x8xf32> to vector<1x2x64x8xf32>
    %79 = tpu.concatenate %75, %76, %77, %78 in 0 : vector<1x2x64x8xf32>, vector<1x2x64x8xf32>, vector<1x2x64x8xf32>, vector<1x2x64x8xf32> -> vector<4x2x64x8xf32>
    %80 = vector.shape_cast %79 : vector<4x2x64x8xf32> to vector<8x64x8xf32>
    %81 = arith.truncf %60 : vector<8x64x8xf32> to vector<8x64x8xbf16>
    %82 = arith.truncf %70 : vector<8x64x8xf32> to vector<8x64x8xbf16>
    %cst_19 = arith.constant dense<0.000000e+00> : vector<8x64x64xf32>
    %83 = tpu.matmul %81, %82, %cst_19 {dimension_numbers = #tpu.dot_dimension_numbers<[2], [2], [1], [1], [0, 0, 0, 1, 1, 1], [0], [0]>} : vector<8x64x8xbf16>, vector<8x64x8xbf16>, vector<8x64x64xf32> -> vector<8x64x64xf32>
    %cst_20 = arith.constant dense<0xFF800000> : vector<8x64xf32>
    %84 = vector.multi_reduction <maximumf>, %83, %cst_20 [2] : vector<8x64x64xf32> to vector<8x64xf32>
    %85 = vector.shape_cast %84 : vector<8x64xf32> to vector<8x64x1xf32>
    %86 = vector.broadcast %85 : vector<8x64x1xf32> to vector<8x64x64xf32>
    %87 = arith.subf %83, %86 : vector<8x64x64xf32>
    %88 = math.exp %87 : vector<8x64x64xf32>
    %cst_21 = arith.constant dense<0.000000e+00> : vector<8x64xf32>
    %89 = vector.multi_reduction <add>, %88, %cst_21 [2] : vector<8x64x64xf32> to vector<8x64xf32>
    %90 = vector.shape_cast %89 : vector<8x64xf32> to vector<8x64x1xf32>
    %91 = vector.broadcast %90 : vector<8x64x1xf32> to vector<8x64x64xf32>
    %92 = arith.divf %88, %91 : vector<8x64x64xf32>
    %93 = arith.truncf %92 : vector<8x64x64xf32> to vector<8x64x64xbf16>
    %94 = arith.truncf %80 : vector<8x64x8xf32> to vector<8x64x8xbf16>
    %cst_22 = arith.constant dense<0.000000e+00> : vector<8x64x8xf32>
    %95 = tpu.matmul %93, %94, %cst_22 {dimension_numbers = #tpu.dot_dimension_numbers<[2], [1], [1], [2], [0, 0, 0, 1, 1, 2], [0], [0]>} : vector<8x64x64xbf16>, vector<8x64x8xbf16>, vector<8x64x8xf32> -> vector<8x64x8xf32>
    %96 = vector.shape_cast %95 : vector<8x64x8xf32> to vector<4x2x64x8xf32>
    %97 = vector.extract_strided_slice %96 {offsets = [0, 0, 0, 0], sizes = [1, 2, 64, 8], strides = [1, 1, 1, 1]} : vector<4x2x64x8xf32> to vector<1x2x64x8xf32>
    %98 = vector.shape_cast %97 : vector<1x2x64x8xf32> to vector<2x64x8xf32>
    %99 = vector.extract_strided_slice %96 {offsets = [1, 0, 0, 0], sizes = [1, 2, 64, 8], strides = [1, 1, 1, 1]} : vector<4x2x64x8xf32> to vector<1x2x64x8xf32>
    %100 = vector.shape_cast %99 : vector<1x2x64x8xf32> to vector<2x64x8xf32>
    %101 = vector.extract_strided_slice %96 {offsets = [2, 0, 0, 0], sizes = [1, 2, 64, 8], strides = [1, 1, 1, 1]} : vector<4x2x64x8xf32> to vector<1x2x64x8xf32>
    %102 = vector.shape_cast %101 : vector<1x2x64x8xf32> to vector<2x64x8xf32>
    %103 = vector.extract_strided_slice %96 {offsets = [3, 0, 0, 0], sizes = [1, 2, 64, 8], strides = [1, 1, 1, 1]} : vector<4x2x64x8xf32> to vector<1x2x64x8xf32>
    %104 = vector.shape_cast %103 : vector<1x2x64x8xf32> to vector<2x64x8xf32>
    %105 = tpu.concatenate %98, %100, %102, %104 in 2 : vector<2x64x8xf32>, vector<2x64x8xf32>, vector<2x64x8xf32>, vector<2x64x8xf32> -> vector<2x64x32xf32>
    %c0_23 = arith.constant 0 : index
    %c0_24 = arith.constant 0 : index
    %c0_25 = arith.constant 0 : index
    %106 = vector.load %arg5[%c0_23, %c0_24, %c0_25] : memref<1x32x32xbf16, #tpu.memory_space<vmem>>, vector<1x32x32xbf16>
    %107 = vector.shape_cast %106 : vector<1x32x32xbf16> to vector<32x32xbf16>
    %c0_26 = arith.constant 0 : index
    %c0_27 = arith.constant 0 : index
    %c0_28 = arith.constant 0 : index
    %108 = vector.load %arg6[%c0_26, %c0_27, %c0_28] : memref<1x1x32xf32, #tpu.memory_space<vmem>>, vector<1x1x32xf32>
    %109 = vector.shape_cast %108 : vector<1x1x32xf32> to vector<1x32xf32>
    %110 = vector.shape_cast %105 : vector<2x64x32xf32> to vector<128x32xf32>
    %111 = arith.truncf %110 : vector<128x32xf32> to vector<128x32xbf16>
    %cst_29 = arith.constant dense<0.000000e+00> : vector<128x32xf32>
    %112 = tpu.matmul %111, %107, %cst_29 {dimension_numbers = #tpu.dot_dimension_numbers<[1], [0], [0], [1], [0, 0, 1, 1], [], []>} : vector<128x32xbf16>, vector<32x32xbf16>, vector<128x32xf32> -> vector<128x32xf32>
    %113 = vector.broadcast %109 : vector<1x32xf32> to vector<128x32xf32>
    %114 = arith.addf %112, %113 : vector<128x32xf32>
    %115 = vector.shape_cast %114 : vector<128x32xf32> to vector<2x64x32xf32>
    %116 = vector.broadcast %8 : vector<2x1x32xf32> to vector<2x64x32xf32>
    %117 = arith.mulf %116, %115 : vector<2x64x32xf32>
    %118 = arith.addf %3, %117 : vector<2x64x32xf32>
    %cst_30 = arith.constant dense<0.000000e+00> : vector<2x64xf32>
    %119 = vector.multi_reduction <add>, %118, %cst_30 [2] : vector<2x64x32xf32> to vector<2x64xf32>
    %120 = vector.shape_cast %119 : vector<2x64xf32> to vector<2x64x1xf32>
    %cst_31 = arith.constant 3.200000e+01 : f32
    %121 = vector.broadcast %cst_31 : f32 to vector<2x64x1xf32>
    %122 = arith.divf %120, %121 : vector<2x64x1xf32>
    %123 = vector.broadcast %122 : vector<2x64x1xf32> to vector<2x64x32xf32>
    %124 = arith.subf %118, %123 : vector<2x64x32xf32>
    %125 = vector.broadcast %122 : vector<2x64x1xf32> to vector<2x64x32xf32>
    %126 = arith.subf %118, %125 : vector<2x64x32xf32>
    %127 = arith.mulf %124, %126 : vector<2x64x32xf32>
    %cst_32 = arith.constant dense<0.000000e+00> : vector<2x64xf32>
    %128 = vector.multi_reduction <add>, %127, %cst_32 [2] : vector<2x64x32xf32> to vector<2x64xf32>
    %129 = vector.shape_cast %128 : vector<2x64xf32> to vector<2x64x1xf32>
    %cst_33 = arith.constant 3.200000e+01 : f32
    %130 = vector.broadcast %cst_33 : f32 to vector<2x64x1xf32>
    %131 = arith.divf %129, %130 : vector<2x64x1xf32>
    %132 = vector.broadcast %122 : vector<2x64x1xf32> to vector<2x64x32xf32>
    %133 = arith.subf %118, %132 : vector<2x64x32xf32>
    %cst_34 = arith.constant 9.99999974E-6 : f32
    %134 = vector.broadcast %cst_34 : f32 to vector<2x64x1xf32>
    %135 = arith.addf %131, %134 : vector<2x64x1xf32>
    %136 = math.rsqrt %135 : vector<2x64x1xf32>
    %137 = vector.broadcast %136 : vector<2x64x1xf32> to vector<2x64x32xf32>
    %138 = arith.mulf %133, %137 : vector<2x64x32xf32>
    %cst_35 = arith.constant 1.000000e+00 : f32
    %139 = vector.broadcast %cst_35 : f32 to vector<2x1x32xf32>
    %140 = arith.addf %139, %10 : vector<2x1x32xf32>
    %141 = vector.broadcast %140 : vector<2x1x32xf32> to vector<2x64x32xf32>
    %142 = arith.mulf %138, %141 : vector<2x64x32xf32>
    %143 = vector.broadcast %9 : vector<2x1x32xf32> to vector<2x64x32xf32>
    %144 = arith.addf %142, %143 : vector<2x64x32xf32>
    %c0_36 = arith.constant 0 : index
    %c0_37 = arith.constant 0 : index
    %c0_38 = arith.constant 0 : index
    %145 = vector.load %arg7[%c0_36, %c0_37, %c0_38] : memref<1x32x128xbf16, #tpu.memory_space<vmem>>, vector<1x32x128xbf16>
    %146 = vector.shape_cast %145 : vector<1x32x128xbf16> to vector<32x128xbf16>
    %c0_39 = arith.constant 0 : index
    %c0_40 = arith.constant 0 : index
    %c0_41 = arith.constant 0 : index
    %147 = vector.load %arg8[%c0_39, %c0_40, %c0_41] : memref<1x1x128xf32, #tpu.memory_space<vmem>>, vector<1x1x128xf32>
    %148 = vector.shape_cast %147 : vector<1x1x128xf32> to vector<1x128xf32>
    %149 = vector.shape_cast %144 : vector<2x64x32xf32> to vector<128x32xf32>
    %150 = arith.truncf %149 : vector<128x32xf32> to vector<128x32xbf16>
    %cst_42 = arith.constant dense<0.000000e+00> : vector<128x128xf32>
    %151 = tpu.matmul %150, %146, %cst_42 {dimension_numbers = #tpu.dot_dimension_numbers<[1], [0], [0], [1], [0, 0, 1, 1], [], []>} : vector<128x32xbf16>, vector<32x128xbf16>, vector<128x128xf32> -> vector<128x128xf32>
    %152 = vector.broadcast %148 : vector<1x128xf32> to vector<128x128xf32>
    %153 = arith.addf %151, %152 : vector<128x128xf32>
    %154 = vector.shape_cast %153 : vector<128x128xf32> to vector<2x64x128xf32>
    %cst_43 = arith.constant 5.000000e-01 : f32
    %155 = vector.broadcast %cst_43 : f32 to vector<2x64x128xf32>
    %156 = arith.mulf %155, %154 : vector<2x64x128xf32>
    %cst_44 = arith.constant 4.471500e-02 : f32
    %157 = vector.broadcast %cst_44 : f32 to vector<2x64x128xf32>
    %158 = arith.mulf %157, %154 : vector<2x64x128xf32>
    %159 = arith.mulf %158, %154 : vector<2x64x128xf32>
    %160 = arith.mulf %159, %154 : vector<2x64x128xf32>
    %161 = arith.addf %154, %160 : vector<2x64x128xf32>
    %cst_45 = arith.constant 0.797884583 : f32
    %162 = vector.broadcast %cst_45 : f32 to vector<2x64x128xf32>
    %163 = arith.mulf %162, %161 : vector<2x64x128xf32>
    %164 = math.tanh %163 : vector<2x64x128xf32>
    %cst_46 = arith.constant 1.000000e+00 : f32
    %165 = vector.broadcast %cst_46 : f32 to vector<2x64x128xf32>
    %166 = arith.addf %165, %164 : vector<2x64x128xf32>
    %167 = arith.mulf %156, %166 : vector<2x64x128xf32>
    %c0_47 = arith.constant 0 : index
    %c0_48 = arith.constant 0 : index
    %c0_49 = arith.constant 0 : index
    %168 = vector.load %arg9[%c0_47, %c0_48, %c0_49] : memref<1x128x32xbf16, #tpu.memory_space<vmem>>, vector<1x128x32xbf16>
    %169 = vector.shape_cast %168 : vector<1x128x32xbf16> to vector<128x32xbf16>
    %c0_50 = arith.constant 0 : index
    %c0_51 = arith.constant 0 : index
    %c0_52 = arith.constant 0 : index
    %170 = vector.load %arg10[%c0_50, %c0_51, %c0_52] : memref<1x1x32xf32, #tpu.memory_space<vmem>>, vector<1x1x32xf32>
    %171 = vector.shape_cast %170 : vector<1x1x32xf32> to vector<1x32xf32>
    %172 = vector.shape_cast %167 : vector<2x64x128xf32> to vector<128x128xf32>
    %173 = arith.truncf %172 : vector<128x128xf32> to vector<128x128xbf16>
    %cst_53 = arith.constant dense<0.000000e+00> : vector<128x32xf32>
    %174 = tpu.matmul %173, %169, %cst_53 {dimension_numbers = #tpu.dot_dimension_numbers<[1], [0], [0], [1], [0, 0, 1, 1], [], []>} : vector<128x128xbf16>, vector<128x32xbf16>, vector<128x32xf32> -> vector<128x32xf32>
    %175 = vector.broadcast %171 : vector<1x32xf32> to vector<128x32xf32>
    %176 = arith.addf %174, %175 : vector<128x32xf32>
    %177 = vector.shape_cast %176 : vector<128x32xf32> to vector<2x64x32xf32>
    %178 = vector.broadcast %11 : vector<2x1x32xf32> to vector<2x64x32xf32>
    %179 = arith.mulf %178, %177 : vector<2x64x32xf32>
    %180 = arith.addf %118, %179 : vector<2x64x32xf32>
    %c0_54 = arith.constant 0 : index
    %c0_55 = arith.constant 0 : index
    %c0_56 = arith.constant 0 : index
    %181 = vector.load %arg11[%c0_54, %c0_55, %c0_56] : memref<2x64x32xf32, #tpu.memory_space<vmem>>, vector<2x64x32xf32>
    tpu.vector_store %arg11[%c0_54, %c0_55, %c0_56], %180 {strides = array<i32>} : memref<2x64x32xf32, #tpu.memory_space<vmem>>, vector<2x64x32xf32>,
    return
  }
  func.func @transform_0(%arg0: i32) -> (i32, i32, i32) {
    %c0_i32 = arith.constant 0 : i32
    %c0_i32_0 = arith.constant 0 : i32
    %c0_i32_1 = arith.constant 0 : i32
    %c0_i32_2 = arith.constant 0 : i32
    return %c0_i32, %c0_i32_0, %c0_i32_1 : i32, i32, i32
  }
  func.func @transform_1(%arg0: i32) -> (i32, i32, i32, i32) {
    %c0_i32 = arith.constant 0 : i32
    %c0_i32_0 = arith.constant 0 : i32
    %c0_i32_1 = arith.constant 0 : i32
    %c0_i32_2 = arith.constant 0 : i32
    return %arg0, %c0_i32, %c0_i32_0, %c0_i32_1 : i32, i32, i32, i32
  }
  func.func @transform_2(%arg0: i32) -> (i32, i32, i32) {
    %c0_i32 = arith.constant 0 : i32
    %c0_i32_0 = arith.constant 0 : i32
    %c0_i32_1 = arith.constant 0 : i32
    return %arg0, %c0_i32, %c0_i32_0 : i32, i32, i32
  }
  func.func @transform_3(%arg0: i32) -> (i32, i32, i32) {
    %c0_i32 = arith.constant 0 : i32
    %c0_i32_0 = arith.constant 0 : i32
    %c0_i32_1 = arith.constant 0 : i32
    return %arg0, %c0_i32, %c0_i32_0 : i32, i32, i32
  }
  func.func @transform_4(%arg0: i32) -> (i32, i32, i32) {
    %c0_i32 = arith.constant 0 : i32
    %c0_i32_0 = arith.constant 0 : i32
    %c0_i32_1 = arith.constant 0 : i32
    return %arg0, %c0_i32, %c0_i32_0 : i32, i32, i32
  }
  func.func @transform_5(%arg0: i32) -> (i32, i32, i32) {
    %c0_i32 = arith.constant 0 : i32
    %c0_i32_0 = arith.constant 0 : i32
    %c0_i32_1 = arith.constant 0 : i32
    return %arg0, %c0_i32, %c0_i32_0 : i32, i32, i32
  }
  func.func @transform_6(%arg0: i32) -> (i32, i32, i32) {
    %c0_i32 = arith.constant 0 : i32
    %c0_i32_0 = arith.constant 0 : i32
    %c0_i32_1 = arith.constant 0 : i32
    return %arg0, %c0_i32, %c0_i32_0 : i32, i32, i32
  }
  func.func @transform_7(%arg0: i32) -> (i32, i32, i32) {
    %c0_i32 = arith.constant 0 : i32
    %c0_i32_0 = arith.constant 0 : i32
    %c0_i32_1 = arith.constant 0 : i32
    return %arg0, %c0_i32, %c0_i32_0 : i32, i32, i32
  }
  func.func @transform_8(%arg0: i32) -> (i32, i32, i32) {
    %c0_i32 = arith.constant 0 : i32
    %c0_i32_0 = arith.constant 0 : i32
    %c0_i32_1 = arith.constant 0 : i32
    return %arg0, %c0_i32, %c0_i32_0 : i32, i32, i32
  }
  func.func @transform_9(%arg0: i32) -> (i32, i32, i32) {
    %c0_i32 = arith.constant 0 : i32
    %c0_i32_0 = arith.constant 0 : i32
    %c0_i32_1 = arith.constant 0 : i32
    return %arg0, %c0_i32, %c0_i32_0 : i32, i32, i32
  }
  func.func @transform_10(%arg0: i32) -> (i32, i32, i32) {
    %c0_i32 = arith.constant 0 : i32
    %c0_i32_0 = arith.constant 0 : i32
    %c0_i32_1 = arith.constant 0 : i32
    %c0_i32_2 = arith.constant 0 : i32
    return %c0_i32, %c0_i32_0, %c0_i32_1 : i32, i32, i32
  }
}

module attributes {stable_mosaic.version = 11 : i64} {
  func.func @_final_layer_kernel(%arg0: i32, %arg1: memref<1x64x32xf32, #tpu.memory_space<vmem>>, %arg2: memref<1x1x32xf32, #tpu.memory_space<vmem>>, %arg3: memref<32x64xbf16, #tpu.memory_space<vmem>>, %arg4: memref<1x64xf32, #tpu.memory_space<vmem>>, %arg5: memref<16x32xbf16, #tpu.memory_space<vmem>>, %arg6: memref<16x1xf32, #tpu.memory_space<vmem>>, %arg7: memref<1x16x64xf32, #tpu.memory_space<vmem>>) attributes {dimension_semantics = [#tpu.dimension_semantics<parallel>], iteration_bounds = array<i64: 2>, scalar_prefetch = 0 : i64, scratch_operands = 0 : i64, tpu.core_type = #tpu.core_type<tc>, window_params = [{transform_indices = @transform_0, window_bounds = array<i64: 1, 64, 32>}, {transform_indices = @transform_1, window_bounds = array<i64: 1, 1, 32>}, {pipeline_mode = #tpu.pipeline_mode<synchronous>, transform_indices = @transform_2, window_bounds = array<i64: 32, 64>}, {pipeline_mode = #tpu.pipeline_mode<synchronous>, transform_indices = @transform_3, window_bounds = array<i64: 1, 64>}, {pipeline_mode = #tpu.pipeline_mode<synchronous>, transform_indices = @transform_4, window_bounds = array<i64: 16, 32>}, {pipeline_mode = #tpu.pipeline_mode<synchronous>, transform_indices = @transform_5, window_bounds = array<i64: 16, 1>}, {transform_indices = @transform_6, window_bounds = array<i64: 1, 16, 64>}]} {
    %c0 = arith.constant 0 : index
    %c0_0 = arith.constant 0 : index
    %c0_1 = arith.constant 0 : index
    %0 = vector.load %arg1[%c0, %c0_0, %c0_1] : memref<1x64x32xf32, #tpu.memory_space<vmem>>, vector<1x64x32xf32>
    %1 = vector.shape_cast %0 : vector<1x64x32xf32> to vector<64x32xf32>
    %c0_2 = arith.constant 0 : index
    %c0_3 = arith.constant 0 : index
    %c0_4 = arith.constant 0 : index
    %2 = vector.load %arg2[%c0_2, %c0_3, %c0_4] : memref<1x1x32xf32, #tpu.memory_space<vmem>>, vector<1x1x32xf32>
    %3 = vector.shape_cast %2 : vector<1x1x32xf32> to vector<1x32xf32>
    %4 = arith.truncf %3 : vector<1x32xf32> to vector<1x32xbf16>
    %c0_5 = arith.constant 0 : index
    %c0_6 = arith.constant 0 : index
    %5 = vector.load %arg3[%c0_5, %c0_6] : memref<32x64xbf16, #tpu.memory_space<vmem>>, vector<32x64xbf16>
    %cst = arith.constant dense<0.000000e+00> : vector<1x64xf32>
    %6 = tpu.matmul %4, %5, %cst {dimension_numbers = #tpu.dot_dimension_numbers<[1], [0], [0], [1], [0, 0, 1, 1], [], []>} : vector<1x32xbf16>, vector<32x64xbf16>, vector<1x64xf32> -> vector<1x64xf32>
    %c0_7 = arith.constant 0 : index
    %c0_8 = arith.constant 0 : index
    %7 = vector.load %arg4[%c0_7, %c0_8] : memref<1x64xf32, #tpu.memory_space<vmem>>, vector<1x64xf32>
    %8 = arith.addf %6, %7 : vector<1x64xf32>
    %9 = vector.extract_strided_slice %8 {offsets = [0, 0], sizes = [1, 32], strides = [1, 1]} : vector<1x64xf32> to vector<1x32xf32>
    %10 = vector.extract_strided_slice %8 {offsets = [0, 32], sizes = [1, 32], strides = [1, 1]} : vector<1x64xf32> to vector<1x32xf32>
    %cst_9 = arith.constant dense<0.000000e+00> : vector<64xf32>
    %11 = vector.multi_reduction <add>, %1, %cst_9 [1] : vector<64x32xf32> to vector<64xf32>
    %12 = vector.shape_cast %11 : vector<64xf32> to vector<64x1xf32>
    %cst_10 = arith.constant 3.200000e+01 : f32
    %13 = vector.broadcast %cst_10 : f32 to vector<64x1xf32>
    %14 = arith.divf %12, %13 : vector<64x1xf32>
    %15 = vector.broadcast %14 : vector<64x1xf32> to vector<64x32xf32>
    %16 = arith.subf %1, %15 : vector<64x32xf32>
    %17 = vector.broadcast %14 : vector<64x1xf32> to vector<64x32xf32>
    %18 = arith.subf %1, %17 : vector<64x32xf32>
    %19 = arith.mulf %16, %18 : vector<64x32xf32>
    %cst_11 = arith.constant dense<0.000000e+00> : vector<64xf32>
    %20 = vector.multi_reduction <add>, %19, %cst_11 [1] : vector<64x32xf32> to vector<64xf32>
    %21 = vector.shape_cast %20 : vector<64xf32> to vector<64x1xf32>
    %cst_12 = arith.constant 3.200000e+01 : f32
    %22 = vector.broadcast %cst_12 : f32 to vector<64x1xf32>
    %23 = arith.divf %21, %22 : vector<64x1xf32>
    %24 = vector.broadcast %14 : vector<64x1xf32> to vector<64x32xf32>
    %25 = arith.subf %1, %24 : vector<64x32xf32>
    %cst_13 = arith.constant 9.99999974E-6 : f32
    %26 = vector.broadcast %cst_13 : f32 to vector<64x1xf32>
    %27 = arith.addf %23, %26 : vector<64x1xf32>
    %28 = math.rsqrt %27 : vector<64x1xf32>
    %29 = vector.broadcast %28 : vector<64x1xf32> to vector<64x32xf32>
    %30 = arith.mulf %25, %29 : vector<64x32xf32>
    %cst_14 = arith.constant 1.000000e+00 : f32
    %31 = vector.broadcast %cst_14 : f32 to vector<1x32xf32>
    %32 = arith.addf %31, %10 : vector<1x32xf32>
    %33 = vector.broadcast %32 : vector<1x32xf32> to vector<64x32xf32>
    %34 = arith.mulf %30, %33 : vector<64x32xf32>
    %35 = vector.broadcast %9 : vector<1x32xf32> to vector<64x32xf32>
    %36 = arith.addf %34, %35 : vector<64x32xf32>
    %c0_15 = arith.constant 0 : index
    %c0_16 = arith.constant 0 : index
    %37 = vector.load %arg5[%c0_15, %c0_16] : memref<16x32xbf16, #tpu.memory_space<vmem>>, vector<16x32xbf16>
    %38 = arith.truncf %36 : vector<64x32xf32> to vector<64x32xbf16>
    %cst_17 = arith.constant dense<0.000000e+00> : vector<16x64xf32>
    %39 = tpu.matmul %37, %38, %cst_17 {dimension_numbers = #tpu.dot_dimension_numbers<[1], [1], [0], [0], [0, 0, 1, 0], [], []>} : vector<16x32xbf16>, vector<64x32xbf16>, vector<16x64xf32> -> vector<16x64xf32>
    %c0_18 = arith.constant 0 : index
    %c0_19 = arith.constant 0 : index
    %40 = vector.load %arg6[%c0_18, %c0_19] : memref<16x1xf32, #tpu.memory_space<vmem>>, vector<16x1xf32>
    %41 = vector.broadcast %40 : vector<16x1xf32> to vector<16x64xf32>
    %42 = arith.addf %39, %41 : vector<16x64xf32>
    %c0_20 = arith.constant 0 : index
    %c0_21 = arith.constant 0 : index
    %c0_22 = arith.constant 0 : index
    %43 = vector.load %arg7[%c0_20, %c0_21, %c0_22] : memref<1x16x64xf32, #tpu.memory_space<vmem>>, vector<1x16x64xf32>
    %44 = vector.shape_cast %43 : vector<1x16x64xf32> to vector<16x64xf32>
    %45 = vector.shape_cast %42 : vector<16x64xf32> to vector<1x16x64xf32>
    tpu.vector_store %arg7[%c0_20, %c0_21, %c0_22], %45 {strides = array<i32>} : memref<1x16x64xf32, #tpu.memory_space<vmem>>, vector<1x16x64xf32>,
    return
  }
  func.func @transform_0(%arg0: i32) -> (i32, i32, i32) {
    %c0_i32 = arith.constant 0 : i32
    %c0_i32_0 = arith.constant 0 : i32
    %c0_i32_1 = arith.constant 0 : i32
    return %arg0, %c0_i32, %c0_i32_0 : i32, i32, i32
  }
  func.func @transform_1(%arg0: i32) -> (i32, i32, i32) {
    %c0_i32 = arith.constant 0 : i32
    %c0_i32_0 = arith.constant 0 : i32
    %c0_i32_1 = arith.constant 0 : i32
    return %arg0, %c0_i32, %c0_i32_0 : i32, i32, i32
  }
  func.func @transform_2(%arg0: i32) -> (i32, i32) {
    %c0_i32 = arith.constant 0 : i32
    %c0_i32_0 = arith.constant 0 : i32
    %c0_i32_1 = arith.constant 0 : i32
    return %c0_i32, %c0_i32_0 : i32, i32
  }
  func.func @transform_3(%arg0: i32) -> (i32, i32) {
    %c0_i32 = arith.constant 0 : i32
    %c0_i32_0 = arith.constant 0 : i32
    %c0_i32_1 = arith.constant 0 : i32
    return %c0_i32, %c0_i32_0 : i32, i32
  }
  func.func @transform_4(%arg0: i32) -> (i32, i32) {
    %c0_i32 = arith.constant 0 : i32
    %c0_i32_0 = arith.constant 0 : i32
    %c0_i32_1 = arith.constant 0 : i32
    return %c0_i32, %c0_i32_0 : i32, i32
  }
  func.func @transform_5(%arg0: i32) -> (i32, i32) {
    %c0_i32 = arith.constant 0 : i32
    %c0_i32_0 = arith.constant 0 : i32
    %c0_i32_1 = arith.constant 0 : i32
    return %c0_i32, %c0_i32_0 : i32, i32
  }
  func.func @transform_6(%arg0: i32) -> (i32, i32, i32) {
    %c0_i32 = arith.constant 0 : i32
    %c0_i32_0 = arith.constant 0 : i32
    %c0_i32_1 = arith.constant 0 : i32
    return %arg0, %c0_i32, %c0_i32_0 : i32, i32, i32
  }
}

</mosaic_0001>

<bundles_post_ra>
// kernel: dit_forward.6
= control target key start
LH: loop header
LB: loop body
LE: loop exit
PB: predicated region body
PF: predicated region fallthrough
CT: control target
= control target key end

     0   :  { %v152_v0 = vmov 0   ;;  %vm81_vm4 = vcmask 261120   ;;  %vm120_vm9 = vcmask 254976   ;;  %s212_s0 = inlined_call_operand.vmem [shape: f32[2,1], index: 0, kind: input, shape index: {}]   ;;  %s213_s1 = inlined_call_operand.vmem [shape: f32[1,32], index: 1, kind: input, shape index: {}]   ;;  %s214_s2 = inlined_call_operand.vmem [shape: f32[1,32], index: 2, kind: input, shape index: {}]   ;;  %s215_s4 = inlined_call_operand.vmem [shape: f32[1,32], index: 4, kind: input, shape index: {}]   ;;  %s216_s3 = inlined_call_operand.vmem [shape: bf16[32,32], index: 3, kind: input, shape index: {}]   ;;  %s217_s5 = inlined_call_operand.vmem [shape: f32[2,32], index: 5, kind: input, shape index: {}]   ;;  %s218_s6 = inlined_call_operand.vmem [shape: f32[2,32], index: 6, kind: output, shape index: {}]  }
   0x1   :  { %140 = vset.pattern.permute.xlu0 %v152_v0  ;;  %v24_v1 = vld [vmem:[%s212_s0] sm:$0x3]  ;;  %v138_v2 = vld [vmem:[%s216_s3 + $0x8] sm:$0xff] }
   0x2   :  { %28 = vperm.xlu0 %140, %v24_v1   ;;  %91 = vmatpush.bf16.msra.mxu0 %v138_v2  ;;  %v137_v3 = vld [vmem:[%s216_s3] sm:$0xff] }
   0x3   :  { %v141_v4 = vld [vmem:[%s213_s1] ss:$0 sm:$0xff] }
   0x4   :  { %v142_v5 = vld [vmem:[%s214_s2] ss:$0 sm:$0xff] }
   0x5   :  { %v143_v24 = vld [vmem:[%s215_s4] ss:$0 sm:$0xff] }
   0x6   :  { %92 = vmatpush.bf16.msra.mxu0 %v137_v3  ;;  %v98_v26 = vld [vmem:[%s217_s5] sm:$0x3] }
  0x74   :  { %v29_v6 = vpop.permute.xlu0 %28 }
  0x75   :  { %v34_v7 = vmul.f32 %v141_v4, %v29_v6 }
  0x77   :  { %v39_v8 = vadd.f32 %v142_v5, %v34_v7 }
  0x79   :  { %v126_v9 = vmul.f32 -1.442695, %v39_v8 }
  0x7b   :  { %144 = vpow2.f32 %v126_v9 }
  0x81   :  { %v145_v10 = vpop.eup %144 }
  0x82   :  { %v43_v11 = vadd.f32 1.0, %v145_v10 }
  0x84   :  { %146 = vrcp.f32 %v43_v11  ;;  %v55_v15 = vand.u32 2147483648, %v43_v11  ;;  %v53_v17 = vand.u32 2147483647, %v43_v11  ;;  %vm49_vm1 = vweird.f32 %v43_v11 }
  0x86   :  { %v56_v19 = vor.u32 1.1754944e-38, %v55_v15  ;;  %vm54_vm3 = vcmp.eq.f32.partialorder %v53_v17, 8.507059e+37 }
  0x8a   :  { %v147_v12 = vpop.eup %146 }
  0x8b   :  { %v45_v13 = vmul.f32 %v147_v12, %v43_v11  ;;  %vm50_vm0 = vweird.f32 %v147_v12 }
  0x8c   :  { %vm51_vm2 = vmor %vm49_vm1, %vm50_vm0 }
  0x8d   :  { %v46_v14 = vsub.f32 1.0, %v45_v13 }
  0x8f   :  { %v47_v16 = vmul.f32 %v147_v12, %v46_v14 }
  0x91   :  { %v48_v18 = vadd.f32 %v147_v12, %v47_v16 }
  0x93   :  { %v52_v20 = vsel %vm51_vm2, %v147_v12, %v48_v18 }
  0x94   :  { %v57_v21 = vsel %vm54_vm3, %v56_v19, %v52_v20 }
  0x95   :  { %v59_v22 = vmul.f32 %v57_v21, %v39_v8 }
  0x97   :  { %v60_v23 = vpack.c.bf16 %v59_v22, %v59_v22 }
  0x99   :  { %135 = vmatmul.msk.bf16.vlgmr.msra.gmra.mxu0 %vm81_vm4, %v60_v23 }
 0x116   :  { %v94_v25 = vpop.f32.mrf.mxu0 }
 0x117   :  { %v95_v27 = vadd.f32 %v143_v24, %v94_v25 }
 0x119   :  { %v99_v28 = vadd.f32 %v98_v26, %v95_v27 }
 0x11b   :  { %v136_v29 = vmul.f32 -1.442695, %v99_v28 }
 0x11d   :  { %148 = vpow2.f32 %v136_v29 }
 0x11e   :  { %v96_v30 = vpop.f32.mrf.mxu0 }
 0x123   :  { %v149_v31 = vpop.eup %148 }
 0x124   :  { %v103_v32 = vadd.f32 1.0, %v149_v31 }
 0x126   :  { %150 = vrcp.f32 %v103_v32  ;;  %v115_v36 = vand.u32 2147483648, %v103_v32  ;;  %v113_v38 = vand.u32 2147483647, %v103_v32  ;;  %vm109_vm6 = vweird.f32 %v103_v32 }
 0x128   :  { %v116_v40 = vor.u32 1.1754944e-38, %v115_v36  ;;  %vm114_vm8 = vcmp.eq.f32.partialorder %v113_v38, 8.507059e+37 }
 0x12c   :  { %v151_v33 = vpop.eup %150 }
 0x12d   :  { %v105_v34 = vmul.f32 %v151_v33, %v103_v32  ;;  %vm110_vm5 = vweird.f32 %v151_v33 }
 0x12e   :  { %vm111_vm7 = vmor %vm109_vm6, %vm110_vm5 }
 0x12f   :  { %v106_v35 = vsub.f32 1.0, %v105_v34 }
 0x131   :  { %v107_v37 = vmul.f32 %v151_v33, %v106_v35 }
 0x133   :  { %v108_v39 = vadd.f32 %v151_v33, %v107_v37 }
 0x135   :  { %v112_v41 = vsel %vm111_vm7, %v151_v33, %v108_v39 }
 0x136   :  { %v117_v42 = vsel %vm114_vm8, %v116_v40, %v112_v41 }
 0x137   :  { %v119_v43 = vmul.f32 %v117_v42, %v99_v28 }
 0x139   :  { %121 = vst.msk [vmem:[%s218_s6] sm:$0x3] %vm120_vm9, %v119_v43 }

// kernel: dit_forward.7
= control target key start
LH: loop header
LB: loop body
LE: loop exit
PB: predicated region body
PF: predicated region fallthrough
CT: control target
= control target key end

     0   :  { %s399_s12 = smov 0   ;;  %s427_s0 = inlined_call_operand.vmem [shape: f32[2,32], index: 0, kind: input, shape index: {}]   ;;  %s428_s1 = inlined_call_operand.vmem [shape: bf16[2,32,192], index: 1, kind: input, shape index: {}]   ;;  %s429_s2 = inlined_call_operand.vmem [shape: f32[2,1,192], index: 2, kind: input, shape index: {}]   ;;  %s430_s3 = inlined_call_operand.vmem [shape: f32[2,2,192], index: 3, kind: output, shape index: {}]  }
   0x1 LB: > { %s327_s13 = sadd.s32 4294967295, %s377_s12   ;;  %p331_p0 = scmp.ge.s32.totalorder %s377_s12, 1  ;;  %s377_s12 = sphi %s399_s12, %s13_s12  }
   0x2   : > { %p146_p1 = scmp.lt.s32.totalorder %s377_s12, 3 }
   0x4   : > { %p147_p2 = pnand %p331_p0, %p146_p1 }
   0x5   : > { %p174_p3 = scmp.lt.s32.totalorder (!%p147_p2), %s327_s13, 1 }
   0x6   : > { %150 = sbr.rel (%p147_p2) target bundleno = 159 (0x9f), region = 32 }
   0xb   : > { %s432_s13 = smov (!%p174_p3, %s327_s13), 1  ;;  %v189_v11 = vld [vmem:[%s427_s0] sm:$0x3]  ;;  %vm221_vm0 = vcmask 261120   ;;  %vm254_vm1 = vcmask 1041408   ;;  %vm257_vm2 = vcmask 519170  }
   0xc   : > { %s357_s14 = sshll.u32 %s432_s13, 5  ;;  %v190_v13 = vpack.c.bf16 %v189_v11, %v189_v11  ;;  %s334_s20 = sshll.u32 %s432_s13, 1  ;;  %vm258_vm3 = vmor %vm257_vm2, %vm254_vm1 }
   0xd   : > { %s178_s17 = scalar_lea.vmem %s428_s1, %s357_s14  ;;  %s182_s23 = scalar_lea.vmem %s429_s2, %s334_s20 }
   0xe   : > { %v347_v0 = vld [vmem:[%s178_s17 + $0x10] sm:$0xf]  ;;  %v362_v1 = vld [vmem:[%s178_s17 + $0x14] sm:$0xf0]  ;;  %v361_v2 = vld [vmem:[%s178_s17 + $0x14] sm:$0xf] }
   0xf   : > { %v348_v3 = vor.u32 %v362_v1, %v347_v0  ;;  %v349_v4 = vld [vmem:[%s178_s17 + $0x18] sm:$0xf0]  ;;  %v339_v5 = vld [vmem:[%s178_s17] sm:$0xf]  ;;  %v360_v6 = vld [vmem:[%s178_s17 + $0x4] sm:$0xf0] }
  0x10   : > { %v352_v7 = vor.u32 %v361_v2, %v349_v4  ;;  %v359_v8 = vld [vmem:[%s178_s17 + $0x4] sm:$0xf]  ;;  %v341_v9 = vld [vmem:[%s178_s17 + $0x8] sm:$0xf0]  ;;  %v340_v10 = vor.u32 %v360_v6, %v339_v5  ;;  %v195_v14 = vld [vmem:[%s182_s23] sm:$0x3] }
  0x11   : > { %231 = vmatpush.bf16.msra.mxu0 %v348_v3  ;;  %v344_v12 = vor.u32 %v359_v8, %v341_v9  ;;  %v198_v15 = vperm.slane %v195_v14, 1  ;;  %v197_v16 = vperm.slane %v195_v14, 0  ;;  %s358_s24 = sshll.u32 %s432_s13, 2 }
  0x12   : > { %244 = vmatpush.bf16.msra.mxu1 %v352_v7  ;;  %s187_s27 = scalar_lea.vmem %s430_s3, %s358_s24 }
  0x15   : > { %232 = vmatpush.bf16.msra.mxu0 %v340_v10 }
  0x16   : > { %245 = vmatpush.bf16.msra.mxu1 %v344_v12 }
  0x18   : > { %353 = vmatmul.msk.bf16.vlgmr.msra.gmra.mxu0 %vm221_vm0, %v190_v13 }
  0x19   : > { %354 = vmatmul.msk.bf16.vlgmr.msra.gmra.mxu1 %vm221_vm0, %v190_v13 }
  0x95   : > { %v234_v17 = vpop.f32.mrf.mxu0 }
  0x96   : > { %v247_v18 = vpop.f32.mrf.mxu1  ;;  %v235_v20 = vadd.f32 %v234_v17, %v197_v16 }
  0x97   : > { %v248_v19 = vadd.f32 %v247_v18, %v198_v15 }
  0x99   : > { %v253_v21 = vrot.slane %v248_v19, 6 }
  0x9b   : > { %v255_v22 = vsel %vm254_vm1, %v235_v20, %v253_v21 }
  0x9c   : > { %259 = vst.msk [vmem:[%s187_s27] sm:$0xf] %vm258_vm3, %v255_v22 }
  0x9d   : > { %v236_v23 = vpop.f32.mrf.mxu0 }
  0x9e   : > { %v249_v24 = vpop.f32.mrf.mxu1 }
  0x9f PF: > { %s13_s12 = sadd.s32 1, %s377_s12  }
  0xa0   : > { %p10_p4 = scmp.ge.s32.totalorder %s13_s12, 4  }
  0xa2   :  { %12 = sbr.rel (!%p10_p4) target bundleno = 1 (0x1), region = 65 }

// kernel: dit_forward.5
= control target key start
LH: loop header
LB: loop body
LE: loop exit
PB: predicated region body
PF: predicated region fallthrough
CT: control target
= control target key end

     0   :  { %s412_s15 = smov 0   ;;  %s480_s0 = inlined_call_operand.vmem [shape: f32[2,64,16], index: 0, kind: input, shape index: {}]   ;;  %s481_s1 = inlined_call_operand.vmem [shape: bf16[16,32], index: 1, kind: input, shape index: {}]   ;;  %s482_s2 = inlined_call_operand.vmem [shape: f32[1,32], index: 2, kind: input, shape index: {}]   ;;  %s483_s3 = inlined_call_operand.vmem [shape: f32[64,32], index: 3, kind: input, shape index: {}]   ;;  %s484_s4 = inlined_call_operand.vmem [shape: f32[2,64,32], index: 4, kind: output, shape index: {}]  }
   0x1 LB: > { %s345_s16 = sadd.s32 4294967295, %s385_s15   ;;  %p349_p0 = scmp.ge.s32.totalorder %s385_s15, 1  ;;  %s385_s15 = sphi %s412_s15, %s14_s15  }
   0x2   : > { %p162_p1 = scmp.lt.s32.totalorder %s385_s15, 3 }
   0x4   : > { %p163_p2 = pnand %p349_p0, %p162_p1 }
   0x5   : > { %p188_p3 = scmp.lt.s32.totalorder (!%p163_p2), %s345_s16, 1 }
   0x6   : > { %166 = sbr.rel (%p163_p2) target bundleno = 164 (0xa4), region = 36 }
   0xb   : > { %v366_v0 = vld [vmem:[%s481_s1] sm:$0xff]  ;;  %s486_s16 = smov (!%p188_p3, %s345_s16), 1  ;;  %vm223_vm0 = vcmask 130048   ;;  %v267_v18 = vld [vmem:[%s483_s3 + $0x10] sm:$0xff]  ;;  %vm281_vm1 = vcmask 261120   ;;  %v266_v28 = vld [vmem:[%s483_s3 + $0x8] sm:$0xff] }
   0xc   : > { %243 = vmatpush.bf16.msra.mxu0 %v366_v0  ;;  %367 = vmatpush.bf16.msra.mxu1 %v366_v0  ;;  %s364_s19 = sshll.u32 %s486_s16, 6  ;;  %v378_v13 = vld [vmem:[%s482_s2] ss:$0 sm:$0xff]  ;;  %v271_v26 = vld [vmem:[%s483_s3 + $0x30] sm:$0xff]  ;;  %v268_v32 = vld [vmem:[%s483_s3 + $0x18] sm:$0xff] }
   0xd   : > { %368 = vmatpush.bf16.msra.mxu2 %v366_v0  ;;  %369 = vmatpush.bf16.msra.mxu3 %v366_v0  ;;  %s192_s22 = scalar_lea.vmem %s480_s0, %s364_s19  ;;  %v265_v15 = vld [vmem:[%s483_s3] sm:$0xff]  ;;  %s441_s5 = scalar_lea.vmem %s484_s4, %s364_s19  ;;  %v270_v39 = vld [vmem:[%s483_s3 + $0x28] sm:$0xff]  ;;  %v272_v42 = vld [vmem:[%s483_s3 + $0x38] sm:$0xff] }
   0xe   : > { %v199_v1 = vld [vmem:[%s192_s22] sm:$0xff]  ;;  %v200_v2 = vld [vmem:[%s192_s22 + $0x8] sm:$0xff]  ;;  %v201_v3 = vld [vmem:[%s192_s22 + $0x10] sm:$0xff] }
   0xf   : > { %v207_v4 = vpack.c.bf16 %v200_v2, %v199_v1  ;;  %v202_v5 = vld [vmem:[%s192_s22 + $0x18] sm:$0xff]  ;;  %v203_v6 = vld [vmem:[%s192_s22 + $0x20] sm:$0xff]  ;;  %v204_v7 = vld [vmem:[%s192_s22 + $0x28] sm:$0xff] }
  0x10   : > { %v208_v8 = vpack.c.bf16 %v202_v5, %v201_v3  ;;  %v209_v9 = vpack.c.bf16 %v204_v7, %v203_v6  ;;  %v205_v10 = vld [vmem:[%s192_s22 + $0x30] sm:$0xff]  ;;  %v206_v11 = vld [vmem:[%s192_s22 + $0x38] sm:$0xff]  ;;  %v269_v23 = vld [vmem:[%s483_s3 + $0x20] sm:$0xff] }
  0x11   : > { %358 = vmatmul.msk.bf16.vlgmr.msra.gmra.mxu0 %vm223_vm0, %v207_v4  ;;  %v210_v12 = vpack.c.bf16 %v206_v11, %v205_v10 }
  0x12   : > { %359 = vmatmul.msk.bf16.vlgmr.msra.gmra.mxu1 %vm223_vm0, %v208_v8  ;;  %360 = vmatmul.msk.bf16.vlgmr.msra.gmra.mxu2 %vm223_vm0, %v209_v9 }
  0x13   : > { %361 = vmatmul.msk.bf16.vlgmr.msra.gmra.mxu3 %vm223_vm0, %v210_v12 }
  0x8e   : > { %v245_v14 = vpop.f32.mrf.mxu0 }
  0x8f   : > { %v246_v16 = vadd.f32 %v378_v13, %v245_v14  ;;  %v250_v17 = vpop.f32.mrf.mxu1 }
  0x90   : > { %v251_v19 = vadd.f32 %v378_v13, %v250_v17 }
  0x91   : > { %v273_v20 = vadd.f32 %v265_v15, %v246_v16 }
  0x92   : > { %v275_v21 = vadd.f32 %v267_v18, %v251_v19 }
  0x93   : > { %282 = vst.msk [vmem:[%s441_s5] sm:$0xff] %vm281_vm1, %v273_v20 }
  0x94   : > { %284 = vst.msk [vmem:[%s441_s5 + $0x10] sm:$0xff] %vm281_vm1, %v275_v21 }
  0x95   : > { %v255_v22 = vpop.f32.mrf.mxu2 }
  0x96   : > { %v256_v24 = vadd.f32 %v378_v13, %v255_v22  ;;  %v260_v25 = vpop.f32.mrf.mxu3  ;;  %v247_v27 = vpop.f32.mrf.mxu0 }
  0x97   : > { %v261_v29 = vadd.f32 %v378_v13, %v260_v25  ;;  %v248_v30 = vadd.f32 %v378_v13, %v247_v27  ;;  %v252_v31 = vpop.f32.mrf.mxu1 }
  0x98   : > { %v277_v33 = vadd.f32 %v269_v23, %v256_v24  ;;  %v253_v34 = vadd.f32 %v378_v13, %v252_v31 }
  0x99   : > { %v279_v35 = vadd.f32 %v271_v26, %v261_v29  ;;  %v274_v36 = vadd.f32 %v266_v28, %v248_v30 }
  0x9a   : > { %286 = vst.msk [vmem:[%s441_s5 + $0x20] sm:$0xff] %vm281_vm1, %v277_v33  ;;  %v276_v37 = vadd.f32 %v268_v32, %v253_v34 }
  0x9b   : > { %288 = vst.msk [vmem:[%s441_s5 + $0x30] sm:$0xff] %vm281_vm1, %v279_v35 }
  0x9c   : > { %283 = vst.msk [vmem:[%s441_s5 + $0x8] sm:$0xff] %vm281_vm1, %v274_v36 }
  0x9d   : > { %285 = vst.msk [vmem:[%s441_s5 + $0x18] sm:$0xff] %vm281_vm1, %v276_v37  ;;  %v257_v38 = vpop.f32.mrf.mxu2 }
  0x9e   : > { %v258_v40 = vadd.f32 %v378_v13, %v257_v38  ;;  %v262_v41 = vpop.f32.mrf.mxu3 }
  0x9f   : > { %v263_v43 = vadd.f32 %v378_v13, %v262_v41 }
  0xa0   : > { %v278_v44 = vadd.f32 %v270_v39, %v258_v40 }
  0xa1   : > { %v280_v45 = vadd.f32 %v272_v42, %v263_v43 }
  0xa2   : > { %287 = vst.msk [vmem:[%s441_s5 + $0x28] sm:$0xff] %vm281_vm1, %v278_v44 }
  0xa3   : > { %289 = vst.msk [vmem:[%s441_s5 + $0x38] sm:$0xff] %vm281_vm1, %v280_v45 }
  0xa4 PF: > { %s14_s15 = sadd.s32 1, %s385_s15  }
  0xa5   : > { %p11_p4 = scmp.ge.s32.totalorder %s14_s15, 4  }
  0xa7   :  { %13 = sbr.rel (!%p11_p4) target bundleno = 1 (0x1), region = 66 }

// kernel: dit_forward.9
= control target key start
LH: loop header
LB: loop body
LE: loop exit
PB: predicated region body
PF: predicated region fallthrough
CT: control target
= control target key end

     0   :  { %s743_s21 = smov 0   ;;  %s979_s0 = inlined_call_operand.vmem [shape: f32[2,64,32], index: 0, kind: input, shape index: {}]   ;;  %s980_s1 = inlined_call_operand.vmem [shape: f32[2,1,32], index: 1, kind: input, shape index: {}]   ;;  %s981_s2 = inlined_call_operand.vmem [shape: bf16[32,64], index: 2, kind: input, shape index: {}]   ;;  %s982_s3 = inlined_call_operand.vmem [shape: f32[1,64], index: 3, kind: input, shape index: {}]   ;;  %s983_s4 = inlined_call_operand.vmem [shape: bf16[16,32], index: 4, kind: input, shape index: {}]   ;;  %s984_s5 = inlined_call_operand.vmem [shape: f32[16,1], index: 5, kind: input, shape index: {}]   ;;  %s985_s6 = inlined_call_operand.vmem [shape: f32[2,16,64], index: 6, kind: output, shape index: {}]  }
   0x1 LB: > { %s636_s22 = sadd.s32 4294967295, %s703_s21   ;;  %p640_p0 = scmp.ge.s32.totalorder %s703_s21, 1  ;;  %s703_s21 = sphi %s743_s21, %s16_s21  }
   0x2   : > { %p220_p1 = scmp.lt.s32.totalorder %s703_s21, 3 }
   0x4   : > { %p221_p2 = pnand %p640_p0, %p220_p1 }
   0x5   : > { %p253_p3 = scmp.lt.s32.totalorder (!%p221_p2), %s636_s22, 1  ;;  %s706_s12 = smov (!%p221_p2), 96  }
   0x6   : > { %224 = sbr.rel (%p221_p2) target bundleno = 465 (0x1d1), region = 44 }
   0xb   : > { %v664_v0 = vld [vmem:[%s981_s2 + $0x8] sm:$0xff]  ;;  %s995_s22 = smov (!%p253_p3, %s636_s22), 1  ;;  %v663_v1 = vld [vmem:[%s981_s2] sm:$0xff]  ;;  %vm294_vm0 = vcmask 261120   ;;  %v705_v20 = vmov 32.0  }
   0xc   : > { %304 = vmatpush.bf16.msra.mxu0 %v664_v0  ;;  %s661_s27 = sshll.u32 %s995_s22, 6  ;;  %s260_s30 = scalar_lea.vmem %s980_s1, %s995_s22  ;;  %679 = vrcp.f32 %v705_v20 }
   0xd   : > { %s257_s9 = scalar_lea.vmem %s979_s0, %s661_s27  ;;  %v275_v2 = vld [vmem:[%s260_s30] sm:$0x1]  ;;  %s662_s19 = sshll.u32 %s995_s22, 4 }
   0xe   : > { %v273_v3 = vld [vmem:[%s257_s9 + $0x30] sm:$0xff]  ;;  %v271_v4 = vld [vmem:[%s257_s9 + $0x20] sm:$0xff]  ;;  %v276_v6 = vpack.c.bf16 %v275_v2, %v275_v2  ;;  %v274_v10 = vld [vmem:[%s257_s9 + $0x38] sm:$0xff]  ;;  %s265_s24 = scalar_lea.vmem %s985_s6, %s662_s19 }
   0xf   : > { %v269_v5 = vld [vmem:[%s257_s9 + $0x10] sm:$0xff]  ;;  %v329_v7 = vsel %vm294_vm0, %v273_v3, 0.0  ;;  %v323_v8 = vsel %vm294_vm0, %v271_v4, 0.0  ;;  %v272_v11 = vld [vmem:[%s257_s9 + $0x28] sm:$0xff]  ;;  %v270_v12 = vld [vmem:[%s257_s9 + $0x18] sm:$0xff]  ;;  %v332_v13 = vsel %vm294_vm0, %v274_v10, 0.0 }
  0x10   : > { %305 = vmatpush.bf16.msra.mxu0 %v663_v1  ;;  %v317_v9 = vsel %vm294_vm0, %v269_v5, 0.0  ;;  %330 = vadd.xlane.f32.xlu0 %v329_v7  ;;  %v326_v14 = vsel %vm294_vm0, %v272_v11, 0.0  ;;  %v320_v15 = vsel %vm294_vm0, %v270_v12, 0.0  ;;  %v267_v16 = vld [vmem:[%s257_s9] sm:$0xff]  ;;  %v268_v17 = vld [vmem:[%s257_s9 + $0x8] sm:$0xff] }
  0x11   : > { %324 = vadd.xlane.f32.xlu1 %v323_v8  ;;  %318 = vadd.xlane.f32.xlu2 %v317_v9  ;;  %v311_v18 = vsel %vm294_vm0, %v267_v16, 0.0  ;;  %v314_v19 = vsel %vm294_vm0, %v268_v17, 0.0 }
  0x12   : > { %v680_v21 = vpop.eup %679 }
  0x13   : > { %653 = vmatmul.msk.bf16.vlgmr.msra.gmra.mxu0 %vm294_vm0, %v276_v6  ;;  %v336_v22 = vmul.f32 32.0, %v680_v21  ;;  %vm340_vm1 = vweird.f32 %v680_v21 }
  0x15   : > { %v337_v23 = vsub.f32 1.0, %v336_v22 }
  0x17   : > { %v338_v24 = vmul.f32 %v680_v21, %v337_v23 }
  0x18   : > { %333 = vadd.xlane.f32.xlu0 %v332_v13 }
  0x19   : > { %327 = vadd.xlane.f32.xlu1 %v326_v14  ;;  %321 = vadd.xlane.f32.xlu2 %v320_v15  ;;  %v339_v25 = vadd.f32 %v680_v21, %v338_v24 }
  0x1b   : > { %v776_v26 = vsel %vm340_vm1, %v680_v21, %v339_v25 }
  0x20   : > { %312 = vadd.xlane.f32.xlu0 %v311_v18 }
  0x21   : > { %315 = vadd.xlane.f32.xlu1 %v314_v19 }
  0x83   : > { %v331_v27 = vpop.xlane.xlu0 %330 }
  0x84   : > { %v325_v28 = vpop.xlane.xlu1 %324  ;;  %v348_v29 = vmul.f32 %v776_v26, %v331_v27  ;;  %v319_v31 = vpop.xlane.xlu2 %318 }
  0x85   : > { %v346_v30 = vmul.f32 %v776_v26, %v325_v28  ;;  %v344_v44 = vmul.f32 %v776_v26, %v319_v31 }
  0x86   : > { %v780_v32 = vsub.f32 %v273_v3, %v348_v29 }
  0x87   : > { %v782_v33 = vsub.f32 %v271_v4, %v346_v30  ;;  %v806_v52 = vsub.f32 %v269_v5, %v344_v44  ;;  %v281_v4 = vld [vmem:[%s982_s3] sm:$0x1] }
  0x88   : > { %v364_v34 = vmul.f32 %v780_v32, %v780_v32 }
  0x89   : > { %v362_v35 = vmul.f32 %v782_v33, %v782_v33  ;;  %v360_v61 = vmul.f32 %v806_v52, %v806_v52 }
  0x8a   : > { %v384_v36 = vsel %vm294_vm0, %v364_v34, 0.0 }
  0x8b   : > { %v378_v37 = vsel %vm294_vm0, %v362_v35, 0.0  ;;  %v334_v38 = vpop.xlane.xlu0 %333  ;;  %385 = vadd.xlane.f32.xlu2 %v384_v36  ;;  %v372_v1 = vsel %vm294_vm0, %v360_v61, 0.0 }
  0x8c   : > { %v328_v39 = vpop.xlane.xlu1 %327  ;;  %379 = vadd.xlane.f32.xlu1 %v378_v37  ;;  %v349_v40 = vmul.f32 %v776_v26, %v334_v38  ;;  %v322_v42 = vpop.xlane.xlu2 %321 }
  0x8d   : > { %v347_v41 = vmul.f32 %v776_v26, %v328_v39  ;;  %v345_v43 = vmul.f32 %v776_v26, %v322_v42 }
  0x8e   : > { %v794_v45 = vsub.f32 %v274_v10, %v349_v40 }
  0x8f   : > { %v796_v46 = vsub.f32 %v272_v11, %v347_v41  ;;  %v798_v48 = vsub.f32 %v270_v12, %v345_v43 }
  0x90   : > { %v307_v47 = vpop.f32.mrf.mxu0  ;;  %v365_v50 = vmul.f32 %v794_v45, %v794_v45 }
  0x91   : > { %v363_v49 = vmul.f32 %v796_v46, %v796_v46  ;;  %v361_v51 = vmul.f32 %v798_v48, %v798_v48  ;;  %v829_v6 = vadd.f32 %v307_v47, %v281_v4 }
  0x92   : > { %v387_v54 = vsel %vm294_vm0, %v365_v50, 0.0 }
  0x93   : > { %v381_v53 = vsel %vm294_vm0, %v363_v49, 0.0  ;;  %v375_v55 = vsel %vm294_vm0, %v361_v51, 0.0  ;;  %388 = vadd.xlane.f32.xlu0 %v387_v54  ;;  %v313_v56 = vpop.xlane.xlu0 %312  ;;  %v494_v7 = vadd.f32 1.0, %v829_v6 }
  0x94   : > { %382 = vadd.xlane.f32.xlu2 %v381_v53  ;;  %v316_v57 = vpop.xlane.xlu1 %315  ;;  %376 = vadd.xlane.f32.xlu1 %v375_v55  ;;  %v342_v58 = vmul.f32 %v776_v26, %v313_v56 }
  0x95   : > { %v343_v59 = vmul.f32 %v776_v26, %v316_v57  ;;  %v495_v8 = vperm.slane %v494_v7, 0 }
  0x96   : > { %v813_v60 = vsub.f32 %v267_v16, %v342_v58 }
  0x97   : > { %v817_v63 = vsub.f32 %v268_v17, %v343_v59 }
  0x98   : > { %v309_v62 = vpop.f32.mrf.mxu0  ;;  %v358_v0 = vmul.f32 %v813_v60, %v813_v60 }
  0x99   : > { %v359_v3 = vmul.f32 %v817_v63, %v817_v63 }
  0x9a   : > { %v366_v2 = vsel %vm294_vm0, %v358_v0, 0.0 }
  0x9b   : > { %373 = vadd.xlane.f32.xlu0 %v372_v1  ;;  %v369_v5 = vsel %vm294_vm0, %v359_v3, 0.0 }
  0x9c   : > { %367 = vadd.xlane.f32.xlu2 %v366_v2 }
  0xa3   : > { %370 = vadd.xlane.f32.xlu0 %v369_v5 }
  0xad   : > { %497 = vrot.lane.b32.xlu1 %v495_v8, %s706_s12 }
  0xfe   : > { %v386_v9 = vpop.xlane.xlu2 %385 }
  0xff   : > { %v380_v10 = vpop.xlane.xlu1 %379  ;;  %v396_v11 = vmul.f32 %v386_v9, %v776_v26 }
 0x100   : > { %v394_v12 = vmul.f32 %v380_v10, %v776_v26 }
 0x101   : > { %v404_v13 = vadd.f32 1e-05, %v396_v11 }
 0x102   : > { %v834_v14 = vadd.f32 1e-05, %v394_v12 }
 0x103   : > { %681 = vrsqrt.f32 %v404_v13  ;;  %vm472_vm2 = vweird.f32 %v404_v13 }
 0x104   : > { %683 = vrsqrt.f32 %v834_v14  ;;  %vm452_vm9 = vweird.f32 %v834_v14 }
 0x106   : > { %v389_v16 = vpop.xlane.xlu0 %388 }
 0x107   : > { %v383_v15 = vpop.xlane.xlu2 %382  ;;  %v377_v18 = vpop.xlane.xlu1 %376  ;;  %v397_v19 = vmul.f32 %v389_v16, %v776_v26 }
 0x108   : > { %v395_v17 = vmul.f32 %v383_v15, %v776_v26  ;;  %v393_v20 = vmul.f32 %v377_v18, %v776_v26 }
 0x109   : > { %v840_v21 = vpop.eup %681  ;;  %v842_v23 = vadd.f32 1e-05, %v397_v19 }
 0x10a   : > { %v403_v22 = vadd.f32 1e-05, %v395_v17  ;;  %v844_v24 = vpop.eup %683  ;;  %v467_v25 = vmul.f32 %v840_v21, %v404_v13  ;;  %v847_v27 = vadd.f32 1e-05, %v393_v20  ;;  %vm473_vm3 = vweird.f32 %v840_v21 }
 0x10b   : > { %v447_v28 = vmul.f32 %v844_v24, %v834_v14  ;;  %vm453_vm6 = vweird.f32 %v844_v24  ;;  %vm878_vm7 = vmor %vm472_vm2, %vm473_vm3  ;;  %vm482_vm12 = vweird.f32 %v842_v23 }
 0x10c   : > { %685 = vrsqrt.f32 %v403_v22  ;;  %v468_v29 = vmul.f32 %v840_v21, %v467_v25  ;;  %vm462_vm4 = vweird.f32 %v403_v22  ;;  %vm894_vm11 = vmor %vm452_vm9, %vm453_vm6  ;;  %v912_v25 = vperm.slane %v829_v6, 0 }
 0x10d   : > { %687 = vrsqrt.f32 %v847_v27  ;;  %v448_v30 = vmul.f32 %v844_v24, %v447_v28  ;;  %vm442_vm14 = vweird.f32 %v847_v27 }
 0x10e   : > { %689 = vrsqrt.f32 %v842_v23  ;;  %v374_v34 = vpop.xlane.xlu0 %373  ;;  %v469_v35 = vmul.f32 0.5, %v468_v29 }
 0x10f   : > { %v368_v31 = vpop.xlane.xlu2 %367  ;;  %v392_v37 = vmul.f32 %v374_v34, %v776_v26  ;;  %v449_v39 = vmul.f32 0.5, %v448_v30 }
 0x110   : > { %v390_v36 = vmul.f32 %v368_v31, %v776_v26  ;;  %v470_v47 = vsub.f32 1.5, %v469_v35 }
 0x111   : > { %v859_v41 = vadd.f32 1e-05, %v392_v37  ;;  %v450_v53 = vsub.f32 1.5, %v449_v39 }
 0x112   : > { %v686_v38 = vpop.eup %685  ;;  %v857_v40 = vadd.f32 1e-05, %v390_v36  ;;  %v471_v58 = vmul.f32 %v840_v21, %v470_v47 }
 0x113   : > { %v861_v42 = vpop.eup %687  ;;  %v457_v43 = vmul.f32 %v686_v38, %v403_v22  ;;  %vm463_vm5 = vweird.f32 %v686_v38  ;;  %v451_v1 = vmul.f32 %v844_v24, %v450_v53  ;;  %vm432_vm3 = vweird.f32 %v859_v41 }
 0x114   : > { %v690_v44 = vpop.eup %689  ;;  %v437_v49 = vmul.f32 %v861_v42, %v847_v27  ;;  %691 = vrsqrt.f32 %v857_v40  ;;  %vm886_vm10 = vmor %vm462_vm4, %vm463_vm5  ;;  %v475_v10 = vsel %vm878_vm7, %v840_v21, %v471_v58  ;;  %vm443_vm15 = vweird.f32 %v861_v42 }
 0x115   : > { %v458_v50 = vmul.f32 %v686_v38, %v457_v43  ;;  %v477_v51 = vmul.f32 %v690_v44, %v842_v23  ;;  %693 = vrsqrt.f32 %v859_v41  ;;  %vm483_vm8 = vweird.f32 %v690_v44  ;;  %vm927_vm2 = vmor %vm442_vm14, %vm443_vm15 }
 0x116   : > { %v438_v54 = vmul.f32 %v861_v42, %v437_v49  ;;  %v371_v57 = vpop.xlane.xlu0 %370  ;;  %v455_v15 = vsel %vm894_vm11, %v844_v24, %v451_v1  ;;  %vm484_vm13 = vmor %vm482_vm12, %vm483_vm8  ;;  %v492_v20 = vmul.f32 %v475_v10, %v780_v32  ;;  %vm412_vm4 = vweird.f32 %v857_v40 }
 0x117   : > { %v459_v55 = vmul.f32 0.5, %v458_v50  ;;  %v478_v56 = vmul.f32 %v690_v44, %v477_v51  ;;  %v391_v59 = vmul.f32 %v371_v57, %v776_v26  ;;  %v490_v31 = vmul.f32 %v455_v15, %v782_v33 }
 0x118   : > { %v439_v2 = vmul.f32 0.5, %v438_v54  ;;  %v524_v54 = vld [vmem:[%s984_s5 + $0x8] sm:$0xff]  ;;  %v707_v57 = vmov 0   ;;  %vm569_vm11 = vcmask 523264  }
 0x119   : > { %v460_v61 = vsub.f32 1.5, %v459_v55  ;;  %v479_v62 = vmul.f32 0.5, %v478_v56  ;;  %v876_v3 = vadd.f32 1e-05, %v391_v59  ;;  %v523_v55 = vld [vmem:[%s984_s5] sm:$0xff]  ;;  %678 = vset.pattern.permute.xlu0 %v707_v57  ;;  %677 = vset.pattern.permute.xlu2 %v707_v57 }
 0x11a   : > { %v872_v0 = vpop.eup %691  ;;  %v440_v16 = vsub.f32 1.5, %v439_v2  ;;  %532 = vperm.xlu0 %678, %v524_v54   ;;  %527 = vperm.xlu2 %677, %v523_v55  }
 0x11b   : > { %v461_v5 = vmul.f32 %v686_v38, %v460_v61  ;;  %v480_v7 = vsub.f32 1.5, %v479_v62  ;;  %v407_v26 = vmul.f32 %v872_v0, %v857_v40  ;;  %v694_v8 = vpop.eup %693  ;;  %695 = vrsqrt.f32 %v876_v3 }
 0x11c   : > { %v427_v14 = vmul.f32 %v694_v8, %v859_v41  ;;  %v441_v30 = vmul.f32 %v861_v42, %v440_v16  ;;  %vm433_vm1 = vweird.f32 %v694_v8  ;;  %vm413_vm5 = vweird.f32 %v872_v0 }
 0x11d   : > { %v465_v12 = vsel %vm886_vm10, %v686_v38, %v461_v5  ;;  %v481_v13 = vmul.f32 %v690_v44, %v480_v7  ;;  %v408_v17 = vmul.f32 %v872_v0, %v407_v26  ;;  %vm434_vm6 = vmor %vm432_vm3, %vm433_vm1  ;;  %vm422_vm7 = vweird.f32 %v876_v3 }
 0x11e   : > { %v428_v18 = vmul.f32 %v694_v8, %v427_v14  ;;  %v491_v23 = vmul.f32 %v465_v12, %v796_v46  ;;  %vm414_vm9 = vmor %vm412_vm4, %vm413_vm5 }
 0x11f   : > { %v485_v19 = vsel %vm484_vm13, %v690_v44, %v481_v13  ;;  %v907_v21 = vpop.permute.xlu1 %497  ;;  %v445_v44 = vsel %vm927_vm2, %v861_v42, %v441_v30 }
 0x120   : > { %v493_v22 = vmul.f32 %v485_v19, %v794_v45  ;;  %v429_v24 = vmul.f32 0.5, %v428_v18  ;;  %v506_v28 = vmul.f32 %v907_v21, %v492_v20  ;;  %v409_v45 = vmul.f32 0.5, %v408_v17 }
 0x121   : > { %v696_v29 = vpop.eup %695  ;;  %v504_v36 = vmul.f32 %v907_v21, %v490_v31  ;;  %v505_v37 = vmul.f32 %v907_v21, %v491_v23  ;;  %v489_v56 = vmul.f32 %v445_v44, %v798_v48 }
 0x122   : > { %v507_v32 = vmul.f32 %v907_v21, %v493_v22  ;;  %v430_v34 = vsub.f32 1.5, %v429_v24  ;;  %v417_v46 = vmul.f32 %v696_v29, %v876_v3  ;;  %v515_v6 = vadd.f32 %v912_v25, %v506_v28 }
 0x123   : > { %v410_v47 = vsub.f32 1.5, %v409_v45  ;;  %v513_v51 = vadd.f32 %v912_v25, %v504_v36  ;;  %v514_v41 = vadd.f32 %v912_v25, %v505_v37  ;;  %vm423_vm8 = vweird.f32 %v696_v29 }
 0x124   : > { %v516_v35 = vadd.f32 %v912_v25, %v507_v32  ;;  %v431_v33 = vmul.f32 %v694_v8, %v430_v34  ;;  %v418_v39 = vmul.f32 %v696_v29, %v417_v46  ;;  %vm424_vm10 = vmor %vm422_vm7, %vm423_vm8  ;;  %v503_v48 = vmul.f32 %v907_v21, %v489_v56 }
 0x125   : > { %v521_v59 = vpack.c.bf16 %v514_v41, %v513_v51 }
 0x126   : > { %v522_v43 = vpack.c.bf16 %v516_v35, %v515_v6  ;;  %v435_v27 = vsel %vm434_vm6, %v694_v8, %v431_v33  ;;  %v419_v49 = vmul.f32 0.5, %v418_v39  ;;  %v512_v40 = vadd.f32 %v912_v25, %v503_v48 }
 0x127   : > { %v488_v53 = vmul.f32 %v435_v27, %v806_v52  ;;  %v411_v52 = vmul.f32 %v872_v0, %v410_v47  ;;  %v550_v2 = vsel %vm294_vm0, %v521_v59, 0 }
 0x128   : > { %v553_v50 = vsel %vm294_vm0, %v522_v43, 0  ;;  %v420_v42 = vsub.f32 1.5, %v419_v49 }
 0x129   : > { %559 = vmatpush.bf16.xpose.msra.mxu1 %v553_v50  ;;  %v502_v61 = vmul.f32 %v907_v21, %v488_v53  ;;  %v415_v1 = vsel %vm414_vm9, %v872_v0, %v411_v52 }
 0x12a   : > { %v421_v58 = vmul.f32 %v696_v29, %v420_v42  ;;  %v486_v5 = vmul.f32 %v415_v1, %v813_v60  ;;  %v665_v60 = vld [vmem:[%s983_s4] sm:$0xff] }
 0x12b   : > { %v511_v3 = vadd.f32 %v912_v25, %v502_v61 }
 0x12c   : > { %v425_v62 = vsel %vm424_vm10, %v696_v29, %v421_v58  ;;  %v500_v8 = vmul.f32 %v907_v21, %v486_v5 }
 0x12d   : > { %v487_v4 = vmul.f32 %v425_v62, %v817_v63  ;;  %v520_v7 = vpack.c.bf16 %v512_v40, %v511_v3 }
 0x12e   : > { %v509_v10 = vadd.f32 %v912_v25, %v500_v8 }
 0x12f   : > { %v501_v26 = vmul.f32 %v907_v21, %v487_v4  ;;  %v547_v9 = vsel %vm294_vm0, %v520_v7, 0 }
 0x131   : > { %560 = vmatpush.bf16.xpose.msra.mxu1 %v550_v2  ;;  %v510_v0 = vadd.f32 %v912_v25, %v501_v26 }
 0x133   : > { %v519_v11 = vpack.c.bf16 %v510_v0, %v509_v10 }
 0x135   : > { %v544_v63 = vsel %vm294_vm0, %v519_v11, 0 }
 0x139   : > { %561 = vmatpush.bf16.xpose.msra.mxu1 %v547_v9 }
 0x141   : > { %562 = vmatpush.bf16.xpose.msra.mxu1 %v544_v63 }
 0x148   : > { %658 = vmatmul.msk.bf16.vlgmr.msra.gmra.mxu1 %vm294_vm0, %v665_v60 }
 0x174   : > { %v528_v12 = vpop.permute.xlu2 %527 }
 0x18c   : > { %v533_v15 = vpop.permute.xlu0 %532 }
 0x1c5   : > { %v564_v13 = vpop.f32.mrf.mxu1 }
 0x1c6   : > { %v565_v14 = vadd.f32 %v564_v13, %v528_v12 }
 0x1c8   : > { %570 = vst.msk [vmem:[%s265_s24] sm:$0xff] %vm569_vm11, %v565_v14 }
 0x1cd   : > { %v566_v16 = vpop.f32.mrf.mxu1 }
 0x1ce   : > { %v567_v17 = vadd.f32 %v566_v16, %v533_v15 }
 0x1d0   : > { %571 = vst.msk [vmem:[%s265_s24 + $0x8] sm:$0xff] %vm569_vm11, %v567_v17 }
 0x1d1 PF: > { %s16_s21 = sadd.s32 1, %s703_s21  }
 0x1d2   : > { %p13_p4 = scmp.ge.s32.totalorder %s16_s21, 4  }
 0x1d4   :  { %15 = sbr.rel (!%p13_p4) target bundleno = 1 (0x1), region = 77 }

// kernel: dit_forward.8
= control target key start
LH: loop header
LB: loop body
LE: loop exit
PB: predicated region body
PF: predicated region fallthrough
CT: control target
= control target key end

     0   :  { %s6284_s13 = smov 0   ;;  %s10210_s0 = inlined_call_operand.vmem [shape: f32[2,64,32], index: 0, kind: input, shape index: {}]   ;;  %s10211_s1 = inlined_call_operand.vmem [shape: f32[2,2,6,32], index: 1, kind: input, shape index: {}]   ;;  %s10212_s2 = inlined_call_operand.vmem [shape: bf16[2,32,96], index: 2, kind: input, shape index: {}]   ;;  %s10213_s3 = inlined_call_operand.vmem [shape: f32[2,1,96], index: 3, kind: input, shape index: {}]   ;;  %s10214_s4 = inlined_call_operand.vmem [shape: bf16[2,32,32], index: 4, kind: input, shape index: {}]   ;;  %s10215_s5 = inlined_call_operand.vmem [shape: f32[2,1,32], index: 5, kind: input, shape index: {}]   ;;  %s10216_s6 = inlined_call_operand.vmem [shape: bf16[2,32,128], index: 6, kind: input, shape index: {}]   ;;  %s10217_s7 = inlined_call_operand.vmem [shape: f32[2,1,128], index: 7, kind: input, shape index: {}]   ;;  %s10218_s8 = inlined_call_operand.vmem [shape: bf16[2,128,32], index: 8, kind: input, shape index: {}]   ;;  %s10219_s9 = inlined_call_operand.vmem [shape: f32[2,1,32], index: 9, kind: input, shape index: {}]   ;;  %s10220_s10 = inlined_call_operand.vmem [shape: f32[2,64,32], index: 10, kind: output, shape index: {}]  }
   0x1   :  { %10309 = sst [smem:[#allocation55_spill]] %s10211_s1 }
   0x2   :  { %10310 = sst [smem:[#allocation56_spill]] %s10212_s2 }
   0x3   :  { %10311 = sst [smem:[#allocation57_spill]] %s10214_s4 }
   0x4 LB: > { %s5391_s14 = sadd.s32 4294967295, %s6218_s13   ;;  %p5394_p0 = scmp.ge.s32.totalorder %s6218_s13, 1  ;;  %s6218_s13 = sphi %s6284_s13, %s20_s13  }
   0x5   : > { %p379_p1 = scmp.lt.s32.totalorder %s6218_s13, 3 }
   0x7   : > { %p380_p2 = pnand %p5394_p0, %p379_p1 }
   0x9   : > { %383 = sbr.rel (%p380_p2) target bundleno = 2697 (0xa89), region = 60 }
   0xe   : > { %p444_p3 = scmp.lt.s32.totalorder %s5391_s14, 1  ;;  %s10312_s1 = sld [smem:[#allocation55_spill]] }
   0xf   : > { %s10313_s2 = sld [smem:[#allocation56_spill]]  ;;  %p5405_p4 = scmp.ne.s32.totalorder %s5391_s14, 0 }
  0x10   : > { %s6292_s15 = scalar_select %p444_p3, %s5391_s14, 1 }
  0x11   : > { %s10314_s4 = sld [smem:[#allocation57_spill]] }
  0x12   : > { %s5552_s16 = sshll.u32 %s6292_s15, 4  ;;  %s464_s11 = scalar_lea.vmem %s10215_s5, %s6292_s15 }
  0x13   : > { %s6321_s18 = scalar_lea.vmem %s10216_s6, %s5552_s16  ;;  %s472_s23 = scalar_lea.vmem %s10217_s7, %s6292_s15 }
  0x14   : > { %s6302_s22 = scalar_lea.vmem %s10312_s1, %s5552_s16  ;;  %s5556_s24 = sshll.u32 %s6292_s15, 6 }
  0x15   : > { %s6307_s25 = scalar_lea.vmem %s10313_s2, %s5552_s16  ;;  %s480_s26 = scalar_lea.vmem %s10219_s9, %s6292_s15 }
  0x16   : > { %485 = sbr.rel (%p5405_p4) target bundleno = 44 (0x2c), region = 64 }
  0x17   : > { %s6312_s28 = scalar_lea.vmem %s10314_s4, %s5552_s16  ;;  %s6335_s4 = scalar_lea.vmem %s10218_s8, %s5556_s24 }
  0x1b   : > { %v486_v0 = vld [vmem:[%s10210_s0] sm:$0xff]  ;;  %vm502_vm0 = vcmask 261120   ;;  %v487_v1 = vld [vmem:[%s10210_s0 + $0x8] sm:$0xff]  ;;  %v488_v2 = vld [vmem:[%s10210_s0 + $0x10] sm:$0xff] }
  0x1c   : > { %503 = vst.msk [vmem:[%s10220_s10] sm:$0xff] %vm502_vm0, %v486_v0  ;;  %v489_v3 = vld [vmem:[%s10210_s0 + $0x18] sm:$0xff]  ;;  %v490_v4 = vld [vmem:[%s10210_s0 + $0x20] sm:$0xff]  ;;  %v491_v5 = vld [vmem:[%s10210_s0 + $0x28] sm:$0xff] }
  0x1d   : > { %504 = vst.msk [vmem:[%s10220_s10 + $0x8] sm:$0xff] %vm502_vm0, %v487_v1  ;;  %v492_v6 = vld [vmem:[%s10210_s0 + $0x30] sm:$0xff]  ;;  %v493_v7 = vld [vmem:[%s10210_s0 + $0x38] sm:$0xff]  ;;  %v494_v8 = vld [vmem:[%s10210_s0 + $0x40] sm:$0xff] }
  0x1e   : > { %505 = vst.msk [vmem:[%s10220_s10 + $0x10] sm:$0xff] %vm502_vm0, %v488_v2  ;;  %v495_v9 = vld [vmem:[%s10210_s0 + $0x48] sm:$0xff]  ;;  %v496_v10 = vld [vmem:[%s10210_s0 + $0x50] sm:$0xff]  ;;  %v497_v11 = vld [vmem:[%s10210_s0 + $0x58] sm:$0xff] }
  0x1f   : > { %506 = vst.msk [vmem:[%s10220_s10 + $0x18] sm:$0xff] %vm502_vm0, %v489_v3  ;;  %v498_v12 = vld [vmem:[%s10210_s0 + $0x60] sm:$0xff]  ;;  %v499_v13 = vld [vmem:[%s10210_s0 + $0x68] sm:$0xff]  ;;  %v500_v14 = vld [vmem:[%s10210_s0 + $0x70] sm:$0xff] }
  0x20   : > { %507 = vst.msk [vmem:[%s10220_s10 + $0x20] sm:$0xff] %vm502_vm0, %v490_v4  ;;  %v501_v15 = vld [vmem:[%s10210_s0 + $0x78] sm:$0xff] }
  0x21   : > { %508 = vst.msk [vmem:[%s10220_s10 + $0x28] sm:$0xff] %vm502_vm0, %v491_v5 }
  0x22   : > { %509 = vst.msk [vmem:[%s10220_s10 + $0x30] sm:$0xff] %vm502_vm0, %v492_v6 }
  0x23   : > { %510 = vst.msk [vmem:[%s10220_s10 + $0x38] sm:$0xff] %vm502_vm0, %v493_v7 }
  0x24   : > { %511 = vst.msk [vmem:[%s10220_s10 + $0x40] sm:$0xff] %vm502_vm0, %v494_v8 }
  0x25   : > { %512 = vst.msk [vmem:[%s10220_s10 + $0x48] sm:$0xff] %vm502_vm0, %v495_v9 }
  0x26   : > { %513 = vst.msk [vmem:[%s10220_s10 + $0x50] sm:$0xff] %vm502_vm0, %v496_v10 }
  0x27   : > { %514 = vst.msk [vmem:[%s10220_s10 + $0x58] sm:$0xff] %vm502_vm0, %v497_v11 }
  0x28   : > { %515 = vst.msk [vmem:[%s10220_s10 + $0x60] sm:$0xff] %vm502_vm0, %v498_v12 }
  0x29   : > { %516 = vst.msk [vmem:[%s10220_s10 + $0x68] sm:$0xff] %vm502_vm0, %v499_v13 }
  0x2a   : > { %517 = vst.msk [vmem:[%s10220_s10 + $0x70] sm:$0xff] %vm502_vm0, %v500_v14 }
  0x2b   : > { %518 = vst.msk [vmem:[%s10220_s10 + $0x78] sm:$0xff] %vm502_vm0, %v501_v15 }
  0x2c PF: > { %v6452_v16 = vld [vmem:[%s10220_s10 + $0x10] sm:$0xff]  ;;  %vm10301_vm1 = vcmask 261120   ;;  %v519_v17 = vld [vmem:[%s10220_s10] sm:$0xff]  ;;  %v522_v22 = vld [vmem:[%s10220_s10 + $0x18] sm:$0xff]  ;;  %v6220_v42 = vmov 32.0   ;;  %s10332_s1 = scalar_lea.vmem %s10213_s3, %s6292_s15  ;;  %s6221_s2 = smov 112  }
  0x2d   : > { %v544_v18 = vsel %vm10301_vm1, %v6452_v16, 0.0  ;;  %v538_v19 = vsel %vm10301_vm1, %v519_v17, 0.0  ;;  %v6463_v20 = vld [vmem:[%s10220_s10 + $0x20] sm:$0xff]  ;;  %v520_v23 = vld [vmem:[%s10220_s10 + $0x8] sm:$0xff]  ;;  %v547_v25 = vsel %vm10301_vm1, %v522_v22, 0.0  ;;  %v526_v28 = vld [vmem:[%s10220_s10 + $0x38] sm:$0xff]  ;;  %5838 = vrcp.f32 %v6220_v42 }
  0x2e   : > { %545 = vadd.xlane.f32.xlu1 %v544_v18  ;;  %539 = vadd.xlane.f32.xlu0 %v538_v19  ;;  %v550_v21 = vsel %vm10301_vm1, %v6463_v20, 0.0  ;;  %v6476_v24 = vld [vmem:[%s10220_s10 + $0x28] sm:$0xff]  ;;  %v541_v26 = vsel %vm10301_vm1, %v520_v23, 0.0  ;;  %v6493_v30 = vld [vmem:[%s10220_s10 + $0x30] sm:$0xff]  ;;  %v559_v31 = vsel %vm10301_vm1, %v526_v28, 0.0  ;;  %v6503_v34 = vld [vmem:[%s10220_s10 + $0x58] sm:$0xff] }
  0x2f   : > { %551 = vadd.xlane.f32.xlu2 %v550_v21  ;;  %v553_v27 = vsel %vm10301_vm1, %v6476_v24, 0.0  ;;  %v556_v33 = vsel %vm10301_vm1, %v6493_v30, 0.0  ;;  %v6508_v35 = vld [vmem:[%s10220_s10 + $0x48] sm:$0xff]  ;;  %v6513_v36 = vld [vmem:[%s10220_s10 + $0x50] sm:$0xff]  ;;  %v571_v37 = vsel %vm10301_vm1, %v6503_v34, 0.0  ;;  %v6542_v62 = vld [vmem:[%s10220_s10 + $0x60] sm:$0xff] }
  0x30   : > { %v6488_v29 = vld [vmem:[%s10220_s10 + $0x68] sm:$0xff]  ;;  %v565_v38 = vsel %vm10301_vm1, %v6508_v35, 0.0  ;;  %v568_v39 = vsel %vm10301_vm1, %v6513_v36, 0.0  ;;  %v574_v2 = vsel %vm10301_vm1, %v6542_v62, 0.0  ;;  %s6222_s14 = smov 104   ;;  %s6223_s19 = smov 120  }
  0x31   : > { %v577_v32 = vsel %vm10301_vm1, %v6488_v29, 0.0  ;;  %v6524_v40 = vld [vmem:[%s10220_s10 + $0x70] sm:$0xff]  ;;  %s6224_s21 = smov 96   ;;  %s6225_s24 = smov 64  }
  0x32   : > { %v580_v41 = vsel %vm10301_vm1, %v6524_v40, 0.0  ;;  %v6564_v10 = vld [vmem:[%s10220_s10 + $0x78] sm:$0xff]  ;;  %s6226_s27 = smov 16   ;;  %s6227_s29 = smov 8  }
  0x33   : > { %v5839_v43 = vpop.eup %5838  ;;  %v583_v14 = vsel %vm10301_vm1, %v6564_v10, 0.0  ;;  %s6228_s30 = smov 24  }
  0x34   : > { %v587_v44 = vmul.f32 32.0, %v5839_v43  ;;  %vm591_vm2 = vweird.f32 %v5839_v43 }
  0x36   : > { %548 = vadd.xlane.f32.xlu1 %v547_v25  ;;  %542 = vadd.xlane.f32.xlu0 %v541_v26  ;;  %v588_v45 = vsub.f32 1.0, %v587_v44  ;;  %v6585_v25 = vld [vmem:[%s10220_s10 + $0x40] sm:$0xff] }
  0x37   : > { %554 = vadd.xlane.f32.xlu2 %v553_v27 }
  0x38   : > { %v589_v46 = vmul.f32 %v5839_v43, %v588_v45 }
  0x3a   : > { %v590_v47 = vadd.f32 %v5839_v43, %v589_v46 }
  0x3c   : > { %v6528_v48 = vsel %vm591_vm2, %v5839_v43, %v590_v47 }
  0x3d   : > { %10315 = vst [vmem:[#allocation2_spill] sm:$0xff] %v6528_v48 }
  0x3e   : > { %560 = vadd.xlane.f32.xlu0 %v559_v31  ;;  %578 = vadd.xlane.f32.xlu1 %v577_v32 }
  0x3f   : > { %557 = vadd.xlane.f32.xlu2 %v556_v33 }
  0x46   : > { %572 = vadd.xlane.f32.xlu0 %v571_v37  ;;  %566 = vadd.xlane.f32.xlu1 %v565_v38 }
  0x47   : > { %569 = vadd.xlane.f32.xlu2 %v568_v39 }
  0x4f   : > { %581 = vadd.xlane.f32.xlu2 %v580_v41 }
  0xa1   : > { %v546_v49 = vpop.xlane.xlu1 %545  ;;  %v540_v50 = vpop.xlane.xlu0 %539 }
  0xa2   : > { %v593_v51 = vmul.f32 %v6528_v48, %v540_v50  ;;  %v552_v52 = vpop.xlane.xlu2 %551  ;;  %v595_v61 = vmul.f32 %v6528_v48, %v546_v49 }
  0xa3   : > { %v597_v21 = vmul.f32 %v6528_v48, %v552_v52 }
  0xa4   : > { %v6531_v53 = vsub.f32 %v519_v17, %v593_v51  ;;  %v6555_v4 = vsub.f32 %v6452_v16, %v595_v61 }
  0xa5   : > { %v6593_v27 = vsub.f32 %v6463_v20, %v597_v21 }
  0xa6   : > { %v625_v54 = vmul.f32 %v6531_v53, %v6531_v53  ;;  %v627_v11 = vmul.f32 %v6555_v4, %v6555_v4 }
  0xa8   : > { %v641_v55 = vsel %vm10301_vm1, %v625_v54, 0.0  ;;  %v647_v17 = vsel %vm10301_vm1, %v627_v11, 0.0 }
  0xa9   : > { %v549_v56 = vpop.xlane.xlu1 %548  ;;  %642 = vadd.xlane.f32.xlu0 %v641_v55  ;;  %v543_v57 = vpop.xlane.xlu0 %542 }
  0xaa   : > { %v596_v58 = vmul.f32 %v6528_v48, %v549_v56  ;;  %v594_v59 = vmul.f32 %v6528_v48, %v543_v57  ;;  %v555_v60 = vpop.xlane.xlu2 %554 }
  0xab   : > { %v598_v9 = vmul.f32 %v6528_v48, %v555_v60  ;;  %v5558_v60 = vld [vmem:[%s6307_s25 + $0x8] sm:$0xff] }
  0xac   : > { %v6544_v63 = vsub.f32 %v522_v22, %v596_v58  ;;  %v6546_v0 = vsub.f32 %v520_v23, %v594_v59  ;;  %993 = vmatpush.bf16.msra.mxu0 %v5558_v60  ;;  %5571 = vmatpush.bf16.msra.mxu1 %v5558_v60 }
  0xad   : > { %v6575_v16 = vsub.f32 %v6476_v24, %v598_v9 }
  0xae   : > { %v628_v1 = vmul.f32 %v6544_v63, %v6544_v63  ;;  %v626_v3 = vmul.f32 %v6546_v0, %v6546_v0 }
  0xaf   : > { %v630_v24 = vmul.f32 %v6575_v16, %v6575_v16 }
  0xb0   : > { %v650_v5 = vsel %vm10301_vm1, %v628_v1, 0.0  ;;  %v644_v6 = vsel %vm10301_vm1, %v626_v3, 0.0 }
  0xb1   : > { %651 = vadd.xlane.f32.xlu2 %v650_v5  ;;  %575 = vadd.xlane.f32.xlu0 %v574_v2  ;;  %v561_v7 = vpop.xlane.xlu0 %560  ;;  %v656_v37 = vsel %vm10301_vm1, %v630_v24, 0.0  ;;  %v579_v38 = vpop.xlane.xlu1 %578  ;;  %v5557_v2 = vld [vmem:[%s6307_s25] sm:$0xff] }
  0xb2   : > { %645 = vadd.xlane.f32.xlu1 %v644_v6  ;;  %v600_v8 = vmul.f32 %v6528_v48, %v561_v7  ;;  %v558_v13 = vpop.xlane.xlu2 %557  ;;  %v606_v20 = vmul.f32 %v6528_v48, %v579_v38  ;;  %994 = vmatpush.bf16.msra.mxu0 %v5557_v2 }
  0xb3   : > { %v599_v23 = vmul.f32 %v6528_v48, %v558_v13  ;;  %5572 = vmatpush.bf16.msra.mxu1 %v5557_v2 }
  0xb4   : > { %v6568_v12 = vsub.f32 %v526_v28, %v600_v8  ;;  %v562_v28 = vsel %vm10301_vm1, %v6585_v25, 0.0 }
  0xb5   : > { %v6600_v33 = vsub.f32 %v6493_v30, %v599_v23  ;;  %v6611_v30 = vsub.f32 %v6488_v29, %v606_v20 }
  0xb6   : > { %v632_v15 = vmul.f32 %v6568_v12, %v6568_v12 }
  0xb7   : > { %v631_v42 = vmul.f32 %v6600_v33, %v6600_v33  ;;  %v638_v47 = vmul.f32 %v6611_v30, %v6611_v30 }
  0xb8   : > { %v662_v18 = vsel %vm10301_vm1, %v632_v15, 0.0 }
  0xb9   : > { %584 = vadd.xlane.f32.xlu0 %v583_v14  ;;  %663 = vadd.xlane.f32.xlu2 %v662_v18  ;;  %v573_v19 = vpop.xlane.xlu0 %572  ;;  %v659_v45 = vsel %vm10301_vm1, %v631_v42, 0.0  ;;  %v680_v29 = vsel %vm10301_vm1, %v638_v47, 0.0  ;;  %v567_v52 = vpop.xlane.xlu1 %566 }
  0xba   : > { %648 = vadd.xlane.f32.xlu1 %v647_v17  ;;  %v604_v22 = vmul.f32 %v6528_v48, %v573_v19  ;;  %v570_v32 = vpop.xlane.xlu2 %569  ;;  %v602_v54 = vmul.f32 %v6528_v48, %v567_v52 }
  0xbb   : > { %v603_v41 = vmul.f32 %v6528_v48, %v570_v32 }
  0xbc   : > { %v6590_v26 = vsub.f32 %v6503_v34, %v604_v22  ;;  %v629_v34 = vmul.f32 %v6593_v27, %v6593_v27  ;;  %v6632_v56 = vsub.f32 %v6508_v35, %v602_v54 }
  0xbd   : > { %v6615_v44 = vsub.f32 %v6513_v36, %v603_v41 }
  0xbe   : > { %v636_v31 = vmul.f32 %v6590_v26, %v6590_v26  ;;  %v653_v43 = vsel %vm10301_vm1, %v629_v34, 0.0 }
  0xbf   : > { %v635_v50 = vmul.f32 %v6615_v44, %v6615_v44 }
  0xc0   : > { %v674_v39 = vsel %vm10301_vm1, %v636_v31, 0.0 }
  0xc1   : > { %563 = vadd.xlane.f32.xlu0 %v562_v28  ;;  %675 = vadd.xlane.f32.xlu2 %v674_v39  ;;  %v671_v36 = vsel %vm10301_vm1, %v635_v50, 0.0 }
  0xc2   : > { %657 = vadd.xlane.f32.xlu1 %v656_v37  ;;  %v582_v46 = vpop.xlane.xlu2 %581 }
  0xc3   : > { %v607_v49 = vmul.f32 %v6528_v48, %v582_v46 }
  0xc5   : > { %v6625_v51 = vsub.f32 %v6524_v40, %v607_v49  ;;  %v634_v40 = vmul.f32 %v6632_v56, %v6632_v56 }
  0xc7   : > { %v639_v55 = vmul.f32 %v6625_v51, %v6625_v51  ;;  %v668_v58 = vsel %vm10301_vm1, %v634_v40, 0.0 }
  0xc9   : > { %654 = vadd.xlane.f32.xlu0 %v653_v43  ;;  %v683_v57 = vsel %vm10301_vm1, %v639_v55, 0.0 }
  0xca   : > { %660 = vadd.xlane.f32.xlu1 %v659_v45  ;;  %v535_v45 = vld [vmem:[%s6302_s22] sm:$0x3f] }
  0xd1   : > { %681 = vadd.xlane.f32.xlu0 %v680_v29 }
  0xd2   : > { %672 = vadd.xlane.f32.xlu1 %v671_v36 }
  0xda   : > { %684 = vadd.xlane.f32.xlu1 %v683_v57  ;;  %v6677_v57 = vadd.f32 1.0, %v535_v45 }
  0xdc   : > { %10318 = vst [vmem:[#allocation3_spill] sm:$0xff] %v6677_v57 }
  0xe2   : > { %669 = vadd.xlane.f32.xlu1 %v668_v58 }
 0x11c   : > { %v643_v59 = vpop.xlane.xlu0 %642 }
 0x11d   : > { %v689_v61 = vmul.f32 %v643_v59, %v6528_v48 }
 0x11f   : > { %v705_v1 = vadd.f32 1e-05, %v689_v61 }
 0x121   : > { %5840 = vrsqrt.f32 %v705_v1  ;;  %vm727_vm4 = vweird.f32 %v705_v1 }
 0x124   : > { %v652_v35 = vpop.xlane.xlu2 %651  ;;  %v576_v3 = vpop.xlane.xlu0 %575 }
 0x125   : > { %v692_v5 = vmul.f32 %v652_v35, %v6528_v48  ;;  %v646_v6 = vpop.xlane.xlu1 %645  ;;  %v605_v7 = vmul.f32 %v6528_v48, %v576_v3 }
 0x126   : > { %v690_v8 = vmul.f32 %v646_v6, %v6528_v48  ;;  %v6694_v6 = vperm.slane %v6677_v57, 1 }
 0x127   : > { %v5841_v9 = vpop.eup %5840  ;;  %v6644_v11 = vadd.f32 1e-05, %v692_v5  ;;  %v6647_v13 = vsub.f32 %v6542_v62, %v605_v7 }
 0x128   : > { %v722_v14 = vmul.f32 %v5841_v9, %v705_v1  ;;  %v706_v15 = vadd.f32 1e-05, %v690_v8  ;;  %vm728_vm3 = vweird.f32 %v5841_v9 }
 0x129   : > { %5842 = vrsqrt.f32 %v6644_v11  ;;  %v637_v17 = vmul.f32 %v6647_v13, %v6647_v13  ;;  %vm6671_vm7 = vmor %vm727_vm4, %vm728_vm3  ;;  %vm757_vm11 = vweird.f32 %v6644_v11 }
 0x12a   : > { %v723_v18 = vmul.f32 %v5841_v9, %v722_v14  ;;  %5844 = vrsqrt.f32 %v706_v15  ;;  %vm737_vm5 = vweird.f32 %v706_v15 }
 0x12b   : > { %v677_v19 = vsel %vm10301_vm1, %v637_v17, 0.0 }
 0x12c   : > { %v724_v21 = vmul.f32 0.5, %v723_v18  ;;  %v664_v22 = vpop.xlane.xlu2 %663  ;;  %678 = vadd.xlane.f32.xlu2 %v677_v19  ;;  %v585_v23 = vpop.xlane.xlu0 %584 }
 0x12d   : > { %v649_v24 = vpop.xlane.xlu1 %648  ;;  %v608_v62 = vmul.f32 %v6528_v48, %v585_v23  ;;  %v6703_v23 = vperm.slane %v535_v45, 0 }
 0x12e   : > { %v691_v28 = vmul.f32 %v649_v24, %v6528_v48  ;;  %v725_v32 = vsub.f32 1.5, %v724_v21  ;;  %v696_v21 = vmul.f32 %v664_v22, %v6528_v48 }
 0x12f   : > { %v6655_v31 = vpop.eup %5842  ;;  %v6658_v37 = vsub.f32 %v6564_v10, %v608_v62 }
 0x130   : > { %v5845_v38 = vpop.eup %5844  ;;  %v6660_v39 = vadd.f32 1e-05, %v691_v28  ;;  %v752_v34 = vmul.f32 %v6655_v31, %v6644_v11  ;;  %v726_v41 = vmul.f32 %v5841_v9, %v725_v32  ;;  %vm758_vm12 = vweird.f32 %v6655_v31 }
 0x131   : > { %v732_v20 = vmul.f32 %v5845_v38, %v706_v15  ;;  %v640_v43 = vmul.f32 %v6658_v37, %v6658_v37  ;;  %vm738_vm6 = vweird.f32 %v5845_v38  ;;  %vm6726_vm14 = vmor %vm757_vm11, %vm758_vm12 }
 0x132   : > { %5846 = vrsqrt.f32 %v6660_v39  ;;  %v753_v54 = vmul.f32 %v6655_v31, %v752_v34  ;;  %v730_v40 = vsel %vm6671_vm7, %v5841_v9, %v726_v41  ;;  %vm739_vm8 = vmor %vm737_vm5, %vm738_vm6  ;;  %vm747_vm9 = vweird.f32 %v6660_v39 }
 0x133   : > { %v733_v42 = vmul.f32 %v5845_v38, %v732_v20  ;;  %v686_v29 = vsel %vm10301_vm1, %v640_v43, 0.0  ;;  %v881_v5 = vmul.f32 %v730_v40, %v6531_v53 }
 0x134   : > { %v676_v10 = vpop.xlane.xlu2 %675  ;;  %v564_v46 = vpop.xlane.xlu0 %563  ;;  %687 = vadd.xlane.f32.xlu2 %v686_v29  ;;  %v754_v3 = vmul.f32 0.5, %v753_v54 }
 0x135   : > { %v734_v47 = vmul.f32 0.5, %v733_v42  ;;  %v658_v49 = vpop.xlane.xlu1 %657  ;;  %v700_v50 = vmul.f32 %v676_v10, %v6528_v48  ;;  %v601_v36 = vmul.f32 %v6528_v48, %v564_v46  ;;  %v901_v32 = vmul.f32 %v6694_v6, %v881_v5 }
 0x136   : > { %v694_v55 = vmul.f32 %v658_v49, %v6528_v48  ;;  %v755_v53 = vsub.f32 1.5, %v754_v3 }
 0x137   : > { %v735_v58 = vsub.f32 1.5, %v734_v47  ;;  %v6681_v59 = vadd.f32 1e-05, %v700_v50  ;;  %v6684_v60 = vsub.f32 %v6585_v25, %v601_v36  ;;  %v919_v43 = vadd.f32 %v6703_v23, %v901_v32 }
 0x138   : > { %v5847_v61 = vpop.eup %5846  ;;  %v6688_v1 = vadd.f32 1e-05, %v694_v55  ;;  %v756_v41 = vmul.f32 %v6655_v31, %v755_v53  ;;  %v536_v53 = vld [vmem:[%s6302_s22 + $0x8] sm:$0x3f] }
 0x139   : > { %v736_v2 = vmul.f32 %v5845_v38, %v735_v58  ;;  %v742_v35 = vmul.f32 %v5847_v61, %v6660_v39  ;;  %5848 = vrsqrt.f32 %v6681_v59  ;;  %v633_v8 = vmul.f32 %v6684_v60, %v6684_v60 }
 0x13a   : > { %5850 = vrsqrt.f32 %v6688_v1  ;;  %vm748_vm10 = vweird.f32 %v5847_v61  ;;  %v6722_v39 = vadd.f32 1e-05, %v696_v21  ;;  %v760_v54 = vsel %vm6726_vm14, %v6655_v31, %v756_v41 }
 0x13b   : > { %v740_v7 = vsel %vm739_vm8, %v5845_v38, %v736_v2  ;;  %v743_v25 = vmul.f32 %v5847_v61, %v742_v35  ;;  %v665_v18 = vsel %vm10301_vm1, %v633_v8, 0.0  ;;  %vm6718_vm13 = vmor %vm747_vm9, %vm748_vm10  ;;  %v884_v3 = vmul.f32 %v760_v54, %v6544_v63 }
 0x13c   : > { %v655_v9 = vpop.xlane.xlu0 %654  ;;  %v882_v14 = vmul.f32 %v740_v7, %v6546_v0  ;;  %666 = vadd.xlane.f32.xlu0 %v665_v18  ;;  %vm837_vm15 = vweird.f32 %v6681_v59  ;;  %vm777_vm5 = vweird.f32 %v6688_v1  ;;  %vm797_vm14 = vweird.f32 %v6722_v39 }
 0x13d   : > { %v744_v15 = vmul.f32 0.5, %v743_v25  ;;  %v661_v17 = vpop.xlane.xlu1 %660  ;;  %v693_v19 = vmul.f32 %v655_v9, %v6528_v48 }
 0x13e   : > { %v902_v0 = vmul.f32 %v6694_v6, %v882_v14  ;;  %v695_v22 = vmul.f32 %v661_v17, %v6528_v48 }
 0x13f   : > { %v6705_v24 = vpop.eup %5848  ;;  %v745_v62 = vsub.f32 1.5, %v744_v15  ;;  %v709_v28 = vadd.f32 1e-05, %v693_v19 }
 0x140   : > { %v832_v38 = vmul.f32 %v6705_v24, %v6681_v59  ;;  %v6712_v20 = vpop.eup %5850  ;;  %v920_v45 = vadd.f32 %v6703_v23, %v902_v0  ;;  %v6733_v47 = vadd.f32 1e-05, %v695_v22  ;;  %vm838_vm0 = vweird.f32 %v6705_v24 }
 0x141   : > { %5852 = vrsqrt.f32 %v709_v28  ;;  %v746_v34 = vmul.f32 %v5847_v61, %v745_v62  ;;  %v772_v10 = vmul.f32 %v6712_v20, %v6688_v1  ;;  %vm767_vm2 = vweird.f32 %v709_v28  ;;  %vm6756_vm4 = vmor %vm837_vm15, %vm838_vm0 }
 0x142   : > { %v833_v46 = vmul.f32 %v6705_v24, %v832_v38  ;;  %v940_v49 = vpack.c.bf16 %v920_v45, %v919_v43  ;;  %5854 = vrsqrt.f32 %v6722_v39  ;;  %vm778_vm6 = vweird.f32 %v6712_v20 }
 0x143   : > { %v750_v29 = vsel %vm6718_vm13, %v5847_v61, %v746_v34  ;;  %v773_v55 = vmul.f32 %v6712_v20, %v772_v10  ;;  %5856 = vrsqrt.f32 %v6733_v47  ;;  %v6777_v34 = vadd.f32 1.0, %v536_v53  ;;  %vm6779_vm8 = vmor %vm777_vm5, %vm778_vm6 }
 0x144   : > { %5414 = vmatmul.msk.bf16.vlgmr.msra.gmra.mxu0 %vm10301_vm1, %v940_v49  ;;  %v834_v40 = vmul.f32 0.5, %v833_v46  ;;  %v883_v61 = vmul.f32 %v750_v29, %v6555_v4  ;;  %v904_v4 = vmul.f32 %v6694_v6, %v884_v3  ;;  %vm787_vm12 = vweird.f32 %v6733_v47 }
 0x145   : > { %v673_v50 = vpop.xlane.xlu1 %672  ;;  %v774_v5 = vmul.f32 0.5, %v773_v55  ;;  %10327 = vst [vmem:[#allocation4_spill] sm:$0xff] %v6777_v34 }
 0x146   : > { %v699_v36 = vmul.f32 %v673_v50, %v6528_v48  ;;  %v835_v7 = vsub.f32 1.5, %v834_v40  ;;  %v903_v8 = vmul.f32 %v6694_v6, %v883_v61  ;;  %v922_v38 = vadd.f32 %v6703_v23, %v904_v4 }
 0x147   : > { %v5853_v52 = vpop.eup %5852  ;;  %v775_v17 = vsub.f32 1.5, %v774_v5  ;;  %v6793_v50 = vperm.slane %v6777_v34, 1  ;;  %v6799_v61 = vperm.slane %v536_v53, 0 }
 0x148   : > { %v762_v58 = vmul.f32 %v5853_v52, %v709_v28  ;;  %v715_v2 = vadd.f32 1e-05, %v699_v36  ;;  %v6747_v25 = vpop.eup %5854  ;;  %v836_v63 = vmul.f32 %v6705_v24, %v835_v7  ;;  %vm768_vm3 = vweird.f32 %v5853_v52 }
 0x149   : > { %v6752_v14 = vpop.eup %5856  ;;  %v921_v59 = vadd.f32 %v6703_v23, %v903_v8  ;;  %v792_v28 = vmul.f32 %v6747_v25, %v6722_v39  ;;  %vm6768_vm7 = vmor %vm767_vm2, %vm768_vm3  ;;  %v776_v22 = vmul.f32 %v6712_v20, %v775_v17  ;;  %vm798_vm15 = vweird.f32 %v6747_v25 }
 0x14a   : > { %v763_v35 = vmul.f32 %v5853_v52, %v762_v58  ;;  %5858 = vrsqrt.f32 %v715_v2  ;;  %v782_v21 = vmul.f32 %v6752_v14, %v6733_v47  ;;  %v840_v1 = vsel %vm6756_vm4, %v6705_v24, %v836_v63  ;;  %vm799_vm2 = vmor %vm797_vm14, %vm798_vm15 }
 0x14b   : > { %vm827_vm9 = vweird.f32 %v715_v2  ;;  %v941_v43 = vpack.c.bf16 %v922_v38, %v921_v59  ;;  %v793_v10 = vmul.f32 %v6747_v25, %v792_v28  ;;  %v780_v24 = vsel %vm6779_vm8, %v6712_v20, %v776_v22 }
 0x14c   : > { %v764_v31 = vmul.f32 0.5, %v763_v35  ;;  %v783_v45 = vmul.f32 %v6752_v14, %v782_v21  ;;  %v892_v49 = vmul.f32 %v840_v1, %v6590_v26  ;;  %v886_v40 = vmul.f32 %v780_v24, %v6575_v16 }
 0x14d   : > { %vm788_vm13 = vweird.f32 %v6752_v14 }
 0x14e   : > { %v765_v9 = vsub.f32 1.5, %v764_v31  ;;  %v784_v54 = vmul.f32 0.5, %v783_v45  ;;  %v906_v5 = vmul.f32 %v6694_v6, %v886_v40  ;;  %vm789_vm0 = vmor %vm787_vm12, %vm788_vm13 }
 0x150   : > { %v5859_v15 = vpop.eup %5858  ;;  %v766_v62 = vmul.f32 %v5853_v52, %v765_v9  ;;  %v785_v26 = vsub.f32 1.5, %v784_v54  ;;  %v924_v8 = vadd.f32 %v6703_v23, %v906_v5 }
 0x151   : > { %v822_v19 = vmul.f32 %v5859_v15, %v715_v2  ;;  %vm828_vm10 = vweird.f32 %v5859_v15  ;;  %v912_v2 = vmul.f32 %v6793_v50, %v892_v49 }
 0x152   : > { %v770_v11 = vsel %vm6768_vm7, %v5853_v52, %v766_v62  ;;  %vm829_vm11 = vmor %vm827_vm9, %vm828_vm10  ;;  %v794_v52 = vmul.f32 0.5, %v793_v10  ;;  %v786_v7 = vmul.f32 %v6752_v14, %v785_v26 }
 0x153   : > { %v823_v0 = vmul.f32 %v5859_v15, %v822_v19  ;;  %v885_v36 = vmul.f32 %v770_v11, %v6593_v27  ;;  %v930_v27 = vadd.f32 %v6799_v61, %v912_v2 }
 0x154   : > { %5415 = vmatmul.msk.bf16.gmra.mxu0 %vm10301_vm1, %v941_v43  ;;  %v795_v3 = vsub.f32 1.5, %v794_v52  ;;  %v790_v4 = vsel %vm789_vm0, %v6752_v14, %v786_v7  ;;  %v682_v14 = vpop.xlane.xlu0 %681 }
 0x155   : > { %v824_v42 = vmul.f32 0.5, %v823_v0  ;;  %v905_v20 = vmul.f32 %v6694_v6, %v885_v36  ;;  %v702_v21 = vmul.f32 %v682_v14, %v6528_v48 }
 0x156   : > { %v796_v47 = vmul.f32 %v6747_v25, %v795_v3 }
 0x157   : > { %v825_v46 = vsub.f32 1.5, %v824_v42  ;;  %v718_v62 = vadd.f32 1e-05, %v702_v21 }
 0x158   : > { %v800_v39 = vsel %vm799_vm2, %v6747_v25, %v796_v47  ;;  %v685_v25 = vpop.xlane.xlu1 %684 }
 0x159   : > { %v826_v29 = vmul.f32 %v5859_v15, %v825_v46  ;;  %v888_v17 = vmul.f32 %v800_v39, %v6568_v12  ;;  %5860 = vrsqrt.f32 %v718_v62  ;;  %v703_v12 = vmul.f32 %v685_v25, %v6528_v48 }
 0x15a   : > { %vm857_vm3 = vweird.f32 %v718_v62 }
 0x15b   : > { %v830_v55 = vsel %vm829_vm11, %v5859_v15, %v826_v29  ;;  %v887_v15 = vmul.f32 %v790_v4, %v6600_v33  ;;  %v908_v18 = vmul.f32 %v6694_v6, %v888_v17  ;;  %v719_v0 = vadd.f32 1e-05, %v703_v12 }
 0x15c   : > { %v891_v58 = vmul.f32 %v830_v55, %v6615_v44  ;;  %v923_v44 = vadd.f32 %v6703_v23, %v905_v20 }
 0x15d   : > { %v907_v63 = vmul.f32 %v6694_v6, %v887_v15  ;;  %v926_v59 = vadd.f32 %v6703_v23, %v908_v18  ;;  %5862 = vrsqrt.f32 %v719_v0  ;;  %vm867_vm9 = vweird.f32 %v719_v0 }
 0x15e   : > { %v911_v35 = vmul.f32 %v6793_v50, %v891_v58  ;;  %v942_v9 = vpack.c.bf16 %v924_v8, %v923_v44 }
 0x15f   : > { %v925_v19 = vadd.f32 %v6703_v23, %v907_v63  ;;  %v5861_v33 = vpop.eup %5860 }
 0x160   : > { %v929_v16 = vadd.f32 %v6799_v61, %v911_v35  ;;  %v670_v28 = vpop.xlane.xlu1 %669  ;;  %v852_v32 = vmul.f32 %v5861_v33, %v718_v62  ;;  %vm858_vm4 = vweird.f32 %v5861_v33 }
 0x161   : > { %v943_v53 = vpack.c.bf16 %v926_v59, %v925_v19  ;;  %v698_v6 = vmul.f32 %v670_v28, %v6528_v48  ;;  %vm859_vm5 = vmor %vm857_vm3, %vm858_vm4 }
 0x162   : > { %v945_v31 = vpack.c.bf16 %v930_v27, %v929_v16  ;;  %v853_v38 = vmul.f32 %v5861_v33, %v852_v32 }
 0x163   : > { %v6828_v22 = vadd.f32 1e-05, %v698_v6  ;;  %v6832_v45 = vpop.eup %5862 }
 0x164   : > { %5419 = vmatmul.msk.bf16.vlgmr.msra.gmra.mxu1 %vm10301_vm1, %v945_v31  ;;  %5416 = vmatmul.msk.bf16.gmra.mxu0 %vm10301_vm1, %v942_v9  ;;  %v854_v42 = vmul.f32 0.5, %v853_v38  ;;  %v862_v29 = vmul.f32 %v6832_v45, %v719_v0  ;;  %vm868_vm10 = vweird.f32 %v6832_v45 }
 0x165   : > { %5864 = vrsqrt.f32 %v6828_v22  ;;  %vm6851_vm13 = vmor %vm867_vm9, %vm868_vm10  ;;  %vm817_vm14 = vweird.f32 %v6828_v22 }
 0x166   : > { %v855_v43 = vsub.f32 1.5, %v854_v42  ;;  %v863_v58 = vmul.f32 %v6832_v45, %v862_v29 }
 0x168   : > { %v856_v49 = vmul.f32 %v5861_v33, %v855_v43  ;;  %v864_v16 = vmul.f32 0.5, %v863_v58 }
 0x16a   : > { %v860_v40 = vsel %vm859_vm5, %v5861_v33, %v856_v49  ;;  %v865_v39 = vsub.f32 1.5, %v864_v16 }
 0x16b   : > { %v6834_v11 = vpop.eup %5864  ;;  %v894_v5 = vmul.f32 %v860_v40, %v6611_v30 }
 0x16c   : > { %v812_v52 = vmul.f32 %v6834_v11, %v6828_v22  ;;  %v866_v59 = vmul.f32 %v6832_v45, %v865_v39  ;;  %vm818_vm15 = vweird.f32 %v6834_v11 }
 0x16d   : > { %v914_v4 = vmul.f32 %v6793_v50, %v894_v5  ;;  %vm819_vm2 = vmor %vm817_vm14, %vm818_vm15 }
 0x16e   : > { %v813_v20 = vmul.f32 %v6834_v11, %v812_v52  ;;  %v870_v28 = vsel %vm6851_vm13, %v6832_v45, %v866_v59 }
 0x16f   : > { %v932_v19 = vadd.f32 %v6799_v61, %v914_v4  ;;  %v895_v22 = vmul.f32 %v870_v28, %v6625_v51  ;;  %v6876_v51 = vld [vmem:[%s10332_s1] ss:$0 sm:$0xff] }
 0x170   : > { %v814_v31 = vmul.f32 0.5, %v813_v20 }
 0x171   : > { %v915_v45 = vmul.f32 %v6793_v50, %v895_v22 }
 0x172   : > { %v815_v17 = vsub.f32 1.5, %v814_v31 }
 0x174   : > { %5417 = vmatmul.msk.bf16.gmra.mxu0 %vm10301_vm1, %v943_v53  ;;  %v816_v62 = vmul.f32 %v6834_v11, %v815_v17 }
 0x176   : > { %v820_v0 = vsel %vm819_vm2, %v6834_v11, %v816_v62 }
 0x19f   : > { %v679_v23 = vpop.xlane.xlu2 %678 }
 0x1a0   : > { %v701_v1 = vmul.f32 %v679_v23, %v6528_v48 }
 0x1a2   : > { %v717_v41 = vadd.f32 1e-05, %v701_v1 }
 0x1a4   : > { %5866 = vrsqrt.f32 %v717_v41  ;;  %vm847_vm7 = vweird.f32 %v717_v41 }
 0x1a7   : > { %v688_v10 = vpop.xlane.xlu2 %687 }
 0x1a8   : > { %v704_v24 = vmul.f32 %v688_v10, %v6528_v48 }
 0x1aa   : > { %v5867_v46 = vpop.eup %5866  ;;  %v720_v54 = vadd.f32 1e-05, %v704_v24  ;;  %v933_v24 = vadd.f32 %v6799_v61, %v915_v45 }
 0x1ab   : > { %v842_v36 = vmul.f32 %v5867_v46, %v717_v41  ;;  %vm848_vm6 = vweird.f32 %v5867_v46  ;;  %v890_v41 = vmul.f32 %v820_v0, %v6632_v56 }
 0x1ac   : > { %5868 = vrsqrt.f32 %v720_v54  ;;  %vm849_vm8 = vmor %vm847_vm7, %vm848_vm6  ;;  %vm877_vm11 = vweird.f32 %v720_v54  ;;  %vm10302_vm6 = vcmask 64512   ;;  %vm1909_vm7 = vcmask 523264  }
 0x1ad   : > { %v843_v55 = vmul.f32 %v5867_v46, %v842_v36  ;;  %v910_v11 = vmul.f32 %v6793_v50, %v890_v41 }
 0x1af   : > { %v844_v2 = vmul.f32 0.5, %v843_v55  ;;  %v667_v35 = vpop.xlane.xlu0 %666  ;;  %v928_v36 = vadd.f32 %v6799_v61, %v910_v11 }
 0x1b0   : > { %v697_v3 = vmul.f32 %v667_v35, %v6528_v48 }
 0x1b1   : > { %v845_v26 = vsub.f32 1.5, %v844_v2 }
 0x1b2   : > { %v5869_v44 = vpop.eup %5868  ;;  %v713_v7 = vadd.f32 1e-05, %v697_v3 }
 0x1b3   : > { %v846_v27 = vmul.f32 %v5867_v46, %v845_v26  ;;  %v872_v47 = vmul.f32 %v5869_v44, %v720_v54  ;;  %vm878_vm12 = vweird.f32 %v5869_v44 }
 0x1b4   : > { %5870 = vrsqrt.f32 %v713_v7  ;;  %vm879_vm0 = vmor %vm877_vm11, %vm878_vm12  ;;  %vm807_vm3 = vweird.f32 %v713_v7 }
 0x1b5   : > { %v850_v8 = vsel %vm849_vm8, %v5867_v46, %v846_v27  ;;  %v873_v15 = vmul.f32 %v5869_v44, %v872_v47 }
 0x1b6   : > { %v893_v9 = vmul.f32 %v850_v8, %v6647_v13 }
 0x1b7   : > { %v874_v63 = vmul.f32 0.5, %v873_v15 }
 0x1b8   : > { %v913_v30 = vmul.f32 %v6793_v50, %v893_v9 }
 0x1b9   : > { %v875_v53 = vsub.f32 1.5, %v874_v63 }
 0x1ba   : > { %v931_v18 = vadd.f32 %v6799_v61, %v913_v30  ;;  %v5871_v14 = vpop.eup %5870 }
 0x1bb   : > { %v876_v25 = vmul.f32 %v5869_v44, %v875_v53  ;;  %v802_v33 = vmul.f32 %v5871_v14, %v713_v7  ;;  %vm808_vm4 = vweird.f32 %v5871_v14 }
 0x1bc   : > { %v946_v21 = vpack.c.bf16 %v932_v19, %v931_v18  ;;  %vm809_vm5 = vmor %vm807_vm3, %vm808_vm4 }
 0x1bd   : > { %v880_v12 = vsel %vm879_vm0, %v5869_v44, %v876_v25  ;;  %v803_v32 = vmul.f32 %v5871_v14, %v802_v33 }
 0x1be   : > { %5420 = vmatmul.msk.bf16.gmra.mxu1 %vm10301_vm1, %v946_v21  ;;  %v896_v6 = vmul.f32 %v880_v12, %v6658_v37 }
 0x1bf   : > { %v804_v38 = vmul.f32 0.5, %v803_v32 }
 0x1c0   : > { %v916_v42 = vmul.f32 %v6793_v50, %v896_v6 }
 0x1c1   : > { %v805_v23 = vsub.f32 1.5, %v804_v38  ;;  %v996_v1 = vpop.f32.mrf.mxu0 }
 0x1c2   : > { %v934_v46 = vadd.f32 %v6799_v61, %v916_v42  ;;  %v997_v54 = vadd.f32 %v6876_v51, %v996_v1 }
 0x1c3   : > { %v806_v43 = vmul.f32 %v5871_v14, %v805_v23 }
 0x1c4   : > { %v1196_v30 = vpack.c.bf16 %v997_v54, %v997_v54 }
 0x1c5   : > { %v810_v10 = vsel %vm809_vm5, %v5871_v14, %v806_v43 }
 0x1c6   : > { %v889_v37 = vmul.f32 %v810_v10, %v6684_v60  ;;  %v947_v60 = vpack.c.bf16 %v934_v46, %v933_v24  ;;  %v1268_v63 = vunpack.c.l.b16 %v1196_v30 }
 0x1c8   : > { %v909_v56 = vmul.f32 %v6793_v50, %v889_v37 }
 0x1c9   : > { %v998_v49 = vpop.f32.mrf.mxu0 }
 0x1ca   : > { %v927_v29 = vadd.f32 %v6799_v61, %v909_v56  ;;  %v999_v52 = vadd.f32 %v6876_v51, %v998_v49 }
 0x1cc   : > { %v944_v55 = vpack.c.bf16 %v928_v36, %v927_v29  ;;  %v5599_v40 = vpack.i.bf16 %v999_v52, %v997_v54  ;;  %v1197_v15 = vpack.c.bf16 %v999_v52, %v999_v52 }
 0x1ce   : > { %5421 = vmatmul.msk.bf16.gmra.mxu1 %vm10301_vm1, %v947_v60  ;;  %5418 = vmatmul.msk.bf16.gmra.mxu0 %vm10301_vm1, %v944_v55  ;;  %v1269_v17 = vunpack.c.l.b16 %v1197_v15 }
 0x1cf   : > { %5600 = vrot.lane.b32.xlu1 %v5599_v40, %s6221_s2  ;;  %5610 = vrot.lane.b32.xlu2 %v5599_v40, %s6222_s14 }
 0x1d0   : > { %5595 = vrot.lane.b32.xlu0 %v5599_v40, %s6223_s19  ;;  %v6904_v18 = vpack.c.b16 %v1269_v17, %v1268_v63 }
 0x1d1   : > { %v1001_v50 = vpop.f32.mrf.mxu0 }
 0x1d2   : > { %v1002_v61 = vadd.f32 %v6876_v51, %v1001_v50 }
 0x1d4   : > { %v1198_v20 = vpack.c.bf16 %v1002_v61, %v1002_v61 }
 0x1d6   : > { %v1270_v3 = vunpack.c.l.b16 %v1198_v20 }
 0x1d9   : > { %v1003_v58 = vpop.f32.mrf.mxu0 }
 0x1da   : > { %v1004_v2 = vadd.f32 %v6876_v51, %v1003_v58 }
 0x1dc   : > { %v1199_v26 = vpack.c.bf16 %v1004_v2, %v1004_v2  ;;  %v5629_v19 = vpack.i.bf16 %v1004_v2, %v1002_v61 }
 0x1de   : > { %v1271_v5 = vunpack.c.l.b16 %v1199_v26 }
 0x1e0   : > { %v6891_v16 = vpack.c.b16 %v1271_v5, %v1270_v3 }
 0x1e1   : > { %v1021_v35 = vpop.f32.mrf.mxu1  ;;  %v1006_v59 = vpop.f32.mrf.mxu0 }
 0x1e2   : > { %v1022_v27 = vadd.f32 %v6876_v51, %v1021_v35  ;;  %v1007_v23 = vadd.f32 %v6876_v51, %v1006_v59 }
 0x1e4   : > { %v1206_v31 = vpack.c.bf16 %v1022_v27, %v1022_v27  ;;  %v1200_v46 = vpack.c.bf16 %v1007_v23, %v1007_v23 }
 0x1e6   : > { %v1352_v9 = vunpack.c.l.b16 %v1206_v31  ;;  %v1272_v49 = vunpack.c.l.b16 %v1200_v46 }
 0x1e9   : > { %v1023_v44 = vpop.f32.mrf.mxu1  ;;  %v1008_v53 = vpop.f32.mrf.mxu0 }
 0x1ea   : > { %v1024_v7 = vadd.f32 %v6876_v51, %v1023_v44  ;;  %v1009_v22 = vadd.f32 %v6876_v51, %v1008_v53 }
 0x1ec   : > { %v5614_v8 = vpack.i.bf16 %v1024_v7, %v1022_v27  ;;  %v1207_v47 = vpack.c.bf16 %v1024_v7, %v1024_v7  ;;  %v5654_v41 = vpack.i.bf16 %v1009_v22, %v1007_v23  ;;  %v1201_v11 = vpack.c.bf16 %v1009_v22, %v1009_v22 }
 0x1ee   : > { %5615 = vrot.lane.b32.xlu2 %v5614_v8, %s6221_s2  ;;  %5605 = vrot.lane.b32.xlu0 %v5614_v8, %s6223_s19  ;;  %v1353_v4 = vunpack.c.l.b16 %v1207_v47  ;;  %v1273_v56 = vunpack.c.l.b16 %v1201_v11 }
 0x1f0   : > { %v6897_v39 = vpack.c.b16 %v1353_v4, %v1352_v9  ;;  %v6939_v36 = vpack.c.b16 %v1273_v56, %v1272_v49 }
 0x1f1   : > { %v1011_v32 = vpop.f32.mrf.mxu0 }
 0x1f2   : > { %1364 = vrot.lane.b32.xlu1 %v6897_v39, %s6224_s21  ;;  %v1012_v29 = vadd.f32 %v6876_v51, %v1011_v32 }
 0x1f4   : > { %v1202_v17 = vpack.c.bf16 %v1012_v29, %v1012_v29 }
 0x1f6   : > { %3605 = vrot.lane.b32.xlu2 %v6897_v39, %s6225_s24  ;;  %5620 = vrot.lane.b32.xlu0 %v5614_v8, %s6222_s14 }
 0x1f9   : > { %v1013_v1 = vpop.f32.mrf.mxu0 }
 0x1fa   : > { %3530 = vrot.lane.b32.xlu1 %v6904_v18, %s6225_s24  ;;  %v1014_v24 = vadd.f32 %v6876_v51, %v1013_v1 }
 0x1fc   : > { %v5694_v54 = vpack.i.bf16 %v1014_v24, %v1012_v29  ;;  %v1203_v9 = vpack.c.bf16 %v1014_v24, %v1014_v24 }
 0x1fe   : > { %5630 = vrot.lane.b32.xlu2 %v5629_v19, %s6221_s2  ;;  %1280 = vrot.lane.b32.xlu0 %v6904_v18, %s6224_s21  ;;  %v1275_v63 = vunpack.c.l.b16 %v1203_v9 }
 0x202   : > { %5625 = vrot.lane.b32.xlu1 %v5629_v19, %s6223_s19 }
 0x206   : > { %5640 = vrot.lane.b32.xlu2 %v5629_v19, %s6222_s14 }
 0x229   : > { %v6945_v40 = vpop.permute.xlu2 %5610 }
 0x23b   : > { %v1026_v13 = vpop.f32.mrf.mxu1 }
 0x23c   : > { %v1027_v21 = vadd.f32 %v6876_v51, %v1026_v13 }
 0x23e   : > { %v1208_v28 = vpack.c.bf16 %v1027_v21, %v1027_v21 }
 0x240   : > { %v1354_v6 = vunpack.c.l.b16 %v1208_v28 }
 0x241   : > { %v5601_v5 = vpop.permute.xlu1 %5600 }
 0x242   : > { %v6949_v20 = vpop.permute.xlu0 %5595  ;;  %v5603_v7 = vunpack.i.h.bf16 %v5601_v5  ;;  %v5602_v31 = vunpack.i.l.bf16 %v5601_v5 }
 0x243   : > { %v1028_v14 = vpop.f32.mrf.mxu1 }
 0x244   : > { %v1029_v62 = vadd.f32 %v6876_v51, %v1028_v14  ;;  %v1229_v4 = vpack.c.bf16 %v5603_v7, %v5603_v7  ;;  %v1228_v15 = vpack.c.bf16 %v5602_v31, %v5602_v31 }
 0x246   : > { %v5649_v25 = vpack.i.bf16 %v1029_v62, %v1027_v21  ;;  %v1209_v33 = vpack.c.bf16 %v1029_v62, %v1029_v62  ;;  %v1594_v19 = vunpack.c.l.b16 %v1229_v4  ;;  %v1593_v59 = vunpack.c.l.b16 %v1228_v15 }
 0x247   : > { %v1274_v21 = vunpack.c.l.b16 %v1202_v17 }
 0x248   : > { %5650 = vrot.lane.b32.xlu2 %v5649_v25, %s6222_s14  ;;  %5645 = vrot.lane.b32.xlu0 %v5649_v25, %s6221_s2  ;;  %v1355_v12 = vunpack.c.l.b16 %v1209_v33  ;;  %v5616_v44 = vpop.permute.xlu2 %5615  ;;  %v6969_v28 = vpack.c.b16 %v1594_v19, %v1593_v59 }
 0x249   : > { %5635 = vrot.lane.b32.xlu1 %v5649_v25, %s6223_s19  ;;  %v5618_v13 = vunpack.i.h.bf16 %v5616_v44  ;;  %v5617_v53 = vunpack.i.l.bf16 %v5616_v44  ;;  %v6967_v62 = vpack.c.b16 %v1275_v63, %v1274_v21 }
 0x24a   : > { %v6918_v38 = vpack.c.b16 %v1355_v12, %v1354_v6 }
 0x24b   : > { %v1031_v0 = vpop.f32.mrf.mxu1  ;;  %v1016_v10 = vpop.f32.mrf.mxu0  ;;  %v1239_v25 = vpack.c.bf16 %v5618_v13, %v5618_v13  ;;  %v1238_v33 = vpack.c.bf16 %v5617_v53, %v5617_v53 }
 0x24c   : > { %v1032_v45 = vadd.f32 %v6876_v51, %v1031_v0  ;;  %v1017_v2 = vadd.f32 %v6876_v51, %v1016_v10 }
 0x24d   : > { %v1677_v0 = vunpack.c.l.b16 %v1239_v25  ;;  %v1676_v22 = vunpack.c.l.b16 %v1238_v33 }
 0x24e   : > { %v1210_v55 = vpack.c.bf16 %v1032_v45, %v1032_v45  ;;  %v1204_v27 = vpack.c.bf16 %v1017_v2, %v1017_v2 }
 0x24f   : > { %v6978_v11 = vpack.c.b16 %v1677_v0, %v1676_v22 }
 0x250   : > { %3532 = vrot.lane.b32.xlu0 %v6891_v16, %s6225_s24  ;;  %1366 = vrot.lane.b32.xlu2 %v6918_v38, %s6224_s21  ;;  %v1356_v58 = vunpack.c.l.b16 %v1210_v55  ;;  %v1350_v8 = vunpack.c.l.b16 %v1204_v27  ;;  %v6965_v14 = vpop.permute.xlu2 %3605  ;;  %v5613_v55 = vunpack.i.h.bf16 %v6945_v40 }
 0x251   : > { %1282 = vrot.lane.b32.xlu1 %v6891_v16, %s6224_s21  ;;  %10333 = vst [vmem:[#allocation5_spill] sm:$0xff] %v6978_v11 }
 0x252   : > { %v1245_v5 = vpack.c.bf16 %v5613_v55, %v5613_v55 }
 0x253   : > { %v1033_v42 = vpop.f32.mrf.mxu1  ;;  %v1018_v52 = vpop.f32.mrf.mxu0 }
 0x254   : > { %v1034_v43 = vadd.f32 %v6876_v51, %v1033_v42  ;;  %v1019_v61 = vadd.f32 %v6876_v51, %v1018_v52 }
 0x256   : > { %v5664_v37 = vpack.i.bf16 %v1034_v43, %v1032_v45  ;;  %v1211_v60 = vpack.c.bf16 %v1034_v43, %v1034_v43  ;;  %v5704_v35 = vpack.i.bf16 %v1019_v61, %v1017_v2  ;;  %v1205_v3 = vpack.c.bf16 %v1019_v61, %v1019_v61 }
 0x257   : > { %v5598_v61 = vunpack.i.h.bf16 %v6949_v20 }
 0x258   : > { %5655 = vrot.lane.b32.xlu0 %v5654_v41, %s6223_s19  ;;  %3607 = vrot.lane.b32.xlu2 %v6918_v38, %s6225_s24  ;;  %v1357_v50 = vunpack.c.l.b16 %v1211_v60  ;;  %v1351_v51 = vunpack.c.l.b16 %v1205_v3  ;;  %v5631_v42 = vpop.permute.xlu2 %5630 }
 0x259   : > { %5660 = vrot.lane.b32.xlu1 %v5654_v41, %s6221_s2  ;;  %v1213_v44 = vpack.c.bf16 %v5598_v61, %v5598_v61  ;;  %v5633_v15 = vunpack.i.h.bf16 %v5631_v42  ;;  %v5632_v17 = vunpack.i.l.bf16 %v5631_v42 }
 0x25a   : > { %v6951_v26 = vpack.c.b16 %v1357_v50, %v1356_v58  ;;  %v6958_v30 = vpack.c.b16 %v1351_v51, %v1350_v8  ;;  %v5612_v50 = vunpack.i.l.bf16 %v6945_v40  ;;  %v5597_v58 = vunpack.i.l.bf16 %v6949_v20 }
 0x25b   : > { %v1756_v40 = vunpack.c.l.b16 %v1245_v5  ;;  %v1432_v20 = vunpack.c.l.b16 %v1213_v44  ;;  %v1231_v25 = vpack.c.bf16 %v5633_v15, %v5633_v15  ;;  %v1230_v33 = vpack.c.bf16 %v5632_v17, %v5632_v17 }
 0x25c   : > { %v1244_v27 = vpack.c.bf16 %v5612_v50, %v5612_v50 }
 0x25d   : > { %v1596_v22 = vunpack.c.l.b16 %v1231_v25 }
 0x25e   : > { %v1755_v8 = vunpack.c.l.b16 %v1244_v27 }
 0x260   : > { %5670 = vrot.lane.b32.xlu0 %v5654_v41, %s6222_s14  ;;  %5665 = vrot.lane.b32.xlu2 %v5664_v37, %s6223_s19  ;;  %v5606_v47 = vpop.permute.xlu0 %5605  ;;  %v5641_v52 = vpop.permute.xlu2 %5640  ;;  %v7006_v53 = vpack.c.b16 %v1756_v40, %v1755_v8 }
 0x261   : > { %5675 = vrot.lane.b32.xlu1 %v5664_v37, %s6221_s2  ;;  %v5608_v32 = vunpack.i.h.bf16 %v5606_v47  ;;  %v5607_v6 = vunpack.i.l.bf16 %v5606_v47  ;;  %v5643_v2 = vunpack.i.h.bf16 %v5641_v52  ;;  %v5642_v3 = vunpack.i.l.bf16 %v5641_v52 }
 0x263   : > { %v1223_v43 = vpack.c.bf16 %v5608_v32, %v5608_v32  ;;  %v1222_v45 = vpack.c.bf16 %v5607_v6, %v5607_v6  ;;  %v1247_v7 = vpack.c.bf16 %v5643_v2, %v5643_v2  ;;  %v1246_v31 = vpack.c.bf16 %v5642_v3, %v5642_v3 }
 0x264   : > { %v6976_v23 = vpop.permute.xlu1 %1364 }
 0x265   : > { %v1515_v46 = vunpack.c.l.b16 %v1223_v43  ;;  %v1514_v56 = vunpack.c.l.b16 %v1222_v45  ;;  %v1758_v63 = vunpack.c.l.b16 %v1247_v7  ;;  %v1757_v19 = vunpack.c.l.b16 %v1246_v31 }
 0x267   : > { %v6987_v60 = vpack.c.b16 %v1515_v46, %v1514_v56 }
 0x268   : > { %5680 = vrot.lane.b32.xlu0 %v5664_v37, %s6222_s14  ;;  %1284 = vrot.lane.b32.xlu2 %v6939_v36, %s6224_s21  ;;  %v5621_v12 = vpop.permute.xlu0 %5620 }
 0x269   : > { %5695 = vrot.lane.b32.xlu1 %v5694_v54, %s6222_s14  ;;  %v5623_v1 = vunpack.i.h.bf16 %v5621_v12  ;;  %v5622_v41 = vunpack.i.l.bf16 %v5621_v12  ;;  %v7010_v12 = vpack.c.b16 %v1758_v63, %v1757_v19 }
 0x26b   : > { %v1255_v10 = vpack.c.bf16 %v5623_v1, %v5623_v1  ;;  %v1254_v37 = vpack.c.bf16 %v5622_v41, %v5622_v41  ;;  %v1595_v1 = vunpack.c.l.b16 %v1230_v33 }
 0x26c   : > { %v6985_v29 = vpop.permute.xlu1 %3530 }
 0x26d   : > { %v1839_v24 = vunpack.c.l.b16 %v1255_v10  ;;  %v1838_v49 = vunpack.c.l.b16 %v1254_v37  ;;  %v7020_v42 = vpack.c.b16 %v1596_v22, %v1595_v1 }
 0x270   : > { %1368 = vrot.lane.b32.xlu0 %v6951_v26, %s6224_s21  ;;  %3534 = vrot.lane.b32.xlu2 %v6939_v36, %s6225_s24  ;;  %v7034_v45 = vpop.permute.xlu0 %1280 }
 0x271   : > { %5705 = vrot.lane.b32.xlu1 %v5704_v35, %s6221_s2 }
 0x274   : > { %v5626_v51 = vpop.permute.xlu1 %5625 }
 0x275   : > { %v5628_v9 = vunpack.i.h.bf16 %v5626_v51  ;;  %v5627_v4 = vunpack.i.l.bf16 %v5626_v51 }
 0x277   : > { %v1215_v59 = vpack.c.bf16 %v5628_v9, %v5628_v9  ;;  %v1214_v13 = vpack.c.bf16 %v5627_v4, %v5627_v4 }
 0x278   : > { %3609 = vrot.lane.b32.xlu0 %v6951_v26, %s6225_s24  ;;  %5685 = vrot.lane.b32.xlu2 %v5694_v54, %s6223_s19 }
 0x279   : > { %1362 = vrot.lane.b32.xlu1 %v6958_v30, %s6224_s21  ;;  %v1434_v32 = vunpack.c.l.b16 %v1215_v59  ;;  %v1433_v6 = vunpack.c.l.b16 %v1214_v13 }
 0x27b   : > { %v7018_v41 = vpack.c.b16 %v1434_v32, %v1433_v6 }
 0x280   : > { %5690 = vrot.lane.b32.xlu0 %v5694_v54, %s6221_s2  ;;  %1286 = vrot.lane.b32.xlu2 %v6967_v62, %s6224_s21  ;;  %v6989_v54 = vpack.c.b16 %v1839_v24, %v1838_v49 }
 0x281   : > { %1605 = vrot.lane.b32.xlu1 %v6969_v28, %s6224_s21 }
 0x282   : > { %10334 = vst [vmem:[#allocation6_spill] sm:$0xff] %v6989_v54 }
 0x288   : > { %3536 = vrot.lane.b32.xlu0 %v6967_v62, %s6225_s24  ;;  %5710 = vrot.lane.b32.xlu2 %v5704_v35, %s6222_s14 }
 0x289   : > { %1688 = vrot.lane.b32.xlu1 %v6978_v11, %s6224_s21 }
 0x290   : > { %5700 = vrot.lane.b32.xlu0 %v5704_v35, %s6223_s19  ;;  %1526 = vrot.lane.b32.xlu2 %v6987_v60, %s6224_s21  ;;  %v1212_v35 = vpack.c.bf16 %v5597_v58, %v5597_v58 }
 0x291   : > { %1850 = vrot.lane.b32.xlu1 %v6989_v54, %s6224_s21 }
 0x292   : > { %v1431_v47 = vunpack.c.l.b16 %v1212_v35 }
 0x294   : > { %v7008_v21 = vpack.c.b16 %v1432_v20, %v1431_v47 }
 0x298   : > { %3603 = vrot.lane.b32.xlu0 %v6958_v30, %s6225_s24  ;;  %3751 = vrot.lane.b32.xlu2 %v6987_v60, %s6225_s24 }
 0x299   : > { %3822 = vrot.lane.b32.xlu1 %v6969_v28, %s6225_s24 }
 0x2a0   : > { %3968 = vrot.lane.b32.xlu2 %v7006_v53, %s6225_s24  ;;  %1443 = vrot.lane.b32.xlu0 %v7008_v21, %s6224_s21 }
 0x2a1   : > { %1769 = vrot.lane.b32.xlu1 %v7010_v12, %s6224_s21 }
 0x2a2   : > { %v5651_v0 = vpop.permute.xlu2 %5650 }
 0x2a3   : > { %v5653_v31 = vunpack.i.h.bf16 %v5651_v0  ;;  %v5652_v51 = vunpack.i.l.bf16 %v5651_v0 }
 0x2a5   : > { %v1257_v20 = vpack.c.bf16 %v5653_v31, %v5653_v31  ;;  %v1256_v47 = vpack.c.bf16 %v5652_v51, %v5652_v51 }
 0x2a7   : > { %v1841_v0 = vunpack.c.l.b16 %v1257_v20  ;;  %v1840_v22 = vunpack.c.l.b16 %v1256_v47 }
 0x2a8   : > { %1445 = vrot.lane.b32.xlu2 %v7018_v41, %s6224_s21  ;;  %1767 = vrot.lane.b32.xlu0 %v7006_v53, %s6224_s21 }
 0x2a9   : > { %3824 = vrot.lane.b32.xlu1 %v7020_v42, %s6225_s24 }
 0x2aa   : > { %v7028_v43 = vpop.permute.xlu2 %1366 }
 0x2b0   : > { %1607 = vrot.lane.b32.xlu2 %v7020_v42, %s6224_s21  ;;  %3676 = vrot.lane.b32.xlu0 %v7008_v21, %s6225_s24 }
 0x2b2   : > { %v7036_v10 = vpop.permute.xlu2 %3607 }
 0x2b8   : > { %3678 = vrot.lane.b32.xlu2 %v7018_v41, %s6225_s24 }
 0x2ba   : > { %v5666_v37 = vpop.permute.xlu2 %5665  ;;  %v5646_v46 = vpop.permute.xlu0 %5645 }
 0x2bb   : > { %v5636_v56 = vpop.permute.xlu1 %5635  ;;  %v5648_v50 = vunpack.i.h.bf16 %v5646_v46  ;;  %v5647_v61 = vunpack.i.l.bf16 %v5646_v46  ;;  %v5668_v59 = vunpack.i.h.bf16 %v5666_v37  ;;  %v5667_v13 = vunpack.i.l.bf16 %v5666_v37 }
 0x2bc   : > { %v5638_v24 = vunpack.i.h.bf16 %v5636_v56  ;;  %v5637_v49 = vunpack.i.l.bf16 %v5636_v56 }
 0x2bd   : > { %v1241_v3 = vpack.c.bf16 %v5648_v50, %v5648_v50  ;;  %v1240_v5 = vpack.c.bf16 %v5647_v61, %v5647_v61 }
 0x2be   : > { %v1225_v52 = vpack.c.bf16 %v5638_v24, %v5638_v24  ;;  %v1224_v55 = vpack.c.bf16 %v5637_v49, %v5637_v49  ;;  %v1227_v49 = vpack.c.bf16 %v5668_v59, %v5668_v59 }
 0x2bf   : > { %v1679_v40 = vunpack.c.l.b16 %v1241_v3  ;;  %v1678_v8 = vunpack.c.l.b16 %v1240_v5  ;;  %v7062_v3 = vpack.c.b16 %v1841_v0, %v1840_v22 }
 0x2c0   : > { %v1517_v58 = vunpack.c.l.b16 %v1225_v52  ;;  %v1516_v2 = vunpack.c.l.b16 %v1224_v55  ;;  %v1226_v52 = vpack.c.bf16 %v5667_v13, %v5667_v13 }
 0x2c1   : > { %v7054_v15 = vpack.c.b16 %v1679_v40, %v1678_v8  ;;  %10336 = vst [vmem:[#allocation8_spill] sm:$0xff] %v7062_v3  ;;  %v1519_v40 = vunpack.c.l.b16 %v1227_v49 }
 0x2c2   : > { %v7040_v27 = vpop.permute.xlu2 %1284  ;;  %v7042_v44 = vpop.permute.xlu0 %3532  ;;  %v7044_v35 = vpack.c.b16 %v1517_v58, %v1516_v2  ;;  %v1518_v8 = vunpack.c.l.b16 %v1226_v52 }
 0x2c3   : > { %v7046_v7 = vpop.permute.xlu1 %1282  ;;  %10335 = vst [vmem:[#allocation7_spill] sm:$0xff] %v7054_v15 }
 0x2c4   : > { %3753 = vrot.lane.b32.xlu1 %v7044_v35, %s6225_s24  ;;  %1528 = vrot.lane.b32.xlu0 %v7044_v35, %s6224_s21 }
 0x2ca   : > { %v7052_v9 = vpop.permute.xlu2 %3534  ;;  %v5656_v4 = vpop.permute.xlu0 %5655 }
 0x2cb   : > { %v5661_v17 = vpop.permute.xlu1 %5660  ;;  %v5658_v63 = vunpack.i.h.bf16 %v5656_v4  ;;  %v5657_v19 = vunpack.i.l.bf16 %v5656_v4 }
 0x2cc   : > { %v5663_v25 = vunpack.i.h.bf16 %v5661_v17  ;;  %v5662_v33 = vunpack.i.l.bf16 %v5661_v17  ;;  %1690 = vrot.lane.b32.xlu0 %v7054_v15, %s6224_s21 }
 0x2cd   : > { %v1217_v32 = vpack.c.bf16 %v5658_v63, %v5658_v63  ;;  %v1216_v6 = vpack.c.bf16 %v5657_v19, %v5657_v19 }
 0x2ce   : > { %v1233_v1 = vpack.c.bf16 %v5663_v25, %v5663_v25  ;;  %v1232_v46 = vpack.c.bf16 %v5662_v33, %v5662_v33  ;;  %v7070_v25 = vpack.c.b16 %v1519_v40, %v1518_v8 }
 0x2cf   : > { %v1436_v56 = vunpack.c.l.b16 %v1217_v32  ;;  %v1435_v24 = vunpack.c.l.b16 %v1216_v6 }
 0x2d0   : > { %v1598_v55 = vunpack.c.l.b16 %v1233_v1  ;;  %v1597_v50 = vunpack.c.l.b16 %v1232_v46 }
 0x2d1   : > { %v7058_v61 = vpack.c.b16 %v1436_v56, %v1435_v24 }
 0x2d2   : > { %v5686_v37 = vpop.permute.xlu2 %5685  ;;  %v5671_v58 = vpop.permute.xlu0 %5670  ;;  %v7060_v2 = vpack.c.b16 %v1598_v55, %v1597_v50 }
 0x2d3   : > { %v5676_v5 = vpop.permute.xlu1 %5675  ;;  %v5673_v31 = vunpack.i.h.bf16 %v5671_v58  ;;  %v5672_v51 = vunpack.i.l.bf16 %v5671_v58  ;;  %1447 = vrot.lane.b32.xlu1 %v7058_v61, %s6224_s21  ;;  %v5688_v46 = vunpack.i.h.bf16 %v5686_v37  ;;  %v5687_v56 = vunpack.i.l.bf16 %v5686_v37 }
 0x2d4   : > { %1609 = vrot.lane.b32.xlu2 %v7060_v2, %s6224_s21  ;;  %1852 = vrot.lane.b32.xlu0 %v7062_v3, %s6224_s21  ;;  %v5678_v20 = vunpack.i.h.bf16 %v5676_v5  ;;  %v5677_v47 = vunpack.i.l.bf16 %v5676_v5 }
 0x2d5   : > { %v1249_v4 = vpack.c.bf16 %v5673_v31, %v5673_v31  ;;  %v1248_v17 = vpack.c.bf16 %v5672_v51, %v5672_v51  ;;  %v1219_v5 = vpack.c.bf16 %v5688_v46, %v5688_v46  ;;  %v1218_v31 = vpack.c.bf16 %v5687_v56, %v5687_v56 }
 0x2d6   : > { %v1243_v59 = vpack.c.bf16 %v5678_v20, %v5678_v20  ;;  %v1242_v13 = vpack.c.bf16 %v5677_v47, %v5677_v47  ;;  %v1308_v20 = vsel %vm10302_vm6, %v7040_v27, 0  ;;  %v1305_v27 = vsel %vm10302_vm6, %v7046_v7, 0 }
 0x2d7   : > { %v1760_v63 = vunpack.c.l.b16 %v1249_v4  ;;  %v1759_v19 = vunpack.c.l.b16 %v1248_v17  ;;  %v1438_v47 = vunpack.c.l.b16 %v1219_v5  ;;  %v1437_v4 = vunpack.c.l.b16 %v1218_v31 }
 0x2d8   : > { %v1681_v24 = vunpack.c.l.b16 %v1243_v59  ;;  %v1680_v49 = vunpack.c.l.b16 %v1242_v13  ;;  %v1389_v13 = vsel %vm10302_vm6, %v7028_v43, 0  ;;  %v1302_v46 = vsel %vm10302_vm6, %v7034_v45, 0 }
 0x2d9   : > { %v7072_v33 = vpack.c.b16 %v1760_v63, %v1759_v19  ;;  %v7094_v63 = vpack.c.b16 %v1438_v47, %v1437_v4  ;;  %v1386_v7 = vsel %vm10302_vm6, %v6976_v23, 0 }
 0x2da   : > { %v1287_v32 = vpop.permute.xlu2 %1286  ;;  %v5681_v6 = vpop.permute.xlu0 %5680  ;;  %v7081_v51 = vpack.c.b16 %v1681_v24, %v1680_v49 }
 0x2db   : > { %v5683_v0 = vunpack.i.h.bf16 %v5681_v6  ;;  %v5682_v22 = vunpack.i.l.bf16 %v5681_v6  ;;  %1530 = vrot.lane.b32.xlu1 %v7070_v25, %s6224_s21  ;;  %v1311_v1 = vsel %vm10302_vm6, %v1287_v32, 0  ;;  %v5696_v17 = vpop.permute.xlu1 %5695 }
 0x2dc   : > { %1771 = vrot.lane.b32.xlu2 %v7072_v33, %s6224_s21  ;;  %3970 = vrot.lane.b32.xlu0 %v7010_v12, %s6225_s24  ;;  %10337 = vst [vmem:[#allocation9_spill] sm:$0xff] %v7081_v51  ;;  %v5698_v56 = vunpack.i.h.bf16 %v5696_v17  ;;  %v5697_v24 = vunpack.i.l.bf16 %v5696_v17 }
 0x2dd   : > { %v1259_v52 = vpack.c.bf16 %v5683_v0, %v5683_v0  ;;  %v1258_v55 = vpack.c.bf16 %v5682_v22, %v5682_v22  ;;  %1317 = vmatpush.bf16.xpose.msrb.mxu1 %v1311_v1 }
 0x2de   : > { %v1251_v5 = vpack.c.bf16 %v5698_v56, %v5698_v56  ;;  %v1250_v31 = vpack.c.bf16 %v5697_v24, %v5697_v24 }
 0x2df   : > { %v1843_v50 = vunpack.c.l.b16 %v1259_v52  ;;  %v1842_v58 = vunpack.c.l.b16 %v1258_v55 }
 0x2e0   : > { %v1761_v17 = vunpack.c.l.b16 %v1250_v31 }
 0x2e1   : > { %v7083_v40 = vpack.c.b16 %v1843_v50, %v1842_v58 }
 0x2e2   : > { %v1369_v37 = vpop.permute.xlu0 %1368  ;;  %v5711_v19 = vpop.permute.xlu2 %5710 }
 0x2e3   : > { %10338 = vst [vmem:[#allocation10_spill] sm:$0xff] %v7083_v40  ;;  %1692 = vrot.lane.b32.xlu1 %v7081_v51, %s6224_s21  ;;  %v1392_v8 = vsel %vm10302_vm6, %v1369_v37, 0  ;;  %v5706_v32 = vpop.permute.xlu1 %5705 }
 0x2e4   : > { %1854 = vrot.lane.b32.xlu2 %v7083_v40, %s6224_s21  ;;  %3826 = vrot.lane.b32.xlu0 %v7060_v2, %s6225_s24  ;;  %v5708_v52 = vunpack.i.h.bf16 %v5706_v32  ;;  %v5707_v55 = vunpack.i.l.bf16 %v5706_v32  ;;  %v5712_v32 = vunpack.i.l.bf16 %v5711_v19 }
 0x2e5   : > { %1318 = vmatpush.bf16.xpose.msrb.mxu1 %v1308_v20  ;;  %5573 = vmatpush.bf16.xpose.msra.mxu2 %v1392_v8 }
 0x2e6   : > { %v1237_v45 = vpack.c.bf16 %v5708_v52, %v5708_v52  ;;  %v1236_v47 = vpack.c.bf16 %v5707_v55, %v5707_v55  ;;  %v1252_v56 = vpack.c.bf16 %v5712_v32, %v5712_v32 }
 0x2ea   : > { %v7096_v59 = vpop.permute.xlu0 %3609  ;;  %v7108_v1 = vpop.permute.xlu2 %1526 }
 0x2eb   : > { %3682 = vrot.lane.b32.xlu1 %v7094_v63, %s6225_s24  ;;  %v1363_v37 = vpop.permute.xlu1 %1362 }
 0x2ec   : > { %3680 = vrot.lane.b32.xlu2 %v7058_v61, %s6225_s24  ;;  %3755 = vrot.lane.b32.xlu0 %v7070_v25, %s6225_s24  ;;  %v1383_v23 = vsel %vm10302_vm6, %v1363_v37, 0 }
 0x2ed   : > { %1319 = vmatpush.bf16.xpose.msrb.mxu1 %v1305_v27  ;;  %5574 = vmatpush.bf16.xpose.msra.mxu2 %v1389_v13  ;;  %v5713_v27 = vunpack.i.h.bf16 %v5711_v19 }
 0x2f2   : > { %v5691_v6 = vpop.permute.xlu0 %5690 }
 0x2f3   : > { %v5693_v0 = vunpack.i.h.bf16 %v5691_v6  ;;  %v5692_v22 = vunpack.i.l.bf16 %v5691_v6  ;;  %v1675_v6 = vunpack.c.l.b16 %v1237_v45 }
 0x2f4   : > { %3972 = vrot.lane.b32.xlu2 %v7072_v33, %s6225_s24 }
 0x2f5   : > { %v1235_v43 = vpack.c.bf16 %v5693_v0, %v5693_v0  ;;  %v1234_v49 = vpack.c.bf16 %v5692_v22, %v5692_v22  ;;  %1320 = vmatpush.bf16.xpose.msrb.mxu1 %v1302_v46  ;;  %5575 = vmatpush.bf16.xpose.msra.mxu2 %v1386_v7  ;;  %v1674_v0 = vunpack.c.l.b16 %v1236_v47  ;;  %v7129_v22 = vpop.permute.xlu2 %3751  ;;  %v1253_v46 = vpack.c.bf16 %v5713_v27, %v5713_v27 }
 0x2f7   : > { %v1600_v50 = vunpack.c.l.b16 %v1235_v43  ;;  %v1599_v58 = vunpack.c.l.b16 %v1234_v49  ;;  %v7133_v43 = vpack.c.b16 %v1675_v6, %v1674_v0  ;;  %v7135_v49 = vpop.permute.xlu1 %1605  ;;  %v1837_v19 = vunpack.c.l.b16 %v1253_v46 }
 0x2f9   : > { %v7116_v20 = vpack.c.b16 %v1600_v50, %v1599_v58  ;;  %10339 = vst [vmem:[#allocation11_spill] sm:$0xff] %v7133_v43 }
 0x2fa   : > { %v7118_v4 = vpop.permute.xlu0 %3536 }
 0x2fb   : > { %3828 = vrot.lane.b32.xlu1 %v7116_v20, %s6225_s24  ;;  %1611 = vrot.lane.b32.xlu0 %v7116_v20, %s6224_s21 }
 0x2fc   : > { %5422 = vmatmul.msk.bf16.vlgmr.msrb.gmra.mxu1 %vm10302_vm6, %v6904_v18  ;;  %1449 = vrot.lane.b32.xlu2 %v7094_v63, %s6224_s21 }
 0x2fd   : > { %1398 = vmatpush.bf16.xpose.msra.mxu1 %v1392_v8  ;;  %v1762_v8 = vunpack.c.l.b16 %v1251_v5  ;;  %5576 = vmatpush.bf16.xpose.msra.mxu2 %v1383_v23  ;;  %v7145_v37 = vpop.permute.xlu2 %3968 }
 0x2ff   : > { %v7131_v24 = vpack.c.b16 %v1762_v8, %v1761_v17 }
 0x302   : > { %v5701_v18 = vpop.permute.xlu0 %5700 }
 0x303   : > { %v5703_v52 = vunpack.i.h.bf16 %v5701_v18  ;;  %v5702_v55 = vunpack.i.l.bf16 %v5701_v18  ;;  %3974 = vrot.lane.b32.xlu1 %v7131_v24, %s6225_s24  ;;  %1773 = vrot.lane.b32.xlu0 %v7131_v24, %s6224_s21 }
 0x304   : > { %5428 = vmatmul.msk.bf16.vlgmr.msra.gmra.mxu2 %vm10302_vm6, %v6918_v38  ;;  %1686 = vrot.lane.b32.xlu2 %v7133_v43, %s6224_s21  ;;  %v7159_v38 = vpop.permute.xlu1 %1688 }
 0x305   : > { %1399 = vmatpush.bf16.xpose.msra.mxu1 %v1389_v13  ;;  %v1836_v13 = vunpack.c.l.b16 %v1252_v56  ;;  %v1221_v50 = vpack.c.bf16 %v5703_v52, %v5703_v52  ;;  %v1220_v58 = vpack.c.bf16 %v5702_v55, %v5702_v55  ;;  %v1446_v8 = vpop.permute.xlu2 %1445 }
 0x307   : > { %v1513_v5 = vunpack.c.l.b16 %v1221_v50  ;;  %v1512_v31 = vunpack.c.l.b16 %v1220_v58  ;;  %v7149_v47 = vpack.c.b16 %v1837_v19, %v1836_v13 }
 0x309   : > { %v7147_v45 = vpack.c.b16 %v1513_v5, %v1512_v31  ;;  %10340 = vst [vmem:[#allocation12_spill] sm:$0xff] %v7149_v47 }
 0x30b   : > { %1524 = vrot.lane.b32.xlu1 %v7147_v45, %s6224_s21  ;;  %1848 = vrot.lane.b32.xlu0 %v7149_v47, %s6224_s21 }
 0x30c   : > { %5423 = vmatmul.msk.bf16.gmra.mxu1 %vm10302_vm6, %v6891_v16  ;;  %3749 = vrot.lane.b32.xlu2 %v7147_v45, %s6225_s24  ;;  %v7165_v17 = vpop.permute.xlu1 %1850 }
 0x30d   : > { %1400 = vmatpush.bf16.xpose.msra.mxu1 %v1386_v7  ;;  %v7161_v7 = vpop.permute.xlu0 %3603  ;;  %v1608_v32 = vpop.permute.xlu2 %1607 }
 0x314   : > { %5429 = vmatmul.msk.bf16.gmra.mxu2 %vm10302_vm6, %v6951_v26  ;;  %v7169_v16 = vpop.permute.xlu1 %3822 }
 0x315   : > { %1401 = vmatpush.bf16.xpose.msra.mxu1 %v1383_v23  ;;  %v1444_v27 = vpop.permute.xlu0 %1443  ;;  %v7173_v0 = vpop.permute.xlu2 %3678 }
 0x316   : > { %v1464_v54 = vsel %vm10302_vm6, %v1444_v27, 0 }
 0x31c   : > { %5424 = vmatmul.msk.bf16.gmra.mxu1 %vm10302_vm6, %v6939_v36  ;;  %v7175_v23 = vpop.permute.xlu1 %1769 }
 0x31d   : > { %v7171_v6 = vpop.permute.xlu0 %1767 }
 0x324   : > { %v7181_v56 = vpop.permute.xlu1 %3824 }
 0x325   : > { %v7179_v26 = vpop.permute.xlu0 %3676 }
 0x32c   : > { %5425 = vmatmul.msk.bf16.gmra.mxu1 %vm10302_vm6, %v6967_v62 }
 0x32e   : > { %v1610_v46 = vpop.permute.xlu2 %1609 }
 0x336   : > { %v1772_v18 = vpop.permute.xlu2 %1771  ;;  %v1529_v52 = vpop.permute.xlu0 %1528 }
 0x337   : > { %v7185_v36 = vpop.permute.xlu1 %3753  ;;  %v1551_v57 = vsel %vm10302_vm6, %v1529_v52, 0  ;;  %v1467_v52 = vsel %vm10302_vm6, %v1446_v8, 0 }
 0x33c   : > { %5426 = vmatmul.msk.bf16.vlgmr.msra.gmra.mxu1 %vm10302_vm6, %v6958_v30 }
 0x33e   : > { %v1855_v55 = vpop.permute.xlu2 %1854  ;;  %v1691_v19 = vpop.permute.xlu0 %1690 }
 0x345   : > { %v1448_v13 = vpop.permute.xlu1 %1447 }
 0x346   : > { %v7187_v50 = vpop.permute.xlu2 %3680  ;;  %v1853_v58 = vpop.permute.xlu0 %1852 }
 0x34c   : > { %5427 = vmatmul.msk.bf16.gmra.mxu1 %vm10302_vm6, %v6897_v39  ;;  %v1548_v39 = vsel %vm10302_vm6, %v7108_v1, 0 }
 0x34d   : > { %v1531_v62 = vpop.permute.xlu1 %1530 }
 0x34e   : > { %v1554_v5 = vsel %vm10302_vm6, %v1531_v62, 0  ;;  %v7192_v31 = vpop.permute.xlu2 %3972  ;;  %v7194_v34 = vpop.permute.xlu0 %3970  ;;  %v1470_v62 = vsel %vm10302_vm6, %v1448_v13, 0 }
 0x34f   : > { %1560 = vmatpush.bf16.xpose.msrb.mxu1 %v1554_v5 }
 0x355   : > { %v1693_v40 = vpop.permute.xlu1 %1692 }
 0x356   : > { %v1450_v30 = vpop.permute.xlu2 %1449  ;;  %v7198_v3 = vpop.permute.xlu0 %3826  ;;  %v1716_v1 = vsel %vm10302_vm6, %v1693_v40, 0 }
 0x357   : > { %v1473_v48 = vsel %vm10302_vm6, %v1450_v30, 0  ;;  %1561 = vmatpush.bf16.xpose.msrb.mxu1 %v1551_v57 }
 0x358   : > { %1479 = vmatpush.bf16.xpose.msra.mxu3 %v1473_v48 }
 0x35d   : > { %v7203_v5 = vpop.permute.xlu1 %3682 }
 0x35e   : > { %v7205_v51 = vpop.permute.xlu0 %3755 }
 0x35f   : > { %1562 = vmatpush.bf16.xpose.msrb.mxu1 %v1548_v39 }
 0x360   : > { %1480 = vmatpush.bf16.xpose.msra.mxu3 %v1470_v62  ;;  %v1632_v62 = vsel %vm10302_vm6, %v1610_v46, 0  ;;  %v1794_v46 = vsel %vm10302_vm6, %v1772_v18, 0  ;;  %v1875_v18 = vsel %vm10302_vm6, %v1853_v58, 0  ;;  %v1872_v58 = vsel %vm10302_vm6, %v7165_v17, 0 }
 0x368   : > { %1481 = vmatpush.bf16.xpose.msra.mxu3 %v1467_v52  ;;  %v1713_v52 = vsel %vm10302_vm6, %v1691_v19, 0 }
 0x36d   : > { %v7208_v30 = vpop.permute.xlu1 %3828  ;;  %v1612_v48 = vpop.permute.xlu0 %1611 }
 0x36e   : > { %v1635_v57 = vsel %vm10302_vm6, %v1612_v48, 0  ;;  %v1629_v48 = vsel %vm10302_vm6, %v1608_v32, 0  ;;  %v1626_v32 = vsel %vm10302_vm6, %v7135_v49, 0 }
 0x36f   : > { %1641 = vmatpush.bf16.xpose.msrb.mxu2 %v1635_v57  ;;  %v1878_v57 = vsel %vm10302_vm6, %v1855_v55, 0 }
 0x370   : > { %1482 = vmatpush.bf16.xpose.msra.mxu3 %v1464_v54 }
 0x375   : > { %v7213_v13 = vpop.permute.xlu1 %3974  ;;  %v1774_v39 = vpop.permute.xlu0 %1773 }
 0x376   : > { %v1797_v8 = vsel %vm10302_vm6, %v1774_v39, 0 }
 0x377   : > { %5430 = vmatmul.msk.bf16.vlgmr.msra.gmra.mxu3 %vm10302_vm6, %v7008_v21  ;;  %1642 = vmatpush.bf16.xpose.msrb.mxu2 %v1632_v62  ;;  %v1710_v21 = vsel %vm10302_vm6, %v7159_v38, 0  ;;  %v1791_v38 = vsel %vm10302_vm6, %v7175_v23, 0  ;;  %v1788_v23 = vsel %vm10302_vm6, %v7171_v6, 0 }
 0x378   : > { %1722 = vmatpush.bf16.xpose.msrb.mxu3 %v1716_v1  ;;  %1803 = vmatpush.bf16.xpose.msrb.mxu0 %v1797_v8  ;;  %v1687_v1 = vpop.permute.xlu2 %1686 }
 0x379   : > { %v7220_v27 = vpop.f32.mrf.mxu1 }
 0x37d   : > { %v1525_v54 = vpop.permute.xlu1 %1524 }
 0x37e   : > { %v1545_v40 = vsel %vm10302_vm6, %v1525_v54, 0 }
 0x37f   : > { %1563 = vmatpush.bf16.xpose.msrb.mxu1 %v1545_v40  ;;  %1643 = vmatpush.bf16.xpose.msrb.mxu2 %v1629_v48 }
 0x380   : > { %1723 = vmatpush.bf16.xpose.msrb.mxu3 %v1713_v52  ;;  %1804 = vmatpush.bf16.xpose.msrb.mxu0 %v1794_v46  ;;  %v3750_v17 = vpop.permute.xlu2 %3749 }
 0x381   : > { %v7228_v19 = vpop.f32.mrf.mxu1 }
 0x386   : > { %5434 = vmatmul.msk.bf16.vlgmr.msrb.gmra.mxu1 %vm10302_vm6, %v7147_v45  ;;  %v1707_v45 = vsel %vm10302_vm6, %v1687_v1, 0 }
 0x387   : > { %1884 = vmatpush.bf16.xpose.msra.mxu1 %v1878_v57  ;;  %v7234_v55 = vpop.f32.mrf.mxu2  ;;  %5431 = vmatmul.msk.bf16.gmra.mxu3 %vm10302_vm6, %v7018_v41 }
 0x388   : > { %1724 = vmatpush.bf16.xpose.msrb.mxu3 %v1710_v21  ;;  %1644 = vmatpush.bf16.xpose.msrb.mxu2 %v1626_v32  ;;  %v1946_v39 = vsel %vm1909_vm7, %v7234_v55, -inf }
 0x389   : > { %1805 = vmatpush.bf16.xpose.msrb.mxu0 %v1791_v38  ;;  %v7244_v49 = vpop.f32.mrf.mxu1  ;;  %1947 = vmax.xlane.f32.xlu2 %v1946_v39 }
 0x38f   : > { %1885 = vmatpush.bf16.xpose.msra.mxu1 %v1875_v18  ;;  %v7250_v41 = vpop.f32.mrf.mxu2  ;;  %5438 = vmatmul.msk.bf16.vlgmr.msrb.gmra.mxu2 %vm10302_vm6, %v6969_v28  ;;  %v1849_v28 = vpop.permute.xlu0 %1848 }
 0x390   : > { %1725 = vmatpush.bf16.xpose.msrb.mxu3 %v1707_v45  ;;  %3558 = vmatpush.bf16.msra.mxu2 %v7118_v4  ;;  %v1949_v4 = vsel %vm1909_vm7, %v7250_v41, -inf }
 0x391   : > { %1806 = vmatpush.bf16.xpose.msrb.mxu0 %v1788_v23  ;;  %1950 = vmax.xlane.f32.xlu1 %v1949_v4 }
 0x394   : > { %3559 = vmatpush.bf16.msra.mxu2 %v7052_v9  ;;  %v1910_v9 = vsel %vm1909_vm7, %v7220_v27, -inf }
 0x395   : > { %1911 = vmax.xlane.f32.xlu2 %v1910_v9 }
 0x396   : > { %5435 = vmatmul.msk.bf16.gmra.mxu1 %vm10302_vm6, %v6987_v60 }
 0x397   : > { %1886 = vmatpush.bf16.xpose.msra.mxu1 %v1872_v58  ;;  %5432 = vmatmul.msk.bf16.gmra.mxu3 %vm10302_vm6, %v7058_v61 }
 0x398   : > { %3631 = vmatpush.bf16.msra.mxu3 %v7096_v59  ;;  %3560 = vmatpush.bf16.msra.mxu2 %v7042_v44  ;;  %v7271_v59 = vpop.f32.mrf.mxu2 }
 0x399   : > { %3704 = vmatpush.bf16.msra.mxu0 %v7203_v5 }
 0x39a   : > { %5446 = vmatmul.msk.bf16.vlgmr.msrb.gmra.mxu0 %vm10302_vm6, %v7006_v53  ;;  %v1916_v53 = vsel %vm1909_vm7, %v7244_v49, -inf }
 0x39c   : > { %3632 = vmatpush.bf16.msra.mxu3 %v7036_v10  ;;  %v7262_v10 = vpop.f32.mrf.mxu1  ;;  %3561 = vmatpush.bf16.msra.mxu2 %v6985_v29  ;;  %v1952_v29 = vsel %vm1909_vm7, %v7271_v59, -inf }
 0x39d   : > { %3705 = vmatpush.bf16.msra.mxu0 %v7187_v50  ;;  %1953 = vmax.xlane.f32.xlu2 %v1952_v29 }
 0x39f   : > { %5439 = vmatmul.msk.bf16.gmra.mxu2 %vm10302_vm6, %v7020_v42 }
 0x3a0   : > { %3633 = vmatpush.bf16.msra.mxu3 %v6965_v14  ;;  %3850 = vmatpush.bf16.msrb.mxu2 %v7208_v30  ;;  %v1913_v14 = vsel %vm1909_vm7, %v7228_v19, -inf  ;;  %v7291_v60 = vpop.f32.mrf.mxu2 }
 0x3a1   : > { %1914 = vmax.xlane.f32.xlu1 %v1913_v14  ;;  %3706 = vmatpush.bf16.msra.mxu0 %v7173_v0  ;;  %v1955_v61 = vsel %vm1909_vm7, %v7291_v60, -inf }
 0x3a2   : > { %1956 = vmax.xlane.f32.xlu0 %v1955_v61 }
 0x3a4   : > { %3634 = vmatpush.bf16.msra.mxu3 %v7161_v7  ;;  %v7283_v44 = vpop.f32.mrf.mxu1  ;;  %v1869_v7 = vsel %vm10302_vm6, %v1849_v28, 0  ;;  %3851 = vmatpush.bf16.msrb.mxu2 %v7198_v3 }
 0x3a5   : > { %1887 = vmatpush.bf16.xpose.msra.mxu1 %v1869_v7  ;;  %3707 = vmatpush.bf16.msra.mxu0 %v7179_v26  ;;  %v10341_v26 = vld [vmem:[#allocation6_spill] sm:$0xff] }
 0x3a6   : > { %5436 = vmatmul.msk.bf16.gmra.mxu1 %vm10302_vm6, %v7044_v35 }
 0x3a7   : > { %5433 = vmatmul.msk.bf16.gmra.mxu3 %vm10302_vm6, %v7094_v63 }
 0x3a8   : > { %3852 = vmatpush.bf16.msrb.mxu2 %v7181_v56  ;;  %v10343_v56 = vld [vmem:[#allocation8_spill] sm:$0xff] }
 0x3a9   : > { %3996 = vmatpush.bf16.msrb.mxu0 %v7213_v13  ;;  %1917 = vmax.xlane.f32.xlu1 %v1916_v53 }
 0x3aa   : > { %5447 = vmatmul.msk.bf16.gmra.mxu0 %vm10302_vm6, %v7010_v12  ;;  %v1922_v12 = vsel %vm1909_vm7, %v7283_v44, -inf }
 0x3ac   : > { %v7301_v3 = vpop.f32.mrf.mxu1  ;;  %3853 = vmatpush.bf16.msrb.mxu2 %v7169_v16 }
 0x3ad   : > { %3777 = vmatpush.bf16.msrb.mxu1 %v7205_v51  ;;  %v1925_v51 = vsel %vm1909_vm7, %v7301_v3, -inf  ;;  %3997 = vmatpush.bf16.msrb.mxu0 %v7192_v31 }
 0x3ae   : > { %1926 = vmax.xlane.f32.xlu2 %v1925_v51 }
 0x3af   : > { %5440 = vmatmul.msk.bf16.gmra.mxu2 %vm10302_vm6, %v7060_v2 }
 0x3b1   : > { %3778 = vmatpush.bf16.msrb.mxu1 %v7185_v36  ;;  %3998 = vmatpush.bf16.msrb.mxu0 %v7194_v34  ;;  %v10344_v36 = vld [vmem:[#allocation10_spill] sm:$0xff] }
 0x3b4   : > { %v7315_v42 = vpop.f32.mrf.mxu1 }
 0x3b5   : > { %3779 = vmatpush.bf16.msrb.mxu1 %v7129_v22  ;;  %v1919_v22 = vsel %vm1909_vm7, %v7262_v10, -inf  ;;  %v1928_v16 = vsel %vm1909_vm7, %v7315_v42, -inf  ;;  %3999 = vmatpush.bf16.msrb.mxu0 %v7145_v37 }
 0x3b6   : > { %1920 = vmax.xlane.f32.xlu0 %v1919_v22  ;;  %1929 = vmax.xlane.f32.xlu2 %v1928_v16 }
 0x3b7   : > { %5442 = vmatmul.msk.bf16.vlgmr.msrb.gmra.mxu3 %vm10302_vm6, %v7133_v43  ;;  %5437 = vmatmul.msk.bf16.gmra.mxu1 %vm10302_vm6, %v7070_v25 }
 0x3b9   : > { %3780 = vmatpush.bf16.msrb.mxu1 %v3750_v17 }
 0x3ba   : > { %5448 = vmatmul.msk.bf16.gmra.mxu0 %vm10302_vm6, %v7072_v33 }
 0x3bc   : > { %v7324_v34 = vpop.f32.mrf.mxu1 }
 0x3bd   : > { %v1931_v35 = vsel %vm1909_vm7, %v7324_v34, -inf }
 0x3be   : > { %1923 = vmax.xlane.f32.xlu0 %v1922_v12  ;;  %1932 = vmax.xlane.f32.xlu1 %v1931_v35 }
 0x3bf   : > { %5441 = vmatmul.msk.bf16.gmra.mxu2 %vm10302_vm6, %v7116_v20 }
 0x3c4   : > { %v7336_v2 = vpop.f32.mrf.mxu1 }
 0x3c5   : > { %v1934_v63 = vsel %vm1909_vm7, %v7336_v2, -inf }
 0x3c6   : > { %1935 = vmax.xlane.f32.xlu2 %v1934_v63 }
 0x3c7   : > { %5443 = vmatmul.msk.bf16.gmra.mxu3 %vm10302_vm6, %v6978_v11  ;;  %5450 = vmatmul.msk.bf16.vlgmr.msra.gmra.mxu1 %vm10302_vm6, %v7149_v47 }
 0x3ca   : > { %5449 = vmatmul.msk.bf16.gmra.mxu0 %vm10302_vm6, %v7131_v24  ;;  %v10342_v24 = vld [vmem:[#allocation9_spill] sm:$0xff] }
 0x3cc   : > { %v7342_v37 = vpop.f32.mrf.mxu1 }
 0x3cd   : > { %v1937_v6 = vsel %vm1909_vm7, %v7342_v37, -inf }
 0x3ce   : > { %1938 = vmax.xlane.f32.xlu1 %v1937_v6 }
 0x3d4   : > { %v7352_v25 = vpop.f32.mrf.mxu1 }
 0x3d5   : > { %v1940_v33 = vsel %vm1909_vm7, %v7352_v25, -inf }
 0x3d6   : > { %1941 = vmax.xlane.f32.xlu2 %v1940_v33 }
 0x3d7   : > { %5444 = vmatmul.msk.bf16.gmra.mxu3 %vm10302_vm6, %v7054_v15  ;;  %5451 = vmatmul.msk.bf16.gmra.mxu1 %vm10302_vm6, %v10341_v26 }
 0x3dc   : > { %v7356_v20 = vpop.f32.mrf.mxu1 }
 0x3dd   : > { %v1943_v0 = vsel %vm1909_vm7, %v7356_v20, -inf }
 0x3de   : > { %1944 = vmax.xlane.f32.xlu1 %v1943_v0 }
 0x3e7   : > { %5445 = vmatmul.msk.bf16.gmra.mxu3 %vm10302_vm6, %v10342_v24  ;;  %5452 = vmatmul.msk.bf16.gmra.mxu1 %vm10302_vm6, %v10343_v56 }
 0x3f7   : > { %5453 = vmatmul.msk.bf16.gmra.mxu1 %vm10302_vm6, %v10344_v36 }
 0x3fa   : > { %v7385_v57 = vpop.f32.mrf.mxu3 }
 0x3fb   : > { %v1958_v4 = vsel %vm1909_vm7, %v7385_v57, -inf }
 0x3fc   : > { %v1948_v5 = vpop.xlane.xlu2 %1947 }
 0x3fd   : > { %v2114_v30 = vsub.f32 %v7234_v55, %v1948_v5 }
 0x3ff   : > { %v2190_v8 = vmul.f32 1.442695, %v2114_v30 }
 0x401   : > { %5872 = vpow2.f32 %v2190_v8 }
 0x402   : > { %v7406_v9 = vpop.f32.mrf.mxu3 }
 0x403   : > { %v7370_v50 = vpop.f32.mrf.mxu1  ;;  %v1961_v29 = vsel %vm1909_vm7, %v7406_v9, -inf }
 0x404   : > { %v1982_v31 = vsel %vm1909_vm7, %v7370_v50, -inf  ;;  %v1951_v40 = vpop.xlane.xlu1 %1950 }
 0x405   : > { %1983 = vmax.xlane.f32.xlu2 %v1982_v31  ;;  %v2115_v22 = vsub.f32 %v7250_v41, %v1951_v40 }
 0x407   : > { %v7393_v32 = vpop.eup %5872  ;;  %v2192_v33 = vmul.f32 1.442695, %v2115_v22 }
 0x408   : > { %10345 = vst [vmem:[#allocation13_spill] sm:$0xff] %v7393_v32  ;;  %v1912_v55 = vpop.xlane.xlu2 %1911  ;;  %v2330_v18 = vsel %vm1909_vm7, %v7393_v32, 0.0 }
 0x409   : > { %v2102_v39 = vsub.f32 %v7220_v27, %v1912_v55 }
 0x40a   : > { %v7417_v51 = vpop.f32.mrf.mxu3 }
 0x40b   : > { %v7375_v13 = vpop.f32.mrf.mxu1  ;;  %v2166_v28 = vmul.f32 1.442695, %v2102_v39 }
 0x40c   : > { %v1985_v62 = vsel %vm1909_vm7, %v7375_v13, -inf }
 0x40d   : > { %1986 = vmax.xlane.f32.xlu1 %v1985_v62  ;;  %5874 = vpow2.f32 %v2166_v28 }
 0x410   : > { %v1954_v8 = vpop.xlane.xlu2 %1953 }
 0x412   : > { %v7379_v52 = vpop.f32.mrf.mxu2  ;;  %v7434_v31 = vpop.f32.mrf.mxu3 }
 0x413   : > { %v2006_v54 = vsel %vm1909_vm7, %v7379_v52, -inf  ;;  %v7383_v48 = vpop.f32.mrf.mxu1  ;;  %v7421_v17 = vpop.eup %5874  ;;  %v1967_v62 = vsel %vm1909_vm7, %v7434_v31, -inf }
 0x414   : > { %2007 = vmax.xlane.f32.xlu2 %v2006_v54  ;;  %v1988_v21 = vsel %vm1909_vm7, %v7383_v48, -inf  ;;  %v1915_v58 = vpop.xlane.xlu1 %1914  ;;  %v2294_v12 = vsel %vm1909_vm7, %v7421_v17, 0.0 }
 0x415   : > { %1989 = vmax.xlane.f32.xlu1 %v1988_v21  ;;  %v2103_v14 = vsub.f32 %v7228_v19, %v1915_v58  ;;  %v1957_v6 = vpop.xlane.xlu0 %1956  ;;  %v1964_v21 = vsel %vm1909_vm7, %v7417_v51, -inf }
 0x416   : > { %v2117_v5 = vsub.f32 %v7291_v60, %v1957_v6  ;;  %v2116_v60 = vsub.f32 %v7271_v59, %v1954_v8 }
 0x417   : > { %v7387_v46 = vpop.f32.mrf.mxu0  ;;  %v2168_v27 = vmul.f32 1.442695, %v2103_v14 }
 0x418   : > { %v2054_v1 = vsel %vm1909_vm7, %v7387_v46, -inf  ;;  %v2196_v54 = vmul.f32 1.442695, %v2117_v5  ;;  %v2194_v28 = vmul.f32 1.442695, %v2116_v60 }
 0x419   : > { %2055 = vmax.xlane.f32.xlu0 %v2054_v1  ;;  %5876 = vpow2.f32 %v2168_v27 }
 0x41a   : > { %v7395_v38 = vpop.f32.mrf.mxu2  ;;  %5878 = vpow2.f32 %v2192_v33  ;;  %v7472_v33 = vpop.f32.mrf.mxu3 }
 0x41b   : > { %v2009_v23 = vsel %vm1909_vm7, %v7395_v38, -inf  ;;  %v7415_v61 = vpop.f32.mrf.mxu1  ;;  %5880 = vpow2.f32 %v2196_v54 }
 0x41c   : > { %2331 = vadd.xlane.f32.xlu2 %v2330_v18  ;;  %v1991_v19 = vsel %vm1909_vm7, %v7415_v61, -inf  ;;  %5882 = vpow2.f32 %v2194_v28  ;;  %v1970_v28 = vsel %vm1909_vm7, %v7472_v33, -inf }
 0x41d   : > { %2010 = vmax.xlane.f32.xlu1 %v2009_v23 }
 0x41f   : > { %v7400_v45 = vpop.f32.mrf.mxu0  ;;  %v7430_v63 = vpop.eup %5876 }
 0x420   : > { %v2057_v53 = vsel %vm1909_vm7, %v7400_v45, -inf  ;;  %v2297_v0 = vsel %vm1909_vm7, %v7430_v63, 0.0  ;;  %v7445_v1 = vpop.eup %5878 }
 0x421   : > { %1959 = vmax.xlane.f32.xlu0 %v1958_v4  ;;  %10346 = vst [vmem:[#allocation14_spill] sm:$0xff] %v7445_v1  ;;  %v2333_v58 = vsel %vm1909_vm7, %v7445_v1, 0.0  ;;  %v7461_v59 = vpop.eup %5880 }
 0x422   : > { %v7436_v41 = vpop.f32.mrf.mxu2  ;;  %10347 = vst [vmem:[#allocation15_spill] sm:$0xff] %v7461_v59 }
 0x423   : > { %v7447_v55 = vpop.f32.mrf.mxu1  ;;  %v2012_v22 = vsel %vm1909_vm7, %v7436_v41, -inf }
 0x424   : > { %1962 = vmax.xlane.f32.xlu2 %v1961_v29  ;;  %v1918_v29 = vpop.xlane.xlu1 %1917  ;;  %v1994_v27 = vsel %vm1909_vm7, %v7447_v55, -inf }
 0x427   : > { %v7411_v7 = vpop.f32.mrf.mxu0 }
 0x428   : > { %v2060_v30 = vsel %vm1909_vm7, %v7411_v7, -inf }
 0x429   : > { %2058 = vmax.xlane.f32.xlu0 %v2057_v53  ;;  %v1921_v40 = vpop.xlane.xlu0 %1920 }
 0x42a   : > { %v2105_v39 = vsub.f32 %v7262_v10, %v1921_v40  ;;  %v7453_v23 = vpop.f32.mrf.mxu2  ;;  %v2104_v10 = vsub.f32 %v7244_v49, %v1918_v29  ;;  %v7475_v49 = vpop.eup %5882 }
 0x42b   : > { %v7464_v53 = vpop.f32.mrf.mxu1  ;;  %10348 = vst [vmem:[#allocation16_spill] sm:$0xff] %v7475_v49  ;;  %v2336_v8 = vsel %vm1909_vm7, %v7475_v49, 0.0 }
 0x42c   : > { %1992 = vmax.xlane.f32.xlu2 %v1991_v19  ;;  %v2172_v14 = vmul.f32 1.442695, %v2105_v39  ;;  %v2170_v6 = vmul.f32 1.442695, %v2104_v10  ;;  %v7493_v39 = vpop.f32.mrf.mxu3 }
 0x42e   : > { %5884 = vpow2.f32 %v2172_v14 }
 0x42f   : > { %v7424_v16 = vpop.f32.mrf.mxu0  ;;  %5886 = vpow2.f32 %v2170_v6 }
 0x430   : > { %v2063_v35 = vsel %vm1909_vm7, %v7424_v16, -inf }
 0x431   : > { %2295 = vadd.xlane.f32.xlu0 %v2294_v12  ;;  %2064 = vmax.xlane.f32.xlu1 %v2063_v35  ;;  %v1924_v19 = vpop.xlane.xlu0 %1923  ;;  %v2339_v12 = vsel %vm1909_vm7, %v7461_v59, 0.0 }
 0x432   : > { %v7470_v35 = vpop.f32.mrf.mxu2 }
 0x433   : > { %v2018_v5 = vsel %vm1909_vm7, %v7470_v35, -inf }
 0x434   : > { %2298 = vadd.xlane.f32.xlu2 %v2297_v0  ;;  %v2106_v0 = vsub.f32 %v7283_v44, %v1924_v19  ;;  %v7485_v40 = vpop.f32.mrf.mxu1 }
 0x435   : > { %v2000_v6 = vsel %vm1909_vm7, %v7485_v40, -inf }
 0x437   : > { %v7449_v18 = vpop.f32.mrf.mxu0 }
 0x438   : > { %v2066_v4 = vsel %vm1909_vm7, %v7449_v18, -inf }
 0x439   : > { %2061 = vmax.xlane.f32.xlu0 %v2060_v30  ;;  %1968 = vmax.xlane.f32.xlu1 %v1967_v62  ;;  %v7479_v30 = vpop.eup %5884  ;;  %v2174_v62 = vmul.f32 1.442695, %v2106_v0 }
 0x43a   : > { %v2303_v54 = vsel %vm1909_vm7, %v7479_v30, 0.0  ;;  %v7491_v60 = vpop.eup %5886  ;;  %v7514_v0 = vpop.f32.mrf.mxu2 }
 0x43b   : > { %5888 = vpow2.f32 %v2174_v62 }
 0x43c   : > { %1965 = vmax.xlane.f32.xlu2 %v1964_v21 }
 0x43f   : > { %v7487_v21 = vpop.f32.mrf.mxu0 }
 0x440   : > { %v2069_v44 = vsel %vm1909_vm7, %v7487_v21, -inf }
 0x441   : > { %2334 = vadd.xlane.f32.xlu0 %v2333_v58  ;;  %2067 = vmax.xlane.f32.xlu1 %v2066_v4  ;;  %v1927_v58 = vpop.xlane.xlu2 %1926  ;;  %v2300_v4 = vsel %vm1909_vm7, %v7491_v60, 0.0  ;;  %v7499_v14 = vpop.eup %5888 }
 0x442   : > { %v2107_v29 = vsub.f32 %v7301_v3, %v1927_v58  ;;  %v2306_v10 = vsel %vm1909_vm7, %v7499_v14, 0.0 }
 0x444   : > { %1995 = vmax.xlane.f32.xlu2 %v1994_v27  ;;  %v7502_v27 = vpop.f32.mrf.mxu1  ;;  %v2176_v19 = vmul.f32 1.442695, %v2107_v29 }
 0x445   : > { %10349 = vst [vmem:[#allocation17_spill] sm:$0xff] %v7502_v27  ;;  %v2003_v3 = vsel %vm1909_vm7, %v7502_v27, -inf }
 0x446   : > { %5890 = vpow2.f32 %v2176_v19  ;;  %v1933_v19 = vpop.xlane.xlu1 %1932 }
 0x449   : > { %2013 = vmax.xlane.f32.xlu0 %v2012_v22  ;;  %2340 = vadd.xlane.f32.xlu1 %v2339_v12  ;;  %v7506_v22 = vpop.f32.mrf.mxu3  ;;  %v2015_v12 = vsel %vm1909_vm7, %v7453_v23, -inf  ;;  %v1930_v62 = vpop.xlane.xlu2 %1929 }
 0x44c   : > { %2019 = vmax.xlane.f32.xlu2 %v2018_v5  ;;  %v7516_v5 = vpop.f32.mrf.mxu1 }
 0x44d   : > { %10350 = vst [vmem:[#allocation18_spill] sm:$0xff] %v7516_v5 }
 0x451   : > { %2337 = vadd.xlane.f32.xlu0 %v2336_v8  ;;  %2304 = vadd.xlane.f32.xlu1 %v2303_v54  ;;  %v1997_v8 = vsel %vm1909_vm7, %v7464_v53, -inf  ;;  %v2021_v54 = vsel %vm1909_vm7, %v7514_v0, -inf  ;;  %v7524_v58 = vpop.f32.mrf.mxu3 }
 0x452   : > { %10352 = vst [vmem:[#allocation20_spill] sm:$0xff] %v7524_v58  ;;  %v1979_v32 = vsel %vm1909_vm7, %v7524_v58, -inf }
 0x454   : > { %2070 = vmax.xlane.f32.xlu2 %v2069_v44  ;;  %v7522_v44 = vpop.eup %5890 }
 0x455   : > { %10351 = vst [vmem:[#allocation19_spill] sm:$0xff] %v7522_v44 }
 0x459   : > { %2301 = vadd.xlane.f32.xlu0 %v2300_v4  ;;  %1971 = vmax.xlane.f32.xlu1 %v1970_v28  ;;  %v2108_v4 = vsub.f32 %v7315_v42, %v1930_v62  ;;  %v2309_v28 = vsel %vm1909_vm7, %v7522_v44, 0.0  ;;  %v7537_v42 = vpop.f32.mrf.mxu0  ;;  %v2078_v62 = vsel %vm1909_vm7, %v7516_v5, -inf }
 0x45a   : > { %v2072_v56 = vsel %vm1909_vm7, %v7537_v42, -inf }
 0x45b   : > { %v2178_v29 = vmul.f32 1.442695, %v2108_v4  ;;  %v2109_v4 = vsub.f32 %v7324_v34, %v1933_v19 }
 0x45c   : > { %2307 = vadd.xlane.f32.xlu2 %v2306_v10  ;;  %v7529_v10 = vpop.f32.mrf.mxu1 }
 0x45d   : > { %10353 = vst [vmem:[#allocation21_spill] sm:$0xff] %v7529_v10  ;;  %5892 = vpow2.f32 %v2178_v29  ;;  %v2180_v36 = vmul.f32 1.442695, %v2109_v4 }
 0x45f   : > { %5894 = vpow2.f32 %v2180_v36 }
 0x461   : > { %2016 = vmax.xlane.f32.xlu0 %v2015_v12  ;;  %2001 = vmax.xlane.f32.xlu1 %v2000_v6  ;;  %v1936_v12 = vpop.xlane.xlu2 %1935  ;;  %v1973_v6 = vsel %vm1909_vm7, %v7493_v39, -inf  ;;  %v7556_v34 = vpop.f32.mrf.mxu0 }
 0x462   : > { %10358 = vst [vmem:[#allocation26_spill] sm:$0xff] %v7556_v34  ;;  %v2110_v36 = vsub.f32 %v7336_v2, %v1936_v12 }
 0x464   : > { %2004 = vmax.xlane.f32.xlu2 %v2003_v3  ;;  %v1976_v3 = vsel %vm1909_vm7, %v7506_v22, -inf }
 0x469   : > { %1998 = vmax.xlane.f32.xlu0 %v1997_v8  ;;  %2022 = vmax.xlane.f32.xlu1 %v2021_v54  ;;  %v7535_v8 = vpop.f32.mrf.mxu3  ;;  %v7541_v54 = vpop.f32.mrf.mxu2 }
 0x46a   : > { %10354 = vst [vmem:[#allocation22_spill] sm:$0xff] %v7535_v8  ;;  %v1942_v47 = vpop.xlane.xlu2 %1941  ;;  %v2024_v29 = vsel %vm1909_vm7, %v7541_v54, -inf  ;;  %v2030_v2 = vsel %vm1909_vm7, %v7535_v8, -inf }
 0x46c   : > { %2310 = vadd.xlane.f32.xlu2 %v2309_v28  ;;  %v1939_v28 = vpop.xlane.xlu1 %1938 }
 0x46d   : > { %v2111_v1 = vsub.f32 %v7342_v37, %v1939_v28 }
 0x471   : > { %1974 = vmax.xlane.f32.xlu0 %v1973_v6  ;;  %1977 = vmax.xlane.f32.xlu1 %v1976_v3  ;;  %v7548_v6 = vpop.eup %5892  ;;  %v7550_v3 = vpop.f32.mrf.mxu1 }
 0x472   : > { %10355 = vst [vmem:[#allocation23_spill] sm:$0xff] %v7548_v6  ;;  %v7554_v59 = vpop.f32.mrf.mxu3  ;;  %v2084_v12 = vsel %vm1909_vm7, %v7550_v3, -inf }
 0x473   : > { %10356 = vst [vmem:[#allocation24_spill] sm:$0xff] %v7550_v3 }
 0x474   : > { %2079 = vmax.xlane.f32.xlu2 %v2078_v62  ;;  %v2312_v62 = vsel %vm1909_vm7, %v7548_v6, 0.0  ;;  %10357 = vst [vmem:[#allocation25_spill] sm:$0xff] %v7554_v59  ;;  %v1945_v19 = vpop.xlane.xlu1 %1944 }
 0x475   : > { %v2113_v3 = vsub.f32 %v7356_v20, %v1945_v19 }
 0x478   : > { %v7558_v49 = vpop.xlane.xlu2 %1983 }
 0x479   : > { %2073 = vmax.xlane.f32.xlu0 %v2072_v56  ;;  %2025 = vmax.xlane.f32.xlu1 %v2024_v29  ;;  %v2075_v56 = vsel %vm1909_vm7, %v7556_v34, -inf  ;;  %v7564_v29 = vpop.f32.mrf.mxu2  ;;  %v7566_v4 = vpop.f32.mrf.mxu1 }
 0x47a   : > { %10359 = vst [vmem:[#allocation27_spill] sm:$0xff] %v7564_v29  ;;  %v2027_v26 = vsel %vm1909_vm7, %v7564_v29, -inf  ;;  %v7574_v15 = vpop.f32.mrf.mxu3  ;;  %v2182_v29 = vmul.f32 1.442695, %v2110_v36  ;;  %v2087_v28 = vsel %vm1909_vm7, %v7566_v4, -inf }
 0x47b   : > { %10360 = vst [vmem:[#allocation28_spill] sm:$0xff] %v7566_v4  ;;  %v2036_v20 = vsel %vm1909_vm7, %v7574_v15, -inf }
 0x47c   : > { %2313 = vadd.xlane.f32.xlu2 %v2312_v62  ;;  %v7570_v62 = vpop.eup %5894  ;;  %10362 = vst [vmem:[#allocation30_spill] sm:$0xff] %v7574_v15  ;;  %5896 = vpow2.f32 %v2182_v29  ;;  %v2033_v29 = vsel %vm1909_vm7, %v7554_v59, -inf }
 0x47d   : > { %10361 = vst [vmem:[#allocation29_spill] sm:$0xff] %v7570_v62 }
 0x480   : > { %v7576_v43 = vpop.xlane.xlu1 %1986 }
 0x481   : > { %1980 = vmax.xlane.f32.xlu0 %v1979_v32  ;;  %2076 = vmax.xlane.f32.xlu1 %v2075_v56  ;;  %v2081_v32 = vsel %vm1909_vm7, %v7529_v10, -inf  ;;  %v2315_v56 = vsel %vm1909_vm7, %v7570_v62, 0.0  ;;  %v7588_v37 = vpop.f32.mrf.mxu1  ;;  %v2188_v62 = vmul.f32 1.442695, %v2113_v3 }
 0x482   : > { %10363 = vst [vmem:[#allocation31_spill] sm:$0xff] %v7588_v37  ;;  %v7596_v36 = vpop.f32.mrf.mxu3  ;;  %v2090_v19 = vsel %vm1909_vm7, %v7588_v37, -inf }
 0x483   : > { %10365 = vst [vmem:[#allocation33_spill] sm:$0xff] %v7596_v36  ;;  %v2039_v58 = vsel %vm1909_vm7, %v7596_v36, -inf }
 0x484   : > { %2028 = vmax.xlane.f32.xlu2 %v2027_v26  ;;  %v2184_v26 = vmul.f32 1.442695, %v2111_v1 }
 0x486   : > { %5898 = vpow2.f32 %v2184_v26 }
 0x487   : > { %v7582_v34 = vpop.xlane.xlu2 %2007 }
 0x488   : > { %v7598_v1 = vpop.xlane.xlu1 %1989 }
 0x489   : > { %2082 = vmax.xlane.f32.xlu0 %v2081_v32  ;;  %2316 = vadd.xlane.f32.xlu1 %v2315_v56  ;;  %v7600_v56 = vpop.eup %5896  ;;  %v7610_v4 = vpop.f32.mrf.mxu1 }
 0x48a   : > { %10366 = vst [vmem:[#allocation34_spill] sm:$0xff] %v7600_v56  ;;  %v7618_v6 = vpop.f32.mrf.mxu3 }
 0x48b   : > { %10368 = vst [vmem:[#allocation36_spill] sm:$0xff] %v7610_v4 }
 0x48c   : > { %v7584_v11 = vpop.xlane.xlu0 %2055  ;;  %2031 = vmax.xlane.f32.xlu2 %v2030_v2  ;;  %v7606_v26 = vpop.eup %5898  ;;  %v2112_v2 = vsub.f32 %v7352_v25, %v1942_v47  ;;  %v2093_v25 = vsel %vm1909_vm7, %v7610_v4, -inf }
 0x48d   : > { %10367 = vst [vmem:[#allocation35_spill] sm:$0xff] %v7606_v26 }
 0x48e   : > { %v2186_v59 = vmul.f32 1.442695, %v2112_v2  ;;  %v2126_v2 = vsub.f32 %v7370_v50, %v7558_v49 }
 0x48f   : > { %v7594_v32 = vpop.xlane.xlu2 %2331 }
 0x490   : > { %10364 = vst [vmem:[#allocation32_spill] sm:$0xff] %v7594_v32  ;;  %5900 = vpow2.f32 %v2186_v59  ;;  %v2214_v15 = vmul.f32 1.442695, %v2126_v2 }
 0x491   : > { %2085 = vmax.xlane.f32.xlu0 %v2084_v12  ;;  %2088 = vmax.xlane.f32.xlu1 %v2087_v28  ;;  %v2318_v12 = vsel %vm1909_vm7, %v7600_v56, 0.0  ;;  %v2321_v28 = vsel %vm1909_vm7, %v7606_v26, 0.0  ;;  %5902 = vpow2.f32 %v2188_v62  ;;  %v7630_v3 = vpop.f32.mrf.mxu1 }
 0x492   : > { %10369 = vst [vmem:[#allocation37_spill] sm:$0xff] %v7630_v3  ;;  %v2096_v62 = vsel %vm1909_vm7, %v7630_v3, -inf  ;;  %v7642_v37 = vpop.f32.mrf.mxu3 }
 0x493   : > { %10372 = vst [vmem:[#allocation40_spill] sm:$0xff] %v7642_v37 }
 0x494   : > { %v7602_v8 = vpop.xlane.xlu0 %1959  ;;  %2034 = vmax.xlane.f32.xlu2 %v2033_v29  ;;  %v2011_v29 = vpop.xlane.xlu1 %2010 }
 0x497   : > { %v7616_v24 = vpop.xlane.xlu2 %1962 }
 0x499   : > { %2319 = vadd.xlane.f32.xlu0 %v2318_v12  ;;  %2322 = vadd.xlane.f32.xlu1 %v2321_v28  ;;  %v7634_v28 = vpop.eup %5900 }
 0x49a   : > { %10370 = vst [vmem:[#allocation38_spill] sm:$0xff] %v7634_v28  ;;  %v7640_v4 = vpop.eup %5902  ;;  %v2324_v49 = vsel %vm1909_vm7, %v7634_v28, 0.0  ;;  %v7659_v28 = vpop.f32.mrf.mxu3 }
 0x49b   : > { %10371 = vst [vmem:[#allocation39_spill] sm:$0xff] %v7640_v4  ;;  %v2327_v50 = vsel %vm1909_vm7, %v7640_v4, 0.0 }
 0x49c   : > { %v7620_v47 = vpop.xlane.xlu0 %2058  ;;  %2094 = vmax.xlane.f32.xlu2 %v2093_v25 }
 0x49f   : > { %v7628_v12 = vpop.xlane.xlu2 %1992 }
 0x4a1   : > { %2037 = vmax.xlane.f32.xlu0 %v2036_v20  ;;  %2091 = vmax.xlane.f32.xlu1 %v2090_v19  ;;  %v2127_v20 = vsub.f32 %v7375_v13, %v7576_v43  ;;  %v2045_v43 = vsel %vm1909_vm7, %v7642_v37, -inf  ;;  %v7657_v13 = vpop.f32.mrf.mxu1 }
 0x4a2   : > { %10373 = vst [vmem:[#allocation41_spill] sm:$0xff] %v7657_v13  ;;  %v2099_v32 = vsel %vm1909_vm7, %v7657_v13, -inf }
 0x4a3   : > { %v2216_v3 = vmul.f32 1.442695, %v2127_v20 }
 0x4a4   : > { %v7636_v25 = vpop.xlane.xlu1 %2064  ;;  %v2296_v59 = vpop.xlane.xlu0 %2295  ;;  %2097 = vmax.xlane.f32.xlu2 %v2096_v62 }
 0x4a5   : > { %5904 = vrcp.f32 %v2296_v59  ;;  %v2497_v20 = vand.u32 2147483648, %v2296_v59  ;;  %vm2491_vm9 = vweird.f32 %v2296_v59 }
 0x4a7   : > { %v7650_v19 = vpop.xlane.xlu2 %2298  ;;  %v2498_v36 = vor.u32 1.1754944e-38, %v2497_v20 }
 0x4a8   : > { %5906 = vrcp.f32 %v7650_v19  ;;  %vm2506_vm13 = vweird.f32 %v7650_v19 }
 0x4a9   : > { %2328 = vadd.xlane.f32.xlu0 %v2327_v50  ;;  %2325 = vadd.xlane.f32.xlu1 %v2324_v49  ;;  %5908 = vpow2.f32 %v2214_v15  ;;  %v2135_v50 = vsub.f32 %v7395_v38, %v2011_v29  ;;  %v2495_v15 = vand.u32 2147483647, %v2296_v59  ;;  %v2118_v38 = vsub.f32 %v7385_v57, %v7602_v8 }
 0x4aa   : > { %5910 = vpow2.f32 %v2216_v3 }
 0x4ab   : > { %v5905_v62 = vpop.eup %5904  ;;  %vm2496_vm11 = vcmp.eq.f32.partialorder %v2495_v15, 8.507059e+37  ;;  %v2198_v15 = vmul.f32 1.442695, %v2118_v38 }
 0x4ac   : > { %v7653_v56 = vpop.xlane.xlu1 %1968  ;;  %v2062_v2 = vpop.xlane.xlu0 %2061  ;;  %v2487_v4 = vmul.f32 %v5905_v62, %v2296_v59  ;;  %2046 = vmax.xlane.f32.xlu2 %v2045_v43  ;;  %vm2492_vm8 = vweird.f32 %v5905_v62  ;;  %v2510_v59 = vand.u32 2147483647, %v7650_v19 }
 0x4ad   : > { %vm7673_vm10 = vmor %vm2491_vm9, %vm2492_vm8 }
 0x4ae   : > { %v2488_v49 = vsub.f32 1.0, %v2487_v4  ;;  %v5907_v26 = vpop.eup %5906  ;;  %v2232_v4 = vmul.f32 1.442695, %v2135_v50  ;;  %v2150_v50 = vsub.f32 %v7387_v46, %v7584_v11  ;;  %v7698_v11 = vpop.f32.mrf.mxu3  ;;  %vm2511_vm15 = vcmp.eq.f32.partialorder %v2510_v59, 8.507059e+37 }
 0x4af   : > { %v7666_v37 = vpop.xlane.xlu2 %1965  ;;  %v7668_v5 = vpop.eup %5908  ;;  %v2502_v3 = vmul.f32 %v5907_v26, %v7650_v19  ;;  %vm2507_vm12 = vweird.f32 %v5907_v26 }
 0x4b0   : > { %10374 = vst [vmem:[#allocation42_spill] sm:$0xff] %v7668_v5  ;;  %v2489_v43 = vmul.f32 %v5905_v62, %v2488_v49  ;;  %v2512_v49 = vand.u32 2147483648, %v7650_v19  ;;  %v7684_v57 = vpop.eup %5910  ;;  %5912 = vpow2.f32 %v2232_v4  ;;  %vm2508_vm14 = vmor %vm2506_vm13, %vm2507_vm12 }
 0x4b1   : > { %2100 = vmax.xlane.f32.xlu0 %v2099_v32  ;;  %2040 = vmax.xlane.f32.xlu1 %v2039_v58  ;;  %v2503_v13 = vsub.f32 1.0, %v2502_v3  ;;  %v2366_v58 = vsel %vm1909_vm7, %v7668_v5, 0.0  ;;  %v2152_v3 = vsub.f32 %v7411_v7, %v2062_v2  ;;  %v2369_v10 = vsel %vm1909_vm7, %v7684_v57, 0.0 }
 0x4b2   : > { %v2490_v29 = vadd.f32 %v5905_v62, %v2489_v43  ;;  %v2513_v5 = vor.u32 1.1754944e-38, %v2512_v49  ;;  %v2134_v7 = vsub.f32 %v7379_v52, %v7582_v34  ;;  %5914 = vpow2.f32 %v2198_v15 }
 0x4b3   : > { %v2504_v32 = vmul.f32 %v5907_v26, %v2503_v13  ;;  %v2266_v2 = vmul.f32 1.442695, %v2152_v3 }
 0x4b4   : > { %v7678_v27 = vpop.xlane.xlu1 %2067  ;;  %v7680_v44 = vpop.xlane.xlu0 %2334  ;;  %v2494_v8 = vsel %vm7673_vm10, %v5905_v62, %v2490_v29  ;;  %2367 = vadd.xlane.f32.xlu2 %v2366_v58  ;;  %v2042_v62 = vsel %vm1909_vm7, %v7618_v6, -inf  ;;  %v2230_v34 = vmul.f32 1.442695, %v2134_v7 }
 0x4b5   : > { %v2499_v20 = vsel %vm2496_vm11, %v2498_v36, %v2494_v8  ;;  %v2505_v43 = vadd.f32 %v5907_v26, %v2504_v32  ;;  %v2262_v36 = vmul.f32 1.442695, %v2150_v50  ;;  %v2048_v32 = vsel %vm1909_vm7, %v7659_v28, -inf }
 0x4b6   : > { %v2500_v29 = vmul.f32 %v7421_v17, %v2499_v20  ;;  %v2051_v17 = vsel %vm1909_vm7, %v7698_v11, -inf  ;;  %v7709_v58 = vpop.eup %5912 }
 0x4b7   : > { %v1996_v13 = vpop.xlane.xlu2 %1995  ;;  %v2509_v46 = vsel %vm2508_vm14, %v5907_v26, %v2505_v43  ;;  %5916 = vpow2.f32 %v2262_v36  ;;  %v2393_v8 = vsel %vm1909_vm7, %v7709_v58, 0.0 }
 0x4b8   : > { %v2514_v19 = vsel %vm2511_vm15, %v2513_v5, %v2509_v46  ;;  %v3446_v26 = vpack.c.bf16 %v2500_v29, %v2500_v29  ;;  %v2128_v5 = vsub.f32 %v7383_v48, %v7598_v1  ;;  %5918 = vpow2.f32 %v2266_v2  ;;  %v7721_v20 = vpop.eup %5914 }
 0x4b9   : > { %2370 = vadd.xlane.f32.xlu0 %v2369_v10  ;;  %2043 = vmax.xlane.f32.xlu1 %v2042_v62  ;;  %v2515_v38 = vmul.f32 %v7430_v63, %v2514_v19  ;;  %v2153_v63 = vsub.f32 %v7424_v16, %v7636_v25  ;;  %5920 = vpow2.f32 %v2230_v34  ;;  %v2151_v16 = vsub.f32 %v7400_v45, %v7620_v47 }
 0x4ba   : > { %v3518_v50 = vunpack.c.l.b16 %v3446_v26  ;;  %v2218_v48 = vmul.f32 1.442695, %v2128_v5  ;;  %v2342_v62 = vsel %vm1909_vm7, %v7721_v20, 0.0  ;;  %v2119_v46 = vsub.f32 %v7406_v9, %v7616_v24 }
 0x4bb   : > { %v3447_v52 = vpack.c.bf16 %v2515_v38, %v2515_v38  ;;  %v2268_v25 = vmul.f32 1.442695, %v2153_v63  ;;  %v2264_v45 = vmul.f32 1.442695, %v2151_v16  ;;  %v2130_v47 = vsub.f32 %v7447_v55, %v1996_v13 }
 0x4bc   : > { %v7703_v4 = vpop.xlane.xlu1 %2340  ;;  %v7705_v49 = vpop.xlane.xlu0 %2013  ;;  %2052 = vmax.xlane.f32.xlu2 %v2051_v17  ;;  %5922 = vpow2.f32 %v2218_v48  ;;  %v2200_v38 = vmul.f32 1.442695, %v2119_v46  ;;  %v2129_v9 = vsub.f32 %v7415_v61, %v7628_v12  ;;  %v2121_v34 = vsub.f32 %v7434_v31, %v7653_v56 }
 0x4bd   : > { %v3519_v15 = vunpack.c.l.b16 %v3447_v52  ;;  %v7725_v43 = vpop.eup %5916  ;;  %v2222_v55 = vmul.f32 1.442695, %v2130_v47  ;;  %v2120_v61 = vsub.f32 %v7417_v51, %v7666_v37 }
 0x4be   : > { %v7734_v29 = vpop.eup %5918  ;;  %v2438_v36 = vsel %vm1909_vm7, %v7725_v43, 0.0  ;;  %v2220_v12 = vmul.f32 1.442695, %v2129_v9  ;;  %v2204_v56 = vmul.f32 1.442695, %v2121_v34 }
 0x4bf   : > { %v7719_v59 = vpop.xlane.xlu2 %2019  ;;  %v3526_v1 = vpack.c.b16 %v3519_v15, %v3518_v50  ;;  %10377 = vst [vmem:[#allocation43_spill] sm:$0xff] %v7734_v29  ;;  %v2444_v19 = vsel %vm1909_vm7, %v7734_v29, 0.0  ;;  %v7746_v2 = vpop.eup %5920  ;;  %v2202_v51 = vmul.f32 1.442695, %v2120_v61 }
 0x4c0   : > { %v2390_v5 = vsel %vm1909_vm7, %v7746_v2, 0.0 }
 0x4c1   : > { %2394 = vadd.xlane.f32.xlu0 %v2393_v8  ;;  %2049 = vmax.xlane.f32.xlu1 %v2048_v32 }
 0x4c2   : > { %5454 = vmatmul.msk.bf16.vlgmr.msra.gmra.mxu2 %vm1909_vm7, %v3526_v1  ;;  %v7748_v24 = vpop.eup %5922  ;;  %v2136_v1 = vsub.f32 %v7436_v41, %v7705_v49 }
 0x4c3   : > { %v2372_v32 = vsel %vm1909_vm7, %v7748_v24, 0.0 }
 0x4c4   : > { %v7727_v3 = vpop.xlane.xlu1 %2304  ;;  %v7730_v10 = vpop.xlane.xlu0 %2337  ;;  %2343 = vadd.xlane.f32.xlu2 %v2342_v62 }
 0x4c5   : > { %5924 = vrcp.f32 %v7727_v3  ;;  %v2542_v16 = vand.u32 2147483648, %v7727_v3  ;;  %vm2536_vm2 = vweird.f32 %v7727_v3 }
 0x4c6   : > { %5926 = vpow2.f32 %v2268_v25 }
 0x4c7   : > { %v7744_v7 = vpop.xlane.xlu2 %2070  ;;  %5928 = vpow2.f32 %v2264_v45 }
 0x4c8   : > { %5930 = vpow2.f32 %v2200_v38  ;;  %v2138_v38 = vsub.f32 %v7470_v35, %v7719_v59 }
 0x4c9   : > { %2439 = vadd.xlane.f32.xlu1 %v2438_v36  ;;  %2445 = vadd.xlane.f32.xlu0 %v2444_v19  ;;  %v2540_v36 = vand.u32 2147483647, %v7727_v3 }
 0x4cb   : > { %v7752_v13 = vpop.eup %5924  ;;  %vm2541_vm4 = vcmp.eq.f32.partialorder %v2540_v36, 8.507059e+37 }
 0x4cc   : > { %v7754_v17 = vpop.xlane.xlu1 %1971  ;;  %v7756_v26 = vpop.xlane.xlu0 %2301  ;;  %v2532_v63 = vmul.f32 %v7752_v13, %v7727_v3  ;;  %2391 = vadd.xlane.f32.xlu2 %v2390_v5  ;;  %vm2537_vm0 = vweird.f32 %v7752_v13  ;;  %v2543_v5 = vor.u32 1.1754944e-38, %v2542_v16 }
 0x4cd   : > { %v7760_v52 = vpop.eup %5926  ;;  %5932 = vrcp.f32 %v7756_v26  ;;  %vm7797_vm3 = vmor %vm2536_vm2, %vm2537_vm0  ;;  %vm2521_vm8 = vweird.f32 %v7756_v26 }
 0x4ce   : > { %10378 = vst [vmem:[#allocation44_spill] sm:$0xff] %v7760_v52  ;;  %5934 = vpow2.f32 %v2222_v55  ;;  %v2533_v8 = vsub.f32 1.0, %v2532_v63  ;;  %v2447_v50 = vsel %vm1909_vm7, %v7760_v52, 0.0  ;;  %v7775_v31 = vpop.eup %5928  ;;  %v2234_v55 = vmul.f32 1.442695, %v2136_v1 }
 0x4cf   : > { %v7773_v15 = vpop.xlane.xlu2 %2307  ;;  %v7780_v37 = vpop.eup %5930  ;;  %v2441_v47 = vsel %vm1909_vm7, %v7775_v31, 0.0 }
 0x4d0   : > { %v2534_v48 = vmul.f32 %v7752_v13, %v2533_v8  ;;  %5936 = vrcp.f32 %v7773_v15  ;;  %v2345_v9 = vsel %vm1909_vm7, %v7780_v37, 0.0  ;;  %v2527_v8 = vand.u32 2147483648, %v7756_v26 }
 0x4d1   : > { %2373 = vadd.xlane.f32.xlu1 %v2372_v32  ;;  %2448 = vadd.xlane.f32.xlu0 %v2447_v50  ;;  %5938 = vpow2.f32 %v2220_v12  ;;  %v2154_v12 = vsub.f32 %v7449_v18, %v7678_v27  ;;  %vm2551_vm12 = vweird.f32 %v7773_v15 }
 0x4d2   : > { %v2535_v25 = vadd.f32 %v7752_v13, %v2534_v48  ;;  %5940 = vpow2.f32 %v2204_v56  ;;  %v2238_v56 = vmul.f32 1.442695, %v2138_v38  ;;  %v2528_v16 = vor.u32 1.1754944e-38, %v2527_v8 }
 0x4d3   : > { %v5933_v62 = vpop.eup %5932  ;;  %5942 = vpow2.f32 %v2202_v51 }
 0x4d4   : > { %v7787_v46 = vpop.xlane.xlu1 %2001  ;;  %v2017_v45 = vpop.xlane.xlu0 %2016  ;;  %v2517_v41 = vmul.f32 %v5933_v62, %v7756_v26  ;;  %2442 = vadd.xlane.f32.xlu2 %v2441_v47  ;;  %v2539_v3 = vsel %vm7797_vm3, %v7752_v13, %v2535_v25  ;;  %vm2522_vm5 = vweird.f32 %v5933_v62  ;;  %5944 = vpow2.f32 %v2234_v55 }
 0x4d5   : > { %v7792_v19 = vpop.eup %5934  ;;  %v2137_v63 = vsub.f32 %v7453_v23, %v2017_v45  ;;  %v2525_v23 = vand.u32 2147483647, %v7756_v26  ;;  %v2544_v50 = vsel %vm2541_vm4, %v2543_v5, %v2539_v3  ;;  %vm2523_vm9 = vmor %vm2521_vm8, %vm2522_vm5  ;;  %5946 = vpow2.f32 %v2238_v56 }
 0x4d6   : > { %10379 = vst [vmem:[#allocation45_spill] sm:$0xff] %v7792_v19  ;;  %v2518_v34 = vsub.f32 1.0, %v2517_v41  ;;  %v7809_v61 = vpop.eup %5936  ;;  %v2378_v35 = vsel %vm1909_vm7, %v7792_v19, 0.0  ;;  %v2545_v36 = vmul.f32 %v7479_v30, %v2544_v50  ;;  %v2270_v41 = vmul.f32 1.442695, %v2154_v12  ;;  %v10426_v19 = vld [vmem:[#allocation39_spill] sm:$0xff] }
 0x4d7   : > { %v7816_v59 = vpop.xlane.xlu2 %2004  ;;  %v7818_v32 = vpop.eup %5938  ;;  %v2547_v18 = vmul.f32 %v7809_v61, %v7773_v15  ;;  %v2236_v48 = vmul.f32 1.442695, %v2137_v63  ;;  %vm2526_vm10 = vcmp.eq.f32.partialorder %v2525_v23, 8.507059e+37  ;;  %v2155_v26 = vsub.f32 %v7487_v21, %v7744_v7 }
 0x4d8   : > { %v2519_v13 = vmul.f32 %v5933_v62, %v2518_v34  ;;  %v7823_v27 = vpop.eup %5940  ;;  %v2375_v47 = vsel %vm1909_vm7, %v7818_v32, 0.0  ;;  %vm2552_vm11 = vweird.f32 %v7809_v61 }
 0x4d9   : > { %2346 = vadd.xlane.f32.xlu1 %v2345_v9  ;;  %2379 = vadd.xlane.f32.xlu0 %v2378_v35  ;;  %v7826_v1 = vpop.eup %5942  ;;  %v2548_v38 = vsub.f32 1.0, %v2547_v18  ;;  %5948 = vpow2.f32 %v2236_v48  ;;  %v2351_v30 = vsel %vm1909_vm7, %v7823_v27, 0.0  ;;  %v2272_v21 = vmul.f32 1.442695, %v2155_v26  ;;  %vm7875_vm13 = vmor %vm2551_vm12, %vm2552_vm11  ;;  %v10391_v26 = vld [vmem:[#allocation19_spill] sm:$0xff] }
 0x4da   : > { %v2520_v51 = vadd.f32 %v5933_v62, %v2519_v13  ;;  %v2348_v5 = vsel %vm1909_vm7, %v7826_v1, 0.0  ;;  %v7844_v63 = vpop.eup %5944  ;;  %5950 = vpow2.f32 %v2270_v41  ;;  %v2132_v48 = vsub.f32 %v7485_v40, %v7787_v46 }
 0x4db   : > { %v2549_v7 = vmul.f32 %v7809_v61, %v2548_v38  ;;  %v7850_v8 = vpop.eup %5946  ;;  %v2396_v56 = vsel %vm1909_vm7, %v7844_v63, 0.0 }
 0x4dc   : > { %v7828_v25 = vpop.xlane.xlu1 %2022  ;;  %v1999_v45 = vpop.xlane.xlu0 %1998  ;;  %2376 = vadd.xlane.f32.xlu2 %v2375_v47  ;;  %v2524_v49 = vsel %vm2523_vm9, %v5933_v62, %v2520_v51  ;;  %v3449_v62 = vpack.c.bf16 %v2545_v36, %v2545_v36  ;;  %10382 = vst [vmem:[#allocation46_spill] sm:$0xff] %v7850_v8  ;;  %v2555_v36 = vand.u32 2147483647, %v7773_v15  ;;  %v2402_v40 = vsel %vm1909_vm7, %v7850_v8, 0.0 }
 0x4dd   : > { %v2529_v9 = vsel %vm2526_vm10, %v2528_v16, %v2524_v49  ;;  %v2131_v3 = vsub.f32 %v7464_v53, %v1999_v45  ;;  %v2557_v16 = vand.u32 2147483648, %v7773_v15 }
 0x4de   : > { %v2530_v55 = vmul.f32 %v7491_v60, %v2529_v9  ;;  %v2122_v60 = vsub.f32 %v7472_v33, %v7754_v17  ;;  %v3521_v50 = vunpack.c.l.b16 %v3449_v62  ;;  %v2550_v33 = vadd.f32 %v7809_v61, %v2549_v7 }
 0x4df   : > { %v7842_v34 = vpop.xlane.xlu2 %2310  ;;  %v2224_v12 = vmul.f32 1.442695, %v2131_v3  ;;  %v7856_v18 = vpop.eup %5948  ;;  %v2558_v9 = vor.u32 1.1754944e-38, %v2557_v16  ;;  %vm2556_vm14 = vcmp.eq.f32.partialorder %v2555_v36, 8.507059e+37 }
 0x4e0   : > { %v3448_v53 = vpack.c.bf16 %v2530_v55, %v2530_v55  ;;  %5952 = vrcp.f32 %v7842_v34  ;;  %10383 = vst [vmem:[#allocation47_spill] sm:$0xff] %v7856_v18  ;;  %v2206_v51 = vmul.f32 1.442695, %v2122_v60  ;;  %v7864_v47 = vpop.eup %5950  ;;  %v2399_v46 = vsel %vm1909_vm7, %v7856_v18, 0.0 }
 0x4e1   : > { %2349 = vadd.xlane.f32.xlu1 %v2348_v5  ;;  %2352 = vadd.xlane.f32.xlu0 %v2351_v30  ;;  %5954 = vpow2.f32 %v2272_v21  ;;  %10384 = vst [vmem:[#allocation48_spill] sm:$0xff] %v7864_v47  ;;  %v2554_v38 = vsel %vm7875_vm13, %v7809_v61, %v2550_v33  ;;  %v2450_v21 = vsel %vm1909_vm7, %v7864_v47, 0.0  ;;  %vm2566_vm0 = vweird.f32 %v7842_v34 }
 0x4e2   : > { %v3520_v23 = vunpack.c.l.b16 %v3448_v53  ;;  %5956 = vpow2.f32 %v2224_v12  ;;  %v2572_v53 = vand.u32 2147483648, %v7842_v34  ;;  %v2559_v61 = vsel %vm2556_vm14, %v2558_v9, %v2554_v38 }
 0x4e3   : > { %5958 = vpow2.f32 %v2206_v51  ;;  %v2139_v12 = vsub.f32 %v7514_v0, %v7828_v25  ;;  %v2560_v0 = vmul.f32 %v7499_v14, %v2559_v61 }
 0x4e4   : > { %v7852_v35 = vpop.xlane.xlu1 %1977  ;;  %v1975_v13 = vpop.xlane.xlu0 %1974  ;;  %2397 = vadd.xlane.f32.xlu2 %v2396_v56  ;;  %v3527_v17 = vpack.c.b16 %v3521_v50, %v3520_v23  ;;  %v2570_v23 = vand.u32 2147483647, %v7842_v34  ;;  %v2573_v51 = vor.u32 1.1754944e-38, %v2572_v53 }
 0x4e5   : > { %v2123_v45 = vsub.f32 %v7493_v39, %v1975_v13  ;;  %v2226_v39 = vmul.f32 1.442695, %v2132_v48  ;;  %v2124_v50 = vsub.f32 %v7506_v22, %v7852_v35  ;;  %v2240_v22 = vmul.f32 1.442695, %v2139_v12 }
 0x4e6   : > { %5455 = vmatmul.msk.bf16.gmra.mxu2 %vm1909_vm7, %v3527_v17  ;;  %v5953_v49 = vpop.eup %5952  ;;  %vm2571_vm3 = vcmp.eq.f32.partialorder %v2570_v23, 8.507059e+37 }
 0x4e7   : > { %v7873_v41 = vpop.xlane.xlu2 %2079  ;;  %v2562_v15 = vmul.f32 %v5953_v49, %v7842_v34  ;;  %v2208_v3 = vmul.f32 1.442695, %v2123_v45  ;;  %v7883_v55 = vpop.eup %5954  ;;  %5960 = vpow2.f32 %v2226_v39  ;;  %vm2567_vm15 = vweird.f32 %v5953_v49 }
 0x4e8   : > { %10387 = vst [vmem:[#allocation49_spill] sm:$0xff] %v7883_v55  ;;  %v7887_v7 = vpop.eup %5956  ;;  %v2453_v48 = vsel %vm1909_vm7, %v7883_v55, 0.0  ;;  %vm2568_vm2 = vmor %vm2566_vm0, %vm2567_vm15  ;;  %v2210_v34 = vmul.f32 1.442695, %v2124_v50 }
 0x4e9   : > { %2403 = vadd.xlane.f32.xlu0 %v2402_v40  ;;  %2400 = vadd.xlane.f32.xlu1 %v2399_v46  ;;  %v2563_v5 = vsub.f32 1.0, %v2562_v15  ;;  %10388 = vst [vmem:[#allocation50_spill] sm:$0xff] %v7887_v7  ;;  %5962 = vpow2.f32 %v2208_v3  ;;  %v7904_v25 = vpop.eup %5958  ;;  %v3450_v15 = vpack.c.bf16 %v2560_v0, %v2560_v0  ;;  %v10397_v0 = vld [vmem:[#allocation21_spill] sm:$0xff] }
 0x4ea   : > { %10389 = vst [vmem:[#allocation51_spill] sm:$0xff] %v7904_v25  ;;  %v2354_v46 = vsel %vm1909_vm7, %v7904_v25, 0.0 }
 0x4eb   : > { %v2564_v13 = vmul.f32 %v5953_v49, %v2563_v5  ;;  %v3522_v53 = vunpack.c.l.b16 %v3450_v15 }
 0x4ec   : > { %v2026_v30 = vpop.xlane.xlu1 %2025  ;;  %v2074_v62 = vpop.xlane.xlu0 %2073  ;;  %2451 = vadd.xlane.f32.xlu2 %v2450_v21 }
 0x4ed   : > { %v2156_v60 = vsub.f32 %v7537_v42, %v2074_v62  ;;  %v2565_v33 = vadd.f32 %v5953_v49, %v2564_v13  ;;  %v2381_v42 = vsel %vm1909_vm7, %v7887_v7, 0.0  ;;  %v7906_v16 = vpop.eup %5960  ;;  %v2140_v45 = vsub.f32 %v7541_v54, %v2026_v30  ;;  %v10393_v54 = vld [vmem:[#allocation17_spill] sm:$0xff] }
 0x4ee   : > { %10390 = vst [vmem:[#allocation52_spill] sm:$0xff] %v7906_v16  ;;  %v2133_v9 = vsub.f32 %v10393_v54, %v7816_v59  ;;  %v2384_v30 = vsel %vm1909_vm7, %v7906_v16, 0.0 }
 0x4ef   : > { %v2274_v56 = vmul.f32 1.442695, %v2156_v60  ;;  %v7901_v17 = vpop.xlane.xlu2 %2313  ;;  %v2569_v35 = vsel %vm2568_vm2, %v5953_v49, %v2565_v33  ;;  %v7917_v38 = vpop.eup %5962  ;;  %v2242_v3 = vmul.f32 1.442695, %v2140_v45 }
 0x4f0   : > { %v2574_v36 = vsel %vm2571_vm3, %v2573_v51, %v2569_v35  ;;  %10392 = vst [vmem:[#allocation19_spill] sm:$0xff] %v7917_v38  ;;  %v2357_v62 = vsel %vm1909_vm7, %v7917_v38, 0.0  ;;  %v2228_v13 = vmul.f32 1.442695, %v2133_v9  ;;  %vm2581_vm5 = vweird.f32 %v7901_v17  ;;  %v10423_v38 = vld [vmem:[#allocation26_spill] sm:$0xff] }
 0x4f1   : > { %2454 = vadd.xlane.f32.xlu0 %v2453_v48  ;;  %2382 = vadd.xlane.f32.xlu1 %v2381_v42  ;;  %5964 = vpow2.f32 %v2274_v56  ;;  %v2575_v39 = vmul.f32 %v10391_v26, %v2574_v36 }
 0x4f2   : > { %5966 = vrcp.f32 %v7901_v17 }
 0x4f3   : > { %5968 = vpow2.f32 %v2240_v22  ;;  %v3451_v49 = vpack.c.bf16 %v2575_v39, %v2575_v39  ;;  %v10398_v22 = vld [vmem:[#allocation18_spill] sm:$0xff] }
 0x4f4   : > { %v7910_v40 = vpop.xlane.xlu1 %2076  ;;  %v7912_v14 = vpop.xlane.xlu0 %1980  ;;  %2355 = vadd.xlane.f32.xlu2 %v2354_v46  ;;  %5970 = vpow2.f32 %v2210_v34  ;;  %v2158_v35 = vsub.f32 %v10398_v22, %v7873_v41 }
 0x4f5   : > { %v3523_v60 = vunpack.c.l.b16 %v3451_v49  ;;  %5972 = vpow2.f32 %v2242_v3 }
 0x4f6   : > { %v2278_v15 = vmul.f32 1.442695, %v2158_v35 }
 0x4f7   : > { %v7921_v5 = vpop.eup %5964  ;;  %v7927_v21 = vpop.xlane.xlu2 %2028  ;;  %v3528_v59 = vpack.c.b16 %v3523_v60, %v3522_v53  ;;  %v10401_v53 = vld [vmem:[#allocation20_spill] sm:$0xff] }
 0x4f8   : > { %10394 = vst [vmem:[#allocation17_spill] sm:$0xff] %v7921_v5  ;;  %v5967_v61 = vpop.eup %5966  ;;  %v2456_v33 = vsel %vm1909_vm7, %v7921_v5, 0.0  ;;  %v2125_v60 = vsub.f32 %v10401_v53, %v7912_v14 }
 0x4f9   : > { %2385 = vadd.xlane.f32.xlu0 %v2384_v30  ;;  %2358 = vadd.xlane.f32.xlu1 %v2357_v62  ;;  %v2577_v12 = vmul.f32 %v5967_v61, %v7901_v17  ;;  %v7930_v23 = vpop.eup %5968  ;;  %vm2582_vm4 = vweird.f32 %v5967_v61  ;;  %v2587_v62 = vand.u32 2147483648, %v7901_v17 }
 0x4fa   : > { %10395 = vst [vmem:[#allocation53_spill] sm:$0xff] %v7930_v23  ;;  %5456 = vmatmul.msk.bf16.gmra.mxu2 %vm1909_vm7, %v3528_v59  ;;  %v7937_v42 = vpop.eup %5970  ;;  %v2405_v46 = vsel %vm1909_vm7, %v7930_v23, 0.0  ;;  %v10402_v59 = vld [vmem:[#allocation32_spill] sm:$0xff]  ;;  %vm7966_vm8 = vmor %vm2581_vm5, %vm2582_vm4  ;;  %v2212_v35 = vmul.f32 1.442695, %v2125_v60  ;;  %v10407_v60 = vld [vmem:[#allocation23_spill] sm:$0xff] }
 0x4fb   : > { %v2578_v50 = vsub.f32 1.0, %v2577_v12  ;;  %10396 = vst [vmem:[#allocation54_spill] sm:$0xff] %v7937_v42  ;;  %v2360_v36 = vsel %vm1909_vm7, %v7937_v42, 0.0  ;;  %v7949_v39 = vpop.eup %5972  ;;  %v2588_v22 = vor.u32 1.1754944e-38, %v2587_v62 }
 0x4fc   : > { %v7932_v56 = vpop.xlane.xlu1 %2316  ;;  %v2083_v48 = vpop.xlane.xlu0 %2082  ;;  %2457 = vadd.xlane.f32.xlu2 %v2456_v33  ;;  %10399 = vst [vmem:[#allocation21_spill] sm:$0xff] %v7949_v39  ;;  %v2408_v3 = vsel %vm1909_vm7, %v7949_v39, 0.0 }
 0x4fd   : > { %5974 = vrcp.f32 %v7932_v56  ;;  %v2159_v51 = vsub.f32 %v10397_v0, %v2083_v48  ;;  %v2579_v34 = vmul.f32 %v5967_v61, %v2578_v50  ;;  %vm2596_vm11 = vweird.f32 %v7932_v56 }
 0x4fe   : > { %5976 = vpow2.f32 %v2228_v13  ;;  %v2585_v13 = vand.u32 2147483647, %v7901_v17  ;;  %v2602_v17 = vand.u32 2147483648, %v7932_v56 }
 0x4ff   : > { %v2280_v45 = vmul.f32 1.442695, %v2159_v51  ;;  %v7947_v26 = vpop.xlane.xlu2 %2031  ;;  %v2580_v54 = vadd.f32 %v5967_v61, %v2579_v34 }
 0x500   : > { %vm2586_vm9 = vcmp.eq.f32.partialorder %v2585_v13, 8.507059e+37  ;;  %v2603_v62 = vor.u32 1.1754944e-38, %v2602_v17 }
 0x501   : > { %2361 = vadd.xlane.f32.xlu0 %v2360_v36  ;;  %2406 = vadd.xlane.f32.xlu1 %v2405_v46  ;;  %5978 = vpow2.f32 %v2280_v45  ;;  %v2584_v14 = vsel %vm7966_vm8, %v5967_v61, %v2580_v54  ;;  %v2600_v36 = vand.u32 2147483647, %v7932_v56 }
 0x502   : > { %5980 = vrcp.f32 %v10402_v59  ;;  %v2589_v46 = vsel %vm2586_vm9, %v2588_v22, %v2584_v14  ;;  %v10408_v14 = vld [vmem:[#allocation29_spill] sm:$0xff] }
 0x503   : > { %v5975_v49 = vpop.eup %5974  ;;  %5982 = vpow2.f32 %v2278_v15  ;;  %vm2601_vm13 = vcmp.eq.f32.partialorder %v2600_v36, 8.507059e+37 }
 0x504   : > { %v7951_v41 = vpop.xlane.xlu1 %2088  ;;  %v7953_v9 = vpop.xlane.xlu0 %2085  ;;  %v2592_v12 = vmul.f32 %v5975_v49, %v7932_v56  ;;  %2409 = vadd.xlane.f32.xlu2 %v2408_v3  ;;  %vm2597_vm10 = vweird.f32 %v5975_v49  ;;  %5984 = vpow2.f32 %v2212_v35 }
 0x505   : > { %v7957_v30 = vpop.eup %5976  ;;  %vm2598_vm12 = vmor %vm2596_vm11, %vm2597_vm10  ;;  %vm2671_vm10 = vweird.f32 %v10402_v59 }
 0x506   : > { %10400 = vst [vmem:[#allocation18_spill] sm:$0xff] %v7957_v30  ;;  %v2593_v48 = vsub.f32 1.0, %v2592_v12  ;;  %v2387_v33 = vsel %vm1909_vm7, %v7957_v30, 0.0  ;;  %v2590_v12 = vmul.f32 %v10407_v60, %v2589_v46 }
 0x507   : > { %v7972_v0 = vpop.xlane.xlu2 %2034  ;;  %v7976_v51 = vpop.eup %5978 }
 0x508   : > { %10405 = vst [vmem:[#allocation20_spill] sm:$0xff] %v7976_v51  ;;  %v2594_v34 = vmul.f32 %v5975_v49, %v2593_v48  ;;  %v7980_v15 = vpop.eup %5980  ;;  %v2465_v61 = vsel %vm1909_vm7, %v7976_v51, 0.0  ;;  %v3452_v35 = vpack.c.bf16 %v2590_v12, %v2590_v12 }
 0x509   : > { %2388 = vadd.xlane.f32.xlu1 %v2387_v33  ;;  %v7988_v54 = vpop.eup %5982  ;;  %v2667_v13 = vmul.f32 %v7980_v15, %v10402_v59  ;;  %vm2672_vm4 = vweird.f32 %v7980_v15 }
 0x50a   : > { %v2595_v45 = vadd.f32 %v5975_v49, %v2594_v34  ;;  %10406 = vst [vmem:[#allocation32_spill] sm:$0xff] %v7988_v54  ;;  %v2462_v48 = vsel %vm1909_vm7, %v7988_v54, 0.0  ;;  %v8002_v34 = vpop.eup %5984  ;;  %vm8052_vm11 = vmor %vm2671_vm10, %vm2672_vm4 }
 0x50b   : > { %10409 = vst [vmem:[#allocation23_spill] sm:$0xff] %v8002_v34  ;;  %v2668_v17 = vsub.f32 1.0, %v2667_v13  ;;  %v2677_v13 = vand.u32 2147483648, %v10402_v59  ;;  %v2363_v47 = vsel %vm1909_vm7, %v8002_v34, 0.0 }
 0x50c   : > { %v7982_v3 = vpop.xlane.xlu1 %2322  ;;  %v7984_v53 = vpop.xlane.xlu0 %2319  ;;  %2466 = vadd.xlane.f32.xlu2 %v2465_v61  ;;  %v2599_v50 = vsel %vm2598_vm12, %v5975_v49, %v2595_v45 }
 0x50d   : > { %5986 = vrcp.f32 %v7982_v3  ;;  %v2604_v56 = vsel %vm2601_vm13, %v2603_v62, %v2599_v50  ;;  %v10410_v62 = vld [vmem:[#allocation9_spill] sm:$0xff]  ;;  %v2669_v12 = vmul.f32 %v7980_v15, %v2668_v17  ;;  %v2632_v5 = vand.u32 2147483648, %v7982_v3 }
 0x50e   : > { %5988 = vrcp.f32 %v7984_v53  ;;  %v2605_v22 = vmul.f32 %v10408_v14, %v2604_v56  ;;  %v2617_v17 = vand.u32 2147483648, %v7984_v53  ;;  %vm2626_vm0 = vweird.f32 %v7982_v3 }
 0x50f   : > { %v7998_v33 = vpop.xlane.xlu2 %2094  ;;  %5990 = vrcp.f32 %v7680_v44  ;;  %vm2611_vm3 = vweird.f32 %v7984_v53  ;;  %vm2686_vm13 = vweird.f32 %v7680_v44 }
 0x510   : > { %v3453_v46 = vpack.c.bf16 %v2605_v22, %v2605_v22  ;;  %5992 = vrcp.f32 %v7703_v4  ;;  %v2618_v29 = vor.u32 1.1754944e-38, %v2617_v17 }
 0x511   : > { %2463 = vadd.xlane.f32.xlu1 %v2462_v48  ;;  %v3524_v48 = vunpack.c.l.b16 %v3452_v35  ;;  %v2630_v35 = vand.u32 2147483647, %v7982_v3  ;;  %5994 = vrcp.f32 %v7730_v10 }
 0x512   : > { %v3525_v56 = vunpack.c.l.b16 %v3453_v46 }
 0x513   : > { %v5987_v36 = vpop.eup %5986  ;;  %vm2631_vm5 = vcmp.eq.f32.partialorder %v2630_v35, 8.507059e+37 }
 0x514   : > { %v8004_v61 = vpop.xlane.xlu1 %2091  ;;  %v8006_v49 = vpop.xlane.xlu0 %2037  ;;  %v2622_v60 = vmul.f32 %v5987_v36, %v7982_v3  ;;  %v3529_v55 = vpack.c.b16 %v3525_v56, %v3524_v48  ;;  %vm2627_vm14 = vweird.f32 %v5987_v36  ;;  %v2633_v56 = vor.u32 1.1754944e-38, %v2632_v5 }
 0x515   : > { %v5989_v45 = vpop.eup %5988  ;;  %3901 = vrot.lane.b32.xlu0 %v10410_v62, %s6225_s24  ;;  %vm2628_vm2 = vmor %vm2626_vm0, %vm2627_vm14 }
 0x516   : > { %v2607_v50 = vmul.f32 %v5989_v45, %v7984_v53  ;;  %v2623_v14 = vsub.f32 1.0, %v2622_v60  ;;  %v8014_v22 = vpop.eup %5990  ;;  %vm2612_vm15 = vweird.f32 %v5989_v45  ;;  %v2615_v60 = vand.u32 2147483647, %v7984_v53  ;;  %5457 = vmatmul.msk.bf16.gmra.mxu2 %vm1909_vm7, %v3529_v55  ;;  %v10412_v53 = vld [vmem:[#allocation35_spill] sm:$0xff] }
 0x517   : > { %v8019_v52 = vpop.xlane.xlu2 %2097  ;;  %vm2613_vm8 = vmor %vm2611_vm3, %vm2612_vm15  ;;  %v8041_v54 = vpop.eup %5992  ;;  %vm2687_vm15 = vweird.f32 %v8014_v22 }
 0x518   : > { %v2608_v39 = vsub.f32 1.0, %v2607_v50  ;;  %10411 = vst [vmem:[#allocation29_spill] sm:$0xff] %v8019_v52  ;;  %v2624_v62 = vmul.f32 %v5987_v36, %v2623_v14  ;;  %v2682_v50 = vmul.f32 %v8014_v22, %v7680_v44  ;;  %vm2616_vm9 = vcmp.eq.f32.partialorder %v2615_v60, 8.507059e+37  ;;  %vm8097_vm4 = vmor %vm2686_vm13, %vm2687_vm15 }
 0x519   : > { %2364 = vadd.xlane.f32.xlu1 %v2363_v47  ;;  %vm2717_vm13 = vweird.f32 %v8041_v54 }
 0x51a   : > { %v2609_v46 = vmul.f32 %v5989_v45, %v2608_v39  ;;  %v2625_v48 = vadd.f32 %v5987_v36, %v2624_v62  ;;  %v2670_v62 = vadd.f32 %v7980_v15, %v2669_v12  ;;  %v2683_v5 = vsub.f32 1.0, %v2682_v50 }
 0x51b   : > { %v2675_v12 = vand.u32 2147483647, %v10402_v59 }
 0x51c   : > { %v2610_v14 = vadd.f32 %v5989_v45, %v2609_v46  ;;  %v8031_v47 = vpop.xlane.xlu1 %2325  ;;  %v8033_v39 = vpop.xlane.xlu0 %2328  ;;  %v2629_v55 = vsel %vm2628_vm2, %v5987_v36, %v2625_v48  ;;  %v10413_v36 = vld [vmem:[#allocation34_spill] sm:$0xff]  ;;  %v2690_v48 = vand.u32 2147483647, %v7680_v44  ;;  %v2684_v59 = vmul.f32 %v8014_v22, %v2683_v5 }
 0x51d   : > { %v2634_v34 = vsel %vm2631_vm5, %v2633_v56, %v2629_v55  ;;  %5996 = vrcp.f32 %v8031_v47  ;;  %v2678_v56 = vor.u32 1.1754944e-38, %v2677_v13  ;;  %vm2676_vm12 = vcmp.eq.f32.partialorder %v2675_v12, 8.507059e+37 }
 0x51e   : > { %v2614_v3 = vsel %vm2613_vm8, %v5989_v45, %v2610_v14  ;;  %v2635_v46 = vmul.f32 %v10412_v53, %v2634_v34  ;;  %5998 = vrcp.f32 %v8033_v39  ;;  %v8048_v45 = vpop.eup %5994  ;;  %vm8077_vm14 = vcmp.eq.f32.partialorder %v2690_v48, 8.507059e+37 }
 0x51f   : > { %v2619_v42 = vsel %vm2616_vm9, %v2618_v29, %v2614_v3  ;;  %v8045_v17 = vpop.xlane.xlu2 %2046  ;;  %v2692_v29 = vand.u32 2147483648, %v7680_v44  ;;  %v2712_v3 = vmul.f32 %v8041_v54, %v7703_v4  ;;  %v2697_v53 = vmul.f32 %v8048_v45, %v7730_v10  ;;  %v10431_v44 = vld [vmem:[#allocation14_spill] sm:$0xff] }
 0x520   : > { %v2620_v35 = vmul.f32 %v10413_v36, %v2619_v42  ;;  %v3455_v60 = vpack.c.bf16 %v2635_v46, %v2635_v46  ;;  %v2674_v42 = vsel %vm8052_vm11, %v7980_v15, %v2670_v62  ;;  %v10416_v62 = vld [vmem:[#allocation5_spill] sm:$0xff]  ;;  %v2722_v12 = vand.u32 2147483648, %v7703_v4 }
 0x521   : > { %v8074_v5 = vsel %vm2676_vm12, %v2678_v56, %v2674_v42  ;;  %v2685_v51 = vadd.f32 %v8014_v22, %v2684_v59  ;;  %v2713_v23 = vsub.f32 1.0, %v2712_v3  ;;  %v2698_v8 = vsub.f32 1.0, %v2697_v53 }
 0x522   : > { %v3454_v50 = vpack.c.bf16 %v2620_v35, %v2620_v35  ;;  %v3592_v14 = vunpack.c.l.b16 %v3455_v60  ;;  %v2693_v60 = vor.u32 1.1754944e-38, %v2692_v29  ;;  %v2720_v42 = vand.u32 2147483647, %v7703_v4 }
 0x523   : > { %v5997_v55 = vpop.eup %5996  ;;  %v2647_v56 = vand.u32 2147483648, %v8031_v47  ;;  %vm2716_vm2 = vweird.f32 %v7703_v4  ;;  %v2645_v59 = vand.u32 2147483647, %v8031_v47  ;;  %v2660_v3 = vand.u32 2147483647, %v8033_v39 }
 0x524   : > { %v3591_v46 = vunpack.c.l.b16 %v3454_v50  ;;  %v8066_v36 = vpop.xlane.xlu1 %2040  ;;  %v8068_v35 = vpop.xlane.xlu0 %2100  ;;  %v2637_v13 = vmul.f32 %v5997_v55, %v8031_v47  ;;  %3897 = vrot.lane.b32.xlu2 %v10416_v62, %s6225_s24  ;;  %vm2642_vm0 = vweird.f32 %v5997_v55  ;;  %vm2641_vm5 = vweird.f32 %v8031_v47  ;;  %v10427_v50 = vld [vmem:[#allocation7_spill] sm:$0xff] }
 0x525   : > { %v5999_v15 = vpop.eup %5998  ;;  %v2689_v53 = vsel %vm8097_vm4, %v8014_v22, %v2685_v51  ;;  %vm8109_vm8 = vmor %vm2641_vm5, %vm2642_vm0  ;;  %vm2656_vm9 = vweird.f32 %v8033_v39  ;;  %v2648_v51 = vor.u32 1.1754944e-38, %v2647_v56  ;;  %vm2646_vm11 = vcmp.eq.f32.partialorder %v2645_v59, 8.507059e+37  ;;  %v10425_v56 = vld [vmem:[#allocation38_spill] sm:$0xff] }
 0x526   : > { %v2652_v34 = vmul.f32 %v5999_v15, %v8033_v39  ;;  %v3599_v30 = vpack.c.b16 %v3592_v14, %v3591_v46  ;;  %v2638_v16 = vsub.f32 1.0, %v2637_v13  ;;  %v2662_v14 = vand.u32 2147483648, %v8033_v39 }
 0x527   : > { %v8085_v29 = vpop.xlane.xlu2 %2367  ;;  %vm2657_vm3 = vweird.f32 %v5999_v15  ;;  %v2714_v13 = vmul.f32 %v8041_v54, %v2713_v23  ;;  %vm2661_vm12 = vcmp.eq.f32.partialorder %v2660_v3, 8.507059e+37  ;;  %vm2702_vm15 = vweird.f32 %v8048_v45 }
 0x528   : > { %v2653_v62 = vsub.f32 1.0, %v2652_v34  ;;  %5458 = vmatmul.msk.bf16.vlgmr.msra.gmra.mxu3 %vm1909_vm7, %v3599_v30  ;;  %v2639_v48 = vmul.f32 %v5997_v55, %v2638_v16  ;;  %6000 = vrcp.f32 %v8085_v29  ;;  %v2699_v34 = vmul.f32 %v8048_v45, %v2698_v8  ;;  %vm2658_vm10 = vmor %vm2656_vm9, %vm2657_vm3  ;;  %v10424_v8 = vld [vmem:[#allocation11_spill] sm:$0xff] }
 0x529   : > { %v2157_v30 = vsub.f32 %v10423_v38, %v7910_v40  ;;  %v2663_v23 = vor.u32 1.1754944e-38, %v2662_v14  ;;  %v2694_v40 = vsel %vm8077_vm14, %v2693_v60, %v2689_v53  ;;  %v2715_v59 = vadd.f32 %v8041_v54, %v2714_v13  ;;  %vm8154_vm3 = vmor %vm2716_vm2, %vm2717_vm13 }
 0x52a   : > { %v2654_v46 = vmul.f32 %v5999_v15, %v2653_v62  ;;  %v2640_v16 = vadd.f32 %v5997_v55, %v2639_v48  ;;  %vm2701_vm0 = vweird.f32 %v7730_v10  ;;  %vm8141_vm14 = vcmp.eq.f32.partialorder %v2720_v42, 8.507059e+37 }
 0x52b   : > { %vm8163_vm4 = vmor %vm2701_vm0, %vm2702_vm15  ;;  %v2719_v4 = vsel %vm8154_vm3, %v8041_v54, %v2715_v59  ;;  %vm2851_vm5 = vweird.f32 %v8085_v29 }
 0x52c   : > { %v2655_v62 = vadd.f32 %v5999_v15, %v2654_v46  ;;  %v8114_v48 = vpop.xlane.xlu1 %2043  ;;  %v8116_v47 = vpop.xlane.xlu0 %2370  ;;  %3895 = vrot.lane.b32.xlu2 %v10424_v8, %s6225_s24  ;;  %v2644_v22 = vsel %vm8109_vm8, %v5997_v55, %v2640_v16  ;;  %v2707_v46 = vand.u32 2147483648, %v7730_v10  ;;  %v2723_v55 = vor.u32 1.1754944e-38, %v2722_v12  ;;  %v10430_v12 = vld [vmem:[#allocation27_spill] sm:$0xff] }
 0x52d   : > { %6002 = vrcp.f32 %v8116_v47  ;;  %v2649_v25 = vsel %vm2646_vm11, %v2648_v51, %v2644_v22  ;;  %v2700_v16 = vadd.f32 %v8048_v45, %v2699_v34  ;;  %v2141_v13 = vsub.f32 %v10430_v12, %v7927_v21 }
 0x52e   : > { %v2659_v39 = vsel %vm2658_vm10, %v5999_v15, %v2655_v62  ;;  %v2650_v14 = vmul.f32 %v10425_v56, %v2649_v25  ;;  %v6001_v3 = vpop.eup %6000  ;;  %v2276_v15 = vmul.f32 1.442695, %v2157_v30  ;;  %v2708_v53 = vor.u32 1.1754944e-38, %v2707_v46  ;;  %v10436_v46 = vld [vmem:[#allocation6_spill] sm:$0xff] }
 0x52f   : > { %v2664_v7 = vsel %vm2661_vm12, %v2663_v23, %v2659_v39  ;;  %v8129_v38 = vpop.xlane.xlu2 %2052  ;;  %v2847_v60 = vmul.f32 %v6001_v3, %v8085_v29  ;;  %v8148_v62 = vmul.f32 %v10431_v44, %v2694_v40  ;;  %v2705_v21 = vand.u32 2147483647, %v7730_v10 }
 0x530   : > { %v2665_v18 = vmul.f32 %v10426_v19, %v2664_v7  ;;  %v3456_v25 = vpack.c.bf16 %v2650_v14, %v2650_v14  ;;  %6004 = vpow2.f32 %v2276_v15  ;;  %v2857_v8 = vand.u32 2147483648, %v8085_v29 }
 0x531   : > { %v2848_v42 = vsub.f32 1.0, %v2847_v60  ;;  %v2704_v40 = vsel %vm8163_vm4, %v8048_v45, %v2700_v16  ;;  %vm2852_vm2 = vweird.f32 %v6001_v3  ;;  %v2855_v10 = vand.u32 2147483647, %v8085_v29  ;;  %v10437_v45 = vld [vmem:[#allocation22_spill] sm:$0xff] }
 0x532   : > { %3899 = vrot.lane.b32.xlu1 %v10427_v50, %s6225_s24  ;;  %v3457_v34 = vpack.c.bf16 %v2665_v18, %v2665_v18  ;;  %v3593_v39 = vunpack.c.l.b16 %v3456_v25  ;;  %v2244_v60 = vmul.f32 1.442695, %v2141_v13  ;;  %v2872_v54 = vand.u32 2147483648, %v8116_v47  ;;  %vm2853_vm9 = vmor %vm2851_vm5, %vm2852_vm2 }
 0x533   : > { %v6003_v7 = vpop.eup %6002  ;;  %v2849_v56 = vmul.f32 %v6001_v3, %v2848_v42  ;;  %v2870_v25 = vand.u32 2147483647, %v8116_v47  ;;  %v2142_v16 = vsub.f32 %v10437_v45, %v7947_v26  ;;  %v2858_v44 = vor.u32 1.1754944e-38, %v2857_v8  ;;  %v10439_v8 = vld [vmem:[#allocation42_spill] sm:$0xff]  ;;  %v10445_v45 = vld [vmem:[#allocation15_spill] sm:$0xff] }
 0x534   : > { %v2862_v51 = vmul.f32 %v6003_v7, %v8116_v47  ;;  %v8159_v23 = vpop.xlane.xlu1 %2049  ;;  %v8172_v22 = vpop.xlane.xlu0 %2394  ;;  %4043 = vrot.lane.b32.xlu2 %v10436_v46, %s6225_s24  ;;  %v3594_v59 = vunpack.c.l.b16 %v3457_v34  ;;  %vm2867_vm8 = vweird.f32 %v6003_v7  ;;  %vm2706_vm10 = vcmp.eq.f32.partialorder %v2705_v21, 8.507059e+37 }
 0x535   : > { %v2850_v15 = vadd.f32 %v6001_v3, %v2849_v56  ;;  %vm2856_vm11 = vcmp.eq.f32.partialorder %v2855_v10, 8.507059e+37  ;;  %vm2866_vm12 = vweird.f32 %v8116_v47  ;;  %v2709_v18 = vsel %vm2706_vm10, %v2708_v53, %v2704_v40  ;;  %v10440_v47 = vld [vmem:[#allocation25_spill] sm:$0xff] }
 0x536   : > { %v2863_v14 = vsub.f32 1.0, %v2862_v51  ;;  %v3600_v30 = vpack.c.b16 %v3594_v59, %v3593_v39  ;;  %v8188_v34 = vpop.eup %6004  ;;  %vm2868_vm13 = vmor %vm2866_vm12, %vm2867_vm8  ;;  %v2873_v51 = vor.u32 1.1754944e-38, %v2872_v54  ;;  %v2724_v26 = vsel %vm8141_vm14, %v2723_v55, %v2719_v4  ;;  %v10442_v4 = vld [vmem:[#allocation13_spill] sm:$0xff]  ;;  %v10443_v54 = vld [vmem:[#allocation16_spill] sm:$0xff] }
 0x537   : > { %v8183_v12 = vpop.xlane.xlu2 %2343  ;;  %v2854_v13 = vsel %vm2853_vm9, %v6001_v3, %v2850_v15  ;;  %10438 = vst [vmem:[#allocation9_spill] sm:$0xff] %v8188_v34  ;;  %6006 = vpow2.f32 %v2244_v60  ;;  %vm2871_vm15 = vcmp.eq.f32.partialorder %v2870_v25, 8.507059e+37  ;;  %v2246_v46 = vmul.f32 1.442695, %v2142_v16  ;;  %v10444_v59 = vld [vmem:[#allocation33_spill] sm:$0xff] }
 0x538   : > { %v2864_v50 = vmul.f32 %v6003_v7, %v2863_v14  ;;  %v2859_v42 = vsel %vm2856_vm11, %v2858_v44, %v2854_v13  ;;  %5459 = vmatmul.msk.bf16.gmra.mxu3 %vm1909_vm7, %v3600_v30  ;;  %v2143_v56 = vsub.f32 %v10440_v47, %v7972_v0  ;;  %v10441_v14 = vld [vmem:[#allocation30_spill] sm:$0xff]  ;;  %v2459_v19 = vsel %vm1909_vm7, %v8188_v34, 0.0  ;;  %v10449_v47 = vld [vmem:[#allocation36_spill] sm:$0xff] }
 0x539   : > { %v2860_v39 = vmul.f32 %v10439_v8, %v2859_v42  ;;  %v2144_v53 = vsub.f32 %v10441_v14, %v8006_v49  ;;  %v2680_v60 = vmul.f32 %v10442_v4, %v8074_v5  ;;  %v2710_v0 = vmul.f32 %v10443_v54, %v2709_v18  ;;  %v10450_v14 = vld [vmem:[#allocation31_spill] sm:$0xff]  ;;  %v10452_v4 = vld [vmem:[#allocation40_spill] sm:$0xff] }
 0x53a   : > { %v2865_v29 = vadd.f32 %v6003_v7, %v2864_v50  ;;  %v2145_v15 = vsub.f32 %v10444_v59, %v8066_v36  ;;  %v3459_v25 = vpack.c.bf16 %v8148_v62, %v8148_v62  ;;  %v2725_v16 = vmul.f32 %v10445_v45, %v2724_v26  ;;  %v10448_v62 = vld [vmem:[#allocation24_spill] sm:$0xff] }
 0x53b   : > { %v3470_v40 = vpack.c.bf16 %v2860_v39, %v2860_v39  ;;  %v2250_v5 = vmul.f32 1.442695, %v2144_v53  ;;  %v3460_v18 = vpack.c.bf16 %v2710_v0, %v2710_v0  ;;  %v2160_v8 = vsub.f32 %v10448_v62, %v7953_v9 }
 0x53c   : > { %v2869_v21 = vsel %vm2868_vm13, %v6003_v7, %v2865_v29  ;;  %v8194_v3 = vpop.xlane.xlu1 %2439  ;;  %v8204_v7 = vpop.xlane.xlu0 %2445  ;;  %v10447_v29 = vld [vmem:[#allocation28_spill] sm:$0xff]  ;;  %v2252_v26 = vmul.f32 1.442695, %v2145_v15  ;;  %v2162_v53 = vsub.f32 %v10450_v14, %v8004_v61  ;;  %vm2986_vm3 = vweird.f32 %v8172_v22 }
 0x53d   : > { %v2874_v10 = vsel %vm2871_vm15, %v2873_v51, %v2869_v21  ;;  %6008 = vrcp.f32 %v8194_v3  ;;  %v8217_v44 = vpop.eup %6006  ;;  %v3737_v30 = vunpack.c.l.b16 %v3470_v40  ;;  %v2161_v42 = vsub.f32 %v10447_v29, %v7951_v41 }
 0x53e   : > { %v2875_v55 = vmul.f32 %v7684_v57, %v2874_v10  ;;  %6010 = vrcp.f32 %v8172_v22  ;;  %v2248_v57 = vmul.f32 1.442695, %v2143_v56  ;;  %10446 = vst [vmem:[#allocation35_spill] sm:$0xff] %v8217_v44  ;;  %v3458_v51 = vpack.c.bf16 %v2680_v60, %v2680_v60 }
 0x53f   : > { %2460 = vadd.xlane.f32.xlu0 %v2459_v19  ;;  %v8212_v49 = vpop.xlane.xlu2 %2391  ;;  %6012 = vpow2.f32 %v2246_v46  ;;  %v2163_v56 = vsub.f32 %v10449_v47, %v7998_v33  ;;  %v3596_v10 = vunpack.c.l.b16 %v3459_v25  ;;  %v2411_v9 = vsel %vm1909_vm7, %v8217_v44, 0.0 }
 0x540   : > { %v3471_v50 = vpack.c.bf16 %v2875_v55, %v2875_v55  ;;  %6014 = vrcp.f32 %v8212_v49  ;;  %v3461_v40 = vpack.c.bf16 %v2725_v16, %v2725_v16  ;;  %v2284_v19 = vmul.f32 1.442695, %v2161_v42 }
 0x541   : > { %6016 = vrcp.f32 %v8183_v12  ;;  %v2147_v60 = vsub.f32 %v10452_v4, %v8045_v17  ;;  %v3595_v33 = vunpack.c.l.b16 %v3458_v51  ;;  %v2282_v0 = vmul.f32 1.442695, %v2160_v8 }
 0x542   : > { %v3738_v13 = vunpack.c.l.b16 %v3471_v50  ;;  %6018 = vpow2.f32 %v2248_v57  ;;  %v8246_v59 = vunpack.c.l.b16 %v3460_v18  ;;  %v2288_v50 = vmul.f32 1.442695, %v2163_v56 }
 0x543   : > { %v8220_v36 = vpop.eup %6008  ;;  %6020 = vpow2.f32 %v2250_v5  ;;  %v3601_v45 = vpack.c.b16 %v3596_v10, %v3595_v33  ;;  %v2286_v16 = vmul.f32 1.442695, %v2162_v53  ;;  %v8256_v5 = vunpack.c.l.b16 %v3461_v40 }
 0x544   : > { %v3745_v39 = vpack.c.b16 %v3738_v13, %v3737_v30  ;;  %v3207_v21 = vmul.f32 %v8220_v36, %v8194_v3  ;;  %v8229_v46 = vpop.xlane.xlu1 %2373  ;;  %v8233_v41 = vpop.eup %6010  ;;  %6022 = vpow2.f32 %v2252_v26  ;;  %v2256_v13 = vmul.f32 1.442695, %v2147_v60 }
 0x545   : > { %v8240_v55 = vpop.eup %6012  ;;  %v2982_v57 = vmul.f32 %v8233_v41, %v8172_v22  ;;  %v8252_v25 = vpop.xlane.xlu0 %2448  ;;  %6024 = vpow2.f32 %v2284_v19  ;;  %v2146_v8 = vsub.f32 %v7618_v6, %v8114_v48  ;;  %v10457_v6 = vld [vmem:[#allocation41_spill] sm:$0xff]  ;;  %vm3212_vm0 = vweird.f32 %v8220_v36 }
 0x546   : > { %5466 = vmatmul.msk.bf16.vlgmr.msrb.gmra.mxu1 %vm1909_vm7, %v3745_v39  ;;  %10451 = vst [vmem:[#allocation34_spill] sm:$0xff] %v8240_v55  ;;  %v8244_v54 = vpop.eup %6014  ;;  %v3208_v61 = vsub.f32 1.0, %v3207_v21  ;;  %6026 = vpow2.f32 %v2282_v0  ;;  %v2414_v21 = vsel %vm1909_vm7, %v8240_v55, 0.0  ;;  %vm3211_vm14 = vweird.f32 %v8194_v3 }
 0x547   : > { %2412 = vadd.xlane.f32.xlu0 %v2411_v9  ;;  %v8248_v15 = vpop.eup %6016  ;;  %v2967_v17 = vmul.f32 %v8244_v54, %v8212_v49  ;;  %6028 = vpow2.f32 %v2288_v50  ;;  %v2983_v26 = vsub.f32 1.0, %v2982_v57  ;;  %v8272_v39 = vpop.xlane.xlu2 %2442  ;;  %v2990_v9 = vand.u32 2147483647, %v8172_v22  ;;  %vm8321_vm2 = vmor %vm3211_vm14, %vm3212_vm0 }
 0x548   : > { %v8258_v30 = vpop.eup %6018  ;;  %5460 = vmatmul.msk.bf16.gmra.mxu3 %vm1909_vm7, %v3601_v45  ;;  %v2727_v42 = vmul.f32 %v8248_v15, %v8183_v12  ;;  %v3209_v51 = vmul.f32 %v8220_v36, %v3208_v61  ;;  %6030 = vpow2.f32 %v2286_v16  ;;  %v8296_v33 = vmul.f32 1.442695, %v2146_v8 }
 0x549   : > { %10453 = vst [vmem:[#allocation5_spill] sm:$0xff] %v8258_v30  ;;  %v8261_v29 = vpop.eup %6020  ;;  %v2968_v14 = vsub.f32 1.0, %v2967_v17  ;;  %v8282_v53 = vsel %vm1909_vm7, %v8258_v30, 0.0  ;;  %6032 = vpow2.f32 %v2256_v13  ;;  %v2984_v0 = vmul.f32 %v8233_v41, %v2983_v26 }
 0x54a   : > { %10454 = vst [vmem:[#allocation26_spill] sm:$0xff] %v8261_v29  ;;  %v8276_v47 = vpop.eup %6022  ;;  %v8289_v40 = vsel %vm1909_vm7, %v8261_v29, 0.0  ;;  %v2728_v19 = vsub.f32 1.0, %v2727_v42  ;;  %v3210_v4 = vadd.f32 %v8220_v36, %v3209_v51  ;;  %6034 = vrcp.f32 %v8272_v39 }
 0x54b   : > { %10455 = vst [vmem:[#allocation11_spill] sm:$0xff] %v8276_v47  ;;  %v8294_v60 = vpop.eup %6024  ;;  %v3217_v61 = vand.u32 2147483648, %v8194_v3  ;;  %v8302_v50 = vsel %vm1909_vm7, %v8276_v47, 0.0  ;;  %v2992_v45 = vand.u32 2147483648, %v8172_v22  ;;  %v3215_v16 = vand.u32 2147483647, %v8194_v3 }
 0x54c   : > { %v8266_v18 = vpop.xlane.xlu1 %2346  ;;  %v8304_v57 = vpop.eup %6026  ;;  %v2969_v17 = vmul.f32 %v8244_v54, %v2968_v14  ;;  %vm8315_vm4 = vcmp.eq.f32.partialorder %v2990_v9, 8.507059e+37  ;;  %6036 = vrcp.f32 %v8204_v7  ;;  %vm2987_vm5 = vweird.f32 %v8233_v41 }
 0x54d   : > { %10458 = vst [vmem:[#allocation38_spill] sm:$0xff] %v8304_v57  ;;  %v8310_v13 = vpop.eup %6028  ;;  %v8326_v3 = vpop.xlane.xlu0 %2379  ;;  %v3214_v14 = vsel %vm8321_vm2, %v8220_v36, %v3210_v4  ;;  %6038 = vrcp.f32 %v8266_v18  ;;  %v2985_v10 = vadd.f32 %v8233_v41, %v2984_v0  ;;  %v3218_v48 = vor.u32 1.1754944e-38, %v3217_v61  ;;  %vm8352_vm11 = vmor %vm2986_vm3, %vm2987_vm5 }
 0x54e   : > { %v8328_v26 = vpop.eup %6030  ;;  %v2975_v42 = vand.u32 2147483647, %v8212_v49  ;;  %6040 = vrcp.f32 %v8229_v46  ;;  %v2993_v47 = vor.u32 1.1754944e-38, %v2992_v45  ;;  %vm3216_vm8 = vcmp.eq.f32.partialorder %v3215_v16, 8.507059e+37 }
 0x54f   : > { %2415 = vadd.xlane.f32.xlu0 %v2414_v21  ;;  %10463 = vst [vmem:[#allocation39_spill] sm:$0xff] %v8328_v26  ;;  %v2729_v21 = vmul.f32 %v8248_v15, %v2728_v19  ;;  %v8336_v9 = vpop.eup %6032  ;;  %v2970_v19 = vadd.f32 %v8244_v54, %v2969_v17  ;;  %vm2972_vm9 = vweird.f32 %v8244_v54  ;;  %vm2731_vm10 = vweird.f32 %v8183_v12  ;;  %v8384_v30 = vpop.xlane.xlu2 %2376 }
 0x550   : > { %v6035_v62 = vpop.eup %6034  ;;  %v3219_v36 = vsel %vm3216_vm8, %v3218_v48, %v3214_v14  ;;  %v2977_v4 = vand.u32 2147483648, %v8212_v49  ;;  %vm2732_vm12 = vweird.f32 %v8248_v15  ;;  %v2735_v16 = vand.u32 2147483647, %v8183_v12 }
 0x551   : > { %v3222_v0 = vmul.f32 %v6035_v62, %v8272_v39  ;;  %v8357_v45 = vadd.f32 %v8248_v15, %v2729_v21  ;;  %vm2971_vm13 = vweird.f32 %v8212_v49  ;;  %v2989_v17 = vsel %vm8352_vm11, %v8233_v41, %v2985_v10  ;;  %vm8392_vm14 = vmor %vm2731_vm10, %vm2732_vm12 }
 0x552   : > { %v8362_v48 = vpop.eup %6036  ;;  %v2737_v22 = vand.u32 2147483648, %v8183_v12  ;;  %vm8368_vm15 = vmor %vm2971_vm13, %vm2972_vm9  ;;  %vm8372_vm0 = vcmp.eq.f32.partialorder %v2975_v42, 8.507059e+37  ;;  %v3220_v49 = vmul.f32 %v7725_v43, %v3219_v36  ;;  %v3230_v41 = vand.u32 2147483647, %v8272_v39 }
 0x553   : > { %10466 = vst [vmem:[#allocation7_spill] sm:$0xff] %v8362_v48  ;;  %v3223_v29 = vsub.f32 1.0, %v3222_v0  ;;  %v8376_v34 = vpop.eup %6038  ;;  %v2974_v61 = vsel %vm8368_vm15, %v8244_v54, %v2970_v19  ;;  %v3232_v10 = vand.u32 2147483648, %v8272_v39  ;;  %v2978_v43 = vor.u32 1.1754944e-38, %v2977_v4 }
 0x554   : > { %v8343_v8 = vpop.xlane.xlu1 %2349  ;;  %v8386_v55 = vpop.eup %6040  ;;  %vm3227_vm3 = vweird.f32 %v6035_v62  ;;  %v2742_v54 = vmul.f32 %v8376_v34, %v8266_v18  ;;  %v10473_v19 = vpack.c.b16 %v8256_v5, %v8246_v59  ;;  %v2994_v0 = vsel %vm8315_vm4, %v2993_v47, %v2989_v17 }
 0x555   : > { %v3224_v36 = vmul.f32 %v6035_v62, %v3223_v29  ;;  %v2734_v12 = vsel %vm8392_vm14, %v8248_v15, %v8357_v45  ;;  %v3237_v29 = vmul.f32 %v8362_v48, %v8204_v7  ;;  %6042 = vrcp.f32 %v8252_v25  ;;  %v8415_v47 = vpop.xlane.xlu0 %2352 }
 0x556   : > { %v2979_v59 = vsel %vm8372_vm0, %v2978_v43, %v2974_v61  ;;  %vm3226_vm2 = vweird.f32 %v8272_v39  ;;  %v2743_v51 = vsub.f32 1.0, %v2742_v54  ;;  %v3494_v4 = vpack.c.bf16 %v3220_v49, %v3220_v49  ;;  %v10477_v54 = vld [vmem:[#allocation10_spill] sm:$0xff] }
 0x557   : > { %v3225_v5 = vadd.f32 %v6035_v62, %v3224_v36  ;;  %v2877_v15 = vmul.f32 %v8386_v55, %v8229_v46  ;;  %vm3228_vm4 = vmor %vm3226_vm2, %vm3227_vm3  ;;  %vm3231_vm5 = vcmp.eq.f32.partialorder %v3230_v41, 8.507059e+37  ;;  %v3233_v45 = vor.u32 1.1754944e-38, %v3232_v10 }
 0x558   : > { %5461 = vmatmul.msk.bf16.gmra.mxu3 %vm1909_vm7, %v10473_v19  ;;  %v2744_v17 = vmul.f32 %v8376_v34, %v2743_v51  ;;  %vm2747_vm8 = vweird.f32 %v8376_v34  ;;  %6044 = vrcp.f32 %v8326_v3  ;;  %v2980_v39 = vmul.f32 %v7746_v2, %v2979_v59  ;;  %v8453_v19 = vpop.xlane.xlu2 %2397 }
 0x559   : > { %v2752_v21 = vand.u32 2147483648, %v8266_v18  ;;  %6046 = vrcp.f32 %v8384_v30  ;;  %vm2746_vm9 = vweird.f32 %v8266_v18  ;;  %v10474_v2 = vsub.f32 %v7698_v11, %v8129_v38 }
 0x55a   : > { %6048 = vpow2.f32 %v8296_v33  ;;  %v2995_v42 = vmul.f32 %v7709_v58, %v2994_v0  ;;  %v2738_v43 = vor.u32 1.1754944e-38, %v2737_v22  ;;  %vm8442_vm10 = vmor %vm2746_vm9, %vm2747_vm8  ;;  %vm2736_vm11 = vcmp.eq.f32.partialorder %v2735_v16, 8.507059e+37 }
 0x55b   : > { %v8433_v41 = vpop.eup %6042  ;;  %v2260_v10 = vmul.f32 1.442695, %v10474_v2  ;;  %v3238_v36 = vsub.f32 1.0, %v3237_v29  ;;  %v2148_v11 = vsub.f32 %v7659_v28, %v8159_v23  ;;  %v2878_v38 = vsub.f32 1.0, %v2877_v15 }
 0x55c   : > { %2418 = vadd.xlane.f32.xlu1 %v8282_v53  ;;  %v3229_v53 = vsel %vm3228_vm4, %v6035_v62, %v3225_v5  ;;  %v8427_v49 = vpop.xlane.xlu1 %2400  ;;  %v2750_v62 = vand.u32 2147483647, %v8266_v18  ;;  %v2739_v58 = vsel %vm2736_vm11, %v2738_v43, %v2734_v12  ;;  %v2753_v22 = vor.u32 1.1754944e-38, %v2752_v21 }
 0x55d   : > { %2421 = vadd.xlane.f32.xlu2 %v8289_v40  ;;  %v3234_v14 = vsel %vm3231_vm5, %v3233_v45, %v3229_v53  ;;  %v2745_v40 = vadd.f32 %v8376_v34, %v2744_v17  ;;  %v8457_v16 = vunpack.c.l.b16 %v3494_v4  ;;  %v3478_v29 = vpack.c.bf16 %v2980_v39, %v2980_v39  ;;  %v8474_v45 = vpop.xlane.xlu0 %2403 }
 0x55e   : > { %v3235_v61 = vmul.f32 %v7775_v31, %v3234_v14  ;;  %v8455_v0 = vpop.eup %6044  ;;  %vm2751_vm12 = vcmp.eq.f32.partialorder %v2750_v62, 8.507059e+37  ;;  %v10480_v5 = vsub.f32 %v10457_v6, %v8068_v35  ;;  %6050 = vpow2.f32 %v2260_v10 }
 0x55f   : > { %v2749_v33 = vsel %vm8442_vm10, %v8376_v34, %v2745_v40  ;;  %10478 = vst [vmem:[#allocation27_spill] sm:$0xff] %v8457_v16  ;;  %v8461_v34 = vpop.eup %6046  ;;  %v3479_v28 = vpack.c.bf16 %v2995_v42, %v2995_v42  ;;  %v2740_v12 = vmul.f32 %v7721_v20, %v2739_v58  ;;  %v3239_v4 = vmul.f32 %v8362_v48, %v3238_v36 }
 0x560   : > { %v3495_v18 = vpack.c.bf16 %v3235_v61, %v3235_v61  ;;  %v8466_v51 = vmul.f32 1.442695, %v10480_v5  ;;  %v2754_v23 = vsel %vm2751_vm12, %v2753_v22, %v2749_v33  ;;  %6052 = vrcp.f32 %v8343_v8  ;;  %v8476_v53 = vpop.eup %6048  ;;  %v10584_v22 = vld [vmem:[#allocation29_spill] sm:$0xff] }
 0x561   : > { %v2879_v35 = vmul.f32 %v8386_v55, %v2878_v38  ;;  %v2907_v6 = vmul.f32 %v8455_v0, %v8326_v3  ;;  %6054 = vrcp.f32 %v8415_v47  ;;  %v8484_v20 = vsel %vm1909_vm7, %v8304_v57, 0.0 }
 0x562   : > { %v8459_v59 = vunpack.c.l.b16 %v3495_v18  ;;  %10481 = vst [vmem:[#allocation6_spill] sm:$0xff] %v8466_v51  ;;  %v3810_v17 = vunpack.c.l.b16 %v3478_v29  ;;  %v2755_v39 = vmul.f32 %v7780_v37, %v2754_v23  ;;  %v2892_v14 = vmul.f32 %v8461_v34, %v8384_v30 }
 0x563   : > { %4047 = vrot.lane.b32.xlu0 %v10477_v54, %s6225_s24  ;;  %vm3241_vm13 = vweird.f32 %v8204_v7  ;;  %vm3242_vm15 = vweird.f32 %v8362_v48  ;;  %v2885_v21 = vand.u32 2147483647, %v8229_v46  ;;  %v3252_v61 = vmul.f32 %v8433_v41, %v8252_v25 }
 0x564   : > { %10479 = vst [vmem:[#allocation14_spill] sm:$0xff] %v8459_v59  ;;  %v8496_v40 = vpop.xlane.xlu1 %2382  ;;  %v3811_v62 = vunpack.c.l.b16 %v3479_v28  ;;  %v3462_v2 = vpack.c.bf16 %v2740_v12, %v2740_v12  ;;  %v8499_v10 = vadd.f32 %v8362_v48, %v3239_v4  ;;  %v2887_v37 = vand.u32 2147483648, %v8229_v46  ;;  %v8502_v42 = vpop.eup %6050  ;;  %vm8516_vm14 = vmor %vm3241_vm13, %vm3242_vm15  ;;  %v10492_v12 = vld [vmem:[#allocation8_spill] sm:$0xff] }
 0x565   : > { %2424 = vadd.xlane.f32.xlu2 %v8302_v50  ;;  %v8486_v50 = vmul.f32 1.442695, %v2148_v11  ;;  %10483 = vst [vmem:[#allocation42_spill] sm:$0xff] %v8502_v42  ;;  %v2880_v31 = vadd.f32 %v8386_v55, %v2879_v35  ;;  %vm2882_vm0 = vweird.f32 %v8386_v55  ;;  %v2908_v36 = vsub.f32 1.0, %v2907_v6  ;;  %v8526_v28 = vpop.xlane.xlu2 %2451 }
 0x566   : > { %10482 = vst [vmem:[#allocation22_spill] sm:$0xff] %v8499_v10  ;;  %v8507_v18 = vpop.eup %6052  ;;  %v3463_v54 = vpack.c.bf16 %v2755_v39, %v2755_v39  ;;  %v2893_v11 = vsub.f32 1.0, %v2892_v14  ;;  %v3818_v58 = vpack.c.b16 %v3811_v62, %v3810_v17  ;;  %vm2881_vm3 = vweird.f32 %v8229_v46  ;;  %v8551_v62 = vpop.xlane.xlu0 %2454 }
 0x567   : > { %v8510_v38 = vpop.eup %6054  ;;  %vm8521_vm2 = vcmp.eq.f32.partialorder %v2885_v21, 8.507059e+37  ;;  %v3253_v5 = vsub.f32 1.0, %v3252_v61  ;;  %6056 = vrcp.f32 %v8453_v19  ;;  %10488 = vst [vmem:[#allocation25_spill] sm:$0xff] %v8526_v28  ;;  %v3664_v23 = vunpack.c.l.b16 %v3462_v2  ;;  %vm8534_vm4 = vmor %vm2881_vm3, %vm2882_vm0 }
 0x568   : > { %v2888_v46 = vor.u32 1.1754944e-38, %v2887_v37  ;;  %5470 = vmatmul.msk.bf16.vlgmr.msrb.gmra.mxu2 %vm1909_vm7, %v3818_v58  ;;  %6058 = vrcp.f32 %v8474_v45  ;;  %v2884_v35 = vsel %vm8534_vm4, %v8386_v55, %v2880_v31  ;;  %v2909_v17 = vmul.f32 %v8455_v0, %v2908_v36  ;;  %10491 = vst [vmem:[#allocation30_spill] sm:$0xff] %v8551_v62 }
 0x569   : > { %6060 = vrcp.f32 %v8496_v40  ;;  %v3665_v39 = vunpack.c.l.b16 %v3463_v54  ;;  %v2894_v14 = vmul.f32 %v8461_v34, %v2893_v11  ;;  %v2757_v21 = vmul.f32 %v8507_v18, %v8343_v8 }
 0x56a   : > { %v2772_v61 = vmul.f32 %v8510_v38, %v8415_v47  ;;  %v3254_v2 = vmul.f32 %v8433_v41, %v3253_v5  ;;  %v2915_v37 = vand.u32 2147483647, %v8326_v3  ;;  %6062 = vrcp.f32 %v8427_v49 }
 0x56b   : > { %v2889_v31 = vsel %vm8521_vm2, %v2888_v46, %v2884_v35  ;;  %vm2911_vm5 = vweird.f32 %v8326_v3  ;;  %v2917_v36 = vand.u32 2147483648, %v8326_v3  ;;  %v2900_v54 = vand.u32 2147483647, %v8384_v30 }
 0x56c   : > { %v2910_v58 = vadd.f32 %v8455_v0, %v2909_v17  ;;  %vm2912_vm8 = vweird.f32 %v8455_v0  ;;  %vm2897_vm9 = vweird.f32 %v8461_v34  ;;  %v2902_v5 = vand.u32 2147483648, %v8384_v30  ;;  %v8568_v4 = vpop.xlane.xlu1 %2358 }
 0x56d   : > { %v8562_v11 = vpop.eup %6056  ;;  %v2895_v46 = vadd.f32 %v8461_v34, %v2894_v14  ;;  %v2758_v35 = vsub.f32 1.0, %v2757_v21  ;;  %v2773_v15 = vsub.f32 1.0, %v2772_v61  ;;  %v3672_v6 = vpack.c.b16 %v3665_v39, %v3664_v23  ;;  %vm8590_vm11 = vmor %vm2911_vm5, %vm2912_vm8 }
 0x56e   : > { %v8570_v29 = vpop.eup %6058  ;;  %v8578_v17 = vadd.f32 %v8433_v41, %v3254_v2  ;;  %vm8580_vm10 = vcmp.eq.f32.partialorder %v2915_v37, 8.507059e+37  ;;  %v2767_v43 = vand.u32 2147483648, %v8343_v8  ;;  %v2782_v57 = vand.u32 2147483648, %v8415_v47 }
 0x56f   : > { %v8575_v55 = vpop.eup %6060  ;;  %vm2896_vm12 = vweird.f32 %v8384_v30  ;;  %vm8595_vm13 = vcmp.eq.f32.partialorder %v2900_v54, 8.507059e+37  ;;  %v2997_v14 = vmul.f32 %v8562_v11, %v8453_v19  ;;  %5462 = vmatmul.msk.bf16.vlgmr.msra.gmra.mxu0 %vm1909_vm7, %v3672_v6  ;;  %v2914_v3 = vsel %vm8590_vm11, %v8455_v0, %v2910_v58  ;;  %v8617_v6 = vpop.xlane.xlu2 %2355 }
 0x570   : > { %v8602_v21 = vpop.eup %6062  ;;  %vm8609_vm15 = vmor %vm2896_vm12, %vm2897_vm9  ;;  %v2903_v30 = vor.u32 1.1754944e-38, %v2902_v5  ;;  %v3027_v2 = vmul.f32 %v8570_v29, %v8474_v45  ;;  %v2922_v37 = vmul.f32 %v8575_v55, %v8496_v40  ;;  %v2759_v0 = vmul.f32 %v8507_v18, %v2758_v35 }
 0x571   : > { %v2774_v54 = vmul.f32 %v8510_v38, %v2773_v15  ;;  %v3007_v58 = vand.u32 2147483648, %v8453_v19  ;;  %v2765_v5 = vand.u32 2147483647, %v8343_v8  ;;  %v8626_v23 = vor.u32 1.1754944e-38, %v2767_v43 }
 0x572   : > { %v2780_v44 = vand.u32 2147483647, %v8415_v47  ;;  %v8629_v16 = vor.u32 1.1754944e-38, %v2782_v57  ;;  %v2998_v61 = vsub.f32 1.0, %v2997_v14  ;;  %v3012_v15 = vmul.f32 %v8602_v21, %v8427_v49 }
 0x573   : > { %v3028_v35 = vsub.f32 1.0, %v3027_v2  ;;  %v2923_v42 = vsub.f32 1.0, %v2922_v37  ;;  %6064 = vrcp.f32 %v8617_v6  ;;  %v8644_v57 = vadd.f32 %v8507_v18, %v2759_v0  ;;  %v10501_v37 = vld [vmem:[#allocation12_spill] sm:$0xff] }
 0x574   : > { %vm2762_vm0 = vweird.f32 %v8507_v18  ;;  %v8648_v33 = vadd.f32 %v8510_v38, %v2774_v54  ;;  %v3022_v14 = vand.u32 2147483648, %v8427_v49  ;;  %v3020_v39 = vand.u32 2147483647, %v8427_v49  ;;  %v8658_v2 = vpop.xlane.xlu1 %2406 }
 0x575   : > { %4045 = vrot.lane.b32.xlu1 %v10492_v12, %s6225_s24  ;;  %v2918_v12 = vor.u32 1.1754944e-38, %v2917_v36  ;;  %v2899_v36 = vsel %vm8609_vm15, %v8461_v34, %v2895_v46  ;;  %v3005_v34 = vand.u32 2147483647, %v8453_v19  ;;  %v8638_v46 = vpop.xlane.xlu0 %2385  ;;  %6066 = vrcp.f32 %v8526_v28 }
 0x576   : > { %v2904_v43 = vsel %vm8595_vm13, %v2903_v30, %v2899_v36  ;;  %v2890_v30 = vmul.f32 %v7748_v24, %v2889_v31  ;;  %vm2761_vm2 = vweird.f32 %v8343_v8  ;;  %v2999_v36 = vmul.f32 %v8562_v11, %v2998_v61 }
 0x577   : > { %v8633_v59 = vsel %vm8580_vm10, %v2918_v12, %v2914_v3  ;;  %v8650_v12 = vor.u32 1.1754944e-38, %v3007_v58  ;;  %v3035_v3 = vand.u32 2147483647, %v8474_v45  ;;  %v3013_v0 = vsub.f32 1.0, %v3012_v15 }
 0x578   : > { %6068 = vrcp.f32 %v8551_v62  ;;  %v2905_v54 = vmul.f32 %v7818_v32, %v2904_v43  ;;  %v3029_v24 = vmul.f32 %v8570_v29, %v3028_v35  ;;  %v2924_v31 = vmul.f32 %v8575_v55, %v2923_v42 }
 0x579   : > { %6070 = vrcp.f32 %v8568_v4  ;;  %v3472_v58 = vpack.c.bf16 %v2890_v30, %v2890_v30  ;;  %vm3031_vm9 = vweird.f32 %v8474_v45  ;;  %v3037_v61 = vand.u32 2147483648, %v8474_v45  ;;  %v8676_v51 = vpop.eup %6064 }
 0x57a   : > { %v3473_v15 = vpack.c.bf16 %v2905_v54, %v2905_v54  ;;  %vm8678_vm10 = vcmp.eq.f32.partialorder %v2765_v5, 8.507059e+37  ;;  %vm8683_vm12 = vcmp.eq.f32.partialorder %v3035_v3, 8.507059e+37  ;;  %v2930_v43 = vand.u32 2147483647, %v8496_v40 }
 0x57b   : > { %v2932_v35 = vand.u32 2147483648, %v8496_v40  ;;  %6072 = vrcp.f32 %v8638_v46  ;;  %vm8692_vm13 = vcmp.eq.f32.partialorder %v2780_v44, 8.507059e+37  ;;  %v3014_v5 = vmul.f32 %v8602_v21, %v3013_v0  ;;  %v8698_v26 = vpop.eup %6066 }
 0x57c   : > { %vm3032_vm15 = vweird.f32 %v8570_v29  ;;  %v3739_v3 = vunpack.c.l.b16 %v3472_v58  ;;  %v3740_v54 = vunpack.c.l.b16 %v3473_v15  ;;  %v8701_v52 = vadd.f32 %v8562_v11, %v2999_v36 }
 0x57d   : > { %4041 = vrot.lane.b32.xlu2 %v10501_v37, %s6225_s24  ;;  %v8672_v37 = vor.u32 1.1754944e-38, %v3022_v14  ;;  %v8690_v14 = vpop.xlane.xlu2 %2457  ;;  %v3030_v56 = vadd.f32 %v8570_v29, %v3029_v24  ;;  %v2925_v10 = vadd.f32 %v8575_v55, %v2924_v31  ;;  %vm2927_vm1 = vweird.f32 %v8575_v55  ;;  %v8715_v15 = vpop.xlane.xlu0 %2361  ;;  %vm8728_vm5 = vmor %vm3031_vm9, %vm3032_vm15 }
 0x57e   : > { %10506 = vst [vmem:[#allocation13_spill] sm:$0xff] %v8690_v14  ;;  %v8706_v44 = vpop.eup %6068  ;;  %vm8708_vm6 = vcmp.eq.f32.partialorder %v3005_v34, 8.507059e+37  ;;  %v3038_v0 = vor.u32 1.1754944e-38, %v3037_v61  ;;  %vm2926_vm11 = vweird.f32 %v8496_v40  ;;  %v2787_v58 = vmul.f32 %v8676_v51, %v8617_v6  ;;  %vm8757_vm15 = vmor %vm2761_vm2, %vm2762_vm0  ;;  %v10532_v40 = vld [vmem:[#allocation47_spill] sm:$0xff] }
 0x57f   : > { %v3746_v36 = vpack.c.b16 %v3740_v54, %v3739_v3  ;;  %v8717_v24 = vpop.eup %6070  ;;  %vm3017_vm8 = vweird.f32 %v8602_v21  ;;  %vm8720_vm4 = vcmp.eq.f32.partialorder %v3020_v39, 8.507059e+37  ;;  %vm8732_vm3 = vcmp.eq.f32.partialorder %v2930_v43, 8.507059e+37  ;;  %vm8745_vm9 = vmor %vm2926_vm11, %vm2927_vm1  ;;  %v8772_v54 = vpop.xlane.xlu1 %2388 }
 0x580   : > { %v2797_v61 = vand.u32 2147483648, %v8617_v6  ;;  %6074 = vrcp.f32 %v8658_v2  ;;  %v3015_v39 = vadd.f32 %v8602_v21, %v3014_v5  ;;  %v8741_v3 = vmul.f32 %v8698_v26, %v8526_v28 }
 0x581   : > { %v2933_v43 = vor.u32 1.1754944e-38, %v2932_v35  ;;  %5467 = vmatmul.msk.bf16.gmra.mxu1 %vm1909_vm7, %v3746_v36  ;;  %v8751_v48 = vpop.eup %6072  ;;  %v3034_v28 = vsel %vm8728_vm5, %v8570_v29, %v3030_v56  ;;  %v2929_v35 = vsel %vm8745_vm9, %v8575_v55, %v2925_v10  ;;  %v8769_v36 = vmul.f32 %v8706_v44, %v8551_v62 }
 0x582   : > { %6076 = vrcp.f32 %v8715_v15  ;;  %vm10521_vm1 = vweird.f32 %v8510_v38  ;;  %vm10522_vm0 = vweird.f32 %v8415_v47  ;;  %v2788_v56 = vsub.f32 1.0, %v2787_v58 }
 0x583   : > { %vm8778_vm2 = vmor %vm10522_vm0, %vm10521_vm1  ;;  %v2802_v10 = vmul.f32 %v8717_v24, %v8568_v4  ;;  %v2812_v55 = vand.u32 2147483648, %v8568_v4  ;;  %v2937_v29 = vmul.f32 %v8751_v48, %v8638_v46  ;;  %vm10525_vm5 = vweird.f32 %v8562_v11 }
 0x584   : > { %vm10526_vm11 = vweird.f32 %v8453_v19  ;;  %v8795_v47 = vor.u32 1.1754944e-38, %v2797_v61  ;;  %v2810_v58 = vand.u32 2147483647, %v8568_v4  ;;  %v2764_v45 = vsel %vm8757_vm15, %v8507_v18, %v8644_v57 }
 0x585   : > { %vm8791_vm9 = vmor %vm10526_vm11, %vm10525_vm5  ;;  %v2779_v62 = vsel %vm8778_vm2, %v8510_v38, %v8648_v33  ;;  %vm10529_vm1 = vweird.f32 %v8427_v49  ;;  %v8816_v61 = vsel %vm8683_vm12, %v3038_v0, %v3034_v28  ;;  %v8820_v18 = vsel %vm8732_vm3, %v2933_v43, %v2929_v35  ;;  %v8838_v0 = vpop.xlane.xlu2 %2409 }
 0x586   : > { %vm8810_vm0 = vmor %vm10529_vm1, %vm3017_vm8  ;;  %v2938_v57 = vsub.f32 1.0, %v2937_v29  ;;  %v2769_v38 = vsel %vm8678_vm10, %v8626_v23, %v2764_v45  ;;  %v8825_v33 = vpop.eup %6074  ;;  %v2784_v5 = vsel %vm8692_vm13, %v8629_v16, %v2779_v62  ;;  %v3004_v28 = vsel %vm8791_vm9, %v8562_v11, %v8701_v52 }
 0x587   : > { %v2770_v49 = vmul.f32 %v7826_v1, %v2769_v38  ;;  %v3019_v42 = vsel %vm8810_vm0, %v8602_v21, %v3015_v39  ;;  %v2789_v23 = vmul.f32 %v8676_v51, %v2788_v56  ;;  %v2803_v32 = vsub.f32 1.0, %v2802_v10  ;;  %v8868_v45 = vpop.xlane.xlu1 %2463 }
 0x588   : > { %v8841_v34 = vor.u32 1.1754944e-38, %v2812_v55  ;;  %v3042_v1 = vmul.f32 %v8825_v33, %v8658_v2  ;;  %v8846_v16 = vpop.eup %6076  ;;  %v2945_v52 = vand.u32 2147483647, %v8638_v46  ;;  %v2785_v62 = vmul.f32 %v7823_v27, %v2784_v5  ;;  %v3902_v5 = vpop.permute.xlu0 %3901 }
 0x589   : > { %v3464_v11 = vpack.c.bf16 %v2770_v49, %v2770_v49  ;;  %v3009_v21 = vsel %vm8708_vm6, %v8650_v12, %v3004_v28  ;;  %v2947_v30 = vand.u32 2147483648, %v8638_v46  ;;  %v2817_v43 = vmul.f32 %v8846_v16, %v8715_v15  ;;  %3923 = vmatpush.bf16.msrb.mxu3 %v3902_v5 }
 0x58a   : > { %v3043_v39 = vsub.f32 1.0, %v3042_v1  ;;  %v2939_v35 = vmul.f32 %v8751_v48, %v2938_v57  ;;  %v3465_v8 = vpack.c.bf16 %v2785_v62, %v2785_v62  ;;  %v3010_v27 = vmul.f32 %v7844_v63, %v3009_v21 }
 0x58b   : > { %v3666_v56 = vunpack.c.l.b16 %v3464_v11  ;;  %v8862_v10 = vadd.f32 %v8676_v51, %v2789_v23  ;;  %vm2941_vm6 = vweird.f32 %v8638_v46  ;;  %v2818_v14 = vsub.f32 1.0, %v2817_v43 }
 0x58c   : > { %v3044_v12 = vmul.f32 %v8825_v33, %v3043_v39  ;;  %v2804_v55 = vmul.f32 %v8717_v24, %v2803_v32  ;;  %v3667_v29 = vunpack.c.l.b16 %v3465_v8  ;;  %vm2792_vm3 = vweird.f32 %v8676_v51 }
 0x58d   : > { %2469 = vadd.xlane.f32.xlu0 %v8484_v20  ;;  %v3024_v20 = vsel %vm8720_vm4, %v8672_v37, %v3019_v42  ;;  %v3480_v37 = vpack.c.bf16 %v3010_v27, %v3010_v27  ;;  %vm8871_vm4 = vcmp.eq.f32.partialorder %v2945_v52, 8.507059e+37  ;;  %v2948_v19 = vor.u32 1.1754944e-38, %v2947_v30  ;;  %v8889_v21 = vpop.xlane.xlu2 %2466 }
 0x58e   : > { %v3025_v31 = vmul.f32 %v10532_v40, %v3024_v20  ;;  %v3050_v57 = vand.u32 2147483647, %v8658_v2  ;;  %v3052_v38 = vand.u32 2147483648, %v8658_v2  ;;  %v2819_v49 = vmul.f32 %v8846_v16, %v2818_v14  ;;  %v10548_v14 = vld [vmem:[#allocation45_spill] sm:$0xff] }
 0x58f   : > { %v2940_v28 = vadd.f32 %v8751_v48, %v2939_v35  ;;  %vm2942_vm8 = vweird.f32 %v8751_v48  ;;  %v3673_v42 = vpack.c.b16 %v3667_v29, %v3666_v56  ;;  %vm2791_vm10 = vweird.f32 %v8617_v6  ;;  %v10549_v29 = vld [vmem:[#allocation50_spill] sm:$0xff] }
 0x590   : > { %v3481_v23 = vpack.c.bf16 %v3025_v31, %v3025_v31  ;;  %vm2807_vm12 = vweird.f32 %v8717_v24  ;;  %v3045_v32 = vadd.f32 %v8825_v33, %v3044_v12  ;;  %vm3047_vm13 = vweird.f32 %v8825_v33  ;;  %vm8905_vm11 = vmor %vm2941_vm6, %vm2942_vm8 }
 0x591   : > { %vm2822_vm15 = vweird.f32 %v8846_v16  ;;  %v2825_v1 = vand.u32 2147483647, %v8715_v15  ;;  %v2820_v52 = vadd.f32 %v8846_v16, %v2819_v49  ;;  %5463 = vmatmul.msk.bf16.gmra.mxu0 %vm1909_vm7, %v3673_v42  ;;  %v3812_v62 = vunpack.c.l.b16 %v3480_v37  ;;  %v8962_v49 = vpop.xlane.xlu1 %2364 }
 0x592   : > { %v3813_v11 = vunpack.c.l.b16 %v3481_v23  ;;  %6078 = vrcp.f32 %v8772_v54  ;;  %v10535_v30 = vand.u32 2147483647, %v8617_v6  ;;  %v8898_v43 = vadd.f32 %v8717_v24, %v2804_v55  ;;  %v10563_v6 = vld [vmem:[#allocation53_spill] sm:$0xff] }
 0x593   : > { %vm2806_vm5 = vweird.f32 %v8568_v4  ;;  %vm3046_vm9 = vweird.f32 %v8658_v2  ;;  %vm2821_vm1 = vweird.f32 %v8715_v15  ;;  %v2827_v35 = vand.u32 2147483648, %v8715_v15 }
 0x594   : > { %vm8893_vm2 = vcmp.eq.f32.partialorder %v10535_v30, 8.507059e+37  ;;  %v2944_v8 = vsel %vm8905_vm11, %v8751_v48, %v2940_v28  ;;  %vm8917_vm0 = vmor %vm3046_vm9, %vm3047_vm13  ;;  %vm8921_vm6 = vcmp.eq.f32.partialorder %v3050_v57, 8.507059e+37  ;;  %v3053_v27 = vor.u32 1.1754944e-38, %v3052_v38 }
 0x595   : > { %v3819_v2 = vpack.c.b16 %v3813_v11, %v3812_v62  ;;  %vm8927_vm8 = vcmp.eq.f32.partialorder %v2810_v58, 8.507059e+37  ;;  %v3049_v48 = vsel %vm8917_vm0, %v8825_v33, %v3045_v32  ;;  %vm8936_vm13 = vmor %vm2821_vm1, %vm2822_vm15  ;;  %v2920_v55 = vmul.f32 %v10548_v14, %v8633_v59  ;;  %v3898_v12 = vpop.permute.xlu2 %3897 }
 0x596   : > { %v2935_v40 = vmul.f32 %v10549_v29, %v8820_v18  ;;  %6080 = vrcp.f32 %v8889_v21  ;;  %v2824_v58 = vsel %vm8936_vm13, %v8846_v16, %v2820_v52  ;;  %vm2826_vm11 = vcmp.eq.f32.partialorder %v2825_v1, 8.507059e+37 }
 0x597   : > { %5471 = vmatmul.msk.bf16.gmra.mxu2 %vm1909_vm7, %v3819_v2  ;;  %v2960_v33 = vand.u32 2147483647, %v8772_v54  ;;  %v2962_v31 = vand.u32 2147483648, %v8772_v54  ;;  %v2828_v37 = vor.u32 1.1754944e-38, %v2827_v35  ;;  %6082 = vrcp.f32 %v8838_v0 }
 0x598   : > { %v3474_v59 = vpack.c.bf16 %v2920_v55, %v2920_v55  ;;  %v3475_v57 = vpack.c.bf16 %v2935_v40, %v2935_v40  ;;  %v6079_v38 = vpop.eup %6078  ;;  %v8954_v18 = vsel %vm8871_vm4, %v2948_v19, %v2944_v8  ;;  %v8958_v16 = vsel %vm8921_vm6, %v3053_v27, %v3049_v48  ;;  %vm2793_vm4 = vmor %vm2791_vm10, %vm2792_vm3 }
 0x599   : > { %vm2956_vm15 = vweird.f32 %v8772_v54  ;;  %6084 = vrcp.f32 %v8868_v45  ;;  %v8964_v5 = vsel %vm2826_vm11, %v2828_v37, %v2824_v58  ;;  %v2952_v28 = vmul.f32 %v6079_v38, %v8772_v54  ;;  %vm8984_vm3 = vmor %vm2806_vm5, %vm2807_vm12 }
 0x59a   : > { %v3741_v42 = vunpack.c.l.b16 %v3474_v59  ;;  %v3742_v23 = vunpack.c.l.b16 %v3475_v57  ;;  %vm8971_vm9 = vcmp.eq.f32.partialorder %v2960_v33, 8.507059e+37  ;;  %v2963_v19 = vor.u32 1.1754944e-38, %v2962_v31 }
 0x59b   : > { %v3350_v32 = vand.u32 2147483647, %v8889_v21  ;;  %v3352_v1 = vand.u32 2147483648, %v8889_v21  ;;  %v2953_v62 = vsub.f32 1.0, %v2952_v28  ;;  %v3335_v30 = vand.u32 2147483647, %v8868_v45 }
 0x59c   : > { %v6081_v52 = vpop.eup %6080  ;;  %v3747_v11 = vpack.c.b16 %v3742_v23, %v3741_v42  ;;  %v2794_v20 = vsel %vm2793_vm4, %v8676_v51, %v8862_v10  ;;  %vm2957_vm10 = vweird.f32 %v6079_v38  ;;  %vm3346_vm1 = vweird.f32 %v8889_v21  ;;  %v10554_v10 = vld [vmem:[#allocation51_spill] sm:$0xff] }
 0x59d   : > { %v3342_v35 = vmul.f32 %v6081_v52, %v8889_v21  ;;  %v2799_v8 = vsel %vm8893_vm2, %v8795_v47, %v2794_v20  ;;  %v8993_v56 = vpop.eup %6082  ;;  %v2954_v51 = vmul.f32 %v6079_v38, %v2953_v62  ;;  %vm3331_vm0 = vweird.f32 %v8868_v45  ;;  %vm9019_vm5 = vmor %vm2956_vm15, %vm2957_vm10 }
 0x59e   : > { %5468 = vmatmul.msk.bf16.gmra.mxu1 %vm1909_vm7, %v3747_v11  ;;  %v3337_v4 = vand.u32 2147483648, %v8868_v45  ;;  %v2800_v46 = vmul.f32 %v10554_v10, %v2799_v8  ;;  %v2809_v27 = vsel %vm8984_vm3, %v8717_v24, %v8898_v43  ;;  %vm9003_vm12 = vcmp.eq.f32.partialorder %v3350_v32, 8.507059e+37 }
 0x59f   : > { %v6085_v2 = vpop.eup %6084  ;;  %v3343_v48 = vsub.f32 1.0, %v3342_v35  ;;  %v2814_v39 = vsel %vm8927_vm8, %v8841_v34, %v2809_v27  ;;  %6086 = vrcp.f32 %v8962_v49  ;;  %v2955_v14 = vadd.f32 %v6079_v38, %v2954_v51  ;;  %v10561_v34 = vld [vmem:[#allocation19_spill] sm:$0xff]  ;;  %v10564_v51 = vld [vmem:[#allocation20_spill] sm:$0xff] }
 0x5a0   : > { %v3353_v55 = vor.u32 1.1754944e-38, %v3352_v1  ;;  %v3327_v29 = vmul.f32 %v6085_v2, %v8868_v45  ;;  %vm9012_vm2 = vcmp.eq.f32.partialorder %v3335_v30, 8.507059e+37  ;;  %vm3347_vm6 = vweird.f32 %v6081_v52  ;;  %v10562_v1 = vld [vmem:[#allocation46_spill] sm:$0xff]  ;;  %v3896_v45 = vpop.permute.xlu2 %3895 }
 0x5a1   : > { %v3344_v43 = vmul.f32 %v6081_v52, %v3343_v48  ;;  %v2815_v15 = vmul.f32 %v10561_v34, %v2814_v39  ;;  %v3466_v58 = vpack.c.bf16 %v2800_v46, %v2800_v46  ;;  %v2959_v31 = vsel %vm9019_vm5, %v6079_v38, %v2955_v14  ;;  %vm3348_vm11 = vmor %vm3346_vm1, %vm3347_vm6  ;;  %v10565_v48 = vld [vmem:[#allocation52_spill] sm:$0xff]  ;;  %v10566_v39 = vld [vmem:[#allocation18_spill] sm:$0xff] }
 0x5a2   : > { %v3328_v37 = vsub.f32 1.0, %v3327_v29  ;;  %vm3332_vm8 = vweird.f32 %v6085_v2  ;;  %v3338_v59 = vor.u32 1.1754944e-38, %v3337_v4  ;;  %vm3257_vm13 = vweird.f32 %v8433_v41 }
 0x5a3   : > { %v3345_v54 = vadd.f32 %v6081_v52, %v3344_v43  ;;  %v3467_v57 = vpack.c.bf16 %v2815_v15, %v2815_v15  ;;  %v2840_v28 = vand.u32 2147483647, %v8962_v49  ;;  %v2842_v42 = vand.u32 2147483648, %v8962_v49  ;;  %v10567_v43 = vld [vmem:[#allocation32_spill] sm:$0xff] }
 0x5a4   : > { %v3900_v33 = vpop.permute.xlu1 %3899  ;;  %v2964_v23 = vsel %vm8971_vm9, %v2963_v19, %v2959_v31  ;;  %v3329_v38 = vmul.f32 %v6085_v2, %v3328_v37  ;;  %v3668_v32 = vunpack.c.l.b16 %v3466_v58  ;;  %v3040_v62 = vmul.f32 %v10562_v1, %v8816_v61  ;;  %v9044_v61 = vpop.f32.mrf.mxu2  ;;  %vm3333_vm9 = vmor %vm3331_vm0, %vm3332_vm8 }
 0x5a5   : > { %3924 = vmatpush.bf16.msrb.mxu3 %v3900_v33  ;;  %v6087_v11 = vpop.eup %6086  ;;  %vm3256_vm15 = vweird.f32 %v8252_v25  ;;  %v3349_v30 = vsel %vm3348_vm11, %v6081_v52, %v3345_v54  ;;  %v3669_v20 = vunpack.c.l.b16 %v3467_v57  ;;  %v3055_v35 = vmul.f32 %v10563_v6, %v8958_v16 }
 0x5a6   : > { %v2429_v63 = vsel %vm1909_vm7, %v8336_v9, 0.0  ;;  %v3354_v21 = vsel %vm9003_vm12, %v3353_v55, %v3349_v30  ;;  %v3330_v19 = vadd.f32 %v6085_v2, %v3329_v38  ;;  %v2832_v8 = vmul.f32 %v6087_v11, %v8962_v49  ;;  %vm9080_vm0 = vmor %vm3256_vm15, %vm3257_vm13 }
 0x5a7   : > { %vm2837_vm4 = vweird.f32 %v6087_v11  ;;  %2430 = vadd.xlane.f32.xlu0 %v2429_v63  ;;  %v3355_v52 = vmul.f32 %v10564_v51, %v3354_v21  ;;  %v3674_v16 = vpack.c.b16 %v3669_v20, %v3668_v32  ;;  %v3482_v4 = vpack.c.bf16 %v3040_v62, %v3040_v62 }
 0x5a8   : > { %v3483_v10 = vpack.c.bf16 %v3055_v35, %v3055_v35  ;;  %v3334_v46 = vsel %vm3333_vm9, %v6085_v2, %v3330_v19  ;;  %v2833_v27 = vsub.f32 1.0, %v2832_v8  ;;  %v2950_v47 = vmul.f32 %v10565_v48, %v8954_v18 }
 0x5a9   : > { %3925 = vmatpush.bf16.msrb.mxu3 %v3898_v12  ;;  %v2965_v14 = vmul.f32 %v10566_v39, %v2964_v23  ;;  %v3503_v55 = vpack.c.bf16 %v3355_v52, %v3355_v52  ;;  %v3339_v12 = vsel %vm9012_vm2, %v3338_v59, %v3334_v46  ;;  %5464 = vmatmul.msk.bf16.gmra.mxu0 %vm1909_vm7, %v3674_v16  ;;  %v3814_v29 = vunpack.c.l.b16 %v3482_v4 }
 0x5aa   : > { %v3815_v24 = vunpack.c.l.b16 %v3483_v10  ;;  %v3340_v34 = vmul.f32 %v10567_v43, %v3339_v12  ;;  %v2834_v15 = vmul.f32 %v6087_v11, %v2833_v27  ;;  %v3476_v58 = vpack.c.bf16 %v2950_v47, %v2950_v47 }
 0x5ab   : > { %v3477_v2 = vpack.c.bf16 %v2965_v14, %v2965_v14  ;;  %vm2836_vm3 = vweird.f32 %v8962_v49  ;;  %vm9058_vm10 = vcmp.eq.f32.partialorder %v2840_v28, 8.507059e+37  ;;  %v2471_v40 = vsel %vm1909_vm7, %v8294_v60, 0.0  ;;  %v10572_v28 = vld [vmem:[#allocation54_spill] sm:$0xff] }
 0x5ac   : > { %v3820_v33 = vpack.c.b16 %v3815_v24, %v3814_v29  ;;  %v3502_v31 = vpack.c.bf16 %v3340_v34, %v3340_v34  ;;  %v2835_v37 = vadd.f32 %v6087_v11, %v2834_v15  ;;  %v3743_v59 = vunpack.c.l.b16 %v3476_v58  ;;  %2472 = vadd.xlane.f32.xlu1 %v2471_v40  ;;  %vm9065_vm1 = vmor %vm2836_vm3, %vm2837_vm4  ;;  %v9116_v27 = vpop.f32.mrf.mxu2  ;;  %v10586_v24 = vld [vmem:[#allocation39_spill] sm:$0xff]  ;;  %v10588_v58 = vld [vmem:[#allocation42_spill] sm:$0xff] }
 0x5ad   : > { %3926 = vmatpush.bf16.msrb.mxu3 %v3896_v45  ;;  %v3744_v54 = vunpack.c.l.b16 %v3477_v2  ;;  %v2843_v23 = vor.u32 1.1754944e-38, %v2842_v42  ;;  %v2477_v49 = vsel %vm1909_vm7, %v8310_v13, 0.0  ;;  %v2830_v38 = vmul.f32 %v10572_v28, %v8964_v5 }
 0x5ae   : > { %5472 = vmatmul.msk.bf16.gmra.mxu2 %vm1909_vm7, %v3820_v33  ;;  %v2426_v32 = vsel %vm1909_vm7, %v8476_v53, 0.0  ;;  %v9084_v42 = vunpack.c.l.b16 %v3503_v55  ;;  %v9086_v62 = vunpack.c.l.b16 %v3502_v31  ;;  %v2839_v30 = vsel %vm9065_vm1, %v6087_v11, %v2835_v37  ;;  %v10583_v55 = vld [vmem:[#allocation37_spill] sm:$0xff] }
 0x5af   : > { %v3748_v20 = vpack.c.b16 %v3744_v54, %v3743_v59  ;;  %2478 = vadd.xlane.f32.xlu0 %v2477_v49  ;;  %2427 = vadd.xlane.f32.xlu2 %v2426_v32  ;;  %v10575_v5 = vand.u32 2147483647, %v8204_v7  ;;  %v10576_v6 = vand.u32 2147483648, %v8204_v7  ;;  %v3259_v63 = vsel %vm9080_vm0, %v8433_v41, %v8578_v17  ;;  %v10578_v7 = vld [vmem:[#allocation23_spill] sm:$0xff]  ;;  %v10580_v17 = vld [vmem:[#allocation22_spill] sm:$0xff] }
 0x5b0   : > { %v2844_v21 = vsel %vm9058_vm10, %v2843_v23, %v2839_v30  ;;  %v10577_v11 = vand.u32 2147483648, %v8252_v25  ;;  %v4037_v51 = vpack.c.b16 %v9084_v42, %v9086_v62  ;;  %v3468_v16 = vpack.c.bf16 %v2830_v38, %v2830_v38  ;;  %v10579_v41 = vld [vmem:[#allocation7_spill] sm:$0xff] }
 0x5b1   : > { %vm3246_vm12 = vcmp.eq.f32.partialorder %v10575_v5, 8.507059e+37  ;;  %v3248_v35 = vor.u32 1.1754944e-38, %v10576_v6  ;;  %5469 = vmatmul.msk.bf16.gmra.mxu1 %vm1909_vm7, %v3748_v20  ;;  %v2845_v52 = vmul.f32 %v10578_v7, %v2844_v21  ;;  %6088 = vpow2.f32 %v8486_v50  ;;  %v10591_v20 = vld [vmem:[#allocation25_spill] sm:$0xff] }
 0x5b2   : > { %v9100_v19 = vpop.xlane.xlu0 %2460  ;;  %v3263_v8 = vor.u32 1.1754944e-38, %v10577_v11  ;;  %v10581_v4 = vsel %vm8516_vm14, %v10579_v41, %v10580_v17  ;;  %v10582_v46 = vand.u32 2147483647, %v8252_v25  ;;  %v3057_v48 = vmul.f32 %v8993_v56, %v8838_v0  ;;  %v10587_v25 = vld [vmem:[#allocation6_spill] sm:$0xff] }
 0x5b3   : > { %v3249_v10 = vsel %vm3246_vm12, %v3248_v35, %v10581_v4  ;;  %v3268_v39 = vsub.f32 1.0, %v8741_v3  ;;  %v3283_v14 = vsub.f32 1.0, %v8769_v36  ;;  %v3469_v50 = vpack.c.bf16 %v2845_v52, %v2845_v52  ;;  %v10589_v3 = vld [vmem:[#allocation43_spill] sm:$0xff]  ;;  %v10590_v36 = vld [vmem:[#allocation44_spill] sm:$0xff]  ;;  %v10592_v35 = vld [vmem:[#allocation30_spill] sm:$0xff] }
 0x5b4   : > { %vm3261_vm2 = vcmp.eq.f32.partialorder %v10582_v46, 8.507059e+37  ;;  %v10585_v12 = vsub.f32 %v10583_v55, %v10584_v22  ;;  %v2474_v45 = vsel %vm1909_vm7, %v10586_v24, 0.0  ;;  %6090 = vpow2.f32 %v10587_v25  ;;  %v9140_v49 = vpop.f32.mrf.mxu2 }
 0x5b5   : > { %v3264_v47 = vsel %vm3261_vm2, %v3263_v8, %v3259_v63  ;;  %v3670_v43 = vunpack.c.l.b16 %v3468_v16  ;;  %v3671_v34 = vunpack.c.l.b16 %v3469_v50  ;;  %2475 = vadd.xlane.f32.xlu1 %v2474_v45  ;;  %v3058_v15 = vsub.f32 1.0, %v3057_v48 }
 0x5b6   : > { %v2290_v29 = vmul.f32 1.442695, %v10585_v12  ;;  %v2435_v2 = vsel %vm1909_vm7, %v10588_v58, 0.0  ;;  %v3250_v18 = vmul.f32 %v10589_v3, %v3249_v10  ;;  %v3265_v33 = vmul.f32 %v10590_v36, %v3264_v47  ;;  %v10597_v3 = vld [vmem:[#allocation48_spill] sm:$0xff]  ;;  %v10598_v36 = vld [vmem:[#allocation49_spill] sm:$0xff] }
 0x5b7   : > { %v3269_v40 = vmul.f32 %v8698_v26, %v3268_v39  ;;  %v3284_v31 = vmul.f32 %v8706_v44, %v3283_v14  ;;  %2436 = vadd.xlane.f32.xlu0 %v2435_v2  ;;  %v3675_v37 = vpack.c.b16 %v3671_v34, %v3670_v43  ;;  %v9134_v59 = vpop.eup %6088  ;;  %vm3272_vm14 = vweird.f32 %v8698_v26 }
 0x5b8   : > { %6092 = vpow2.f32 %v2290_v29  ;;  %v3496_v57 = vpack.c.bf16 %v3250_v18, %v3250_v18  ;;  %v3497_v23 = vpack.c.bf16 %v3265_v33, %v3265_v33  ;;  %v3059_v28 = vmul.f32 %v8993_v56, %v3058_v15 }
 0x5b9   : > { %5465 = vmatmul.msk.bf16.gmra.mxu0 %vm1909_vm7, %v3675_v37  ;;  %v3270_v30 = vadd.f32 %v8698_v26, %v3269_v40  ;;  %vm3271_vm5 = vweird.f32 %v10591_v20  ;;  %v3285_v5 = vadd.f32 %v8706_v44, %v3284_v31  ;;  %vm3287_vm6 = vweird.f32 %v8706_v44  ;;  %v9204_v31 = vpop.permute.xlu2 %4043 }
 0x5ba   : > { %v9136_v54 = vpop.xlane.xlu0 %2412  ;;  %v9144_v38 = vunpack.c.l.b16 %v3496_v57  ;;  %v9146_v32 = vunpack.c.l.b16 %v3497_v23  ;;  %v9148_v1 = vpop.eup %6090  ;;  %v3277_v6 = vand.u32 2147483648, %v10591_v20  ;;  %v3292_v63 = vand.u32 2147483648, %v10592_v35  ;;  %vm9162_vm8 = vmor %vm3271_vm5, %vm3272_vm14 }
 0x5bb   : > { %6094 = vrcp.f32 %v9136_v54  ;;  %v2432_v21 = vsel %vm1909_vm7, %v9134_v59, 0.0  ;;  %v3275_v7 = vand.u32 2147483647, %v10591_v20  ;;  %vm3286_vm13 = vweird.f32 %v10592_v35  ;;  %v10599_v20 = vld [vmem:[#allocation21_spill] sm:$0xff] }
 0x5bc   : > { %v3965_v11 = vpack.c.b16 %v9146_v32, %v9144_v38  ;;  %v3290_v52 = vand.u32 2147483647, %v10592_v35  ;;  %vm9171_vm11 = vmor %vm3286_vm13, %vm3287_vm6  ;;  %v3060_v17 = vadd.f32 %v8993_v56, %v3059_v28  ;;  %vm3062_vm15 = vweird.f32 %v8993_v56  ;;  %v9196_v25 = vpop.f32.mrf.mxu2 }
 0x5bd   : > { %2433 = vadd.xlane.f32.xlu1 %v2432_v21  ;;  %v2483_v4 = vsel %vm1909_vm7, %v9148_v1, 0.0  ;;  %v3274_v46 = vsel %vm9162_vm8, %v8698_v26, %v3270_v30  ;;  %v3289_v48 = vsel %vm9171_vm11, %v8706_v44, %v3285_v5  ;;  %v3065_v47 = vand.u32 2147483647, %v8838_v0  ;;  %v10600_v21 = vld [vmem:[#allocation14_spill] sm:$0xff] }
 0x5be   : > { %v9169_v16 = vpop.eup %6092  ;;  %v3067_v39 = vand.u32 2147483648, %v8838_v0  ;;  %v3278_v14 = vor.u32 1.1754944e-38, %v3277_v6  ;;  %v3293_v50 = vor.u32 1.1754944e-38, %v3292_v63  ;;  %vm3061_vm4 = vweird.f32 %v8838_v0 }
 0x5bf   : > { %2484 = vadd.xlane.f32.xlu0 %v2483_v4  ;;  %vm3276_vm9 = vcmp.eq.f32.partialorder %v3275_v7, 8.507059e+37  ;;  %vm3291_vm3 = vcmp.eq.f32.partialorder %v3290_v52, 8.507059e+37  ;;  %vm3063_vm10 = vmor %vm3061_vm4, %vm3062_vm15  ;;  %vm3066_vm1 = vcmp.eq.f32.partialorder %v3065_v47, 8.507059e+37  ;;  %v3082_v0 = vand.u32 2147483648, %v9136_v54  ;;  %v10603_v52 = vld [vmem:[#allocation35_spill] sm:$0xff] }
 0x5c0   : > { %v3279_v26 = vsel %vm3276_vm9, %v3278_v14, %v3274_v46  ;;  %v3294_v44 = vsel %vm3291_vm3, %v3293_v50, %v3289_v48  ;;  %v3064_v12 = vsel %vm3063_vm10, %v8993_v56, %v3060_v17  ;;  %v3068_v45 = vor.u32 1.1754944e-38, %v3067_v39  ;;  %v10604_v39 = vld [vmem:[#allocation13_spill] sm:$0xff] }
 0x5c1   : > { %v6095_v10 = vpop.eup %6094  ;;  %v2480_v43 = vsel %vm1909_vm7, %v9169_v16, 0.0  ;;  %v3080_v15 = vand.u32 2147483647, %v9136_v54  ;;  %v3280_v18 = vmul.f32 %v10597_v3, %v3279_v26  ;;  %v3295_v56 = vmul.f32 %v10598_v36, %v3294_v44 }
 0x5c2   : > { %v3072_v55 = vmul.f32 %v6095_v10, %v9136_v54  ;;  %v9189_v22 = vpop.xlane.xlu0 %2415  ;;  %vm3077_vm0 = vweird.f32 %v6095_v10  ;;  %v3069_v2 = vsel %vm3066_vm1, %v3068_v45, %v3064_v12  ;;  %vm3076_vm12 = vweird.f32 %v9136_v54  ;;  %v10601_v54 = vld [vmem:[#allocation27_spill] sm:$0xff] }
 0x5c3   : > { %6096 = vrcp.f32 %v9189_v22  ;;  %vm3078_vm2 = vmor %vm3076_vm12, %vm3077_vm0  ;;  %v3083_v37 = vor.u32 1.1754944e-38, %v3082_v0  ;;  %v3498_v57 = vpack.c.bf16 %v3280_v18, %v3280_v18  ;;  %v3499_v23 = vpack.c.bf16 %v3295_v56, %v3295_v56 }
 0x5c4   : > { %v3073_v29 = vsub.f32 1.0, %v3072_v55  ;;  %vm3081_vm14 = vcmp.eq.f32.partialorder %v3080_v15, 8.507059e+37  ;;  %v3070_v5 = vmul.f32 %v10599_v20, %v3069_v2  ;;  %v10602_v8 = vpack.c.b16 %v10600_v21, %v10601_v54  ;;  %v9219_v4 = vpop.f32.mrf.mxu2 }
 0x5c5   : > { %2481 = vadd.xlane.f32.xlu1 %v2480_v43  ;;  %v9208_v35 = vunpack.c.l.b16 %v3498_v57  ;;  %v9210_v63 = vunpack.c.l.b16 %v3499_v23  ;;  %6098 = vrcp.f32 %v9100_v19  ;;  %v3097_v44 = vand.u32 2147483648, %v9189_v22 }
 0x5c6   : > { %v3074_v34 = vmul.f32 %v6095_v10, %v3073_v29  ;;  %vm3091_vm6 = vweird.f32 %v9189_v22  ;;  %v3095_v45 = vand.u32 2147483647, %v9189_v22  ;;  %vm3316_vm1 = vweird.f32 %v9100_v19 }
 0x5c7   : > { %v3966_v17 = vpack.c.b16 %v9210_v63, %v9208_v35  ;;  %v3098_v36 = vor.u32 1.1754944e-38, %v3097_v44  ;;  %vm3301_vm12 = vweird.f32 %v10604_v39 }
 0x5c8   : > { %v3075_v33 = vadd.f32 %v6095_v10, %v3074_v34  ;;  %vm3096_vm13 = vcmp.eq.f32.partialorder %v3095_v45, 8.507059e+37  ;;  %v3307_v45 = vand.u32 2147483648, %v10604_v39 }
 0x5c9   : > { %v6097_v40 = vpop.eup %6096  ;;  %5478 = vmatmul.msk.bf16.vlgmr.msrb.gmra.mxu0 %vm1909_vm7, %v10602_v8 }
 0x5ca   : > { %v3079_v28 = vsel %vm3078_vm2, %v6095_v10, %v3075_v33  ;;  %v3087_v30 = vmul.f32 %v6097_v40, %v9189_v22  ;;  %v3484_v10 = vpack.c.bf16 %v3070_v5, %v3070_v5  ;;  %vm3092_vm5 = vweird.f32 %v6097_v40 }
 0x5cb   : > { %v3084_v6 = vsel %vm3081_vm14, %v3083_v37, %v3079_v28  ;;  %v9226_v29 = vpop.eup %6098  ;;  %vm3093_vm8 = vmor %vm3091_vm6, %vm3092_vm5 }
 0x5cc   : > { %v3088_v7 = vsub.f32 1.0, %v3087_v30  ;;  %v3085_v41 = vmul.f32 %v10603_v52, %v3084_v6  ;;  %v3816_v55 = vunpack.c.l.b16 %v3484_v10  ;;  %v9233_v3 = vpop.f32.mrf.mxu2  ;;  %v3312_v18 = vmul.f32 %v9226_v29, %v9100_v19  ;;  %v10605_v30 = vld [vmem:[#allocation34_spill] sm:$0xff] }
 0x5cd   : > { %vm3317_vm3 = vweird.f32 %v9226_v29 }
 0x5ce   : > { %v3485_v46 = vpack.c.bf16 %v3085_v41, %v3085_v41  ;;  %v3089_v48 = vmul.f32 %v6097_v40, %v3088_v7  ;;  %vm9265_vm0 = vmor %vm3316_vm1, %vm3317_vm3 }
 0x5cf   : > { %v2419_v47 = vpop.xlane.xlu1 %2418 }
 0x5d0   : > { %6100 = vrcp.f32 %v2419_v47  ;;  %v9223_v14 = vpop.xlane.xlu2 %2421  ;;  %v3817_v50 = vunpack.c.l.b16 %v3485_v46  ;;  %v3090_v26 = vadd.f32 %v6097_v40, %v3089_v48  ;;  %v3112_v37 = vand.u32 2147483648, %v2419_v47 }
 0x5d1   : > { %6102 = vrcp.f32 %v10604_v39  ;;  %v3110_v23 = vand.u32 2147483647, %v2419_v47  ;;  %vm3106_vm15 = vweird.f32 %v2419_v47 }
 0x5d2   : > { %v3821_v12 = vpack.c.b16 %v3817_v50, %v3816_v55  ;;  %v3094_v15 = vsel %vm3093_vm8, %v6097_v40, %v3090_v26  ;;  %v3313_v40 = vsub.f32 1.0, %v3312_v18  ;;  %6104 = vrcp.f32 %v9223_v14 }
 0x5d3   : > { %v3099_v33 = vsel %vm3096_vm13, %v3098_v36, %v3094_v15  ;;  %v3113_v21 = vor.u32 1.1754944e-38, %v3112_v37  ;;  %vm3111_vm9 = vcmp.eq.f32.partialorder %v3110_v23, 8.507059e+37  ;;  %v3322_v50 = vand.u32 2147483648, %v9100_v19 }
 0x5d4   : > { %5473 = vmatmul.msk.bf16.gmra.mxu2 %vm1909_vm7, %v3821_v12  ;;  %v3100_v20 = vmul.f32 %v10605_v30, %v3099_v33  ;;  %v9248_v8 = vpop.f32.mrf.mxu2  ;;  %v3314_v7 = vmul.f32 %v9226_v29, %v3313_v40  ;;  %v3320_v12 = vand.u32 2147483647, %v9100_v19  ;;  %v3305_v36 = vand.u32 2147483647, %v10604_v39 }
 0x5d5   : > { %v4048_v0 = vpop.permute.xlu0 %4047  ;;  %v3308_v37 = vor.u32 1.1754944e-38, %v3307_v45  ;;  %vm3121_vm13 = vweird.f32 %v9223_v14 }
 0x5d6   : > { %v6101_v43 = vpop.eup %6100  ;;  %4069 = vmatpush.bf16.msra.mxu1 %v4048_v0  ;;  %v3486_v32 = vpack.c.bf16 %v3100_v20, %v3100_v20  ;;  %vm3321_vm14 = vcmp.eq.f32.partialorder %v3320_v12, 8.507059e+37  ;;  %vm3306_vm5 = vcmp.eq.f32.partialorder %v3305_v36, 8.507059e+37 }
 0x5d7   : > { %v9231_v34 = vpop.eup %6102  ;;  %v3102_v2 = vmul.f32 %v6101_v43, %v2419_v47  ;;  %vm3107_vm11 = vweird.f32 %v6101_v43  ;;  %v3315_v47 = vadd.f32 %v9226_v29, %v3314_v7 }
 0x5d8   : > { %v3297_v22 = vmul.f32 %v9231_v34, %v10604_v39  ;;  %v9239_v28 = vpop.xlane.xlu2 %2424  ;;  %vm3108_vm4 = vmor %vm3106_vm15, %vm3107_vm11  ;;  %v9253_v10 = vpop.eup %6104  ;;  %v3883_v55 = vunpack.c.l.b16 %v3486_v32  ;;  %vm3302_vm10 = vweird.f32 %v9231_v34 }
 0x5d9   : > { %v3103_v56 = vsub.f32 1.0, %v3102_v2  ;;  %5479 = vmatmul.msk.bf16.gmra.mxu0 %vm1909_vm7, %v3965_v11  ;;  %6106 = vrcp.f32 %v9239_v28  ;;  %v10606_v11 = vld [vmem:[#allocation5_spill] sm:$0xff]  ;;  %v3117_v15 = vmul.f32 %v9253_v10, %v9223_v14  ;;  %v3319_v19 = vsel %vm9265_vm0, %v9226_v29, %v3315_v47  ;;  %vm3303_vm2 = vmor %vm3301_vm12, %vm3302_vm10 }
 0x5da   : > { %v3298_v6 = vsub.f32 1.0, %v3297_v22  ;;  %v10609_v29 = vld [vmem:[#allocation9_spill] sm:$0xff]  ;;  %vm3122_vm6 = vweird.f32 %v9253_v10  ;;  %vm3136_vm15 = vweird.f32 %v9239_v28 }
 0x5db   : > { %v3104_v57 = vmul.f32 %v6101_v43, %v3103_v56  ;;  %v3323_v56 = vor.u32 1.1754944e-38, %v3322_v50  ;;  %v3118_v23 = vsub.f32 1.0, %v3117_v15  ;;  %vm3123_vm11 = vmor %vm3121_vm13, %vm3122_vm6 }
 0x5dc   : > { %v3299_v41 = vmul.f32 %v9231_v34, %v3298_v6  ;;  %v9280_v33 = vpop.f32.mrf.mxu2  ;;  %v10610_v6 = vld [vmem:[#allocation17_spill] sm:$0xff] }
 0x5dd   : > { %v3105_v5 = vadd.f32 %v6101_v43, %v3104_v57  ;;  %v3324_v57 = vsel %vm3321_vm14, %v3323_v56, %v3319_v19 }
 0x5de   : > { %v3300_v44 = vadd.f32 %v9231_v34, %v3299_v41  ;;  %v3325_v30 = vmul.f32 %v10609_v29, %v3324_v57  ;;  %v9316_v29 = vpop.f32.mrf.mxu3 }
 0x5df   : > { %v3109_v54 = vsel %vm3108_vm4, %v6101_v43, %v3105_v5  ;;  %v9255_v48 = vpop.eup %6106 }
 0x5e0   : > { %v3114_v38 = vsel %vm3111_vm9, %v3113_v21, %v3109_v54  ;;  %v3132_v2 = vmul.f32 %v9255_v48, %v9239_v28  ;;  %v3304_v22 = vsel %vm3303_vm2, %v9231_v34, %v3300_v44  ;;  %v3119_v34 = vmul.f32 %v9253_v10, %v3118_v23  ;;  %v4042_v5 = vpop.permute.xlu2 %4041 }
 0x5e1   : > { %v3115_v52 = vmul.f32 %v10606_v11, %v3114_v38  ;;  %v3309_v39 = vsel %vm3306_vm5, %v3308_v37, %v3304_v22  ;;  %v3501_v7 = vpack.c.bf16 %v3325_v30, %v3325_v30  ;;  %vm3137_vm8 = vweird.f32 %v9255_v48  ;;  %v9319_v30 = vpop.f32.mrf.mxu1 }
 0x5e2   : > { %v3133_v40 = vsub.f32 1.0, %v3132_v2  ;;  %v3310_v21 = vmul.f32 %v10610_v6, %v3309_v39  ;;  %v3120_v35 = vadd.f32 %v9253_v10, %v3119_v34  ;;  %v3125_v11 = vand.u32 2147483647, %v9223_v14  ;;  %vm3138_vm4 = vmor %vm3136_vm15, %vm3137_vm8 }
 0x5e3   : > { %v3487_v46 = vpack.c.bf16 %v3115_v52, %v3115_v52  ;;  %v3140_v52 = vand.u32 2147483647, %v9239_v28  ;;  %v3963_v41 = vunpack.c.l.b16 %v3501_v7 }
 0x5e4   : > { %v3134_v20 = vmul.f32 %v9255_v48, %v3133_v40  ;;  %v3500_v32 = vpack.c.bf16 %v3310_v21, %v3310_v21  ;;  %v3124_v42 = vsel %vm3123_vm11, %v9253_v10, %v3120_v35  ;;  %vm3126_vm9 = vcmp.eq.f32.partialorder %v3125_v11, 8.507059e+37  ;;  %v10611_v10 = vld [vmem:[#allocation26_spill] sm:$0xff] }
 0x5e5   : > { %v3884_v26 = vunpack.c.l.b16 %v3487_v46  ;;  %vm3141_vm3 = vcmp.eq.f32.partialorder %v3140_v52, 8.507059e+37 }
 0x5e6   : > { %v3135_v63 = vadd.f32 %v9255_v48, %v3134_v20  ;;  %v3962_v47 = vunpack.c.l.b16 %v3500_v32 }
 0x5e7   : > { %v3891_v43 = vpack.c.b16 %v3884_v26, %v3883_v55  ;;  %v4046_v18 = vpop.permute.xlu1 %4045 }
 0x5e8   : > { %4070 = vmatpush.bf16.msra.mxu1 %v4046_v18  ;;  %v3139_v62 = vsel %vm3138_vm4, %v9255_v48, %v3135_v63  ;;  %v3967_v26 = vpack.c.b16 %v3963_v41, %v3962_v47  ;;  %v10612_v48 = vld [vmem:[#allocation11_spill] sm:$0xff] }
 0x5e9   : > { %5474 = vmatmul.msk.bf16.vlgmr.msrb.gmra.mxu3 %vm1909_vm7, %v3891_v43  ;;  %5480 = vmatmul.msk.bf16.gmra.mxu0 %vm1909_vm7, %v3966_v17  ;;  %v3142_v17 = vand.u32 2147483648, %v9239_v28  ;;  %v9338_v32 = vpop.f32.mrf.mxu1 }
 0x5eb   : > { %v3855_v54 = vpop.f32.mrf.mxu2  ;;  %v3143_v46 = vor.u32 1.1754944e-38, %v3142_v17 }
 0x5ec   : > { %4071 = vmatpush.bf16.msra.mxu1 %v9204_v31  ;;  %v3127_v31 = vand.u32 2147483648, %v9223_v14  ;;  %v3709_v38 = vpop.f32.mrf.mxu0 }
 0x5ed   : > { %v3144_v55 = vsel %vm3141_vm3, %v3143_v46, %v3139_v62 }
 0x5ee   : > { %v3145_v0 = vmul.f32 %v10612_v48, %v3144_v55 }
 0x5f0   : > { %4072 = vmatpush.bf16.msra.mxu1 %v4042_v5  ;;  %v3489_v15 = vpack.c.bf16 %v3145_v0, %v3145_v0 }
 0x5f2   : > { %v3886_v18 = vunpack.c.l.b16 %v3489_v15 }
 0x5f3   : > { %5482 = vmatmul.msk.bf16.vlgmr.msra.gmra.mxu1 %vm1909_vm7, %v4037_v51  ;;  %v3128_v51 = vor.u32 1.1754944e-38, %v3127_v31  ;;  %v3857_v44 = vpop.f32.mrf.mxu2  ;;  %v9333_v31 = vpop.f32.mrf.mxu3 }
 0x5f4   : > { %v5719_v14 = vpack.i.bf16 %v3857_v44, %v3855_v54  ;;  %v3711_v12 = vpop.f32.mrf.mxu0 }
 0x5f5   : > { %v3129_v50 = vsel %vm3126_vm9, %v3128_v51, %v3124_v42  ;;  %v5714_v28 = vpack.i.bf16 %v3711_v12, %v3709_v38 }
 0x5f6   : > { %5720 = vrot.lane.b32.xlu0 %v5719_v14, %s6226_s27  ;;  %v3130_v45 = vmul.f32 %v10611_v10, %v3129_v50 }
 0x5f7   : > { %5715 = vrot.lane.b32.xlu1 %v5714_v28, %s6227_s29 }
 0x5f8   : > { %v3488_v43 = vpack.c.bf16 %v3130_v45, %v3130_v45 }
 0x5f9   : > { %5481 = vmatmul.msk.bf16.gmra.mxu0 %vm1909_vm7, %v3967_v26 }
 0x5fa   : > { %v3885_v2 = vunpack.c.l.b16 %v3488_v43 }
 0x5fc   : > { %v3892_v36 = vpack.c.b16 %v3886_v18, %v3885_v2 }
 0x5fe   : > { %5475 = vmatmul.msk.bf16.gmra.mxu3 %vm1909_vm7, %v3892_v36  ;;  %v9366_v15 = vpop.f32.mrf.mxu1 }
 0x600   : > { %v2470_v19 = vpop.xlane.xlu0 %2469 }
 0x601   : > { %6108 = vrcp.f32 %v2470_v19  ;;  %v3367_v11 = vand.u32 2147483648, %v2470_v19  ;;  %vm3361_vm1 = vweird.f32 %v2470_v19  ;;  %v3365_v42 = vand.u32 2147483647, %v2470_v19 }
 0x603   : > { %v3368_v44 = vor.u32 1.1754944e-38, %v3367_v11  ;;  %vm3366_vm12 = vcmp.eq.f32.partialorder %v3365_v42, 8.507059e+37 }
 0x607   : > { %v6109_v22 = vpop.eup %6108 }
 0x608   : > { %v3357_v23 = vmul.f32 %v6109_v22, %v2470_v19  ;;  %vm3362_vm10 = vweird.f32 %v6109_v22 }
 0x609   : > { %vm3363_vm0 = vmor %vm3361_vm1, %vm3362_vm10 }
 0x60a   : > { %v3358_v34 = vsub.f32 1.0, %v3357_v23 }
 0x60c   : > { %v3359_v6 = vmul.f32 %v6109_v22, %v3358_v34 }
 0x60e   : > { %v3714_v56 = vpop.f32.mrf.mxu0  ;;  %v3360_v17 = vadd.f32 %v6109_v22, %v3359_v6 }
 0x610   : > { %v3364_v46 = vsel %vm3363_vm0, %v6109_v22, %v3360_v17 }
 0x611   : > { %v3369_v28 = vsel %vm3366_vm12, %v3368_v44, %v3364_v46 }
 0x616   : > { %v3716_v37 = vpop.f32.mrf.mxu0 }
 0x617   : > { %v5729_v57 = vpack.i.bf16 %v3716_v37, %v3714_v56  ;;  %v9371_v56 = vpop.f32.mrf.mxu3 }
 0x619   : > { %5730 = vrot.lane.b32.xlu0 %v5729_v57, %s6227_s29 }
 0x61a   : > { %v9313_v40 = vpop.xlane.xlu0 %2430  ;;  %v3860_v39 = vpop.f32.mrf.mxu2 }
 0x61b   : > { %6110 = vrcp.f32 %v9313_v40  ;;  %v3170_v47 = vand.u32 2147483647, %v9313_v40  ;;  %vm3166_vm2 = vweird.f32 %v9313_v40  ;;  %v3172_v48 = vand.u32 2147483648, %v9313_v40 }
 0x61d   : > { %vm9358_vm14 = vcmp.eq.f32.partialorder %v3170_v47, 8.507059e+37 }
 0x61f   : > { %v9321_v20 = vpop.xlane.xlu1 %2472 }
 0x620   : > { %6112 = vrcp.f32 %v9321_v20  ;;  %v3380_v36 = vand.u32 2147483647, %v9321_v20  ;;  %v3382_v57 = vand.u32 2147483648, %v9321_v20  ;;  %vm3376_vm13 = vweird.f32 %v9321_v20 }
 0x621   : > { %v9323_v5 = vpop.eup %6110 }
 0x622   : > { %v9326_v21 = vpop.xlane.xlu0 %2478  ;;  %v9328_v54 = vpop.xlane.xlu2 %2427  ;;  %v3162_v35 = vmul.f32 %v9323_v5, %v9313_v40  ;;  %vm3167_vm5 = vweird.f32 %v9323_v5  ;;  %vm9414_vm9 = vcmp.eq.f32.partialorder %v3380_v36, 8.507059e+37 }
 0x623   : > { %v3862_v7 = vpop.f32.mrf.mxu2  ;;  %6114 = vrcp.f32 %v9328_v54  ;;  %vm9390_vm8 = vmor %vm3166_vm2, %vm3167_vm5  ;;  %vm3151_vm4 = vweird.f32 %v9328_v54  ;;  %vm3406_vm12 = vweird.f32 %v9326_v21 }
 0x624   : > { %v5734_v63 = vpack.i.bf16 %v3862_v7, %v3860_v39  ;;  %v3163_v41 = vsub.f32 1.0, %v3162_v35  ;;  %6116 = vrcp.f32 %v9326_v21  ;;  %v3155_v7 = vand.u32 2147483647, %v9328_v54 }
 0x626   : > { %5735 = vrot.lane.b32.xlu1 %v5734_v63, %s6226_s27  ;;  %v9336_v38 = vpop.eup %6112  ;;  %v3719_v52 = vpop.f32.mrf.mxu0  ;;  %v3164_v14 = vmul.f32 %v9323_v5, %v3163_v41  ;;  %v3173_v63 = vor.u32 1.1754944e-38, %v3172_v48  ;;  %v3157_v41 = vand.u32 2147483648, %v9328_v54  ;;  %vm9422_vm10 = vcmp.eq.f32.partialorder %v3155_v7, 8.507059e+37 }
 0x627   : > { %v3372_v62 = vmul.f32 %v9336_v38, %v9321_v20  ;;  %vm3377_vm6 = vweird.f32 %v9336_v38  ;;  %v9450_v7 = vpop.f32.mrf.mxu1 }
 0x628   : > { %v9343_v51 = vpop.xlane.xlu1 %2475  ;;  %v3165_v2 = vadd.f32 %v9323_v5, %v3164_v14  ;;  %vm9408_vm15 = vmor %vm3376_vm13, %vm3377_vm6  ;;  %v3158_v36 = vor.u32 1.1754944e-38, %v3157_v41 }
 0x629   : > { %6118 = vrcp.f32 %v9343_v51  ;;  %v3373_v50 = vsub.f32 1.0, %v3372_v62  ;;  %v9349_v26 = vpop.eup %6114  ;;  %v3410_v62 = vand.u32 2147483647, %v9326_v21  ;;  %vm3391_vm1 = vweird.f32 %v9343_v51 }
 0x62a   : > { %v9347_v55 = vpop.xlane.xlu0 %2436  ;;  %v9353_v12 = vpop.eup %6116  ;;  %v3147_v10 = vmul.f32 %v9349_v26, %v9328_v54  ;;  %vm3152_vm11 = vweird.f32 %v9349_v26  ;;  %v3169_v11 = vsel %vm9390_vm8, %v9323_v5, %v3165_v2  ;;  %v3412_v5 = vand.u32 2147483648, %v9326_v21 }
 0x62b   : > { %6120 = vrcp.f32 %v9347_v55  ;;  %v3374_v0 = vmul.f32 %v9336_v38, %v3373_v50  ;;  %v3402_v37 = vmul.f32 %v9353_v12, %v9326_v21  ;;  %v3383_v50 = vor.u32 1.1754944e-38, %v3382_v57  ;;  %vm9418_vm3 = vmor %vm3151_vm4, %vm3152_vm11 }
 0x62c   : > { %v3148_v19 = vsub.f32 1.0, %v3147_v10  ;;  %v3174_v10 = vsel %vm9358_vm14, %v3173_v63, %v3169_v11  ;;  %v3395_v48 = vand.u32 2147483647, %v9343_v51  ;;  %vm3407_vm0 = vweird.f32 %v9353_v12  ;;  %v9458_v11 = vpop.f32.mrf.mxu3 }
 0x62d   : > { %v3375_v17 = vadd.f32 %v9336_v38, %v3374_v0  ;;  %v3403_v42 = vsub.f32 1.0, %v3402_v37  ;;  %v3397_v45 = vand.u32 2147483648, %v9343_v51  ;;  %vm3196_vm2 = vweird.f32 %v9347_v55  ;;  %vm9509_vm4 = vmor %vm3406_vm12, %vm3407_vm0 }
 0x62e   : > { %v3721_v18 = vpop.f32.mrf.mxu0  ;;  %v3149_v6 = vmul.f32 %v9349_v26, %v3148_v19  ;;  %vm9466_vm5 = vcmp.eq.f32.partialorder %v3395_v48, 8.507059e+37  ;;  %v5774_v21 = vpack.i.bf16 %v9338_v32, %v9319_v30 }
 0x62f   : > { %v9364_v43 = vpop.eup %6118  ;;  %v5744_v22 = vpack.i.bf16 %v3721_v18, %v3719_v52  ;;  %v3379_v54 = vsel %vm9408_vm15, %v9336_v38, %v3375_v17  ;;  %v3404_v38 = vmul.f32 %v9353_v12, %v3403_v42  ;;  %v3175_v17 = vmul.f32 %v8336_v9, %v3174_v10 }
 0x630   : > { %v3387_v23 = vmul.f32 %v9364_v43, %v9343_v51  ;;  %v9378_v39 = vpop.xlane.xlu1 %2433  ;;  %v3150_v52 = vadd.f32 %v9349_v26, %v3149_v6  ;;  %v3384_v35 = vsel %vm9414_vm9, %v3383_v50, %v3379_v54  ;;  %vm3392_vm14 = vweird.f32 %v9364_v43 }
 0x631   : > { %v9380_v34 = vpop.eup %6120  ;;  %6122 = vrcp.f32 %v9378_v39  ;;  %5745 = vrot.lane.b32.xlu1 %v5744_v22, %s6227_s29  ;;  %v3385_v20 = vmul.f32 %v8294_v60, %v3384_v35  ;;  %v3405_v50 = vadd.f32 %v9353_v12, %v3404_v38  ;;  %v3491_v14 = vpack.c.bf16 %v3175_v17, %v3175_v17  ;;  %vm9486_vm13 = vmor %vm3391_vm1, %vm3392_vm14 }
 0x632   : > { %v3192_v40 = vmul.f32 %v9380_v34, %v9347_v55  ;;  %v3388_v46 = vsub.f32 1.0, %v3387_v23  ;;  %v3154_v0 = vsel %vm9418_vm3, %v9349_v26, %v3150_v52  ;;  %v9440_v19 = vpop.xlane.xlu0 %2484  ;;  %v10625_v23 = vld [vmem:[#allocation38_spill] sm:$0xff]  ;;  %v3185_v10 = vand.u32 2147483647, %v9378_v39 }
 0x633   : > { %v3370_v6 = vmul.f32 %v10625_v23, %v3369_v28  ;;  %v3159_v63 = vsel %vm9422_vm10, %v3158_v36, %v3154_v0  ;;  %v3202_v28 = vand.u32 2147483648, %v9347_v55  ;;  %v3187_v54 = vand.u32 2147483648, %v9378_v39 }
 0x634   : > { %v3193_v18 = vsub.f32 1.0, %v3192_v40  ;;  %v3389_v37 = vmul.f32 %v9364_v43, %v3388_v46  ;;  %v3200_v40 = vand.u32 2147483647, %v9347_v55  ;;  %v3160_v47 = vmul.f32 %v8476_v53, %v3159_v63  ;;  %v9503_v63 = vpop.f32.mrf.mxu1 }
 0x635   : > { %v3504_v46 = vpack.c.bf16 %v3370_v6, %v3370_v6  ;;  %v3505_v48 = vpack.c.bf16 %v3385_v20, %v3385_v20  ;;  %vm3197_vm8 = vweird.f32 %v9380_v34  ;;  %vm3181_vm11 = vweird.f32 %v9378_v39 }
 0x636   : > { %v3724_v22 = vpop.f32.mrf.mxu0  ;;  %v3194_v52 = vmul.f32 %v9380_v34, %v3193_v18  ;;  %v3390_v9 = vadd.f32 %v9364_v43, %v3389_v37  ;;  %v3490_v0 = vpack.c.bf16 %v3160_v47, %v3160_v47  ;;  %v3888_v35 = vunpack.c.l.b16 %v3491_v14  ;;  %vm9525_vm9 = vmor %vm3196_vm2, %vm3197_vm8 }
 0x637   : > { %v9436_v2 = vpop.eup %6122  ;;  %v4031_v6 = vunpack.c.l.b16 %v3504_v46  ;;  %v3398_v20 = vor.u32 1.1754944e-38, %v3397_v45  ;;  %vm3186_vm3 = vcmp.eq.f32.partialorder %v3185_v10, 8.507059e+37  ;;  %v3413_v55 = vor.u32 1.1754944e-38, %v3412_v5 }
 0x638   : > { %v3177_v26 = vmul.f32 %v9436_v2, %v9378_v39  ;;  %v9447_v57 = vpop.xlane.xlu1 %2481  ;;  %vm3182_vm6 = vweird.f32 %v9436_v2  ;;  %v3195_v60 = vadd.f32 %v9380_v34, %v3194_v52  ;;  %v3887_v52 = vunpack.c.l.b16 %v3490_v0 }
 0x639   : > { %6124 = vrcp.f32 %v9447_v57  ;;  %vm9499_vm15 = vmor %vm3181_vm11, %vm3182_vm6  ;;  %v3203_v14 = vor.u32 1.1754944e-38, %v3202_v28  ;;  %vm3411_vm10 = vcmp.eq.f32.partialorder %v3410_v62, 8.507059e+37  ;;  %vm3201_vm1 = vcmp.eq.f32.partialorder %v3200_v40, 8.507059e+37 }
 0x63a   : > { %6126 = vrcp.f32 %v9440_v19  ;;  %v3178_v42 = vsub.f32 1.0, %v3177_v26  ;;  %v3394_v26 = vsel %vm9486_vm13, %v9364_v43, %v3390_v9  ;;  %v3199_v46 = vsel %vm9525_vm9, %v9380_v34, %v3195_v60 }
 0x63b   : > { %v3399_v45 = vsel %vm9466_vm5, %v3398_v20, %v3394_v26  ;;  %v3204_v0 = vsel %vm3201_vm1, %v3203_v14, %v3199_v46  ;;  %vm3421_vm12 = vweird.f32 %v9447_v57  ;;  %vm3436_vm14 = vweird.f32 %v9440_v19 }
 0x63c   : > { %v3179_v44 = vmul.f32 %v9436_v2, %v3178_v42  ;;  %v3409_v42 = vsel %vm9509_vm4, %v9353_v12, %v3405_v50  ;;  %v3893_v50 = vpack.c.b16 %v3888_v35, %v3887_v52  ;;  %v3400_v28 = vmul.f32 %v10586_v24, %v3399_v45  ;;  %v5559_v52 = vld [vmem:[%s6312_s28] sm:$0xff] }
 0x63d   : > { %v3205_v53 = vmul.f32 %v10588_v58, %v3204_v0  ;;  %v3427_v58 = vand.u32 2147483648, %v9447_v57  ;;  %vm4319_vm4 = vcmask 195584   ;;  %vm10642_vm9 = vcmask 261120  }
 0x63e   : > { %v3180_v36 = vadd.f32 %v9436_v2, %v3179_v44  ;;  %v3726_v38 = vpop.f32.mrf.mxu0  ;;  %v9535_v44 = vpop.f32.mrf.mxu3  ;;  %5476 = vmatmul.msk.bf16.gmra.mxu3 %vm1909_vm7, %v3893_v50  ;;  %v3506_v26 = vpack.c.bf16 %v3400_v28, %v3400_v28  ;;  %vm10645_vm1 = vmmov %vm10642_vm9 }
 0x63f   : > { %v9478_v18 = vpop.eup %6124  ;;  %v5759_v51 = vpack.i.bf16 %v3726_v38, %v3724_v22  ;;  %v4032_v22 = vunpack.c.l.b16 %v3505_v48  ;;  %v3414_v48 = vsel %vm3411_vm10, %v3413_v55, %v3409_v42  ;;  %v3440_v42 = vand.u32 2147483647, %v9440_v19 }
 0x640   : > { %v9492_v37 = vpop.eup %6126  ;;  %v3184_v43 = vsel %vm9499_vm15, %v9436_v2, %v3180_v36  ;;  %v3417_v17 = vmul.f32 %v9478_v18, %v9447_v57  ;;  %v3188_v2 = vor.u32 1.1754944e-38, %v3187_v54  ;;  %v9543_v54 = vpop.f32.mrf.mxu2  ;;  %v3415_v40 = vmul.f32 %v8310_v13, %v3414_v48 }
 0x641   : > { %5760 = vrot.lane.b32.xlu1 %v5759_v51, %s6227_s29  ;;  %v3432_v12 = vmul.f32 %v9492_v37, %v9440_v19  ;;  %v4038_v47 = vpack.c.b16 %v4032_v22, %v4031_v6  ;;  %v3794_v36 = vpop.f32.mrf.mxu1  ;;  %vm3422_vm0 = vweird.f32 %v9478_v18  ;;  %v3493_v51 = vpack.c.bf16 %v3205_v53, %v3205_v53 }
 0x642   : > { %v3189_v10 = vsel %vm3186_vm3, %v3188_v2, %v3184_v43  ;;  %v3418_v34 = vsub.f32 1.0, %v3417_v17  ;;  %v3425_v13 = vand.u32 2147483647, %v9447_v57  ;;  %vm3437_vm2 = vweird.f32 %v9492_v37  ;;  %vm9571_vm5 = vmor %vm3421_vm12, %vm3422_vm0 }
 0x643   : > { %5483 = vmatmul.msk.bf16.gmra.mxu1 %vm1909_vm7, %v4038_v47  ;;  %v3433_v60 = vsub.f32 1.0, %v3432_v12  ;;  %v3190_v41 = vmul.f32 %v9134_v59, %v3189_v10  ;;  %v3507_v59 = vpack.c.bf16 %v3415_v40, %v3415_v40  ;;  %v4033_v39 = vunpack.c.l.b16 %v3506_v26  ;;  %vm9579_vm6 = vmor %vm3436_vm14, %vm3437_vm2 }
 0x644   : > { %v3419_v62 = vmul.f32 %v9478_v18, %v3418_v34  ;;  %v5789_v17 = vpack.i.bf16 %v9450_v7, %v9366_v15  ;;  %v3442_v22 = vand.u32 2147483648, %v9440_v19  ;;  %v3890_v2 = vunpack.c.l.b16 %v3493_v51  ;;  %vm10648_vm2 = vmmov %vm10645_vm1 }
 0x645   : > { %v3434_v38 = vmul.f32 %v9492_v37, %v3433_v60  ;;  %v3492_v23 = vpack.c.bf16 %v3190_v41, %v3190_v41  ;;  %v4034_v20 = vunpack.c.l.b16 %v3507_v59  ;;  %v3428_v7 = vor.u32 1.1754944e-38, %v3427_v58 }
 0x646   : > { %v4001_v5 = vpop.f32.mrf.mxu0  ;;  %v3420_v24 = vadd.f32 %v9478_v18, %v3419_v62  ;;  %v9558_v30 = vpop.f32.mrf.mxu3  ;;  %vm3426_vm8 = vcmp.eq.f32.partialorder %v3425_v13, 8.507059e+37  ;;  %v3443_v47 = vor.u32 1.1754944e-38, %v3442_v22  ;;  %vm3441_vm13 = vcmp.eq.f32.partialorder %v3440_v42, 8.507059e+37 }
 0x647   : > { %v3435_v6 = vadd.f32 %v9492_v37, %v3434_v38  ;;  %v3889_v43 = vunpack.c.l.b16 %v3492_v23  ;;  %v4039_v12 = vpack.c.b16 %v4034_v20, %v4033_v39  ;;  %v5804_v48 = vpack.i.bf16 %v3794_v36, %v9503_v63 }
 0x648   : > { %v3867_v32 = vpop.f32.mrf.mxu2  ;;  %v3424_v9 = vsel %vm9571_vm5, %v9478_v18, %v3420_v24  ;;  %vm4302_vm15 = vcmask 130048  }
 0x649   : > { %5775 = vrot.lane.b32.xlu1 %v5774_v21, %s6227_s29  ;;  %v3797_v46 = vpop.f32.mrf.mxu1  ;;  %v3439_v19 = vsel %vm9579_vm6, %v9492_v37, %v3435_v6  ;;  %v3894_v18 = vpack.c.b16 %v3890_v2, %v3889_v43  ;;  %v3429_v50 = vsel %vm3426_vm8, %v3428_v7, %v3424_v9  ;;  %v5749_v37 = vpack.i.bf16 %v3867_v32, %v9543_v54  ;;  %v5560_v43 = vld [vmem:[%s6312_s28 + $0x8] sm:$0xff]  ;;  %vm10651_vm6 = vmmov %vm10645_vm1 }
 0x64a   : > { %v3444_v55 = vsel %vm3441_vm13, %v3443_v47, %v3439_v19  ;;  %v3430_v45 = vmul.f32 %v9169_v16, %v3429_v50  ;;  %4394 = vmatpush.bf16.msra.mxu2 %v5560_v43 }
 0x64b   : > { %v3445_v0 = vmul.f32 %v9148_v1, %v3444_v55 }
 0x64c   : > { %v3508_v60 = vpack.c.bf16 %v3430_v45, %v3430_v45 }
 0x64d   : > { %v3509_v28 = vpack.c.bf16 %v3445_v0, %v3445_v0 }
 0x64e   : > { %v4003_v35 = vpop.f32.mrf.mxu0  ;;  %5477 = vmatmul.msk.bf16.gmra.mxu3 %vm1909_vm7, %v3894_v18  ;;  %v9591_v34 = vpop.f32.mrf.mxu3  ;;  %v4035_v21 = vunpack.c.l.b16 %v3508_v60  ;;  %4395 = vmatpush.bf16.msra.mxu2 %v5559_v52 }
 0x64f   : > { %v5724_v57 = vpack.i.bf16 %v4003_v35, %v4001_v5  ;;  %v4036_v38 = vunpack.c.l.b16 %v3509_v28 }
 0x651   : > { %5790 = vrot.lane.b32.xlu1 %v5789_v17, %s6227_s29  ;;  %5725 = vrot.lane.b32.xlu2 %v5724_v57, %s6228_s30  ;;  %v3799_v5 = vpop.f32.mrf.mxu1  ;;  %v4040_v1 = vpack.c.b16 %v4036_v38, %v4035_v21 }
 0x652   : > { %v5819_v16 = vpack.i.bf16 %v3799_v5, %v3797_v46 }
 0x653   : > { %5484 = vmatmul.msk.bf16.gmra.mxu1 %vm1909_vm7, %v4039_v12 }
 0x656   : > { %v4006_v14 = vpop.f32.mrf.mxu0  ;;  %v9598_v26 = vpop.f32.mrf.mxu3 }
 0x657   : > { %v3870_v10 = vpop.f32.mrf.mxu2 }
 0x659   : > { %5805 = vrot.lane.b32.xlu1 %v5804_v48, %s6227_s29  ;;  %5750 = vrot.lane.b32.xlu2 %v5749_v37, %s6226_s27 }
 0x65e   : > { %v4008_v41 = vpop.f32.mrf.mxu0 }
 0x65f   : > { %v3872_v62 = vpop.f32.mrf.mxu2  ;;  %v5739_v40 = vpack.i.bf16 %v4008_v41, %v4006_v14 }
 0x660   : > { %v5764_v53 = vpack.i.bf16 %v3872_v62, %v3870_v10 }
 0x661   : > { %5820 = vrot.lane.b32.xlu1 %v5819_v16, %s6227_s29  ;;  %5740 = vrot.lane.b32.xlu0 %v5739_v40, %s6228_s30 }
 0x662   : > { %5765 = vrot.lane.b32.xlu2 %v5764_v53, %s6226_s27 }
 0x663   : > { %5485 = vmatmul.msk.bf16.gmra.mxu1 %vm1909_vm7, %v4040_v1  ;;  %vm10640_vm7 = vcmask 64512  }
 0x664   : > { %vm10641_vm11 = vmmov %vm10640_vm7 }
 0x665   : > { %vm10643_vm3 = vmmov %vm10640_vm7 }
 0x666   : > { %v4011_v63 = vpop.f32.mrf.mxu0  ;;  %vm10644_vm10 = vmmov %vm10643_vm3 }
 0x667   : > { %vm10646_vm0 = vmmov %vm10643_vm3 }
 0x668   : > { %v5721_v20 = vpop.permute.xlu0 %5720  ;;  %vm10647_vm12 = vmmov %vm10646_vm0 }
 0x669   : > { %v5716_v57 = vpop.permute.xlu1 %5715  ;;  %v5723_v7 = vunpack.i.h.bf16 %v5721_v20  ;;  %v5722_v46 = vunpack.i.l.bf16 %v5721_v20  ;;  %vm10649_vm14 = vmmov %vm10646_vm0 }
 0x66a   : > { %v5718_v42 = vunpack.i.h.bf16 %v5716_v57  ;;  %v5717_v9 = vunpack.i.l.bf16 %v5716_v57  ;;  %vm10650_vm5 = vmmov %vm10646_vm0 }
 0x66b   : > { %vm10652_vm8 = vmmov %vm10646_vm0 }
 0x66c   : > { %v3928_v54 = vpop.f32.mrf.mxu3  ;;  %v4287_v2 = vsel %vm10640_vm7, %v9116_v27, %v5718_v42  ;;  %v4286_v15 = vsel %vm10641_vm11, %v9044_v61, %v5717_v9  ;;  %vm10653_vm13 = vmmov %vm10646_vm0 }
 0x66d   : > { %v4303_v47 = vsel %vm4302_vm15, %v4286_v15, %v5722_v46  ;;  %v4304_v50 = vsel %vm4302_vm15, %v4287_v2, %v5723_v7  ;;  %vm10654_vm7 = vmmov %vm10645_vm1 }
 0x66e   : > { %v4013_v36 = vpop.f32.mrf.mxu0  ;;  %vm10655_vm11 = vmmov %vm10645_vm1 }
 0x66f   : > { %v5754_v23 = vpack.i.bf16 %v4013_v36, %v4011_v63 }
 0x670   : > { %v4074_v13 = vpop.f32.mrf.mxu1 }
 0x671   : > { %5755 = vrot.lane.b32.xlu0 %v5754_v23, %s6228_s30 }
 0x674   : > { %v3930_v24 = vpop.f32.mrf.mxu3 }
 0x675   : > { %v5779_v59 = vpack.i.bf16 %v3930_v24, %v3928_v54 }
 0x676   : > { %v4016_v51 = vpop.f32.mrf.mxu0 }
 0x677   : > { %5780 = vrot.lane.b32.xlu2 %v5779_v59, %s6226_s27 }
 0x678   : > { %v4076_v6 = vpop.f32.mrf.mxu1 }
 0x679   : > { %v5784_v35 = vpack.i.bf16 %v4076_v6, %v4074_v13 }
 0x67e   : > { %v4018_v58 = vpop.f32.mrf.mxu0 }
 0x67f   : > { %v5769_v32 = vpack.i.bf16 %v4018_v58, %v4016_v51 }
 0x681   : > { %5770 = vrot.lane.b32.xlu0 %v5769_v32, %s6228_s30  ;;  %v3933_v39 = vpop.f32.mrf.mxu3 }
 0x689   : > { %5785 = vrot.lane.b32.xlu0 %v5784_v35, %s6228_s30  ;;  %v3935_v17 = vpop.f32.mrf.mxu3 }
 0x68a   : > { %v5794_v22 = vpack.i.bf16 %v3935_v17, %v3933_v39 }
 0x68b   : > { %v5731_v37 = vpop.permute.xlu0 %5730 }
 0x68c   : > { %5795 = vrot.lane.b32.xlu2 %v5794_v22, %s6226_s27  ;;  %v5733_v5 = vunpack.i.h.bf16 %v5731_v37  ;;  %v5732_v28 = vunpack.i.l.bf16 %v5731_v37 }
 0x68e   : > { %v4289_v53 = vsel %vm10643_vm3, %v9196_v25, %v5733_v5  ;;  %v4288_v38 = vsel %vm10644_vm10, %v9140_v49, %v5732_v28  ;;  %vm10657_vm3 = vmmov %vm10646_vm0 }
 0x68f   : > { %vm10658_vm10 = vmmov %vm10645_vm1 }
 0x698   : > { %v5736_v0 = vpop.permute.xlu1 %5735 }
 0x699   : > { %v5738_v21 = vunpack.i.h.bf16 %v5736_v0  ;;  %v5737_v62 = vunpack.i.l.bf16 %v5736_v0 }
 0x69b   : > { %v4305_v54 = vsel %vm4302_vm15, %v4288_v38, %v5737_v62  ;;  %v4306_v36 = vsel %vm4302_vm15, %v4289_v53, %v5738_v21 }
 0x6a3   : > { %v5746_v25 = vpop.permute.xlu1 %5745 }
 0x6a4   : > { %v5748_v6 = vunpack.i.h.bf16 %v5746_v25  ;;  %v5747_v35 = vunpack.i.l.bf16 %v5746_v25 }
 0x6a6   : > { %v4291_v57 = vsel %vm10646_vm0, %v9233_v3, %v5748_v6  ;;  %v4290_v42 = vsel %vm10647_vm12, %v9219_v4, %v5747_v35  ;;  %v6193_v6 = vld [vmem:[%s10220_s10] sm:$0xff]  ;;  %vm10659_vm12 = vmmov %vm10646_vm0 }
 0x6ab   : > { %v5726_v19 = vpop.permute.xlu2 %5725 }
 0x6ac   : > { %v5728_v12 = vunpack.i.h.bf16 %v5726_v19  ;;  %v5727_v18 = vunpack.i.l.bf16 %v5726_v19 }
 0x6ae   : > { %v4320_v55 = vsel %vm4319_vm4, %v4303_v47, %v5727_v18  ;;  %v4321_v14 = vsel %vm4319_vm4, %v4304_v50, %v5728_v12 }
 0x6af   : > { %v4341_v45 = vpack.c.bf16 %v4321_v14, %v4320_v55 }
 0x6b1   : > { %5494 = vmatmul.msk.bf16.vlgmr.msra.gmra.mxu2 %vm10642_vm9, %v4341_v45  ;;  %vm10656_vm9 = vmmov %vm10646_vm0 }
 0x6b3   : > { %v5751_v49 = vpop.permute.xlu2 %5750  ;;  %v5761_v3 = vpop.permute.xlu1 %5760 }
 0x6b4   : > { %v5753_v43 = vunpack.i.h.bf16 %v5751_v49  ;;  %v5752_v17 = vunpack.i.l.bf16 %v5751_v49  ;;  %v5763_v4 = vunpack.i.h.bf16 %v5761_v3  ;;  %v5762_v50 = vunpack.i.l.bf16 %v5761_v3 }
 0x6b6   : > { %v4308_v2 = vsel %vm4302_vm15, %v4291_v57, %v5753_v43  ;;  %v4307_v15 = vsel %vm4302_vm15, %v4290_v42, %v5752_v17 }
 0x6bc   : > { %v5766_v47 = vpop.permute.xlu2 %5765 }
 0x6bd   : > { %v5768_v55 = vunpack.i.h.bf16 %v5766_v47  ;;  %v5767_v14 = vunpack.i.l.bf16 %v5766_v47 }
 0x6c0   : > { %v4079_v27 = vpop.f32.mrf.mxu1 }
 0x6c1   : > { %v3938_v61 = vpop.f32.mrf.mxu3 }
 0x6c8   : > { %v4081_v10 = vpop.f32.mrf.mxu1 }
 0x6c9   : > { %v5799_v48 = vpack.i.bf16 %v4081_v10, %v4079_v27  ;;  %v3940_v60 = vpop.f32.mrf.mxu3  ;;  %v4293_v27 = vsel %vm10649_vm14, %v9280_v33, %v5763_v4  ;;  %vm10661_vm14 = vmmov %vm10646_vm0 }
 0x6ca   : > { %v5809_v41 = vpack.i.bf16 %v3940_v60, %v3938_v61  ;;  %v4292_v61 = vsel %vm10650_vm5, %v9248_v8, %v5762_v50  ;;  %v4310_v37 = vsel %vm4302_vm15, %v4293_v27, %v5768_v55  ;;  %vm10662_vm5 = vmmov %vm10646_vm0 }
 0x6cb   : > { %5800 = vrot.lane.b32.xlu0 %v5799_v48, %s6228_s30  ;;  %v4309_v0 = vsel %vm4302_vm15, %v4292_v61, %v5767_v14 }
 0x6cc   : > { %5810 = vrot.lane.b32.xlu2 %v5809_v41, %s6226_s27  ;;  %v5776_v41 = vpop.permute.xlu1 %5775 }
 0x6cd   : > { %v5778_v62 = vunpack.i.h.bf16 %v5776_v41  ;;  %v5777_v8 = vunpack.i.l.bf16 %v5776_v41 }
 0x6d0   : > { %v4084_v16 = vpop.f32.mrf.mxu1 }
 0x6d1   : > { %v3943_v51 = vpop.f32.mrf.mxu3  ;;  %v5781_v21 = vpop.permute.xlu2 %5780 }
 0x6d3   : > { %v5741_v40 = vpop.permute.xlu0 %5740 }
 0x6d4   : > { %v5743_v1 = vunpack.i.h.bf16 %v5741_v40  ;;  %v5742_v63 = vunpack.i.l.bf16 %v5741_v40  ;;  %v5782_v40 = vunpack.i.l.bf16 %v5781_v21  ;;  %v5791_v25 = vpop.permute.xlu1 %5790 }
 0x6d5   : > { %v5792_v43 = vunpack.i.l.bf16 %v5791_v25 }
 0x6d6   : > { %v4322_v23 = vsel %vm4319_vm4, %v4305_v54, %v5742_v63  ;;  %v4323_v24 = vsel %vm4319_vm4, %v4306_v36, %v5743_v1  ;;  %v4295_v1 = vsel %vm10652_vm8, %v9333_v31, %v5778_v62  ;;  %v4294_v63 = vsel %vm10653_vm13, %v9316_v29, %v5777_v8  ;;  %v9669_v31 = vld [vmem:[%s6302_s22] sm:$0x3f]  ;;  %vm10664_vm8 = vmmov %vm10645_vm1 }
 0x6d7   : > { %v4342_v59 = vpack.c.bf16 %v4323_v24, %v4322_v23  ;;  %v4311_v36 = vsel %vm4302_vm15, %v4294_v63, %v5782_v40  ;;  %v9672_v29 = vperm.slane %v9669_v31, 2  ;;  %vm10667_vm13 = vmmov %vm10645_vm1 }
 0x6d8   : > { %v4086_v13 = vpop.f32.mrf.mxu1 }
 0x6d9   : > { %5495 = vmatmul.msk.bf16.gmra.mxu2 %vm10645_vm1, %v4342_v59  ;;  %v5814_v58 = vpack.i.bf16 %v4086_v13, %v4084_v16  ;;  %v3945_v32 = vpop.f32.mrf.mxu3  ;;  %v5783_v16 = vunpack.i.h.bf16 %v5781_v21 }
 0x6da   : > { %v5824_v39 = vpack.i.bf16 %v3945_v32, %v3943_v51  ;;  %v9666_v51 = vld [vmem:[%s464_s11] ss:$0 sm:$0xff] }
 0x6db   : > { %5815 = vrot.lane.b32.xlu0 %v5814_v58, %s6228_s30  ;;  %v4312_v54 = vsel %vm4302_vm15, %v4295_v1, %v5783_v16 }
 0x6dc   : > { %5825 = vrot.lane.b32.xlu2 %v5824_v39, %s6226_s27  ;;  %v5793_v39 = vunpack.i.h.bf16 %v5791_v25  ;;  %v5806_v50 = vpop.permute.xlu1 %5805 }
 0x6dd   : > { %v5808_v14 = vunpack.i.h.bf16 %v5806_v50 }
 0x6e0   : > { %v4089_v22 = vpop.f32.mrf.mxu1 }
 0x6e3   : > { %v5756_v52 = vpop.permute.xlu0 %5755 }
 0x6e4   : > { %v5758_v9 = vunpack.i.h.bf16 %v5756_v52  ;;  %v5757_v20 = vunpack.i.l.bf16 %v5756_v52  ;;  %v5821_v62 = vpop.permute.xlu1 %5820 }
 0x6e5   : > { %v5823_v16 = vunpack.i.h.bf16 %v5821_v62 }
 0x6e6   : > { %v4325_v7 = vsel %vm4319_vm4, %v4308_v2, %v5758_v9  ;;  %v4324_v46 = vsel %vm4319_vm4, %v4307_v15, %v5757_v20  ;;  %v5796_v32 = vpop.permute.xlu2 %5795  ;;  %v4297_v9 = vsel %vm10656_vm9, %v9458_v11, %v5793_v39  ;;  %v4296_v2 = vsel %vm10657_vm3, %v9371_v56, %v5792_v43  ;;  %v6194_v11 = vld [vmem:[%s10220_s10 + $0x8] sm:$0xff]  ;;  %vm10671_vm9 = vmmov %vm10645_vm1 }
 0x6e7   : > { %v4343_v19 = vpack.c.bf16 %v4325_v7, %v4324_v46  ;;  %v5797_v52 = vunpack.i.l.bf16 %v5796_v32  ;;  %v4301_v1 = vsel %vm10661_vm14, %v9598_v26, %v5823_v16  ;;  %v6195_v26 = vld [vmem:[%s10220_s10 + $0x10] sm:$0xff]  ;;  %v9781_v16 = vld [vmem:[%s6302_s22 + $0x8] sm:$0x3f]  ;;  %vm10672_vm3 = vmmov %vm10645_vm1 }
 0x6e8   : > { %v4091_v12 = vpop.f32.mrf.mxu1 }
 0x6e9   : > { %5496 = vmatmul.msk.bf16.gmra.mxu2 %vm10648_vm2, %v4343_v19  ;;  %v5829_v18 = vpack.i.bf16 %v4091_v12, %v4089_v22  ;;  %v5798_v22 = vunpack.i.h.bf16 %v5796_v32  ;;  %v4313_v12 = vsel %vm4302_vm15, %v4296_v2, %v5797_v52  ;;  %vm10660_vm2 = vmmov %vm10645_vm1 }
 0x6eb   : > { %5830 = vrot.lane.b32.xlu0 %v5829_v18, %s6228_s30  ;;  %v4314_v19 = vsel %vm4302_vm15, %v4297_v9, %v5798_v22 }
 0x6f3   : > { %v5771_v45 = vpop.permute.xlu0 %5770 }
 0x6f4   : > { %v5773_v10 = vunpack.i.h.bf16 %v5771_v45  ;;  %v5772_v48 = vunpack.i.l.bf16 %v5771_v45  ;;  %v5807_v45 = vunpack.i.l.bf16 %v5806_v50  ;;  %v6199_v50 = vld [vmem:[%s10220_s10 + $0x30] sm:$0xff] }
 0x6f6   : > { %v4327_v60 = vsel %vm4319_vm4, %v4310_v37, %v5773_v10  ;;  %v4326_v5 = vsel %vm4319_vm4, %v4309_v0, %v5772_v48  ;;  %v4299_v48 = vsel %vm10646_vm0, %v9558_v30, %v5808_v14  ;;  %v4298_v37 = vsel %vm10659_vm12, %v9535_v44, %v5807_v45  ;;  %vm10674_vm0 = vmmov %vm10645_vm1 }
 0x6f7   : > { %v4344_v28 = vpack.c.bf16 %v4327_v60, %v4326_v5  ;;  %v5822_v30 = vunpack.i.l.bf16 %v5821_v62  ;;  %vm10675_vm12 = vmmov %vm10674_vm0 }
 0x6f8   : > { %vm10677_vm14 = vmmov %vm10674_vm0 }
 0x6f9   : > { %5497 = vmatmul.msk.bf16.gmra.mxu2 %vm10651_vm6, %v4344_v28  ;;  %vm10663_vm6 = vmmov %vm10645_vm1 }
 0x6fb   : > { %v5786_v33 = vpop.permute.xlu0 %5785 }
 0x6fc   : > { %v5788_v53 = vunpack.i.h.bf16 %v5786_v33  ;;  %v5787_v38 = vunpack.i.l.bf16 %v5786_v33 }
 0x6fe   : > { %v4329_v23 = vsel %vm4319_vm4, %v4312_v54, %v5788_v53  ;;  %v4328_v24 = vsel %vm4319_vm4, %v4311_v36, %v5787_v38  ;;  %v4300_v54 = vsel %vm10662_vm5, %v9591_v34, %v5822_v30  ;;  %v9784_v30 = vperm.slane %v9781_v16, 2  ;;  %vm10678_vm5 = vmmov %vm10674_vm0 }
 0x6ff   : > { %v4345_v59 = vpack.c.bf16 %v4329_v23, %v4328_v24 }
 0x709   : > { %5498 = vmatmul.msk.bf16.gmra.mxu2 %vm10654_vm7, %v4345_v59  ;;  %vm10668_vm7 = vmmov %vm10645_vm1 }
 0x726   : > { %v5811_v55 = vpop.permute.xlu2 %5810 }
 0x727   : > { %v5813_v27 = vunpack.i.h.bf16 %v5811_v55  ;;  %v5812_v61 = vunpack.i.l.bf16 %v5811_v55 }
 0x729   : > { %v4316_v5 = vsel %vm4302_vm15, %v4299_v48, %v5813_v27  ;;  %v4315_v28 = vsel %vm4302_vm15, %v4298_v37, %v5812_v61  ;;  %v10669_v61 = vld [vmem:[#allocation2_spill] sm:$0xff] }
 0x734   : > { %v4397_v13 = vpop.f32.mrf.mxu2 }
 0x735   : > { %v4398_v58 = vadd.f32 %v9666_v51, %v4397_v13 }
 0x736   : > { %v5826_v8 = vpop.permute.xlu2 %5825 }
 0x737   : > { %v4439_v49 = vmul.f32 %v9672_v29, %v4398_v58  ;;  %v5828_v40 = vunpack.i.h.bf16 %v5826_v8  ;;  %v5827_v53 = vunpack.i.l.bf16 %v5826_v8 }
 0x739   : > { %v9679_v35 = vadd.f32 %v6193_v6, %v4439_v49  ;;  %v4318_v59 = vsel %vm4302_vm15, %v4301_v1, %v5828_v40  ;;  %v4317_v13 = vsel %vm4302_vm15, %v4300_v54, %v5827_v53  ;;  %vm10665_vm15 = vmmov %vm10645_vm1  ;;  %v6202_v1 = vld [vmem:[%s10220_s10 + $0x40] sm:$0xff] }
 0x73b   : > { %v4471_v17 = vsel %vm10655_vm11, %v9679_v35, 0.0  ;;  %vm10670_vm11 = vmmov %vm10645_vm1 }
 0x73c   : > { %v4399_v57 = vpop.f32.mrf.mxu2  ;;  %4472 = vadd.xlane.f32.xlu1 %v4471_v17  ;;  %v6196_v17 = vld [vmem:[%s10220_s10 + $0x18] sm:$0xff] }
 0x73d   : > { %v4400_v42 = vadd.f32 %v9666_v51, %v4399_v57  ;;  %v5801_v20 = vpop.permute.xlu0 %5800 }
 0x73e   : > { %v5803_v15 = vunpack.i.h.bf16 %v5801_v20  ;;  %v5802_v7 = vunpack.i.l.bf16 %v5801_v20  ;;  %v6197_v20 = vld [vmem:[%s10220_s10 + $0x20] sm:$0xff] }
 0x73f   : > { %v4440_v46 = vmul.f32 %v9672_v29, %v4400_v42 }
 0x740   : > { %v4331_v18 = vsel %vm4319_vm4, %v4314_v19, %v5803_v15  ;;  %v4330_v3 = vsel %vm4319_vm4, %v4313_v12, %v5802_v7  ;;  %v6198_v12 = vld [vmem:[%s10220_s10 + $0x28] sm:$0xff] }
 0x741   : > { %v9696_v47 = vadd.f32 %v6194_v11, %v4440_v46  ;;  %v4346_v4 = vpack.c.bf16 %v4331_v18, %v4330_v3 }
 0x743   : > { %v4474_v56 = vsel %vm10658_vm10, %v9696_v47, 0.0  ;;  %5499 = vmatmul.msk.bf16.gmra.mxu2 %vm10645_vm1, %v4346_v4  ;;  %vm10673_vm10 = vmmov %vm10645_vm1 }
 0x744   : > { %4475 = vadd.xlane.f32.xlu2 %v4474_v56 }
 0x74d   : > { %v5816_v10 = vpop.permute.xlu0 %5815 }
 0x74e   : > { %v5818_v0 = vunpack.i.h.bf16 %v5816_v10  ;;  %v5817_v60 = vunpack.i.l.bf16 %v5816_v10 }
 0x750   : > { %v4333_v41 = vsel %vm4319_vm4, %v4316_v5, %v5818_v0  ;;  %v4332_v21 = vsel %vm4319_vm4, %v4315_v28, %v5817_v60 }
 0x751   : > { %v4347_v33 = vpack.c.bf16 %v4333_v41, %v4332_v21 }
 0x753   : > { %5500 = vmatmul.msk.bf16.gmra.mxu2 %vm10660_vm2, %v4347_v33  ;;  %v6200_v33 = vld [vmem:[%s10220_s10 + $0x38] sm:$0xff]  ;;  %vm10676_vm2 = vmmov %vm10674_vm0 }
 0x75c   : > { %v4402_v44 = vpop.f32.mrf.mxu2 }
 0x75d   : > { %v4403_v38 = vadd.f32 %v9666_v51, %v4402_v44  ;;  %v5831_v63 = vpop.permute.xlu0 %5830 }
 0x75e   : > { %v5833_v36 = vunpack.i.h.bf16 %v5831_v63  ;;  %v5832_v23 = vunpack.i.l.bf16 %v5831_v63 }
 0x75f   : > { %v4441_v24 = vmul.f32 %v9672_v29, %v4403_v38 }
 0x760   : > { %v4335_v58 = vsel %vm4319_vm4, %v4318_v59, %v5833_v36  ;;  %v4334_v25 = vsel %vm4319_vm4, %v4317_v13, %v5832_v23  ;;  %vm10666_vm4 = vmmov %vm10645_vm1 }
 0x761   : > { %v9723_v49 = vadd.f32 %v6195_v26, %v4441_v24  ;;  %v4348_v32 = vpack.c.bf16 %v4335_v58, %v4334_v25 }
 0x763   : > { %v4477_v34 = vsel %vm10663_vm6, %v9723_v49, 0.0  ;;  %5501 = vmatmul.msk.bf16.gmra.mxu2 %vm10664_vm8, %v4348_v32  ;;  %vm10679_vm6 = vmmov %vm10674_vm0 }
 0x764   : > { %v4404_v6 = vpop.f32.mrf.mxu2  ;;  %4478 = vadd.xlane.f32.xlu0 %v4477_v34  ;;  %vm10680_vm8 = vmmov %vm10674_vm0 }
 0x765   : > { %v4405_v39 = vadd.f32 %v9666_v51, %v4404_v6 }
 0x767   : > { %v4442_v43 = vmul.f32 %v9672_v29, %v4405_v39 }
 0x769   : > { %v9733_v22 = vadd.f32 %v6196_v17, %v4442_v43  ;;  %v6203_v43 = vld [vmem:[%s10220_s10 + $0x48] sm:$0xff] }
 0x76b   : > { %v4480_v52 = vsel %vm10665_vm15, %v9733_v22, 0.0  ;;  %vm10681_vm15 = vmmov %vm10674_vm0 }
 0x76c   : > { %v4407_v57 = vpop.f32.mrf.mxu2  ;;  %4481 = vadd.xlane.f32.xlu1 %v4480_v52 }
 0x76d   : > { %v4408_v42 = vadd.f32 %v9666_v51, %v4407_v57 }
 0x76f   : > { %v4443_v9 = vmul.f32 %v9672_v29, %v4408_v42 }
 0x771   : > { %v9742_v2 = vadd.f32 %v6197_v20, %v4443_v9 }
 0x773   : > { %v4483_v15 = vsel %vm10666_vm4, %v9742_v2, 0.0  ;;  %vm10682_vm4 = vmmov %vm10674_vm0 }
 0x774   : > { %v4409_v7 = vpop.f32.mrf.mxu2  ;;  %4484 = vadd.xlane.f32.xlu2 %v4483_v15 }
 0x775   : > { %v4410_v46 = vadd.f32 %v9666_v51, %v4409_v7 }
 0x777   : > { %v4444_v19 = vmul.f32 %v9672_v29, %v4410_v46 }
 0x779   : > { %v9751_v18 = vadd.f32 %v6198_v12, %v4444_v19  ;;  %v6204_v19 = vld [vmem:[%s10220_s10 + $0x50] sm:$0xff] }
 0x77b   : > { %v4486_v3 = vsel %vm10667_vm13, %v9751_v18, 0.0  ;;  %vm10683_vm13 = vmmov %vm10674_vm0 }
 0x77c   : > { %v4412_v11 = vpop.f32.mrf.mxu2  ;;  %4487 = vadd.xlane.f32.xlu0 %v4486_v3 }
 0x77d   : > { %v4413_v4 = vadd.f32 %v9666_v51, %v4412_v11 }
 0x77f   : > { %v4445_v56 = vmul.f32 %v9672_v29, %v4413_v4 }
 0x781   : > { %v9760_v55 = vadd.f32 %v6199_v50, %v4445_v56 }
 0x783   : > { %v4489_v14 = vsel %vm10668_vm7, %v9760_v55, 0.0  ;;  %vm10684_vm7 = vmmov %vm10674_vm0 }
 0x784   : > { %4490 = vadd.xlane.f32.xlu0 %v4489_v14  ;;  %v4414_v45 = vpop.f32.mrf.mxu2 }
 0x785   : > { %v4415_v48 = vadd.f32 %v9666_v51, %v4414_v45 }
 0x787   : > { %v4446_v60 = vmul.f32 %v9672_v29, %v4415_v48  ;;  %v6205_v48 = vld [vmem:[%s10220_s10 + $0x58] sm:$0xff] }
 0x789   : > { %v9777_v62 = vadd.f32 %v6200_v33, %v4446_v60 }
 0x78b   : > { %v4492_v38 = vsel %vm10672_vm3, %v9777_v62, 0.0 }
 0x78c   : > { %v4417_v28 = vpop.f32.mrf.mxu2 }
 0x78d   : > { %v4418_v8 = vadd.f32 %v9666_v51, %v4417_v28 }
 0x78f   : > { %v4447_v53 = vmul.f32 %v9784_v30, %v4418_v8 }
 0x791   : > { %v9798_v63 = vadd.f32 %v6202_v1, %v4447_v53 }
 0x793   : > { %v4495_v54 = vsel %vm10673_vm10, %v9798_v63, 0.0  ;;  %vm10685_vm10 = vmmov %vm10674_vm0 }
 0x794   : > { %v4419_v36 = vpop.f32.mrf.mxu2 }
 0x795   : > { %v4420_v13 = vadd.f32 %v9666_v51, %v4419_v36 }
 0x797   : > { %v4448_v26 = vmul.f32 %v9784_v30, %v4420_v13 }
 0x799   : > { %v9815_v17 = vadd.f32 %v6203_v43, %v4448_v26 }
 0x79b   : > { %v4498_v20 = vsel %vm10674_vm0, %v9815_v17, 0.0 }
 0x7af   : > { %v4473_v27 = vpop.xlane.xlu1 %4472 }
 0x7b0   : > { %v4519_v10 = vmul.f32 %v4473_v27, %v10669_v61 }
 0x7b2   : > { %v9767_v37 = vsub.f32 %v9679_v35, %v4519_v10 }
 0x7b4   : > { %v4551_v0 = vmul.f32 %v9767_v37, %v9767_v37 }
 0x7b6   : > { %v4567_v5 = vsel %vm10670_vm11, %v4551_v0, 0.0 }
 0x7b7   : > { %v4476_v41 = vpop.xlane.xlu2 %4475  ;;  %4568 = vadd.xlane.f32.xlu1 %v4567_v5 }
 0x7b8   : > { %v4520_v21 = vmul.f32 %v4476_v41, %v10669_v61 }
 0x7ba   : > { %v9787_v29 = vsub.f32 %v9696_v47, %v4520_v21 }
 0x7bc   : > { %v4552_v40 = vmul.f32 %v9787_v29, %v9787_v29 }
 0x7be   : > { %v4570_v44 = vsel %vm10671_vm9, %v4552_v40, 0.0 }
 0x7bf   : > { %4571 = vadd.xlane.f32.xlu2 %v4570_v44  ;;  %4493 = vadd.xlane.f32.xlu1 %v4492_v38  ;;  %v6206_v44 = vld [vmem:[%s10220_s10 + $0x60] sm:$0xff] }
 0x7c6   : > { %v4422_v23 = vpop.f32.mrf.mxu2 }
 0x7c7   : > { %4496 = vadd.xlane.f32.xlu1 %v4495_v54  ;;  %v4423_v52 = vadd.f32 %v9666_v51, %v4422_v23 }
 0x7c9   : > { %v4449_v9 = vmul.f32 %v9784_v30, %v4423_v52 }
 0x7cb   : > { %v9831_v12 = vadd.f32 %v6204_v19, %v4449_v9 }
 0x7cd   : > { %v4501_v14 = vsel %vm10676_vm2, %v9831_v12, 0.0 }
 0x7ce   : > { %v4424_v39 = vpop.f32.mrf.mxu2 }
 0x7cf   : > { %v4425_v3 = vadd.f32 %v9666_v51, %v4424_v39  ;;  %v6208_v39 = vld [vmem:[%s10220_s10 + $0x70] sm:$0xff] }
 0x7d1   : > { %v4450_v50 = vmul.f32 %v9784_v30, %v4425_v3 }
 0x7d3   : > { %v9847_v0 = vadd.f32 %v6205_v48, %v4450_v50 }
 0x7d5   : > { %v4504_v8 = vsel %vm10679_vm6, %v9847_v0, 0.0 }
 0x7d6   : > { %v4427_v4 = vpop.f32.mrf.mxu2 }
 0x7d7   : > { %v4479_v24 = vpop.xlane.xlu0 %4478  ;;  %v4428_v60 = vadd.f32 %v9666_v51, %v4427_v4 }
 0x7d8   : > { %v4521_v59 = vmul.f32 %v4479_v24, %v10669_v61 }
 0x7d9   : > { %v4451_v21 = vmul.f32 %v9784_v30, %v4428_v60 }
 0x7da   : > { %v9805_v58 = vsub.f32 %v9723_v49, %v4521_v59 }
 0x7db   : > { %v9863_v38 = vadd.f32 %v6206_v44, %v4451_v21 }
 0x7dc   : > { %v4553_v25 = vmul.f32 %v9805_v58, %v9805_v58 }
 0x7dd   : > { %v4507_v59 = vsel %vm10681_vm15, %v9863_v38, 0.0 }
 0x7de   : > { %v4573_v32 = vsel %vm10645_vm1, %v4553_v25, 0.0  ;;  %v4429_v41 = vpop.f32.mrf.mxu2  ;;  %v6207_v25 = vld [vmem:[%s10220_s10 + $0x68] sm:$0xff] }
 0x7df   : > { %4574 = vadd.xlane.f32.xlu2 %v4573_v32  ;;  %v4482_v34 = vpop.xlane.xlu1 %4481  ;;  %v4430_v1 = vadd.f32 %v9666_v51, %v4429_v41 }
 0x7e0   : > { %v4522_v6 = vmul.f32 %v4482_v34, %v10669_v61 }
 0x7e1   : > { %v4452_v23 = vmul.f32 %v9784_v30, %v4430_v1 }
 0x7e2   : > { %v9819_v57 = vsub.f32 %v9733_v22, %v4522_v6 }
 0x7e3   : > { %v9878_v26 = vadd.f32 %v6207_v25, %v4452_v23 }
 0x7e4   : > { %v4554_v42 = vmul.f32 %v9819_v57, %v9819_v57 }
 0x7e5   : > { %v4510_v6 = vsel %vm10682_vm4, %v9878_v26, 0.0  ;;  %vm10689_vm4 = vmmov %vm10676_vm2 }
 0x7e6   : > { %v4576_v15 = vsel %vm10675_vm12, %v4554_v42, 0.0  ;;  %v4432_v13 = vpop.f32.mrf.mxu2 }
 0x7e7   : > { %4499 = vadd.xlane.f32.xlu2 %v4498_v20  ;;  %v4485_v7 = vpop.xlane.xlu2 %4484  ;;  %4577 = vadd.xlane.f32.xlu0 %v4576_v15  ;;  %v4433_v32 = vadd.f32 %v9666_v51, %v4432_v13  ;;  %v5562_v15 = vld [vmem:[%s6321_s18 + $0x8] sm:$0xff] }
 0x7e8   : > { %v4523_v46 = vmul.f32 %v4485_v7, %v10669_v61  ;;  %4917 = vmatpush.bf16.msra.mxu3 %v5562_v15  ;;  %v5561_v7 = vld [vmem:[%s6321_s18] sm:$0xff] }
 0x7e9   : > { %v4453_v34 = vmul.f32 %v9784_v30, %v4433_v32  ;;  %v6209_v32 = vld [vmem:[%s10220_s10 + $0x78] sm:$0xff] }
 0x7ea   : > { %v9835_v11 = vsub.f32 %v9742_v2, %v4523_v46 }
 0x7eb   : > { %v9887_v43 = vadd.f32 %v6208_v39, %v4453_v34 }
 0x7ec   : > { %v4555_v56 = vmul.f32 %v9835_v11, %v9835_v11  ;;  %4918 = vmatpush.bf16.msra.mxu3 %v5561_v7 }
 0x7ed   : > { %v4513_v52 = vsel %vm10683_vm13, %v9887_v43, 0.0 }
 0x7ee   : > { %v4579_v45 = vsel %vm10677_vm14, %v4555_v56, 0.0  ;;  %v4434_v60 = vpop.f32.mrf.mxu2  ;;  %vm10687_vm14 = vmmov %vm10676_vm2 }
 0x7ef   : > { %v4488_v27 = vpop.xlane.xlu0 %4487  ;;  %4502 = vadd.xlane.f32.xlu2 %v4501_v14  ;;  %4580 = vadd.xlane.f32.xlu0 %v4579_v45 }
 0x7f0   : > { %v4524_v10 = vmul.f32 %v4488_v27, %v10669_v61 }
 0x7f2   : > { %v9851_v5 = vsub.f32 %v9751_v18, %v4524_v10 }
 0x7f4   : > { %v4556_v28 = vmul.f32 %v9851_v5, %v9851_v5 }
 0x7f6   : > { %v4582_v33 = vsel %vm10678_vm5, %v4556_v28, 0.0  ;;  %vm10688_vm5 = vmmov %vm10676_vm2 }
 0x7f7   : > { %v4491_v40 = vpop.xlane.xlu0 %4490  ;;  %4583 = vadd.xlane.f32.xlu1 %v4582_v33  ;;  %4505 = vadd.xlane.f32.xlu0 %v4504_v8 }
 0x7f8   : > { %v4525_v53 = vmul.f32 %v4491_v40, %v10669_v61  ;;  %v4435_v40 = vadd.f32 %v9666_v51, %v4434_v60 }
 0x7fa   : > { %v9867_v54 = vsub.f32 %v9760_v55, %v4525_v53 }
 0x7fc   : > { %v4557_v36 = vmul.f32 %v9867_v54, %v9867_v54 }
 0x7fe   : > { %v4585_v24 = vsel %vm10680_vm8, %v4557_v36, 0.0 }
 0x7ff   : > { %4586 = vadd.xlane.f32.xlu1 %v4585_v24  ;;  %4508 = vadd.xlane.f32.xlu0 %v4507_v59  ;;  %v4454_v24 = vmul.f32 %v9784_v30, %v4435_v40 }
 0x801   : > { %v9914_v34 = vadd.f32 %v6209_v32, %v4454_v24 }
 0x803   : > { %v4516_v7 = vsel %vm10676_vm2, %v9914_v34, 0.0 }
 0x807   : > { %4511 = vadd.xlane.f32.xlu1 %v4510_v6  ;;  %v10686_v6 = vld [vmem:[#allocation3_spill] sm:$0xff] }
 0x808   : > { %v9917_v39 = vperm.slane %v10686_v6, 4 }
 0x80f   : > { %4514 = vadd.xlane.f32.xlu1 %v4513_v52 }
 0x82a   : > { %v4569_v42 = vpop.xlane.xlu1 %4568 }
 0x82b   : > { %v4615_v9 = vmul.f32 %v4569_v42, %v10669_v61 }
 0x82d   : > { %v4631_v20 = vadd.f32 1e-05, %v4615_v9  ;;  %v9921_v9 = vperm.slane %v9669_v31, 3 }
 0x82f   : > { %6128 = vrsqrt.f32 %v4631_v20  ;;  %vm4653_vm9 = vweird.f32 %v4631_v20 }
 0x832   : > { %v4572_v46 = vpop.xlane.xlu2 %4571  ;;  %v4494_v19 = vpop.xlane.xlu1 %4493 }
 0x833   : > { %v4616_v3 = vmul.f32 %v4572_v46, %v10669_v61  ;;  %v4526_v4 = vmul.f32 %v4494_v19, %v10669_v61 }
 0x835   : > { %v6129_v56 = vpop.eup %6128  ;;  %v4632_v50 = vadd.f32 1e-05, %v4616_v3  ;;  %v9897_v14 = vsub.f32 %v9777_v62, %v4526_v4 }
 0x836   : > { %v4648_v45 = vmul.f32 %v6129_v56, %v4631_v20  ;;  %vm4654_vm11 = vweird.f32 %v6129_v56 }
 0x837   : > { %6130 = vrsqrt.f32 %v4632_v50  ;;  %v4558_v27 = vmul.f32 %v9897_v14, %v9897_v14  ;;  %vm4655_vm3 = vmor %vm4653_vm9, %vm4654_vm11  ;;  %vm4663_vm0 = vweird.f32 %v4632_v50 }
 0x838   : > { %v4649_v10 = vmul.f32 %v6129_v56, %v4648_v45  ;;  %vm10690_vm9 = vmmov %vm10676_vm2 }
 0x839   : > { %v4588_v48 = vsel %vm10684_vm7, %v4558_v27, 0.0 }
 0x83a   : > { %v4650_v28 = vmul.f32 0.5, %v4649_v10  ;;  %4589 = vadd.xlane.f32.xlu2 %v4588_v48  ;;  %v4497_v41 = vpop.xlane.xlu1 %4496 }
 0x83b   : > { %v4527_v21 = vmul.f32 %v4497_v41, %v10669_v61 }
 0x83c   : > { %v4651_v33 = vsub.f32 1.5, %v4650_v28 }
 0x83d   : > { %v6131_v8 = vpop.eup %6130  ;;  %v9905_v53 = vsub.f32 %v9798_v63, %v4527_v21 }
 0x83e   : > { %v4652_v44 = vmul.f32 %v6129_v56, %v4651_v33  ;;  %v4658_v1 = vmul.f32 %v6131_v8, %v4632_v50  ;;  %vm4664_vm1 = vweird.f32 %v6131_v8 }
 0x83f   : > { %v4559_v36 = vmul.f32 %v9905_v53, %v9905_v53  ;;  %vm4665_vm12 = vmor %vm4663_vm0, %vm4664_vm1 }
 0x840   : > { %v4659_v23 = vmul.f32 %v6131_v8, %v4658_v1  ;;  %v4656_v13 = vsel %vm4655_vm3, %v6129_v56, %v4652_v44  ;;  %vm10691_vm0 = vmmov %vm10676_vm2 }
 0x841   : > { %v4591_v59 = vsel %vm10685_vm10, %v4559_v36, 0.0  ;;  %v4807_v52 = vmul.f32 %v4656_v13, %v9767_v37 }
 0x842   : > { %v4660_v25 = vmul.f32 0.5, %v4659_v23  ;;  %4592 = vadd.xlane.f32.xlu2 %v4591_v59 }
 0x843   : > { %v4825_v20 = vmul.f32 %v9917_v39, %v4807_v52 }
 0x844   : > { %v4661_v51 = vsub.f32 1.5, %v4660_v25 }
 0x845   : > { %v4843_v19 = vadd.f32 %v9921_v9, %v4825_v20 }
 0x846   : > { %v4662_v30 = vmul.f32 %v6131_v8, %v4661_v51 }
 0x848   : > { %v4666_v42 = vsel %vm4665_vm12, %v6131_v8, %v4662_v30  ;;  %vm10692_vm12 = vmmov %vm10691_vm0 }
 0x849   : > { %v4808_v15 = vmul.f32 %v4666_v42, %v9787_v29 }
 0x84a   : > { %4517 = vadd.xlane.f32.xlu2 %v4516_v7 }
 0x84b   : > { %v4826_v46 = vmul.f32 %v9917_v39, %v4808_v15 }
 0x84d   : > { %v4844_v37 = vadd.f32 %v9921_v9, %v4826_v46 }
 0x84f   : > { %v4864_v3 = vpack.c.bf16 %v4844_v37, %v4843_v19 }
 0x851   : > { %5510 = vmatmul.msk.bf16.vlgmr.msra.gmra.mxu3 %vm10687_vm14, %v4864_v3 }
 0x852   : > { %v4575_v4 = vpop.xlane.xlu2 %4574 }
 0x853   : > { %v4617_v31 = vmul.f32 %v4575_v4, %v10669_v61 }
 0x855   : > { %v4633_v56 = vadd.f32 1e-05, %v4617_v31 }
 0x857   : > { %6132 = vrsqrt.f32 %v4633_v56  ;;  %vm4673_vm8 = vweird.f32 %v4633_v56 }
 0x85a   : > { %v4500_v50 = vpop.xlane.xlu2 %4499  ;;  %v4578_v29 = vpop.xlane.xlu0 %4577 }
 0x85b   : > { %v4528_v45 = vmul.f32 %v4500_v50, %v10669_v61  ;;  %v4618_v27 = vmul.f32 %v4578_v29, %v10669_v61 }
 0x85d   : > { %v6133_v10 = vpop.eup %6132  ;;  %v9935_v48 = vsub.f32 %v9815_v17, %v4528_v45  ;;  %v4634_v60 = vadd.f32 1e-05, %v4618_v27 }
 0x85e   : > { %v4668_v28 = vmul.f32 %v6133_v10, %v4633_v56  ;;  %vm4674_vm6 = vweird.f32 %v6133_v10 }
 0x85f   : > { %6134 = vrsqrt.f32 %v4634_v60  ;;  %v4560_v41 = vmul.f32 %v9935_v48, %v9935_v48  ;;  %vm4675_vm15 = vmor %vm4673_vm8, %vm4674_vm6  ;;  %vm4683_vm7 = vweird.f32 %v4634_v60 }
 0x860   : > { %v4669_v21 = vmul.f32 %v6133_v10, %v4668_v28  ;;  %vm10693_vm6 = vmmov %vm10691_vm0 }
 0x861   : > { %v4594_v33 = vsel %vm10688_vm5, %v4560_v41, 0.0  ;;  %vm10694_vm8 = vmmov %vm10691_vm0 }
 0x862   : > { %v4670_v8 = vmul.f32 0.5, %v4669_v21  ;;  %v4503_v40 = vpop.xlane.xlu2 %4502  ;;  %4595 = vadd.xlane.f32.xlu0 %v4594_v33  ;;  %v4581_v44 = vpop.xlane.xlu0 %4580 }
 0x863   : > { %v4529_v1 = vmul.f32 %v4503_v40, %v10669_v61  ;;  %v4619_v36 = vmul.f32 %v4581_v44, %v10669_v61 }
 0x864   : > { %v4671_v23 = vsub.f32 1.5, %v4670_v8 }
 0x865   : > { %v6135_v24 = vpop.eup %6134  ;;  %v9943_v59 = vsub.f32 %v9831_v12, %v4529_v1  ;;  %v4635_v13 = vadd.f32 1e-05, %v4619_v36 }
 0x866   : > { %v4672_v25 = vmul.f32 %v6133_v10, %v4671_v23  ;;  %v4678_v51 = vmul.f32 %v6135_v24, %v4634_v60  ;;  %vm4684_vm13 = vweird.f32 %v6135_v24 }
 0x867   : > { %6136 = vrsqrt.f32 %v4635_v13  ;;  %v4561_v32 = vmul.f32 %v9943_v59, %v9943_v59  ;;  %vm4685_vm11 = vmor %vm4683_vm7, %vm4684_vm13  ;;  %vm4693_vm10 = vweird.f32 %v4635_v13 }
 0x868   : > { %v4679_v6 = vmul.f32 %v6135_v24, %v4678_v51  ;;  %v4676_v30 = vsel %vm4675_vm15, %v6133_v10, %v4672_v25  ;;  %vm10695_vm15 = vmmov %vm10691_vm0 }
 0x869   : > { %v4597_v52 = vsel %vm10689_vm4, %v4561_v32, 0.0  ;;  %v4809_v3 = vmul.f32 %v4676_v30, %v9805_v58 }
 0x86a   : > { %v4680_v42 = vmul.f32 0.5, %v4679_v6  ;;  %4598 = vadd.xlane.f32.xlu0 %v4597_v52  ;;  %v4506_v20 = vpop.xlane.xlu0 %4505  ;;  %v4584_v15 = vpop.xlane.xlu1 %4583 }
 0x86b   : > { %v4530_v7 = vmul.f32 %v4506_v20, %v10669_v61  ;;  %v4620_v46 = vmul.f32 %v4584_v15, %v10669_v61  ;;  %v4827_v58 = vmul.f32 %v9917_v39, %v4809_v3 }
 0x86c   : > { %v4681_v19 = vsub.f32 1.5, %v4680_v42 }
 0x86d   : > { %v6137_v37 = vpop.eup %6136  ;;  %v9952_v4 = vsub.f32 %v9847_v0, %v4530_v7  ;;  %v4636_v31 = vadd.f32 1e-05, %v4620_v46  ;;  %v4845_v36 = vadd.f32 %v9921_v9, %v4827_v58 }
 0x86e   : > { %v4682_v56 = vmul.f32 %v6135_v24, %v4681_v19  ;;  %v4688_v50 = vmul.f32 %v6137_v37, %v4635_v13  ;;  %vm4694_vm3 = vweird.f32 %v6137_v37 }
 0x86f   : > { %6138 = vrsqrt.f32 %v4636_v31  ;;  %v4562_v29 = vmul.f32 %v9952_v4, %v9952_v4  ;;  %vm4695_vm1 = vmor %vm4693_vm10, %vm4694_vm3  ;;  %vm4703_vm14 = vweird.f32 %v4636_v31 }
 0x870   : > { %v4686_v45 = vsel %vm4685_vm11, %v6135_v24, %v4682_v56  ;;  %v4689_v27 = vmul.f32 %v6137_v37, %v4688_v50  ;;  %vm10696_vm10 = vmmov %vm10691_vm0 }
 0x871   : > { %v4810_v10 = vmul.f32 %v4686_v45, %v9819_v57  ;;  %v4600_v28 = vsel %vm10690_vm9, %v4562_v29, 0.0 }
 0x872   : > { %v4690_v41 = vmul.f32 0.5, %v4689_v27  ;;  %4601 = vadd.xlane.f32.xlu1 %v4600_v28  ;;  %v4509_v21 = vpop.xlane.xlu0 %4508  ;;  %v4587_v33 = vpop.xlane.xlu1 %4586 }
 0x873   : > { %v4531_v60 = vmul.f32 %v4509_v21, %v10669_v61  ;;  %v4828_v8 = vmul.f32 %v9917_v39, %v4810_v10 }
 0x874   : > { %v4691_v40 = vsub.f32 1.5, %v4690_v41  ;;  %v4621_v41 = vmul.f32 %v4587_v33, %v10669_v61 }
 0x875   : > { %v6139_v44 = vpop.eup %6138  ;;  %v9962_v1 = vsub.f32 %v9863_v38, %v4531_v60  ;;  %v4846_v57 = vadd.f32 %v9921_v9, %v4828_v8 }
 0x876   : > { %v4692_v23 = vmul.f32 %v6137_v37, %v4691_v40  ;;  %v4698_v24 = vmul.f32 %v6139_v44, %v4636_v31  ;;  %vm4704_vm2 = vweird.f32 %v6139_v44  ;;  %v4637_v21 = vadd.f32 1e-05, %v4621_v41 }
 0x877   : > { %v4865_v25 = vpack.c.bf16 %v4846_v57, %v4845_v36  ;;  %v4563_v51 = vmul.f32 %v9962_v1, %v9962_v1  ;;  %vm4705_vm5 = vmor %vm4703_vm14, %vm4704_vm2 }
 0x878   : > { %v4699_v32 = vmul.f32 %v6139_v44, %v4698_v24  ;;  %v4696_v52 = vsel %vm4695_vm1, %v6137_v37, %v4692_v23  ;;  %6140 = vrsqrt.f32 %v4637_v21  ;;  %vm4713_vm13 = vweird.f32 %v4637_v21  ;;  %vm10697_vm1 = vmmov %vm10691_vm0 }
 0x879   : > { %5511 = vmatmul.msk.bf16.gmra.mxu3 %vm10691_vm0, %v4865_v25  ;;  %v4603_v6 = vsel %vm10692_vm12, %v4563_v51, 0.0  ;;  %v4811_v7 = vmul.f32 %v4696_v52, %v9835_v11 }
 0x87a   : > { %v4700_v30 = vmul.f32 0.5, %v4699_v32  ;;  %4604 = vadd.xlane.f32.xlu2 %v4603_v6  ;;  %v4512_v42 = vpop.xlane.xlu1 %4511 }
 0x87b   : > { %v4532_v20 = vmul.f32 %v4512_v42, %v10669_v61  ;;  %v4829_v50 = vmul.f32 %v9917_v39, %v4811_v7 }
 0x87c   : > { %v4701_v15 = vsub.f32 1.5, %v4700_v30 }
 0x87d   : > { %v9973_v46 = vsub.f32 %v9878_v26, %v4532_v20  ;;  %v4847_v31 = vadd.f32 %v9921_v9, %v4829_v50 }
 0x87e   : > { %v4702_v13 = vmul.f32 %v6139_v44, %v4701_v15  ;;  %v6141_v60 = vpop.eup %6140 }
 0x87f   : > { %v4564_v19 = vmul.f32 %v9973_v46, %v9973_v46  ;;  %v4708_v8 = vmul.f32 %v6141_v60, %v4637_v21  ;;  %vm4714_vm4 = vweird.f32 %v6141_v60  ;;  %v10015_v21 = vld [vmem:[%s472_s23] ss:$0 sm:$0xff] }
 0x880   : > { %v4706_v3 = vsel %vm4705_vm5, %v6139_v44, %v4702_v13  ;;  %vm4715_vm7 = vmor %vm4713_vm13, %vm4714_vm4 }
 0x881   : > { %v4812_v37 = vmul.f32 %v4706_v3, %v9851_v5  ;;  %v4606_v56 = vsel %vm10693_vm6, %v4564_v19, 0.0  ;;  %v4709_v40 = vmul.f32 %v6141_v60, %v4708_v8  ;;  %vm10699_vm13 = vmmov %vm10697_vm1 }
 0x882   : > { %4607 = vadd.xlane.f32.xlu0 %v4606_v56  ;;  %v4515_v29 = vpop.xlane.xlu1 %4514 }
 0x883   : > { %v4533_v11 = vmul.f32 %v4515_v29, %v10669_v61  ;;  %v4830_v45 = vmul.f32 %v9917_v39, %v4812_v37  ;;  %v4710_v23 = vmul.f32 0.5, %v4709_v40 }
 0x885   : > { %v9983_v27 = vsub.f32 %v9887_v43, %v4533_v11  ;;  %v4848_v10 = vadd.f32 %v9921_v9, %v4830_v45  ;;  %v4711_v24 = vsub.f32 1.5, %v4710_v23 }
 0x887   : > { %v4866_v28 = vpack.c.bf16 %v4848_v10, %v4847_v31  ;;  %v4565_v5 = vmul.f32 %v9983_v27, %v9983_v27  ;;  %v4712_v32 = vmul.f32 %v6141_v60, %v4711_v24 }
 0x889   : > { %5512 = vmatmul.msk.bf16.gmra.mxu3 %vm10694_vm8, %v4866_v28  ;;  %v4609_v58 = vsel %vm10695_vm15, %v4565_v5, 0.0  ;;  %v4716_v33 = vsel %vm4715_vm7, %v6141_v60, %v4712_v32  ;;  %v5568_v60 = vld [vmem:[%s6335_s4 + $0x28] sm:$0xff] }
 0x88a   : > { %4610 = vadd.xlane.f32.xlu1 %v4609_v58  ;;  %v4813_v7 = vmul.f32 %v4716_v33, %v9867_v54  ;;  %v5569_v58 = vld [vmem:[%s6335_s4 + $0x30] sm:$0xff] }
 0x88c   : > { %v4831_v11 = vmul.f32 %v9917_v39, %v4813_v7 }
 0x88e   : > { %v4849_v31 = vadd.f32 %v9921_v9, %v4831_v11 }
 0x8ad   : > { %v4590_v44 = vpop.xlane.xlu2 %4589 }
 0x8ae   : > { %v4622_v36 = vmul.f32 %v4590_v44, %v10669_v61 }
 0x8b0   : > { %v4638_v57 = vadd.f32 1e-05, %v4622_v36  ;;  %v5567_v36 = vld [vmem:[%s6335_s4 + $0x20] sm:$0xff] }
 0x8b2   : > { %6142 = vrsqrt.f32 %v4638_v57  ;;  %vm4723_vm9 = vweird.f32 %v4638_v57 }
 0x8b5   : > { %v4593_v25 = vpop.xlane.xlu2 %4592 }
 0x8b6   : > { %v4623_v13 = vmul.f32 %v4593_v25, %v10669_v61 }
 0x8b8   : > { %v6143_v51 = vpop.eup %6142  ;;  %v4639_v29 = vadd.f32 1e-05, %v4623_v13 }
 0x8b9   : > { %v4718_v6 = vmul.f32 %v6143_v51, %v4638_v57  ;;  %vm4724_vm11 = vweird.f32 %v6143_v51 }
 0x8ba   : > { %vm4725_vm3 = vmor %vm4723_vm9, %vm4724_vm11  ;;  %6144 = vrsqrt.f32 %v4639_v29  ;;  %vm4733_vm12 = vweird.f32 %v4639_v29 }
 0x8bb   : > { %v4719_v52 = vmul.f32 %v6143_v51, %v4718_v6  ;;  %v5566_v6 = vld [vmem:[%s6335_s4 + $0x18] sm:$0xff] }
 0x8bd   : > { %v4720_v30 = vmul.f32 0.5, %v4719_v52  ;;  %v4518_v42 = vpop.xlane.xlu2 %4517 }
 0x8be   : > { %v4534_v20 = vmul.f32 %v4518_v42, %v10669_v61 }
 0x8bf   : > { %v4721_v15 = vsub.f32 1.5, %v4720_v30 }
 0x8c0   : > { %v9997_v19 = vsub.f32 %v9914_v34, %v4534_v20  ;;  %v6145_v5 = vpop.eup %6144 }
 0x8c1   : > { %v4722_v3 = vmul.f32 %v6143_v51, %v4721_v15  ;;  %v4728_v41 = vmul.f32 %v6145_v5, %v4639_v29  ;;  %v5565_v15 = vld [vmem:[%s6335_s4 + $0x10] sm:$0xff]  ;;  %vm4734_vm0 = vweird.f32 %v6145_v5 }
 0x8c2   : > { %v4566_v37 = vmul.f32 %v9997_v19, %v9997_v19  ;;  %vm4735_vm2 = vmor %vm4733_vm12, %vm4734_vm0 }
 0x8c3   : > { %v4726_v56 = vsel %vm4725_vm3, %v6143_v51, %v4722_v3  ;;  %vm10700_vm0 = vmmov %vm10699_vm13 }
 0x8c4   : > { %v4814_v50 = vmul.f32 %v4726_v56, %v9897_v14  ;;  %v4612_v54 = vsel %vm10696_vm10, %v4566_v37, 0.0  ;;  %v5570_v14 = vld [vmem:[%s6335_s4 + $0x38] sm:$0xff] }
 0x8c5   : > { %4613 = vadd.xlane.f32.xlu2 %v4612_v54  ;;  %5180 = vmatpush.bf16.msra.mxu0 %v5570_v14 }
 0x8c6   : > { %v4832_v45 = vmul.f32 %v9917_v39, %v4814_v50 }
 0x8c8   : > { %v4850_v10 = vadd.f32 %v9921_v9, %v4832_v45  ;;  %v4729_v9 = vmul.f32 %v6145_v5, %v4728_v41 }
 0x8c9   : > { %5181 = vmatpush.bf16.msra.mxu0 %v5569_v58 }
 0x8ca   : > { %v4867_v28 = vpack.c.bf16 %v4850_v10, %v4849_v31  ;;  %v4730_v24 = vmul.f32 0.5, %v4729_v9  ;;  %v5564_v31 = vld [vmem:[%s6335_s4 + $0x8] sm:$0xff] }
 0x8cc   : > { %5513 = vmatmul.msk.bf16.gmra.mxu3 %vm10697_vm1, %v4867_v28  ;;  %v4731_v52 = vsub.f32 1.5, %v4730_v24 }
 0x8cd   : > { %5182 = vmatpush.bf16.msra.mxu0 %v5568_v60 }
 0x8ce   : > { %v4732_v37 = vmul.f32 %v6145_v5, %v4731_v52 }
 0x8d0   : > { %v4736_v10 = vsel %vm4735_vm2, %v6145_v5, %v4732_v37 }
 0x8d1   : > { %5183 = vmatpush.bf16.msra.mxu0 %v5567_v36  ;;  %v10698_v36 = vld [vmem:[#allocation4_spill] sm:$0xff] }
 0x8d4   : > { %v4920_v39 = vpop.f32.mrf.mxu3 }
 0x8d5   : > { %v10019_v8 = vadd.f32 %v10015_v21, %v4920_v39  ;;  %v4596_v40 = vpop.xlane.xlu0 %4595  ;;  %5184 = vmatpush.bf16.msra.mxu0 %v5566_v6  ;;  %v5563_v39 = vld [vmem:[%s6335_s4] sm:$0xff] }
 0x8d6   : > { %v4624_v44 = vmul.f32 %v4596_v40, %v10669_v61 }
 0x8d7   : > { %v4976_v57 = vmul.f32 0.044715, %v10019_v8  ;;  %v4960_v37 = vmul.f32 0.5, %v10019_v8 }
 0x8d8   : > { %v4640_v23 = vadd.f32 1e-05, %v4624_v44  ;;  %v4815_v44 = vmul.f32 %v4736_v10, %v9905_v53  ;;  %v10045_v53 = vperm.slane %v9781_v16, 3 }
 0x8d9   : > { %v4992_v25 = vmul.f32 %v4976_v57, %v10019_v8  ;;  %5185 = vmatpush.bf16.msra.mxu0 %v5565_v15  ;;  %v10039_v57 = vperm.slane %v10698_v36, 4 }
 0x8da   : > { %6146 = vrsqrt.f32 %v4640_v23  ;;  %vm4743_vm5 = vweird.f32 %v4640_v23 }
 0x8db   : > { %v5008_v51 = vmul.f32 %v4992_v25, %v10019_v8  ;;  %v4833_v52 = vmul.f32 %v10039_v57, %v4815_v44 }
 0x8dc   : > { %v4922_v32 = vpop.f32.mrf.mxu3 }
 0x8dd   : > { %v5024_v33 = vadd.f32 %v5008_v51, %v10019_v8  ;;  %v4923_v30 = vadd.f32 %v10015_v21, %v4922_v32  ;;  %v4599_v42 = vpop.xlane.xlu0 %4598  ;;  %5186 = vmatpush.bf16.msra.mxu0 %v5564_v31 }
 0x8de   : > { %v4625_v20 = vmul.f32 %v4599_v42, %v10669_v61 }
 0x8df   : > { %v4977_v7 = vmul.f32 0.044715, %v4923_v30  ;;  %v5040_v56 = vmul.f32 0.7978846, %v5024_v33 }
 0x8e0   : > { %v6147_v13 = vpop.eup %6146  ;;  %v10031_v3 = vadd.f32 1e-05, %v4625_v20 }
 0x8e1   : > { %v4738_v50 = vmul.f32 %v6147_v13, %v4640_v23  ;;  %v4993_v54 = vmul.f32 %v4977_v7, %v4923_v30  ;;  %vm4744_vm14 = vweird.f32 %v6147_v13  ;;  %5187 = vmatpush.bf16.msra.mxu0 %v5563_v39 }
 0x8e2   : > { %6148 = vrsqrt.f32 %v10031_v3  ;;  %vm4745_vm6 = vmor %vm4743_vm5, %vm4744_vm14  ;;  %vm4753_vm15 = vweird.f32 %v10031_v3 }
 0x8e3   : > { %v4739_v11 = vmul.f32 %v6147_v13, %v4738_v50  ;;  %v5009_v45 = vmul.f32 %v4993_v54, %v4923_v30  ;;  %6150 = vtanh.f32 %v5040_v56  ;;  %v4961_v56 = vmul.f32 0.5, %v4923_v30  ;;  %vm10701_vm5 = vmmov %vm10700_vm0 }
 0x8e5   : > { %v4740_v28 = vmul.f32 0.5, %v4739_v11  ;;  %v5025_v14 = vadd.f32 %v5009_v45, %v4923_v30  ;;  %v4602_v58 = vpop.xlane.xlu1 %4601  ;;  %v4851_v11 = vadd.f32 %v10045_v53, %v4833_v52 }
 0x8e6   : > { %v4626_v41 = vmul.f32 %v4602_v58, %v10669_v61 }
 0x8e7   : > { %v4741_v60 = vsub.f32 1.5, %v4740_v28  ;;  %v5041_v9 = vmul.f32 0.7978846, %v5025_v14 }
 0x8e8   : > { %v6149_v40 = vpop.eup %6148  ;;  %v4642_v29 = vadd.f32 1e-05, %v4626_v41 }
 0x8e9   : > { %v4742_v24 = vmul.f32 %v6147_v13, %v4741_v60  ;;  %6152 = vtanh.f32 %v5041_v9  ;;  %v4748_v5 = vmul.f32 %v6149_v40, %v10031_v3  ;;  %v6151_v25 = vpop.eup %6150  ;;  %vm4754_vm8 = vweird.f32 %v6149_v40 }
 0x8ea   : > { %6154 = vrsqrt.f32 %v4642_v29  ;;  %v5072_v20 = vadd.f32 1.0, %v6151_v25  ;;  %vm4755_vm4 = vmor %vm4753_vm15, %vm4754_vm8  ;;  %vm4763_vm11 = vweird.f32 %v4642_v29 }
 0x8eb   : > { %v4746_v51 = vsel %vm4745_vm6, %v6147_v13, %v4742_v24  ;;  %v4749_v32 = vmul.f32 %v6149_v40, %v4748_v5 }
 0x8ec   : > { %v4816_v6 = vmul.f32 %v4746_v51, %v9935_v48  ;;  %v5088_v28 = vmul.f32 %v5072_v20, %v4960_v37 }
 0x8ed   : > { %v4750_v33 = vmul.f32 0.5, %v4749_v32  ;;  %v4605_v42 = vpop.xlane.xlu2 %4604 }
 0x8ee   : > { %v4627_v23 = vmul.f32 %v4605_v42, %v10669_v61  ;;  %v4834_v15 = vmul.f32 %v10039_v57, %v4816_v6 }
 0x8ef   : > { %v6153_v7 = vpop.eup %6152  ;;  %v4751_v13 = vsub.f32 1.5, %v4750_v33 }
 0x8f0   : > { %v6155_v50 = vpop.eup %6154  ;;  %v5073_v54 = vadd.f32 1.0, %v6153_v7  ;;  %v4643_v48 = vadd.f32 1e-05, %v4627_v23  ;;  %v4852_v16 = vadd.f32 %v10045_v53, %v4834_v15 }
 0x8f1   : > { %v4752_v45 = vmul.f32 %v6149_v40, %v4751_v13  ;;  %v4758_v31 = vmul.f32 %v6155_v50, %v4642_v29  ;;  %vm4764_vm7 = vweird.f32 %v6155_v50 }
 0x8f2   : > { %6156 = vrsqrt.f32 %v4643_v48  ;;  %v4868_v10 = vpack.c.bf16 %v4852_v16, %v4851_v11  ;;  %v5089_v14 = vmul.f32 %v5073_v54, %v4961_v56  ;;  %vm4765_vm9 = vmor %vm4763_vm11, %vm4764_vm7  ;;  %vm4773_vm10 = vweird.f32 %v4643_v48 }
 0x8f3   : > { %v4759_v58 = vmul.f32 %v6155_v50, %v4758_v31  ;;  %v4756_v30 = vsel %vm4755_vm4, %v6149_v40, %v4752_v45  ;;  %vm10702_vm11 = vmmov %vm10700_vm0 }
 0x8f4   : > { %5514 = vmatmul.msk.bf16.gmra.mxu3 %vm10699_vm13, %v4868_v10  ;;  %v5121_v8 = vpack.c.bf16 %v5089_v14, %v5088_v28  ;;  %v4817_v36 = vmul.f32 %v4756_v30, %v9943_v59 }
 0x8f5   : > { %v4760_v41 = vmul.f32 0.5, %v4759_v58  ;;  %v4608_v39 = vpop.xlane.xlu0 %4607 }
 0x8f6   : > { %v4628_v60 = vmul.f32 %v4608_v39, %v10669_v61  ;;  %5188 = vmatmul.bf16.vlgmr.msra.gmra.mxu0 %v5121_v8  ;;  %v4835_v6 = vmul.f32 %v10039_v57, %v4817_v36 }
 0x8f7   : > { %v4761_v9 = vsub.f32 1.5, %v4760_v41 }
 0x8f8   : > { %v6157_v44 = vpop.eup %6156  ;;  %v4644_v24 = vadd.f32 1e-05, %v4628_v60  ;;  %v4853_v29 = vadd.f32 %v10045_v53, %v4835_v6 }
 0x8f9   : > { %v4762_v5 = vmul.f32 %v6155_v50, %v4761_v9  ;;  %v4768_v3 = vmul.f32 %v6157_v44, %v4643_v48  ;;  %vm4774_vm3 = vweird.f32 %v6157_v44 }
 0x8fa   : > { %6158 = vrsqrt.f32 %v4644_v24  ;;  %vm4775_vm1 = vmor %vm4773_vm10, %vm4774_vm3  ;;  %vm4783_vm2 = vweird.f32 %v4644_v24 }
 0x8fb   : > { %v4766_v25 = vsel %vm4765_vm9, %v6155_v50, %v4762_v5  ;;  %v4769_v51 = vmul.f32 %v6157_v44, %v4768_v3  ;;  %vm10703_vm9 = vmmov %vm10700_vm0 }
 0x8fc   : > { %v4818_v40 = vmul.f32 %v4766_v25, %v9952_v4  ;;  %v4925_v32 = vpop.f32.mrf.mxu3  ;;  %vm10704_vm3 = vmmov %vm10700_vm0 }
 0x8fd   : > { %v4770_v52 = vmul.f32 0.5, %v4769_v51  ;;  %v4926_v33 = vadd.f32 %v10015_v21, %v4925_v32  ;;  %vm10705_vm10 = vmmov %vm10700_vm0 }
 0x8fe   : > { %v4836_v42 = vmul.f32 %v10039_v57, %v4818_v40 }
 0x8ff   : > { %v4771_v20 = vsub.f32 1.5, %v4770_v52  ;;  %v4978_v59 = vmul.f32 0.044715, %v4926_v33 }
 0x900   : > { %v6159_v23 = vpop.eup %6158  ;;  %v4854_v15 = vadd.f32 %v10045_v53, %v4836_v42 }
 0x901   : > { %v4772_v7 = vmul.f32 %v6157_v44, %v4771_v20  ;;  %v4778_v37 = vmul.f32 %v6159_v23, %v4644_v24  ;;  %v4994_v56 = vmul.f32 %v4978_v59, %v4926_v33  ;;  %vm4784_vm12 = vweird.f32 %v6159_v23 }
 0x902   : > { %v4869_v4 = vpack.c.bf16 %v4854_v15, %v4853_v29  ;;  %vm4785_vm14 = vmor %vm4783_vm2, %vm4784_vm12  ;;  %v4962_v29 = vmul.f32 0.5, %v4926_v33 }
 0x903   : > { %v4779_v13 = vmul.f32 %v6159_v23, %v4778_v37  ;;  %v5010_v50 = vmul.f32 %v4994_v56, %v4926_v33  ;;  %v4776_v11 = vsel %vm4775_vm1, %v6157_v44, %v4772_v7  ;;  %vm10706_vm1 = vmmov %vm10700_vm0 }
 0x904   : > { %v4927_v54 = vpop.f32.mrf.mxu3  ;;  %5515 = vmatmul.msk.bf16.gmra.mxu3 %vm10700_vm0, %v4869_v4  ;;  %v4819_v14 = vmul.f32 %v4776_v11, %v9962_v1  ;;  %vm10707_vm12 = vmmov %vm10700_vm0 }
 0x905   : > { %v4780_v16 = vmul.f32 0.5, %v4779_v13  ;;  %v4928_v45 = vadd.f32 %v10015_v21, %v4927_v54  ;;  %v5026_v31 = vadd.f32 %v5010_v50, %v4926_v33  ;;  %vm10708_vm2 = vmmov %vm10700_vm0 }
 0x906   : > { %v4837_v9 = vmul.f32 %v10039_v57, %v4819_v14 }
 0x907   : > { %v4781_v10 = vsub.f32 1.5, %v4780_v16  ;;  %v4979_v28 = vmul.f32 0.044715, %v4928_v45  ;;  %v5042_v48 = vmul.f32 0.7978846, %v5026_v31  ;;  %v4963_v15 = vmul.f32 0.5, %v4928_v45  ;;  %v4611_v31 = vpop.xlane.xlu1 %4610 }
 0x908   : > { %v4855_v24 = vadd.f32 %v10045_v53, %v4837_v9 }
 0x909   : > { %v4782_v58 = vmul.f32 %v6159_v23, %v4781_v10  ;;  %v4995_v8 = vmul.f32 %v4979_v28, %v4928_v45  ;;  %6160 = vtanh.f32 %v5042_v48  ;;  %v4629_v28 = vmul.f32 %v4611_v31, %v10669_v61 }
 0x90b   : > { %v4786_v30 = vsel %vm4785_vm14, %v6159_v23, %v4782_v58  ;;  %v5011_v41 = vmul.f32 %v4995_v8, %v4928_v45  ;;  %v4645_v33 = vadd.f32 1e-05, %v4629_v28  ;;  %vm10709_vm14 = vmmov %vm10700_vm0 }
 0x90c   : > { %v4820_v39 = vmul.f32 %v4786_v30, %v9973_v46  ;;  %v4930_v60 = vpop.f32.mrf.mxu3 }
 0x90d   : > { %v4931_v44 = vadd.f32 %v10015_v21, %v4930_v60  ;;  %v5027_v36 = vadd.f32 %v5011_v41, %v4928_v45  ;;  %vm4793_vm8 = vweird.f32 %v4645_v33 }
 0x90e   : > { %v4838_v5 = vmul.f32 %v10039_v57, %v4820_v39 }
 0x90f   : > { %v4980_v3 = vmul.f32 0.044715, %v4931_v44  ;;  %v5043_v1 = vmul.f32 0.7978846, %v5027_v36  ;;  %v6161_v32 = vpop.eup %6160  ;;  %v4964_v45 = vmul.f32 0.5, %v4931_v44 }
 0x910   : > { %v4856_v25 = vadd.f32 %v10045_v53, %v4838_v5  ;;  %v5074_v20 = vadd.f32 1.0, %v6161_v32 }
 0x911   : > { %v4996_v51 = vmul.f32 %v4980_v3, %v4931_v44  ;;  %6162 = vtanh.f32 %v5043_v1 }
 0x912   : > { %v4870_v40 = vpack.c.bf16 %v4856_v25, %v4855_v24  ;;  %v5090_v4 = vmul.f32 %v5074_v20, %v4962_v29 }
 0x913   : > { %v5012_v46 = vmul.f32 %v4996_v51, %v4931_v44 }
 0x914   : > { %v4932_v6 = vpop.f32.mrf.mxu3  ;;  %5516 = vmatmul.msk.bf16.gmra.mxu3 %vm10701_vm5, %v4870_v40  ;;  %vm10710_vm5 = vmmov %vm10700_vm0 }
 0x915   : > { %v4933_v52 = vadd.f32 %v10015_v21, %v4932_v6  ;;  %v5028_v42 = vadd.f32 %v5012_v46, %v4931_v44 }
 0x917   : > { %v6163_v59 = vpop.eup %6162  ;;  %v4981_v23 = vmul.f32 0.044715, %v4933_v52  ;;  %v5044_v56 = vmul.f32 0.7978846, %v5028_v42  ;;  %v4965_v8 = vmul.f32 0.5, %v4933_v52 }
 0x918   : > { %v5075_v7 = vadd.f32 1.0, %v6163_v59 }
 0x919   : > { %v4997_v37 = vmul.f32 %v4981_v23, %v4933_v52  ;;  %6164 = vtanh.f32 %v5044_v56 }
 0x91a   : > { %v5091_v13 = vmul.f32 %v5075_v7, %v4963_v15 }
 0x91b   : > { %v5013_v50 = vmul.f32 %v4997_v37, %v4933_v52 }
 0x91c   : > { %v5122_v54 = vpack.c.bf16 %v5091_v13, %v5090_v4 }
 0x91d   : > { %v5029_v11 = vadd.f32 %v5013_v50, %v4933_v52 }
 0x91e   : > { %5193 = vmatmul.bf16.gmra.mxu0 %v5122_v54 }
 0x91f   : > { %v5045_v16 = vmul.f32 0.7978846, %v5029_v11  ;;  %v6165_v10 = vpop.eup %6164 }
 0x920   : > { %v5076_v14 = vadd.f32 1.0, %v6165_v10 }
 0x921   : > { %6166 = vtanh.f32 %v5045_v16 }
 0x922   : > { %v5092_v30 = vmul.f32 %v5076_v14, %v4964_v45  ;;  %6168 = vrsqrt.f32 %v4645_v33 }
 0x927   : > { %v6167_v58 = vpop.eup %6166 }
 0x928   : > { %v5077_v48 = vadd.f32 1.0, %v6167_v58  ;;  %v6169_v60 = vpop.eup %6168 }
 0x929   : > { %v4788_v9 = vmul.f32 %v6169_v60, %v4645_v33  ;;  %vm4794_vm6 = vweird.f32 %v6169_v60 }
 0x92a   : > { %v5093_v41 = vmul.f32 %v5077_v48, %v4965_v8  ;;  %vm4795_vm15 = vmor %vm4793_vm8, %vm4794_vm6 }
 0x92b   : > { %v4789_v36 = vmul.f32 %v6169_v60, %v4788_v9  ;;  %v6210_v9 = vld [vmem:[%s6302_s22] sm:$0x3f]  ;;  %vm10711_vm6 = vmmov %vm10700_vm0 }
 0x92c   : > { %v5123_v39 = vpack.c.bf16 %v5093_v41, %v5092_v30  ;;  %vm10712_vm8 = vmmov %vm10700_vm0 }
 0x92d   : > { %v4790_v24 = vmul.f32 0.5, %v4789_v36  ;;  %v10092_v36 = vperm.slane %v6210_v9, 5 }
 0x92e   : > { %5198 = vmatmul.bf16.gmra.mxu0 %v5123_v39 }
 0x92f   : > { %v4791_v25 = vsub.f32 1.5, %v4790_v24 }
 0x931   : > { %v4792_v40 = vmul.f32 %v6169_v60, %v4791_v25 }
 0x933   : > { %v4796_v46 = vsel %vm4795_vm15, %v6169_v60, %v4792_v40  ;;  %v10089_v60 = vld [vmem:[%s480_s26] ss:$0 sm:$0xff]  ;;  %vm10713_vm15 = vmmov %vm10700_vm0 }
 0x934   : > { %v4821_v42 = vmul.f32 %v4796_v46, %v9983_v27 }
 0x936   : > { %v4839_v29 = vmul.f32 %v10039_v57, %v4821_v42 }
 0x938   : > { %v4614_v5 = vpop.xlane.xlu2 %4613  ;;  %v4857_v56 = vadd.f32 %v10045_v53, %v4839_v29 }
 0x939   : > { %v4630_v3 = vmul.f32 %v4614_v5, %v10669_v61 }
 0x93b   : > { %v4646_v1 = vadd.f32 1e-05, %v4630_v3 }
 0x93d   : > { %6170 = vrsqrt.f32 %v4646_v1  ;;  %vm4803_vm13 = vweird.f32 %v4646_v1 }
 0x943   : > { %v6171_v51 = vpop.eup %6170 }
 0x944   : > { %v4798_v44 = vmul.f32 %v6171_v51, %v4646_v1  ;;  %vm4804_vm4 = vweird.f32 %v6171_v51 }
 0x945   : > { %vm4805_vm7 = vmor %vm4803_vm13, %vm4804_vm4 }
 0x946   : > { %v4799_v32 = vmul.f32 %v6171_v51, %v4798_v44  ;;  %vm10714_vm4 = vmmov %vm10700_vm0 }
 0x947   : > { %vm10715_vm13 = vmmov %vm10700_vm0 }
 0x948   : > { %v4800_v6 = vmul.f32 0.5, %v4799_v32 }
 0x94a   : > { %v4801_v52 = vsub.f32 1.5, %v4800_v6 }
 0x94c   : > { %v4802_v20 = vmul.f32 %v6171_v51, %v4801_v52 }
 0x94e   : > { %v4806_v61 = vsel %vm4805_vm7, %v6171_v51, %v4802_v20  ;;  %vm10716_vm7 = vmmov %vm10700_vm0 }
 0x94f   : > { %v4822_v59 = vmul.f32 %v4806_v61, %v9997_v19  ;;  %v4935_v23 = vpop.f32.mrf.mxu3 }
 0x950   : > { %v4936_v15 = vadd.f32 %v10015_v21, %v4935_v23 }
 0x951   : > { %v4840_v7 = vmul.f32 %v10039_v57, %v4822_v59 }
 0x952   : > { %v4982_v37 = vmul.f32 0.044715, %v4936_v15  ;;  %v4966_v45 = vmul.f32 0.5, %v4936_v15 }
 0x953   : > { %v4858_v4 = vadd.f32 %v10045_v53, %v4840_v7 }
 0x954   : > { %v4998_v13 = vmul.f32 %v4982_v37, %v4936_v15 }
 0x955   : > { %v4871_v27 = vpack.c.bf16 %v4858_v4, %v4857_v56 }
 0x956   : > { %v5014_v50 = vmul.f32 %v4998_v13, %v4936_v15 }
 0x957   : > { %v4937_v54 = vpop.f32.mrf.mxu3  ;;  %5517 = vmatmul.msk.bf16.gmra.mxu3 %vm10702_vm11, %v4871_v27  ;;  %vm10717_vm11 = vmmov %vm10700_vm0 }
 0x958   : > { %v4938_v19 = vadd.f32 %v10015_v21, %v4937_v54  ;;  %v5030_v11 = vadd.f32 %v5014_v50, %v4936_v15 }
 0x95a   : > { %v4983_v16 = vmul.f32 0.044715, %v4938_v19  ;;  %v5046_v10 = vmul.f32 0.7978846, %v5030_v11  ;;  %v4967_v8 = vmul.f32 0.5, %v4938_v19 }
 0x95c   : > { %v4999_v31 = vmul.f32 %v4983_v16, %v4938_v19  ;;  %6172 = vtanh.f32 %v5046_v10 }
 0x95e   : > { %v5015_v28 = vmul.f32 %v4999_v31, %v4938_v19 }
 0x960   : > { %v5031_v57 = vadd.f32 %v5015_v28, %v4938_v19 }
 0x962   : > { %v5047_v14 = vmul.f32 0.7978846, %v5031_v57  ;;  %v6173_v53 = vpop.eup %6172 }
 0x963   : > { %v5078_v58 = vadd.f32 1.0, %v6173_v53 }
 0x964   : > { %6174 = vtanh.f32 %v5047_v14 }
 0x965   : > { %v5094_v30 = vmul.f32 %v5078_v58, %v4966_v45 }
 0x96a   : > { %v6175_v33 = vpop.eup %6174 }
 0x96b   : > { %v5079_v48 = vadd.f32 1.0, %v6175_v33 }
 0x96d   : > { %v5095_v41 = vmul.f32 %v5079_v48, %v4967_v8 }
 0x96f   : > { %v5124_v39 = vpack.c.bf16 %v5095_v41, %v5094_v30 }
 0x971   : > { %5203 = vmatmul.bf16.gmra.mxu0 %v5124_v39 }
 0x973   : > { %v5189_v5 = vpop.f32.mrf.mxu0 }
 0x974   : > { %v5190_v3 = vadd.f32 %v10089_v60, %v5189_v5 }
 0x976   : > { %v5231_v1 = vmul.f32 %v10092_v36, %v5190_v3 }
 0x977   : > { %v4940_v24 = vpop.f32.mrf.mxu3 }
 0x978   : > { %v5247_v25 = vadd.f32 %v5231_v1, %v9679_v35  ;;  %v4941_v51 = vadd.f32 %v10015_v21, %v4940_v24 }
 0x97a   : > { %5263 = vst.msk [vmem:[%s10220_s10] sm:$0xff] %vm10703_vm9, %v5247_v25  ;;  %v4984_v40 = vmul.f32 0.044715, %v4941_v51  ;;  %v4968_v28 = vmul.f32 0.5, %v4941_v51 }
 0x97b   : > { %v5191_v44 = vpop.f32.mrf.mxu0 }
 0x97c   : > { %v5000_v32 = vmul.f32 %v4984_v40, %v4941_v51  ;;  %v5192_v46 = vadd.f32 %v10089_v60, %v5191_v44 }
 0x97e   : > { %v5232_v6 = vmul.f32 %v10092_v36, %v5192_v46  ;;  %v5016_v52 = vmul.f32 %v5000_v32, %v4941_v51 }
 0x97f   : > { %v4942_v42 = vpop.f32.mrf.mxu3 }
 0x980   : > { %v5248_v20 = vadd.f32 %v5232_v6, %v9696_v47  ;;  %v4943_v35 = vadd.f32 %v10015_v21, %v4942_v42  ;;  %v5032_v61 = vadd.f32 %v5016_v52, %v4941_v51 }
 0x982   : > { %5264 = vst.msk [vmem:[%s10220_s10 + $0x8] sm:$0xff] %vm10704_vm3, %v5248_v20  ;;  %v4985_v59 = vmul.f32 0.044715, %v4943_v35  ;;  %v5048_v29 = vmul.f32 0.7978846, %v5032_v61  ;;  %v4969_v57 = vmul.f32 0.5, %v4943_v35 }
 0x984   : > { %v5001_v23 = vmul.f32 %v4985_v59, %v4943_v35  ;;  %6176 = vtanh.f32 %v5048_v29 }
 0x986   : > { %v5017_v15 = vmul.f32 %v5001_v23, %v4943_v35 }
 0x987   : > { %v4945_v7 = vpop.f32.mrf.mxu3 }
 0x988   : > { %v4946_v37 = vadd.f32 %v10015_v21, %v4945_v7  ;;  %v5033_v56 = vadd.f32 %v5017_v15, %v4943_v35 }
 0x98a   : > { %v4986_v4 = vmul.f32 0.044715, %v4946_v37  ;;  %v5049_v13 = vmul.f32 0.7978846, %v5033_v56  ;;  %v6177_v27 = vpop.eup %6176  ;;  %v4970_v61 = vmul.f32 0.5, %v4946_v37 }
 0x98b   : > { %v5080_v16 = vadd.f32 1.0, %v6177_v27 }
 0x98c   : > { %v5002_v47 = vmul.f32 %v4986_v4, %v4946_v37  ;;  %6178 = vtanh.f32 %v5049_v13 }
 0x98d   : > { %v5096_v33 = vmul.f32 %v5080_v16, %v4968_v28 }
 0x98e   : > { %v5018_v50 = vmul.f32 %v5002_v47, %v4946_v37 }
 0x98f   : > { %v4947_v54 = vpop.f32.mrf.mxu3 }
 0x990   : > { %v4948_v19 = vadd.f32 %v10015_v21, %v4947_v54  ;;  %v5034_v11 = vadd.f32 %v5018_v50, %v4946_v37 }
 0x992   : > { %v6179_v31 = vpop.eup %6178  ;;  %v4987_v10 = vmul.f32 0.044715, %v4948_v19  ;;  %v5050_v58 = vmul.f32 0.7978846, %v5034_v11  ;;  %v4971_v59 = vmul.f32 0.5, %v4948_v19 }
 0x993   : > { %v5081_v14 = vadd.f32 1.0, %v6179_v31 }
 0x994   : > { %v5003_v53 = vmul.f32 %v4987_v10, %v4948_v19  ;;  %6180 = vtanh.f32 %v5050_v58 }
 0x995   : > { %v5097_v45 = vmul.f32 %v5081_v14, %v4969_v57 }
 0x996   : > { %v5019_v8 = vmul.f32 %v5003_v53, %v4948_v19 }
 0x997   : > { %v4950_v48 = vpop.f32.mrf.mxu3  ;;  %v5125_v30 = vpack.c.bf16 %v5097_v45, %v5096_v33 }
 0x998   : > { %v4951_v41 = vadd.f32 %v10015_v21, %v4950_v48  ;;  %v5035_v39 = vadd.f32 %v5019_v8, %v4948_v19 }
 0x999   : > { %5208 = vmatmul.bf16.gmra.mxu0 %v5125_v30 }
 0x99a   : > { %v4988_v9 = vmul.f32 0.044715, %v4951_v41  ;;  %v5051_v5 = vmul.f32 0.7978846, %v5035_v39  ;;  %v6181_v25 = vpop.eup %6180  ;;  %v4972_v57 = vmul.f32 0.5, %v4951_v41 }
 0x99b   : > { %v5194_v3 = vpop.f32.mrf.mxu0  ;;  %v5082_v52 = vadd.f32 1.0, %v6181_v25 }
 0x99c   : > { %v5004_v1 = vmul.f32 %v4988_v9, %v4951_v41  ;;  %v5195_v24 = vadd.f32 %v10089_v60, %v5194_v3  ;;  %6182 = vtanh.f32 %v5051_v5 }
 0x99e   : > { %v5233_v51 = vmul.f32 %v10092_v36, %v5195_v24  ;;  %v5020_v40 = vmul.f32 %v5004_v1, %v4951_v41 }
 0x99f   : > { %v4952_v44 = vpop.f32.mrf.mxu3 }
 0x9a0   : > { %v5249_v32 = vadd.f32 %v5233_v51, %v9723_v49  ;;  %v4953_v46 = vadd.f32 %v10015_v21, %v4952_v44  ;;  %v5036_v6 = vadd.f32 %v5020_v40, %v4951_v41  ;;  %v5098_v49 = vmul.f32 %v5082_v52, %v4970_v61 }
 0x9a2   : > { %v6183_v42 = vpop.eup %6182  ;;  %5265 = vst.msk [vmem:[%s10220_s10 + $0x10] sm:$0xff] %vm10705_vm10, %v5249_v32  ;;  %v4989_v20 = vmul.f32 0.044715, %v4953_v46  ;;  %v5052_v7 = vmul.f32 0.7978846, %v5036_v6  ;;  %v4973_v14 = vmul.f32 0.5, %v4953_v46 }
 0x9a3   : > { %v5196_v35 = vpop.f32.mrf.mxu0  ;;  %v5083_v23 = vadd.f32 1.0, %v6183_v42 }
 0x9a4   : > { %v5005_v29 = vmul.f32 %v4989_v20, %v4953_v46  ;;  %v5197_v15 = vadd.f32 %v10089_v60, %v5196_v35  ;;  %6184 = vtanh.f32 %v5052_v7 }
 0x9a5   : > { %v5099_v56 = vmul.f32 %v5083_v23, %v4971_v59 }
 0x9a6   : > { %v5234_v4 = vmul.f32 %v10092_v36, %v5197_v15  ;;  %v5021_v13 = vmul.f32 %v5005_v29, %v4953_v46 }
 0x9a7   : > { %v5126_v47 = vpack.c.bf16 %v5099_v56, %v5098_v49 }
 0x9a8   : > { %v5250_v27 = vadd.f32 %v5234_v4, %v9733_v22  ;;  %v5037_v50 = vadd.f32 %v5021_v13, %v4953_v46  ;;  %v6211_v13 = vld [vmem:[%s6302_s22 + $0x8] sm:$0x3f] }
 0x9a9   : > { %5213 = vmatmul.bf16.gmra.mxu0 %v5126_v47  ;;  %v5230_v47 = vperm.slane %v6211_v13, 5 }
 0x9aa   : > { %5266 = vst.msk [vmem:[%s10220_s10 + $0x18] sm:$0xff] %vm10706_vm1, %v5250_v27  ;;  %v5053_v37 = vmul.f32 0.7978846, %v5037_v50  ;;  %v6185_v11 = vpop.eup %6184 }
 0x9ab   : > { %v5199_v54 = vpop.f32.mrf.mxu0  ;;  %v5084_v10 = vadd.f32 1.0, %v6185_v11 }
 0x9ac   : > { %v5200_v19 = vadd.f32 %v10089_v60, %v5199_v54  ;;  %6186 = vtanh.f32 %v5053_v37 }
 0x9ad   : > { %v5100_v33 = vmul.f32 %v5084_v10, %v4972_v57 }
 0x9ae   : > { %v5235_v16 = vmul.f32 %v10092_v36, %v5200_v19 }
 0x9b0   : > { %v5251_v31 = vadd.f32 %v5235_v16, %v9742_v2 }
 0x9b2   : > { %v6187_v22 = vpop.eup %6186  ;;  %5267 = vst.msk [vmem:[%s10220_s10 + $0x20] sm:$0xff] %vm10700_vm0, %v5251_v31 }
 0x9b3   : > { %v5201_v28 = vpop.f32.mrf.mxu0  ;;  %v5085_v53 = vadd.f32 1.0, %v6187_v22 }
 0x9b4   : > { %v5202_v58 = vadd.f32 %v10089_v60, %v5201_v28 }
 0x9b5   : > { %v5101_v45 = vmul.f32 %v5085_v53, %v4973_v14 }
 0x9b6   : > { %v5236_v8 = vmul.f32 %v10092_v36, %v5202_v58 }
 0x9b7   : > { %v5127_v48 = vpack.c.bf16 %v5101_v45, %v5100_v33 }
 0x9b8   : > { %v5252_v2 = vadd.f32 %v5236_v8, %v9751_v18 }
 0x9b9   : > { %5218 = vmatmul.bf16.gmra.mxu0 %v5127_v48 }
 0x9ba   : > { %5268 = vst.msk [vmem:[%s10220_s10 + $0x28] sm:$0xff] %vm10707_vm12, %v5252_v2 }
 0x9da   : > { %v4955_v30 = vpop.f32.mrf.mxu3 }
 0x9db   : > { %v4956_v41 = vadd.f32 %v10015_v21, %v4955_v30 }
 0x9dd   : > { %v4990_v39 = vmul.f32 0.044715, %v4956_v41  ;;  %v4974_v59 = vmul.f32 0.5, %v4956_v41 }
 0x9df   : > { %v5006_v9 = vmul.f32 %v4990_v39, %v4956_v41 }
 0x9e1   : > { %v5022_v5 = vmul.f32 %v5006_v9, %v4956_v41 }
 0x9e2   : > { %v4957_v3 = vpop.f32.mrf.mxu3 }
 0x9e3   : > { %v4958_v1 = vadd.f32 %v10015_v21, %v4957_v3  ;;  %v5038_v24 = vadd.f32 %v5022_v5, %v4956_v41 }
 0x9e5   : > { %v4991_v25 = vmul.f32 0.044715, %v4958_v1  ;;  %v5054_v40 = vmul.f32 0.7978846, %v5038_v24  ;;  %v4975_v23 = vmul.f32 0.5, %v4958_v1 }
 0x9e7   : > { %v5007_v51 = vmul.f32 %v4991_v25, %v4958_v1  ;;  %6188 = vtanh.f32 %v5054_v40 }
 0x9e9   : > { %v5023_v18 = vmul.f32 %v5007_v51, %v4958_v1 }
 0x9eb   : > { %v5039_v44 = vadd.f32 %v5023_v18, %v4958_v1 }
 0x9ed   : > { %v5055_v32 = vmul.f32 0.7978846, %v5039_v44  ;;  %v6189_v52 = vpop.eup %6188 }
 0x9ee   : > { %v5204_v46 = vpop.f32.mrf.mxu0  ;;  %v5086_v35 = vadd.f32 1.0, %v6189_v52 }
 0x9ef   : > { %v5205_v6 = vadd.f32 %v10089_v60, %v5204_v46  ;;  %6190 = vtanh.f32 %v5055_v32 }
 0x9f0   : > { %v5102_v7 = vmul.f32 %v5086_v35, %v4974_v59 }
 0x9f1   : > { %v5237_v42 = vmul.f32 %v10092_v36, %v5205_v6 }
 0x9f3   : > { %v5253_v20 = vadd.f32 %v5237_v42, %v9760_v55 }
 0x9f5   : > { %v6191_v21 = vpop.eup %6190  ;;  %5269 = vst.msk [vmem:[%s10220_s10 + $0x30] sm:$0xff] %vm10708_vm2, %v5253_v20 }
 0x9f6   : > { %v5206_v61 = vpop.f32.mrf.mxu0  ;;  %v5087_v29 = vadd.f32 1.0, %v6191_v21 }
 0x9f7   : > { %v5207_v15 = vadd.f32 %v10089_v60, %v5206_v61 }
 0x9f8   : > { %v5103_v49 = vmul.f32 %v5087_v29, %v4975_v23 }
 0x9f9   : > { %v5238_v56 = vmul.f32 %v10092_v36, %v5207_v15 }
 0x9fa   : > { %v5128_v4 = vpack.c.bf16 %v5103_v49, %v5102_v7 }
 0x9fb   : > { %v5254_v55 = vadd.f32 %v5238_v56, %v9777_v62 }
 0x9fc   : > { %5223 = vmatmul.bf16.gmra.mxu0 %v5128_v4 }
 0x9fd   : > { %5270 = vst.msk [vmem:[%s10220_s10 + $0x38] sm:$0xff] %vm10709_vm14, %v5254_v55 }
 0xa16   : > { %v5209_v27 = vpop.f32.mrf.mxu0 }
 0xa17   : > { %v5210_v50 = vadd.f32 %v10089_v60, %v5209_v27 }
 0xa19   : > { %v5239_v37 = vmul.f32 %v5230_v47, %v5210_v50 }
 0xa1b   : > { %v5255_v54 = vadd.f32 %v5239_v37, %v9798_v63 }
 0xa1d   : > { %5271 = vst.msk [vmem:[%s10220_s10 + $0x40] sm:$0xff] %vm10710_vm5, %v5255_v54 }
 0xa1e   : > { %v5211_v62 = vpop.f32.mrf.mxu0 }
 0xa1f   : > { %v5212_v36 = vadd.f32 %v10089_v60, %v5211_v62 }
 0xa21   : > { %v5240_v19 = vmul.f32 %v5230_v47, %v5212_v36 }
 0xa23   : > { %v5256_v11 = vadd.f32 %v5240_v19, %v9815_v17 }
 0xa25   : > { %5272 = vst.msk [vmem:[%s10220_s10 + $0x48] sm:$0xff] %vm10711_vm6, %v5256_v11 }
 0xa26   : > { %v5214_v16 = vpop.f32.mrf.mxu0 }
 0xa27   : > { %v5215_v31 = vadd.f32 %v10089_v60, %v5214_v16 }
 0xa29   : > { %v5241_v63 = vmul.f32 %v5230_v47, %v5215_v31 }
 0xa2b   : > { %v5257_v10 = vadd.f32 %v5241_v63, %v9831_v12 }
 0xa2d   : > { %5273 = vst.msk [vmem:[%s10220_s10 + $0x50] sm:$0xff] %vm10712_vm8, %v5257_v10 }
 0xa2e   : > { %v5216_v22 = vpop.f32.mrf.mxu0 }
 0xa2f   : > { %v5217_v28 = vadd.f32 %v10089_v60, %v5216_v22 }
 0xa31   : > { %v5242_v17 = vmul.f32 %v5230_v47, %v5217_v28 }
 0xa33   : > { %v5258_v57 = vadd.f32 %v5242_v17, %v9847_v0 }
 0xa35   : > { %5274 = vst.msk [vmem:[%s10220_s10 + $0x58] sm:$0xff] %vm10713_vm15, %v5258_v57 }
 0xa36   : > { %v5219_v14 = vpop.f32.mrf.mxu0 }
 0xa37   : > { %v5220_v53 = vadd.f32 %v10089_v60, %v5219_v14 }
 0xa39   : > { %v5243_v12 = vmul.f32 %v5230_v47, %v5220_v53 }
 0xa3b   : > { %v5259_v58 = vadd.f32 %v5243_v12, %v9863_v38 }
 0xa3d   : > { %5275 = vst.msk [vmem:[%s10220_s10 + $0x60] sm:$0xff] %vm10714_vm4, %v5259_v58 }
 0xa3e   : > { %v5221_v33 = vpop.f32.mrf.mxu0 }
 0xa3f   : > { %v5222_v45 = vadd.f32 %v10089_v60, %v5221_v33 }
 0xa41   : > { %v5244_v0 = vmul.f32 %v5230_v47, %v5222_v45 }
 0xa43   : > { %v5260_v8 = vadd.f32 %v5244_v0, %v9878_v26 }
 0xa45   : > { %5276 = vst.msk [vmem:[%s10220_s10 + $0x68] sm:$0xff] %vm10715_vm13, %v5260_v8 }
 0xa79   : > { %v5224_v48 = vpop.f32.mrf.mxu0 }
 0xa7a   : > { %v5225_v2 = vadd.f32 %v10089_v60, %v5224_v48 }
 0xa7c   : > { %v5245_v38 = vmul.f32 %v5230_v47, %v5225_v2 }
 0xa7e   : > { %v5261_v30 = vadd.f32 %v5245_v38, %v9887_v43 }
 0xa80   : > { %5277 = vst.msk [vmem:[%s10220_s10 + $0x70] sm:$0xff] %vm10716_vm7, %v5261_v30 }
 0xa81   : > { %v5226_v41 = vpop.f32.mrf.mxu0 }
 0xa82   : > { %v5227_v39 = vadd.f32 %v10089_v60, %v5226_v41 }
 0xa84   : > { %v5246_v26 = vmul.f32 %v5230_v47, %v5227_v39 }
 0xa86   : > { %v5262_v9 = vadd.f32 %v5246_v26, %v9914_v34 }
 0xa88   : > { %5278 = vst.msk [vmem:[%s10220_s10 + $0x78] sm:$0xff] %vm10717_vm11, %v5262_v9 }
 0xa89 PF: > { %s20_s13 = sadd.s32 1, %s6218_s13  }
 0xa8a   : > { %p17_p5 = scmp.ge.s32.totalorder %s20_s13, 4  }
 0xa8c   :  { %19 = sbr.rel (!%p17_p5) target bundleno = 4 (0x4), region = 114 }

</bundles_post_ra>
